<compile_context>
chip_gen: v5e
topology: v5e:2x2
jax: 0.10.0
libtpu: 0.0.40
codegen_flags: <defaults>
</compile_context>

<pallas_src>
import math

import jax
import jax.numpy as jnp
from jax.experimental import pallas as pl
from jax.experimental.pallas import tpu as pltpu

BN_EPS = 1e-5
NEG_INF = float("-inf")


# ---------------------------------------------------------------------------
# Pallas kernels
# ---------------------------------------------------------------------------
def _epilogue(acc, aff_ref, out_dtype):
    """out = post_scale * relu(acc + shift) + post_shift (rows of aff_ref)."""
    shift = aff_ref[0:1, :]      # folded conv-bias * bn_scale + bn_shift
    post_s = aff_ref[1:2, :]
    post_t = aff_ref[2:3, :]
    y = jnp.maximum(acc + shift, 0.0)
    return (y * post_s + post_t).astype(out_dtype)


def _pool2x2_stem_kernel(v00_ref, v01_ref, v10_ref, v11_ref, w_ref, aff_ref,
                         stem_ref, pooled_ref):
    """2x2/s2 max pool fused with the three shared-input 1x1 Inception convs."""
    p = jnp.maximum(jnp.maximum(v00_ref[0], v01_ref[0]),
                    jnp.maximum(v10_ref[0], v11_ref[0]))     # (Ho, Wo, C) f32
    pooled_ref[0] = p                                        # reused by branch 4
    ho, wo, c = p.shape
    x2d = p.reshape(ho * wo, c).astype(jnp.bfloat16)
    acc = jnp.dot(x2d, w_ref[...], preferred_element_type=jnp.float32)
    stem_ref[...] = _epilogue(acc, aff_ref, stem_ref.dtype)


def _pool3x3_conv1x1_kernel(xpad_ref, w_ref, aff_ref, o_ref):
    """Branch 4: 3x3/s1/p1 max pool (-inf padded on host) fused with 1x1 conv."""
    h = xpad_ref.shape[1] - 2
    w = xpad_ref.shape[2] - 2
    c = xpad_ref.shape[3]
    m = None
    for dh in range(3):
        for dw in range(3):
            s = xpad_ref[0, dh:dh + h, dw:dw + w, :]
            m = s if m is None else jnp.maximum(m, s)
    x2d = m.reshape(h * w, c).astype(jnp.bfloat16)
    acc = jnp.dot(x2d, w_ref[...], preferred_element_type=jnp.float32)
    o_ref[...] = _epilogue(acc, aff_ref, o_ref.dtype)


def _conv3x3_kernel(xpad_ref, w_ref, aff_ref, o_ref):
    """3x3 'same' conv = 9 accumulated MXU matmuls over shifted VMEM slices."""
    h = xpad_ref.shape[1] - 2
    w = xpad_ref.shape[2] - 2
    cin = xpad_ref.shape[3]
    acc = None
    for t in range(9):
        dh, dw = divmod(t, 3)
        xs = xpad_ref[0, dh:dh + h, dw:dw + w, :].reshape(h * w, cin)
        d = jnp.dot(xs.astype(jnp.bfloat16), w_ref[t],
                    preferred_element_type=jnp.float32)
        acc = d if acc is None else acc + d
    o_ref[...] = _epilogue(acc, aff_ref, o_ref.dtype)


# ---------------------------------------------------------------------------
# pallas_call wrappers
# ---------------------------------------------------------------------------
def _tpu_params():
    return pltpu.CompilerParams(dimension_semantics=("parallel",))


def pool2x2_stem(x_nhwc, w_stem, aff_stem):
    """F.max_pool2d(k=2,s=2,ceil_mode=True) fused with b1|b2a|b3a 1x1 convs."""
    n, h, w, c = x_nhwc.shape
    hp, wp = -(-h // 2) * 2, -(-w // 2) * 2
    if (hp, wp) != (h, w):                       # ceil_mode: pad with -inf
        x_nhwc = jnp.pad(x_nhwc, ((0, 0), (0, hp - h), (0, wp - w), (0, 0)),
                         constant_values=NEG_INF)
    ho, wo = hp // 2, wp // 2
    # 4 strided views partition the input (no HBM blow-up, unlike jnp.stack).
    views = [x_nhwc[:, dh::2, dw::2, :] for dh in (0, 1) for dw in (0, 1)]
    cout = w_stem.shape[1]
    view_spec = pl.BlockSpec((1, ho, wo, c), lambda i: (i, 0, 0, 0))
    stem, pooled = pl.pallas_call(
        _pool2x2_stem_kernel,
        out_shape=(jax.ShapeDtypeStruct((n * ho * wo, cout), jnp.float32),
                   jax.ShapeDtypeStruct((n, ho, wo, c), jnp.float32)),
        grid_spec=pltpu.PrefetchScalarGridSpec(
            num_scalar_prefetch=0,
            grid=(n,),
            in_specs=[view_spec, view_spec, view_spec, view_spec,
                      pl.BlockSpec((c, cout), lambda i: (0, 0)),
                      pl.BlockSpec((8, cout), lambda i: (0, 0))],
            out_specs=(pl.BlockSpec((ho * wo, cout), lambda i: (i, 0)),
                       pl.BlockSpec((1, ho, wo, c), lambda i: (i, 0, 0, 0)))),
        compiler_params=_tpu_params(),
    )(*views, w_stem, aff_stem)
    return stem, pooled


def pool3x3_conv1x1(pooled_nhwc, w_mat, aff):
    """Branch 4: fused 3x3/s1/p1 max pool + 1x1 conv + BN + ReLU (+ bn2)."""
    n, h, w, c = pooled_nhwc.shape
    cout = w_mat.shape[1]
    xpad = jnp.pad(pooled_nhwc, ((0, 0), (1, 1), (1, 1), (0, 0)),
                   constant_values=NEG_INF)
    out = pl.pallas_call(
        _pool3x3_conv1x1_kernel,
        out_shape=jax.ShapeDtypeStruct((n * h * w, cout), jnp.float32),
        grid_spec=pltpu.PrefetchScalarGridSpec(
            num_scalar_prefetch=0,
            grid=(n,),
            in_specs=[pl.BlockSpec((1, h + 2, w + 2, c),
                                   lambda i: (i, 0, 0, 0)),
                      pl.BlockSpec((c, cout), lambda i: (0, 0)),
                      pl.BlockSpec((8, cout), lambda i: (0, 0))],
            out_specs=pl.BlockSpec((h * w, cout), lambda i: (i, 0))),
        compiler_params=_tpu_params(),
    )(xpad, w_mat, aff)
    return out.reshape(n, h, w, cout)


def conv3x3(x_nhwc, w_taps, aff):
    """3x3 stride-1 'same' conv with fused bias / BN / ReLU epilogue."""
    n, h, w, cin = x_nhwc.shape
    cout = w_taps.shape[-1]
    xpad = jnp.pad(x_nhwc, ((0, 0), (1, 1), (1, 1), (0, 0)))
    out = pl.pallas_call(
        _conv3x3_kernel,
        out_shape=jax.ShapeDtypeStruct((n * h * w, cout), jnp.float32),
        grid_spec=pltpu.PrefetchScalarGridSpec(
            num_scalar_prefetch=0,
            grid=(n,),
            in_specs=[pl.BlockSpec((1, h + 2, w + 2, cin),
                                   lambda i: (i, 0, 0, 0)),
                      pl.BlockSpec((9, cin, cout), lambda i: (0, 0, 0)),
                      pl.BlockSpec((8, cout), lambda i: (0, 0))],
            out_specs=pl.BlockSpec((h * w, cout), lambda i: (i, 0))),
        compiler_params=_tpu_params(),
    )(xpad, w_taps, aff)
    return out.reshape(n, h, w, cout)


# ---------------------------------------------------------------------------
# Parameters (deterministic synthetic init matching the module's __init__),
# with bias / BN pre-affine folded into the weights (host-side, once).
# ---------------------------------------------------------------------------
def _xavier_uniform(key, cout, cin, k):
    fan_in, fan_out = cin * k * k, cout * k * k
    bound = math.sqrt(6.0 / (fan_in + fan_out))
    return jax.random.uniform(key, (cout, cin, k, k), jnp.float32, -bound, bound)


def _bn_affine(c):
    # eval-mode BatchNorm2d with default params / running stats
    gamma = jnp.ones((c,), jnp.float32)
    beta = jnp.zeros((c,), jnp.float32)
    mean = jnp.zeros((c,), jnp.float32)
    var = jnp.ones((c,), jnp.float32)
    scale = gamma / jnp.sqrt(var + BN_EPS)
    return scale, beta - mean * scale


def _identity_affine(c):
    return jnp.ones((c,), jnp.float32), jnp.zeros((c,), jnp.float32)


def _fold(w_oihw, bias, pre, post):
    """W' = W * pre_scale (per out-channel); shift' = bias*pre_scale + pre_shift."""
    pre_s, pre_t = pre
    w = w_oihw * pre_s[:, None, None, None]
    shift = bias * pre_s + pre_t
    return w, shift, post[0], post[1]


def _pack_affine(shift, post_s, post_t):
    c = shift.shape[0]
    aff = jnp.zeros((8, c), jnp.float32)      # one lane-dense (8, Cout) input
    return aff.at[0].set(shift).at[1].set(post_s).at[2].set(post_t)


def _as_1x1_mat(w_oihw):
    cout, cin = w_oihw.shape[:2]
    return w_oihw.reshape(cout, cin).T.astype(jnp.bfloat16)        # (Cin, Cout)


def _as_3x3_taps(w_oihw):
    # OIHW -> (kh*kw, Cin, Cout); tap t = kh*3 + kw matches the kernel slices.
    cout, cin = w_oihw.shape[:2]
    return (jnp.transpose(w_oihw, (2, 3, 1, 0))
            .reshape(9, cin, cout).astype(jnp.bfloat16))


def make_params(key):
    ks = jax.random.split(key, 8)

    def conv(k, cout, cin, ksz):
        # nn.init.xavier_uniform(weight); bias.fill_(0.2)
        return (_xavier_uniform(k, cout, cin, ksz),
                jnp.full((cout,), 0.2, jnp.float32))

    bn2_s, bn2_t = _bn_affine(256)            # outer bn2, folded per-branch

    # stem: b1 (1x1,64) | b2 reduce (1x1,96) | b3 reduce (1x1,16), shared input
    w1, b1 = conv(ks[0], 64, 128, 1)
    w2a, b2a = conv(ks[1], 96, 128, 1)
    w3a, b3a = conv(ks[2], 16, 128, 1)
    f1 = _fold(w1, b1, _bn_affine(64), (bn2_s[0:64], bn2_t[0:64]))
    f2a = _fold(w2a, b2a, _bn_affine(96), _identity_affine(96))
    f3a = _fold(w3a, b3a, _bn_affine(16), _identity_affine(16))
    w_stem = jnp.concatenate(
        [_as_1x1_mat(f1[0]), _as_1x1_mat(f2a[0]), _as_1x1_mat(f3a[0])], axis=1)
    aff_stem = _pack_affine(jnp.concatenate([f1[1], f2a[1], f3a[1]]),
                            jnp.concatenate([f1[2], f2a[2], f3a[2]]),
                            jnp.concatenate([f1[3], f2a[3], f3a[3]]))

    # branch 2 tail: 3x3 conv 96 -> 128 (BN + ReLU, then bn2[64:192])
    w2b, b2b = conv(ks[3], 128, 96, 3)
    f2b = _fold(w2b, b2b, _bn_affine(128), (bn2_s[64:192], bn2_t[64:192]))

    # branch 3 tail: 3x3 16 -> 32, 3x3 32 -> 32 (last gets bn2[192:224])
    w3b, b3b = conv(ks[4], 32, 16, 3)
    f3b = _fold(w3b, b3b, _bn_affine(32), _identity_affine(32))
    w3c, b3c = conv(ks[5], 32, 32, 3)
    f3c = _fold(w3c, b3c, _bn_affine(32), (bn2_s[192:224], bn2_t[192:224]))

    # branch 4: 3x3 maxpool(s1,p1) -> 1x1 conv 128 -> 32 (then bn2[224:256])
    w4, b4 = conv(ks[6], 32, 128, 1)
    f4 = _fold(w4, b4, _bn_affine(32), (bn2_s[224:256], bn2_t[224:256]))

    # feature_convo: 3x3 conv 256 -> 256 (bias) -> ReLU -> BN
    wfc, bfc = conv(ks[7], 256, 256, 3)
    ffc = _fold(wfc, bfc, _identity_affine(256), _bn_affine(256))

    return {
        "stem": (w_stem, aff_stem),
        "b2b": (_as_3x3_taps(f2b[0]), _pack_affine(f2b[1], f2b[2], f2b[3])),
        "b3b": (_as_3x3_taps(f3b[0]), _pack_affine(f3b[1], f3b[2], f3b[3])),
        "b3c": (_as_3x3_taps(f3c[0]), _pack_affine(f3c[1], f3c[2], f3c[3])),
        "b4":  (_as_1x1_mat(f4[0]), _pack_affine(f4[1], f4[2], f4[3])),
        "fc":  (_as_3x3_taps(ffc[0]), _pack_affine(ffc[1], ffc[2], ffc[3])),
    }


# ---------------------------------------------------------------------------
# Forward pass (FeatureConvLayerSingle)
# ---------------------------------------------------------------------------
def feature_conv_layer_single(feature1, feature2, params):
    """feature1 is accepted but unused, mirroring the PyTorch forward."""
    del feature1
    x = jnp.transpose(feature2, (0, 2, 3, 1))            # NCHW -> NHWC (f32)
    n = x.shape[0]

    # 2x2 max pool (ceil_mode) fused with the shared-input 1x1 convs
    w_stem, aff_stem = params["stem"]
    stem, pooled = pool2x2_stem(x, w_stem, aff_stem)
    ho, wo = pooled.shape[1], pooled.shape[2]

    y1 = stem[:, 0:64].reshape(n, ho, wo, 64)            # b1 (bn2[0:64] folded)
    t2 = stem[:, 64:160].reshape(n, ho, wo, 96)          # b2 reduce output
    t3 = stem[:, 160:176].reshape(n, ho, wo, 16)         # b3 reduce output

    w, aff = params["b2b"]
    y2 = conv3x3(t2, w, aff)                             # (n,ho,wo,128)

    w, aff = params["b3b"]
    t3 = conv3x3(t3, w, aff)                             # (n,ho,wo,32)
    w, aff = params["b3c"]
    y3 = conv3x3(t3, w, aff)                             # (n,ho,wo,32)

    w, aff = params["b4"]
    y4 = pool3x3_conv1x1(pooled, w, aff)                 # (n,ho,wo,32)

    # Inception concat; bn2 already folded into each branch's post affine.
    inc = jnp.concatenate([y1, y2, y3, y4], axis=-1)     # (n,ho,wo,256)

    # feature_convo: 3x3 conv(bias) -> ReLU -> BN
    w, aff = params["fc"]
    out = conv3x3(inc, w, aff)                           # (n,ho,wo,256) f32
    return jnp.transpose(out, (0, 3, 1, 2))              # NHWC -> NCHW


# ---------------------------------------------------------------------------
if __name__ == "__main__":
    key = jax.random.PRNGKey(0)
    k1, k2, k3 = jax.random.split(key, 3)

    N, C, H, W = 2, 128, 16, 16                  # Inception requires in_planes=128
    feature1 = jax.random.normal(k1, (N, C, H, W), jnp.float32)
    feature2 = jax.random.normal(k2, (N, C, H, W), jnp.float32)

    params = make_params(k3)
    fwd = jax.jit(feature_conv_layer_single)
    out = fwd(feature1, feature2, params)
    jax.block_until_ready(out)
    assert out.shape == (N, 256, H // 2, W // 2), out.shape
    assert out.dtype == jnp.float32
    print("KERNEL_OK")
</pallas_src>

<mosaic_0001>
module attributes {stable_mosaic.version = 11 : i64} {
  func.func @_pool2x2_stem_kernel(%arg0: i32, %arg1: memref<1x8x8x128xf32, #tpu.memory_space<vmem>>, %arg2: memref<1x8x8x128xf32, #tpu.memory_space<vmem>>, %arg3: memref<1x8x8x128xf32, #tpu.memory_space<vmem>>, %arg4: memref<1x8x8x128xf32, #tpu.memory_space<vmem>>, %arg5: memref<128x176xbf16, #tpu.memory_space<vmem>>, %arg6: memref<8x176xf32, #tpu.memory_space<vmem>>, %arg7: memref<64x176xf32, #tpu.memory_space<vmem>>, %arg8: memref<1x8x8x128xf32, #tpu.memory_space<vmem>>) attributes {dimension_semantics = [#tpu.dimension_semantics<parallel>], iteration_bounds = array<i64: 2>, scalar_prefetch = 0 : i64, scratch_operands = 0 : i64, tpu.core_type = #tpu.core_type<tc>, window_params = [{transform_indices = @transform_0, window_bounds = array<i64: 1, 8, 8, 128>}, {transform_indices = @transform_1, window_bounds = array<i64: 1, 8, 8, 128>}, {transform_indices = @transform_2, window_bounds = array<i64: 1, 8, 8, 128>}, {transform_indices = @transform_3, window_bounds = array<i64: 1, 8, 8, 128>}, {pipeline_mode = #tpu.pipeline_mode<synchronous>, transform_indices = @transform_4, window_bounds = array<i64: 128, 176>}, {pipeline_mode = #tpu.pipeline_mode<synchronous>, transform_indices = @transform_5, window_bounds = array<i64: 8, 176>}, {transform_indices = @transform_6, window_bounds = array<i64: 64, 176>}, {transform_indices = @transform_7, window_bounds = array<i64: 1, 8, 8, 128>}]} {
    %c0 = arith.constant 0 : index
    %c0_0 = arith.constant 0 : index
    %c0_1 = arith.constant 0 : index
    %c0_2 = arith.constant 0 : index
    %0 = vector.load %arg1[%c0, %c0_0, %c0_1, %c0_2] : memref<1x8x8x128xf32, #tpu.memory_space<vmem>>, vector<1x8x8x128xf32>
    %1 = vector.shape_cast %0 : vector<1x8x8x128xf32> to vector<8x8x128xf32>
    %c0_3 = arith.constant 0 : index
    %c0_4 = arith.constant 0 : index
    %c0_5 = arith.constant 0 : index
    %c0_6 = arith.constant 0 : index
    %2 = vector.load %arg2[%c0_3, %c0_4, %c0_5, %c0_6] : memref<1x8x8x128xf32, #tpu.memory_space<vmem>>, vector<1x8x8x128xf32>
    %3 = vector.shape_cast %2 : vector<1x8x8x128xf32> to vector<8x8x128xf32>
    %4 = arith.maximumf %1, %3 : vector<8x8x128xf32>
    %c0_7 = arith.constant 0 : index
    %c0_8 = arith.constant 0 : index
    %c0_9 = arith.constant 0 : index
    %c0_10 = arith.constant 0 : index
    %5 = vector.load %arg3[%c0_7, %c0_8, %c0_9, %c0_10] : memref<1x8x8x128xf32, #tpu.memory_space<vmem>>, vector<1x8x8x128xf32>
    %6 = vector.shape_cast %5 : vector<1x8x8x128xf32> to vector<8x8x128xf32>
    %c0_11 = arith.constant 0 : index
    %c0_12 = arith.constant 0 : index
    %c0_13 = arith.constant 0 : index
    %c0_14 = arith.constant 0 : index
    %7 = vector.load %arg4[%c0_11, %c0_12, %c0_13, %c0_14] : memref<1x8x8x128xf32, #tpu.memory_space<vmem>>, vector<1x8x8x128xf32>
    %8 = vector.shape_cast %7 : vector<1x8x8x128xf32> to vector<8x8x128xf32>
    %9 = arith.maximumf %6, %8 : vector<8x8x128xf32>
    %10 = arith.maximumf %4, %9 : vector<8x8x128xf32>
    %c0_15 = arith.constant 0 : index
    %c0_16 = arith.constant 0 : index
    %c0_17 = arith.constant 0 : index
    %c0_18 = arith.constant 0 : index
    %11 = vector.load %arg8[%c0_15, %c0_16, %c0_17, %c0_18] : memref<1x8x8x128xf32, #tpu.memory_space<vmem>>, vector<1x8x8x128xf32>
    %12 = vector.shape_cast %11 : vector<1x8x8x128xf32> to vector<8x8x128xf32>
    %13 = vector.shape_cast %10 : vector<8x8x128xf32> to vector<1x8x8x128xf32>
    tpu.vector_store %arg8[%c0_15, %c0_16, %c0_17, %c0_18], %13 {strides = array<i32>} : memref<1x8x8x128xf32, #tpu.memory_space<vmem>>, vector<1x8x8x128xf32>,
    %14 = vector.shape_cast %10 : vector<8x8x128xf32> to vector<64x128xf32>
    %15 = arith.truncf %14 : vector<64x128xf32> to vector<64x128xbf16>
    %c0_19 = arith.constant 0 : index
    %c0_20 = arith.constant 0 : index
    %16 = vector.load %arg5[%c0_19, %c0_20] : memref<128x176xbf16, #tpu.memory_space<vmem>>, vector<128x176xbf16>
    %cst = arith.constant dense<0.000000e+00> : vector<64x176xf32>
    %17 = tpu.matmul %15, %16, %cst {dimension_numbers = #tpu.dot_dimension_numbers<[1], [0], [0], [1], [0, 0, 1, 1], [], []>} : vector<64x128xbf16>, vector<128x176xbf16>, vector<64x176xf32> -> vector<64x176xf32>
    %c0_21 = arith.constant 0 : index
    %c0_22 = arith.constant 0 : index
    %18 = vector.load %arg6[%c0_21, %c0_22] : memref<8x176xf32, #tpu.memory_space<vmem>>, vector<1x176xf32>
    %c1 = arith.constant 1 : index
    %c0_23 = arith.constant 0 : index
    %19 = vector.load %arg6[%c1, %c0_23] : memref<8x176xf32, #tpu.memory_space<vmem>>, vector<1x176xf32>
    %c2 = arith.constant 2 : index
    %c0_24 = arith.constant 0 : index
    %20 = vector.load %arg6[%c2, %c0_24] : memref<8x176xf32, #tpu.memory_space<vmem>>, vector<1x176xf32>
    %21 = vector.broadcast %18 : vector<1x176xf32> to vector<64x176xf32>
    %22 = arith.addf %17, %21 : vector<64x176xf32>
    %cst_25 = arith.constant 0.000000e+00 : f32
    %23 = vector.broadcast %cst_25 : f32 to vector<64x176xf32>
    %24 = arith.maximumf %22, %23 : vector<64x176xf32>
    %25 = vector.broadcast %19 : vector<1x176xf32> to vector<64x176xf32>
    %26 = arith.mulf %24, %25 : vector<64x176xf32>
    %27 = vector.broadcast %20 : vector<1x176xf32> to vector<64x176xf32>
    %28 = arith.addf %26, %27 : vector<64x176xf32>
    %c0_26 = arith.constant 0 : index
    %c0_27 = arith.constant 0 : index
    %29 = vector.load %arg7[%c0_26, %c0_27] : memref<64x176xf32, #tpu.memory_space<vmem>>, vector<64x176xf32>
    tpu.vector_store %arg7[%c0_26, %c0_27], %28 {strides = array<i32>} : memref<64x176xf32, #tpu.memory_space<vmem>>, vector<64x176xf32>,
    return
  }
  func.func @transform_0(%arg0: i32) -> (i32, i32, i32, i32) {
    %c0_i32 = arith.constant 0 : i32
    %c0_i32_0 = arith.constant 0 : i32
    %c0_i32_1 = arith.constant 0 : i32
    %c0_i32_2 = arith.constant 0 : i32
    return %arg0, %c0_i32, %c0_i32_0, %c0_i32_1 : i32, i32, i32, i32
  }
  func.func @transform_1(%arg0: i32) -> (i32, i32, i32, i32) {
    %c0_i32 = arith.constant 0 : i32
    %c0_i32_0 = arith.constant 0 : i32
    %c0_i32_1 = arith.constant 0 : i32
    %c0_i32_2 = arith.constant 0 : i32
    return %arg0, %c0_i32, %c0_i32_0, %c0_i32_1 : i32, i32, i32, i32
  }
  func.func @transform_2(%arg0: i32) -> (i32, i32, i32, i32) {
    %c0_i32 = arith.constant 0 : i32
    %c0_i32_0 = arith.constant 0 : i32
    %c0_i32_1 = arith.constant 0 : i32
    %c0_i32_2 = arith.constant 0 : i32
    return %arg0, %c0_i32, %c0_i32_0, %c0_i32_1 : i32, i32, i32, i32
  }
  func.func @transform_3(%arg0: i32) -> (i32, i32, i32, i32) {
    %c0_i32 = arith.constant 0 : i32
    %c0_i32_0 = arith.constant 0 : i32
    %c0_i32_1 = arith.constant 0 : i32
    %c0_i32_2 = arith.constant 0 : i32
    return %arg0, %c0_i32, %c0_i32_0, %c0_i32_1 : i32, i32, i32, i32
  }
  func.func @transform_4(%arg0: i32) -> (i32, i32) {
    %c0_i32 = arith.constant 0 : i32
    %c0_i32_0 = arith.constant 0 : i32
    %c0_i32_1 = arith.constant 0 : i32
    return %c0_i32, %c0_i32_0 : i32, i32
  }
  func.func @transform_5(%arg0: i32) -> (i32, i32) {
    %c0_i32 = arith.constant 0 : i32
    %c0_i32_0 = arith.constant 0 : i32
    %c0_i32_1 = arith.constant 0 : i32
    return %c0_i32, %c0_i32_0 : i32, i32
  }
  func.func @transform_6(%arg0: i32) -> (i32, i32) {
    %c0_i32 = arith.constant 0 : i32
    %c0_i32_0 = arith.constant 0 : i32
    return %arg0, %c0_i32 : i32, i32
  }
  func.func @transform_7(%arg0: i32) -> (i32, i32, i32, i32) {
    %c0_i32 = arith.constant 0 : i32
    %c0_i32_0 = arith.constant 0 : i32
    %c0_i32_1 = arith.constant 0 : i32
    %c0_i32_2 = arith.constant 0 : i32
    return %arg0, %c0_i32, %c0_i32_0, %c0_i32_1 : i32, i32, i32, i32
  }
}

module attributes {stable_mosaic.version = 11 : i64} {
  func.func @_conv3x3_kernel(%arg0: i32, %arg1: memref<1x10x10x96xf32, #tpu.memory_space<vmem>>, %arg2: memref<9x96x128xbf16, #tpu.memory_space<vmem>>, %arg3: memref<8x128xf32, #tpu.memory_space<vmem>>, %arg4: memref<64x128xf32, #tpu.memory_space<vmem>>) attributes {dimension_semantics = [#tpu.dimension_semantics<parallel>], iteration_bounds = array<i64: 2>, scalar_prefetch = 0 : i64, scratch_operands = 0 : i64, tpu.core_type = #tpu.core_type<tc>, window_params = [{transform_indices = @transform_0, window_bounds = array<i64: 1, 10, 10, 96>}, {pipeline_mode = #tpu.pipeline_mode<synchronous>, transform_indices = @transform_1, window_bounds = array<i64: 9, 96, 128>}, {pipeline_mode = #tpu.pipeline_mode<synchronous>, transform_indices = @transform_2, window_bounds = array<i64: 8, 128>}, {transform_indices = @transform_3, window_bounds = array<i64: 64, 128>}]} {
    %c0 = arith.constant 0 : index
    %c0_0 = arith.constant 0 : index
    %c0_1 = arith.constant 0 : index
    %c0_2 = arith.constant 0 : index
    %0 = vector.load %arg1[%c0, %c0_0, %c0_1, %c0_2] : memref<1x10x10x96xf32, #tpu.memory_space<vmem>>, vector<1x8x8x96xf32>
    %1 = vector.shape_cast %0 : vector<1x8x8x96xf32> to vector<8x8x96xf32>
    %2 = vector.shape_cast %1 : vector<8x8x96xf32> to vector<64x96xf32>
    %3 = arith.truncf %2 : vector<64x96xf32> to vector<64x96xbf16>
    %c0_3 = arith.constant 0 : index
    %c0_4 = arith.constant 0 : index
    %c0_5 = arith.constant 0 : index
    %4 = vector.load %arg2[%c0_3, %c0_4, %c0_5] : memref<9x96x128xbf16, #tpu.memory_space<vmem>>, vector<1x96x128xbf16>
    %5 = vector.shape_cast %4 : vector<1x96x128xbf16> to vector<96x128xbf16>
    %cst = arith.constant dense<0.000000e+00> : vector<64x128xf32>
    %6 = tpu.matmul %3, %5, %cst {dimension_numbers = #tpu.dot_dimension_numbers<[1], [0], [0], [1], [0, 0, 1, 1], [], []>} : vector<64x96xbf16>, vector<96x128xbf16>, vector<64x128xf32> -> vector<64x128xf32>
    %c0_6 = arith.constant 0 : index
    %c0_7 = arith.constant 0 : index
    %c1 = arith.constant 1 : index
    %c0_8 = arith.constant 0 : index
    %7 = vector.load %arg1[%c0_6, %c0_7, %c1, %c0_8] : memref<1x10x10x96xf32, #tpu.memory_space<vmem>>, vector<1x8x8x96xf32>
    %8 = vector.shape_cast %7 : vector<1x8x8x96xf32> to vector<8x8x96xf32>
    %9 = vector.shape_cast %8 : vector<8x8x96xf32> to vector<64x96xf32>
    %10 = arith.truncf %9 : vector<64x96xf32> to vector<64x96xbf16>
    %c1_9 = arith.constant 1 : index
    %c0_10 = arith.constant 0 : index
    %c0_11 = arith.constant 0 : index
    %11 = vector.load %arg2[%c1_9, %c0_10, %c0_11] : memref<9x96x128xbf16, #tpu.memory_space<vmem>>, vector<1x96x128xbf16>
    %12 = vector.shape_cast %11 : vector<1x96x128xbf16> to vector<96x128xbf16>
    %cst_12 = arith.constant dense<0.000000e+00> : vector<64x128xf32>
    %13 = tpu.matmul %10, %12, %cst_12 {dimension_numbers = #tpu.dot_dimension_numbers<[1], [0], [0], [1], [0, 0, 1, 1], [], []>} : vector<64x96xbf16>, vector<96x128xbf16>, vector<64x128xf32> -> vector<64x128xf32>
    %14 = arith.addf %6, %13 : vector<64x128xf32>
    %c0_13 = arith.constant 0 : index
    %c0_14 = arith.constant 0 : index
    %c2 = arith.constant 2 : index
    %c0_15 = arith.constant 0 : index
    %15 = vector.load %arg1[%c0_13, %c0_14, %c2, %c0_15] : memref<1x10x10x96xf32, #tpu.memory_space<vmem>>, vector<1x8x8x96xf32>
    %16 = vector.shape_cast %15 : vector<1x8x8x96xf32> to vector<8x8x96xf32>
    %17 = vector.shape_cast %16 : vector<8x8x96xf32> to vector<64x96xf32>
    %18 = arith.truncf %17 : vector<64x96xf32> to vector<64x96xbf16>
    %c2_16 = arith.constant 2 : index
    %c0_17 = arith.constant 0 : index
    %c0_18 = arith.constant 0 : index
    %19 = vector.load %arg2[%c2_16, %c0_17, %c0_18] : memref<9x96x128xbf16, #tpu.memory_space<vmem>>, vector<1x96x128xbf16>
    %20 = vector.shape_cast %19 : vector<1x96x128xbf16> to vector<96x128xbf16>
    %cst_19 = arith.constant dense<0.000000e+00> : vector<64x128xf32>
    %21 = tpu.matmul %18, %20, %cst_19 {dimension_numbers = #tpu.dot_dimension_numbers<[1], [0], [0], [1], [0, 0, 1, 1], [], []>} : vector<64x96xbf16>, vector<96x128xbf16>, vector<64x128xf32> -> vector<64x128xf32>
    %22 = arith.addf %14, %21 : vector<64x128xf32>
    %c0_20 = arith.constant 0 : index
    %c1_21 = arith.constant 1 : index
    %c0_22 = arith.constant 0 : index
    %c0_23 = arith.constant 0 : index
    %23 = vector.load %arg1[%c0_20, %c1_21, %c0_22, %c0_23] : memref<1x10x10x96xf32, #tpu.memory_space<vmem>>, vector<1x8x8x96xf32>
    %24 = vector.shape_cast %23 : vector<1x8x8x96xf32> to vector<8x8x96xf32>
    %25 = vector.shape_cast %24 : vector<8x8x96xf32> to vector<64x96xf32>
    %26 = arith.truncf %25 : vector<64x96xf32> to vector<64x96xbf16>
    %c3 = arith.constant 3 : index
    %c0_24 = arith.constant 0 : index
    %c0_25 = arith.constant 0 : index
    %27 = vector.load %arg2[%c3, %c0_24, %c0_25] : memref<9x96x128xbf16, #tpu.memory_space<vmem>>, vector<1x96x128xbf16>
    %28 = vector.shape_cast %27 : vector<1x96x128xbf16> to vector<96x128xbf16>
    %cst_26 = arith.constant dense<0.000000e+00> : vector<64x128xf32>
    %29 = tpu.matmul %26, %28, %cst_26 {dimension_numbers = #tpu.dot_dimension_numbers<[1], [0], [0], [1], [0, 0, 1, 1], [], []>} : vector<64x96xbf16>, vector<96x128xbf16>, vector<64x128xf32> -> vector<64x128xf32>
    %30 = arith.addf %22, %29 : vector<64x128xf32>
    %c0_27 = arith.constant 0 : index
    %c1_28 = arith.constant 1 : index
    %c1_29 = arith.constant 1 : index
    %c0_30 = arith.constant 0 : index
    %31 = vector.load %arg1[%c0_27, %c1_28, %c1_29, %c0_30] : memref<1x10x10x96xf32, #tpu.memory_space<vmem>>, vector<1x8x8x96xf32>
    %32 = vector.shape_cast %31 : vector<1x8x8x96xf32> to vector<8x8x96xf32>
    %33 = vector.shape_cast %32 : vector<8x8x96xf32> to vector<64x96xf32>
    %34 = arith.truncf %33 : vector<64x96xf32> to vector<64x96xbf16>
    %c4 = arith.constant 4 : index
    %c0_31 = arith.constant 0 : index
    %c0_32 = arith.constant 0 : index
    %35 = vector.load %arg2[%c4, %c0_31, %c0_32] : memref<9x96x128xbf16, #tpu.memory_space<vmem>>, vector<1x96x128xbf16>
    %36 = vector.shape_cast %35 : vector<1x96x128xbf16> to vector<96x128xbf16>
    %cst_33 = arith.constant dense<0.000000e+00> : vector<64x128xf32>
    %37 = tpu.matmul %34, %36, %cst_33 {dimension_numbers = #tpu.dot_dimension_numbers<[1], [0], [0], [1], [0, 0, 1, 1], [], []>} : vector<64x96xbf16>, vector<96x128xbf16>, vector<64x128xf32> -> vector<64x128xf32>
    %38 = arith.addf %30, %37 : vector<64x128xf32>
    %c0_34 = arith.constant 0 : index
    %c1_35 = arith.constant 1 : index
    %c2_36 = arith.constant 2 : index
    %c0_37 = arith.constant 0 : index
    %39 = vector.load %arg1[%c0_34, %c1_35, %c2_36, %c0_37] : memref<1x10x10x96xf32, #tpu.memory_space<vmem>>, vector<1x8x8x96xf32>
    %40 = vector.shape_cast %39 : vector<1x8x8x96xf32> to vector<8x8x96xf32>
    %41 = vector.shape_cast %40 : vector<8x8x96xf32> to vector<64x96xf32>
    %42 = arith.truncf %41 : vector<64x96xf32> to vector<64x96xbf16>
    %c5 = arith.constant 5 : index
    %c0_38 = arith.constant 0 : index
    %c0_39 = arith.constant 0 : index
    %43 = vector.load %arg2[%c5, %c0_38, %c0_39] : memref<9x96x128xbf16, #tpu.memory_space<vmem>>, vector<1x96x128xbf16>
    %44 = vector.shape_cast %43 : vector<1x96x128xbf16> to vector<96x128xbf16>
    %cst_40 = arith.constant dense<0.000000e+00> : vector<64x128xf32>
    %45 = tpu.matmul %42, %44, %cst_40 {dimension_numbers = #tpu.dot_dimension_numbers<[1], [0], [0], [1], [0, 0, 1, 1], [], []>} : vector<64x96xbf16>, vector<96x128xbf16>, vector<64x128xf32> -> vector<64x128xf32>
    %46 = arith.addf %38, %45 : vector<64x128xf32>
    %c0_41 = arith.constant 0 : index
    %c2_42 = arith.constant 2 : index
    %c0_43 = arith.constant 0 : index
    %c0_44 = arith.constant 0 : index
    %47 = vector.load %arg1[%c0_41, %c2_42, %c0_43, %c0_44] : memref<1x10x10x96xf32, #tpu.memory_space<vmem>>, vector<1x8x8x96xf32>
    %48 = vector.shape_cast %47 : vector<1x8x8x96xf32> to vector<8x8x96xf32>
    %49 = vector.shape_cast %48 : vector<8x8x96xf32> to vector<64x96xf32>
    %50 = arith.truncf %49 : vector<64x96xf32> to vector<64x96xbf16>
    %c6 = arith.constant 6 : index
    %c0_45 = arith.constant 0 : index
    %c0_46 = arith.constant 0 : index
    %51 = vector.load %arg2[%c6, %c0_45, %c0_46] : memref<9x96x128xbf16, #tpu.memory_space<vmem>>, vector<1x96x128xbf16>
    %52 = vector.shape_cast %51 : vector<1x96x128xbf16> to vector<96x128xbf16>
    %cst_47 = arith.constant dense<0.000000e+00> : vector<64x128xf32>
    %53 = tpu.matmul %50, %52, %cst_47 {dimension_numbers = #tpu.dot_dimension_numbers<[1], [0], [0], [1], [0, 0, 1, 1], [], []>} : vector<64x96xbf16>, vector<96x128xbf16>, vector<64x128xf32> -> vector<64x128xf32>
    %54 = arith.addf %46, %53 : vector<64x128xf32>
    %c0_48 = arith.constant 0 : index
    %c2_49 = arith.constant 2 : index
    %c1_50 = arith.constant 1 : index
    %c0_51 = arith.constant 0 : index
    %55 = vector.load %arg1[%c0_48, %c2_49, %c1_50, %c0_51] : memref<1x10x10x96xf32, #tpu.memory_space<vmem>>, vector<1x8x8x96xf32>
    %56 = vector.shape_cast %55 : vector<1x8x8x96xf32> to vector<8x8x96xf32>
    %57 = vector.shape_cast %56 : vector<8x8x96xf32> to vector<64x96xf32>
    %58 = arith.truncf %57 : vector<64x96xf32> to vector<64x96xbf16>
    %c7 = arith.constant 7 : index
    %c0_52 = arith.constant 0 : index
    %c0_53 = arith.constant 0 : index
    %59 = vector.load %arg2[%c7, %c0_52, %c0_53] : memref<9x96x128xbf16, #tpu.memory_space<vmem>>, vector<1x96x128xbf16>
    %60 = vector.shape_cast %59 : vector<1x96x128xbf16> to vector<96x128xbf16>
    %cst_54 = arith.constant dense<0.000000e+00> : vector<64x128xf32>
    %61 = tpu.matmul %58, %60, %cst_54 {dimension_numbers = #tpu.dot_dimension_numbers<[1], [0], [0], [1], [0, 0, 1, 1], [], []>} : vector<64x96xbf16>, vector<96x128xbf16>, vector<64x128xf32> -> vector<64x128xf32>
    %62 = arith.addf %54, %61 : vector<64x128xf32>
    %c0_55 = arith.constant 0 : index
    %c2_56 = arith.constant 2 : index
    %c2_57 = arith.constant 2 : index
    %c0_58 = arith.constant 0 : index
    %63 = vector.load %arg1[%c0_55, %c2_56, %c2_57, %c0_58] : memref<1x10x10x96xf32, #tpu.memory_space<vmem>>, vector<1x8x8x96xf32>
    %64 = vector.shape_cast %63 : vector<1x8x8x96xf32> to vector<8x8x96xf32>
    %65 = vector.shape_cast %64 : vector<8x8x96xf32> to vector<64x96xf32>
    %66 = arith.truncf %65 : vector<64x96xf32> to vector<64x96xbf16>
    %c8 = arith.constant 8 : index
    %c0_59 = arith.constant 0 : index
    %c0_60 = arith.constant 0 : index
    %67 = vector.load %arg2[%c8, %c0_59, %c0_60] : memref<9x96x128xbf16, #tpu.memory_space<vmem>>, vector<1x96x128xbf16>
    %68 = vector.shape_cast %67 : vector<1x96x128xbf16> to vector<96x128xbf16>
    %cst_61 = arith.constant dense<0.000000e+00> : vector<64x128xf32>
    %69 = tpu.matmul %66, %68, %cst_61 {dimension_numbers = #tpu.dot_dimension_numbers<[1], [0], [0], [1], [0, 0, 1, 1], [], []>} : vector<64x96xbf16>, vector<96x128xbf16>, vector<64x128xf32> -> vector<64x128xf32>
    %70 = arith.addf %62, %69 : vector<64x128xf32>
    %c0_62 = arith.constant 0 : index
    %c0_63 = arith.constant 0 : index
    %71 = vector.load %arg3[%c0_62, %c0_63] : memref<8x128xf32, #tpu.memory_space<vmem>>, vector<1x128xf32>
    %c1_64 = arith.constant 1 : index
    %c0_65 = arith.constant 0 : index
    %72 = vector.load %arg3[%c1_64, %c0_65] : memref<8x128xf32, #tpu.memory_space<vmem>>, vector<1x128xf32>
    %c2_66 = arith.constant 2 : index
    %c0_67 = arith.constant 0 : index
    %73 = vector.load %arg3[%c2_66, %c0_67] : memref<8x128xf32, #tpu.memory_space<vmem>>, vector<1x128xf32>
    %74 = vector.broadcast %71 : vector<1x128xf32> to vector<64x128xf32>
    %75 = arith.addf %70, %74 : vector<64x128xf32>
    %cst_68 = arith.constant 0.000000e+00 : f32
    %76 = vector.broadcast %cst_68 : f32 to vector<64x128xf32>
    %77 = arith.maximumf %75, %76 : vector<64x128xf32>
    %78 = vector.broadcast %72 : vector<1x128xf32> to vector<64x128xf32>
    %79 = arith.mulf %77, %78 : vector<64x128xf32>
    %80 = vector.broadcast %73 : vector<1x128xf32> to vector<64x128xf32>
    %81 = arith.addf %79, %80 : vector<64x128xf32>
    %c0_69 = arith.constant 0 : index
    %c0_70 = arith.constant 0 : index
    %82 = vector.load %arg4[%c0_69, %c0_70] : memref<64x128xf32, #tpu.memory_space<vmem>>, vector<64x128xf32>
    tpu.vector_store %arg4[%c0_69, %c0_70], %81 {strides = array<i32>} : memref<64x128xf32, #tpu.memory_space<vmem>>, vector<64x128xf32>,
    return
  }
  func.func @transform_0(%arg0: i32) -> (i32, i32, i32, i32) {
    %c0_i32 = arith.constant 0 : i32
    %c0_i32_0 = arith.constant 0 : i32
    %c0_i32_1 = arith.constant 0 : i32
    %c0_i32_2 = arith.constant 0 : i32
    return %arg0, %c0_i32, %c0_i32_0, %c0_i32_1 : i32, i32, i32, i32
  }
  func.func @transform_1(%arg0: i32) -> (i32, i32, i32) {
    %c0_i32 = arith.constant 0 : i32
    %c0_i32_0 = arith.constant 0 : i32
    %c0_i32_1 = arith.constant 0 : i32
    %c0_i32_2 = arith.constant 0 : i32
    return %c0_i32, %c0_i32_0, %c0_i32_1 : i32, i32, i32
  }
  func.func @transform_2(%arg0: i32) -> (i32, i32) {
    %c0_i32 = arith.constant 0 : i32
    %c0_i32_0 = arith.constant 0 : i32
    %c0_i32_1 = arith.constant 0 : i32
    return %c0_i32, %c0_i32_0 : i32, i32
  }
  func.func @transform_3(%arg0: i32) -> (i32, i32) {
    %c0_i32 = arith.constant 0 : i32
    %c0_i32_0 = arith.constant 0 : i32
    return %arg0, %c0_i32 : i32, i32
  }
}

module attributes {stable_mosaic.version = 11 : i64} {
  func.func @_conv3x3_kernel(%arg0: i32, %arg1: memref<1x10x10x16xf32, #tpu.memory_space<vmem>>, %arg2: memref<9x16x32xbf16, #tpu.memory_space<vmem>>, %arg3: memref<8x32xf32, #tpu.memory_space<vmem>>, %arg4: memref<64x32xf32, #tpu.memory_space<vmem>>) attributes {dimension_semantics = [#tpu.dimension_semantics<parallel>], iteration_bounds = array<i64: 2>, scalar_prefetch = 0 : i64, scratch_operands = 0 : i64, tpu.core_type = #tpu.core_type<tc>, window_params = [{transform_indices = @transform_0, window_bounds = array<i64: 1, 10, 10, 16>}, {pipeline_mode = #tpu.pipeline_mode<synchronous>, transform_indices = @transform_1, window_bounds = array<i64: 9, 16, 32>}, {pipeline_mode = #tpu.pipeline_mode<synchronous>, transform_indices = @transform_2, window_bounds = array<i64: 8, 32>}, {transform_indices = @transform_3, window_bounds = array<i64: 64, 32>}]} {
    %c0 = arith.constant 0 : index
    %c0_0 = arith.constant 0 : index
    %c0_1 = arith.constant 0 : index
    %c0_2 = arith.constant 0 : index
    %0 = vector.load %arg1[%c0, %c0_0, %c0_1, %c0_2] : memref<1x10x10x16xf32, #tpu.memory_space<vmem>>, vector<1x8x8x16xf32>
    %1 = vector.shape_cast %0 : vector<1x8x8x16xf32> to vector<8x8x16xf32>
    %2 = vector.shape_cast %1 : vector<8x8x16xf32> to vector<64x16xf32>
    %3 = arith.truncf %2 : vector<64x16xf32> to vector<64x16xbf16>
    %c0_3 = arith.constant 0 : index
    %c0_4 = arith.constant 0 : index
    %c0_5 = arith.constant 0 : index
    %4 = vector.load %arg2[%c0_3, %c0_4, %c0_5] : memref<9x16x32xbf16, #tpu.memory_space<vmem>>, vector<1x16x32xbf16>
    %5 = vector.shape_cast %4 : vector<1x16x32xbf16> to vector<16x32xbf16>
    %cst = arith.constant dense<0.000000e+00> : vector<64x32xf32>
    %6 = tpu.matmul %3, %5, %cst {dimension_numbers = #tpu.dot_dimension_numbers<[1], [0], [0], [1], [0, 0, 1, 1], [], []>} : vector<64x16xbf16>, vector<16x32xbf16>, vector<64x32xf32> -> vector<64x32xf32>
    %c0_6 = arith.constant 0 : index
    %c0_7 = arith.constant 0 : index
    %c1 = arith.constant 1 : index
    %c0_8 = arith.constant 0 : index
    %7 = vector.load %arg1[%c0_6, %c0_7, %c1, %c0_8] : memref<1x10x10x16xf32, #tpu.memory_space<vmem>>, vector<1x8x8x16xf32>
    %8 = vector.shape_cast %7 : vector<1x8x8x16xf32> to vector<8x8x16xf32>
    %9 = vector.shape_cast %8 : vector<8x8x16xf32> to vector<64x16xf32>
    %10 = arith.truncf %9 : vector<64x16xf32> to vector<64x16xbf16>
    %c1_9 = arith.constant 1 : index
    %c0_10 = arith.constant 0 : index
    %c0_11 = arith.constant 0 : index
    %11 = vector.load %arg2[%c1_9, %c0_10, %c0_11] : memref<9x16x32xbf16, #tpu.memory_space<vmem>>, vector<1x16x32xbf16>
    %12 = vector.shape_cast %11 : vector<1x16x32xbf16> to vector<16x32xbf16>
    %cst_12 = arith.constant dense<0.000000e+00> : vector<64x32xf32>
    %13 = tpu.matmul %10, %12, %cst_12 {dimension_numbers = #tpu.dot_dimension_numbers<[1], [0], [0], [1], [0, 0, 1, 1], [], []>} : vector<64x16xbf16>, vector<16x32xbf16>, vector<64x32xf32> -> vector<64x32xf32>
    %14 = arith.addf %6, %13 : vector<64x32xf32>
    %c0_13 = arith.constant 0 : index
    %c0_14 = arith.constant 0 : index
    %c2 = arith.constant 2 : index
    %c0_15 = arith.constant 0 : index
    %15 = vector.load %arg1[%c0_13, %c0_14, %c2, %c0_15] : memref<1x10x10x16xf32, #tpu.memory_space<vmem>>, vector<1x8x8x16xf32>
    %16 = vector.shape_cast %15 : vector<1x8x8x16xf32> to vector<8x8x16xf32>
    %17 = vector.shape_cast %16 : vector<8x8x16xf32> to vector<64x16xf32>
    %18 = arith.truncf %17 : vector<64x16xf32> to vector<64x16xbf16>
    %c2_16 = arith.constant 2 : index
    %c0_17 = arith.constant 0 : index
    %c0_18 = arith.constant 0 : index
    %19 = vector.load %arg2[%c2_16, %c0_17, %c0_18] : memref<9x16x32xbf16, #tpu.memory_space<vmem>>, vector<1x16x32xbf16>
    %20 = vector.shape_cast %19 : vector<1x16x32xbf16> to vector<16x32xbf16>
    %cst_19 = arith.constant dense<0.000000e+00> : vector<64x32xf32>
    %21 = tpu.matmul %18, %20, %cst_19 {dimension_numbers = #tpu.dot_dimension_numbers<[1], [0], [0], [1], [0, 0, 1, 1], [], []>} : vector<64x16xbf16>, vector<16x32xbf16>, vector<64x32xf32> -> vector<64x32xf32>
    %22 = arith.addf %14, %21 : vector<64x32xf32>
    %c0_20 = arith.constant 0 : index
    %c1_21 = arith.constant 1 : index
    %c0_22 = arith.constant 0 : index
    %c0_23 = arith.constant 0 : index
    %23 = vector.load %arg1[%c0_20, %c1_21, %c0_22, %c0_23] : memref<1x10x10x16xf32, #tpu.memory_space<vmem>>, vector<1x8x8x16xf32>
    %24 = vector.shape_cast %23 : vector<1x8x8x16xf32> to vector<8x8x16xf32>
    %25 = vector.shape_cast %24 : vector<8x8x16xf32> to vector<64x16xf32>
    %26 = arith.truncf %25 : vector<64x16xf32> to vector<64x16xbf16>
    %c3 = arith.constant 3 : index
    %c0_24 = arith.constant 0 : index
    %c0_25 = arith.constant 0 : index
    %27 = vector.load %arg2[%c3, %c0_24, %c0_25] : memref<9x16x32xbf16, #tpu.memory_space<vmem>>, vector<1x16x32xbf16>
    %28 = vector.shape_cast %27 : vector<1x16x32xbf16> to vector<16x32xbf16>
    %cst_26 = arith.constant dense<0.000000e+00> : vector<64x32xf32>
    %29 = tpu.matmul %26, %28, %cst_26 {dimension_numbers = #tpu.dot_dimension_numbers<[1], [0], [0], [1], [0, 0, 1, 1], [], []>} : vector<64x16xbf16>, vector<16x32xbf16>, vector<64x32xf32> -> vector<64x32xf32>
    %30 = arith.addf %22, %29 : vector<64x32xf32>
    %c0_27 = arith.constant 0 : index
    %c1_28 = arith.constant 1 : index
    %c1_29 = arith.constant 1 : index
    %c0_30 = arith.constant 0 : index
    %31 = vector.load %arg1[%c0_27, %c1_28, %c1_29, %c0_30] : memref<1x10x10x16xf32, #tpu.memory_space<vmem>>, vector<1x8x8x16xf32>
    %32 = vector.shape_cast %31 : vector<1x8x8x16xf32> to vector<8x8x16xf32>
    %33 = vector.shape_cast %32 : vector<8x8x16xf32> to vector<64x16xf32>
    %34 = arith.truncf %33 : vector<64x16xf32> to vector<64x16xbf16>
    %c4 = arith.constant 4 : index
    %c0_31 = arith.constant 0 : index
    %c0_32 = arith.constant 0 : index
    %35 = vector.load %arg2[%c4, %c0_31, %c0_32] : memref<9x16x32xbf16, #tpu.memory_space<vmem>>, vector<1x16x32xbf16>
    %36 = vector.shape_cast %35 : vector<1x16x32xbf16> to vector<16x32xbf16>
    %cst_33 = arith.constant dense<0.000000e+00> : vector<64x32xf32>
    %37 = tpu.matmul %34, %36, %cst_33 {dimension_numbers = #tpu.dot_dimension_numbers<[1], [0], [0], [1], [0, 0, 1, 1], [], []>} : vector<64x16xbf16>, vector<16x32xbf16>, vector<64x32xf32> -> vector<64x32xf32>
    %38 = arith.addf %30, %37 : vector<64x32xf32>
    %c0_34 = arith.constant 0 : index
    %c1_35 = arith.constant 1 : index
    %c2_36 = arith.constant 2 : index
    %c0_37 = arith.constant 0 : index
    %39 = vector.load %arg1[%c0_34, %c1_35, %c2_36, %c0_37] : memref<1x10x10x16xf32, #tpu.memory_space<vmem>>, vector<1x8x8x16xf32>
    %40 = vector.shape_cast %39 : vector<1x8x8x16xf32> to vector<8x8x16xf32>
    %41 = vector.shape_cast %40 : vector<8x8x16xf32> to vector<64x16xf32>
    %42 = arith.truncf %41 : vector<64x16xf32> to vector<64x16xbf16>
    %c5 = arith.constant 5 : index
    %c0_38 = arith.constant 0 : index
    %c0_39 = arith.constant 0 : index
    %43 = vector.load %arg2[%c5, %c0_38, %c0_39] : memref<9x16x32xbf16, #tpu.memory_space<vmem>>, vector<1x16x32xbf16>
    %44 = vector.shape_cast %43 : vector<1x16x32xbf16> to vector<16x32xbf16>
    %cst_40 = arith.constant dense<0.000000e+00> : vector<64x32xf32>
    %45 = tpu.matmul %42, %44, %cst_40 {dimension_numbers = #tpu.dot_dimension_numbers<[1], [0], [0], [1], [0, 0, 1, 1], [], []>} : vector<64x16xbf16>, vector<16x32xbf16>, vector<64x32xf32> -> vector<64x32xf32>
    %46 = arith.addf %38, %45 : vector<64x32xf32>
    %c0_41 = arith.constant 0 : index
    %c2_42 = arith.constant 2 : index
    %c0_43 = arith.constant 0 : index
    %c0_44 = arith.constant 0 : index
    %47 = vector.load %arg1[%c0_41, %c2_42, %c0_43, %c0_44] : memref<1x10x10x16xf32, #tpu.memory_space<vmem>>, vector<1x8x8x16xf32>
    %48 = vector.shape_cast %47 : vector<1x8x8x16xf32> to vector<8x8x16xf32>
    %49 = vector.shape_cast %48 : vector<8x8x16xf32> to vector<64x16xf32>
    %50 = arith.truncf %49 : vector<64x16xf32> to vector<64x16xbf16>
    %c6 = arith.constant 6 : index
    %c0_45 = arith.constant 0 : index
    %c0_46 = arith.constant 0 : index
    %51 = vector.load %arg2[%c6, %c0_45, %c0_46] : memref<9x16x32xbf16, #tpu.memory_space<vmem>>, vector<1x16x32xbf16>
    %52 = vector.shape_cast %51 : vector<1x16x32xbf16> to vector<16x32xbf16>
    %cst_47 = arith.constant dense<0.000000e+00> : vector<64x32xf32>
    %53 = tpu.matmul %50, %52, %cst_47 {dimension_numbers = #tpu.dot_dimension_numbers<[1], [0], [0], [1], [0, 0, 1, 1], [], []>} : vector<64x16xbf16>, vector<16x32xbf16>, vector<64x32xf32> -> vector<64x32xf32>
    %54 = arith.addf %46, %53 : vector<64x32xf32>
    %c0_48 = arith.constant 0 : index
    %c2_49 = arith.constant 2 : index
    %c1_50 = arith.constant 1 : index
    %c0_51 = arith.constant 0 : index
    %55 = vector.load %arg1[%c0_48, %c2_49, %c1_50, %c0_51] : memref<1x10x10x16xf32, #tpu.memory_space<vmem>>, vector<1x8x8x16xf32>
    %56 = vector.shape_cast %55 : vector<1x8x8x16xf32> to vector<8x8x16xf32>
    %57 = vector.shape_cast %56 : vector<8x8x16xf32> to vector<64x16xf32>
    %58 = arith.truncf %57 : vector<64x16xf32> to vector<64x16xbf16>
    %c7 = arith.constant 7 : index
    %c0_52 = arith.constant 0 : index
    %c0_53 = arith.constant 0 : index
    %59 = vector.load %arg2[%c7, %c0_52, %c0_53] : memref<9x16x32xbf16, #tpu.memory_space<vmem>>, vector<1x16x32xbf16>
    %60 = vector.shape_cast %59 : vector<1x16x32xbf16> to vector<16x32xbf16>
    %cst_54 = arith.constant dense<0.000000e+00> : vector<64x32xf32>
    %61 = tpu.matmul %58, %60, %cst_54 {dimension_numbers = #tpu.dot_dimension_numbers<[1], [0], [0], [1], [0, 0, 1, 1], [], []>} : vector<64x16xbf16>, vector<16x32xbf16>, vector<64x32xf32> -> vector<64x32xf32>
    %62 = arith.addf %54, %61 : vector<64x32xf32>
    %c0_55 = arith.constant 0 : index
    %c2_56 = arith.constant 2 : index
    %c2_57 = arith.constant 2 : index
    %c0_58 = arith.constant 0 : index
    %63 = vector.load %arg1[%c0_55, %c2_56, %c2_57, %c0_58] : memref<1x10x10x16xf32, #tpu.memory_space<vmem>>, vector<1x8x8x16xf32>
    %64 = vector.shape_cast %63 : vector<1x8x8x16xf32> to vector<8x8x16xf32>
    %65 = vector.shape_cast %64 : vector<8x8x16xf32> to vector<64x16xf32>
    %66 = arith.truncf %65 : vector<64x16xf32> to vector<64x16xbf16>
    %c8 = arith.constant 8 : index
    %c0_59 = arith.constant 0 : index
    %c0_60 = arith.constant 0 : index
    %67 = vector.load %arg2[%c8, %c0_59, %c0_60] : memref<9x16x32xbf16, #tpu.memory_space<vmem>>, vector<1x16x32xbf16>
    %68 = vector.shape_cast %67 : vector<1x16x32xbf16> to vector<16x32xbf16>
    %cst_61 = arith.constant dense<0.000000e+00> : vector<64x32xf32>
    %69 = tpu.matmul %66, %68, %cst_61 {dimension_numbers = #tpu.dot_dimension_numbers<[1], [0], [0], [1], [0, 0, 1, 1], [], []>} : vector<64x16xbf16>, vector<16x32xbf16>, vector<64x32xf32> -> vector<64x32xf32>
    %70 = arith.addf %62, %69 : vector<64x32xf32>
    %c0_62 = arith.constant 0 : index
    %c0_63 = arith.constant 0 : index
    %71 = vector.load %arg3[%c0_62, %c0_63] : memref<8x32xf32, #tpu.memory_space<vmem>>, vector<1x32xf32>
    %c1_64 = arith.constant 1 : index
    %c0_65 = arith.constant 0 : index
    %72 = vector.load %arg3[%c1_64, %c0_65] : memref<8x32xf32, #tpu.memory_space<vmem>>, vector<1x32xf32>
    %c2_66 = arith.constant 2 : index
    %c0_67 = arith.constant 0 : index
    %73 = vector.load %arg3[%c2_66, %c0_67] : memref<8x32xf32, #tpu.memory_space<vmem>>, vector<1x32xf32>
    %74 = vector.broadcast %71 : vector<1x32xf32> to vector<64x32xf32>
    %75 = arith.addf %70, %74 : vector<64x32xf32>
    %cst_68 = arith.constant 0.000000e+00 : f32
    %76 = vector.broadcast %cst_68 : f32 to vector<64x32xf32>
    %77 = arith.maximumf %75, %76 : vector<64x32xf32>
    %78 = vector.broadcast %72 : vector<1x32xf32> to vector<64x32xf32>
    %79 = arith.mulf %77, %78 : vector<64x32xf32>
    %80 = vector.broadcast %73 : vector<1x32xf32> to vector<64x32xf32>
    %81 = arith.addf %79, %80 : vector<64x32xf32>
    %c0_69 = arith.constant 0 : index
    %c0_70 = arith.constant 0 : index
    %82 = vector.load %arg4[%c0_69, %c0_70] : memref<64x32xf32, #tpu.memory_space<vmem>>, vector<64x32xf32>
    tpu.vector_store %arg4[%c0_69, %c0_70], %81 {strides = array<i32>} : memref<64x32xf32, #tpu.memory_space<vmem>>, vector<64x32xf32>,
    return
  }
  func.func @transform_0(%arg0: i32) -> (i32, i32, i32, i32) {
    %c0_i32 = arith.constant 0 : i32
    %c0_i32_0 = arith.constant 0 : i32
    %c0_i32_1 = arith.constant 0 : i32
    %c0_i32_2 = arith.constant 0 : i32
    return %arg0, %c0_i32, %c0_i32_0, %c0_i32_1 : i32, i32, i32, i32
  }
  func.func @transform_1(%arg0: i32) -> (i32, i32, i32) {
    %c0_i32 = arith.constant 0 : i32
    %c0_i32_0 = arith.constant 0 : i32
    %c0_i32_1 = arith.constant 0 : i32
    %c0_i32_2 = arith.constant 0 : i32
    return %c0_i32, %c0_i32_0, %c0_i32_1 : i32, i32, i32
  }
  func.func @transform_2(%arg0: i32) -> (i32, i32) {
    %c0_i32 = arith.constant 0 : i32
    %c0_i32_0 = arith.constant 0 : i32
    %c0_i32_1 = arith.constant 0 : i32
    return %c0_i32, %c0_i32_0 : i32, i32
  }
  func.func @transform_3(%arg0: i32) -> (i32, i32) {
    %c0_i32 = arith.constant 0 : i32
    %c0_i32_0 = arith.constant 0 : i32
    return %arg0, %c0_i32 : i32, i32
  }
}

module attributes {stable_mosaic.version = 11 : i64} {
  func.func @_conv3x3_kernel(%arg0: i32, %arg1: memref<1x10x10x32xf32, #tpu.memory_space<vmem>>, %arg2: memref<9x32x32xbf16, #tpu.memory_space<vmem>>, %arg3: memref<8x32xf32, #tpu.memory_space<vmem>>, %arg4: memref<64x32xf32, #tpu.memory_space<vmem>>) attributes {dimension_semantics = [#tpu.dimension_semantics<parallel>], iteration_bounds = array<i64: 2>, scalar_prefetch = 0 : i64, scratch_operands = 0 : i64, tpu.core_type = #tpu.core_type<tc>, window_params = [{transform_indices = @transform_0, window_bounds = array<i64: 1, 10, 10, 32>}, {pipeline_mode = #tpu.pipeline_mode<synchronous>, transform_indices = @transform_1, window_bounds = array<i64: 9, 32, 32>}, {pipeline_mode = #tpu.pipeline_mode<synchronous>, transform_indices = @transform_2, window_bounds = array<i64: 8, 32>}, {transform_indices = @transform_3, window_bounds = array<i64: 64, 32>}]} {
    %c0 = arith.constant 0 : index
    %c0_0 = arith.constant 0 : index
    %c0_1 = arith.constant 0 : index
    %c0_2 = arith.constant 0 : index
    %0 = vector.load %arg1[%c0, %c0_0, %c0_1, %c0_2] : memref<1x10x10x32xf32, #tpu.memory_space<vmem>>, vector<1x8x8x32xf32>
    %1 = vector.shape_cast %0 : vector<1x8x8x32xf32> to vector<8x8x32xf32>
    %2 = vector.shape_cast %1 : vector<8x8x32xf32> to vector<64x32xf32>
    %3 = arith.truncf %2 : vector<64x32xf32> to vector<64x32xbf16>
    %c0_3 = arith.constant 0 : index
    %c0_4 = arith.constant 0 : index
    %c0_5 = arith.constant 0 : index
    %4 = vector.load %arg2[%c0_3, %c0_4, %c0_5] : memref<9x32x32xbf16, #tpu.memory_space<vmem>>, vector<1x32x32xbf16>
    %5 = vector.shape_cast %4 : vector<1x32x32xbf16> to vector<32x32xbf16>
    %cst = arith.constant dense<0.000000e+00> : vector<64x32xf32>
    %6 = tpu.matmul %3, %5, %cst {dimension_numbers = #tpu.dot_dimension_numbers<[1], [0], [0], [1], [0, 0, 1, 1], [], []>} : vector<64x32xbf16>, vector<32x32xbf16>, vector<64x32xf32> -> vector<64x32xf32>
    %c0_6 = arith.constant 0 : index
    %c0_7 = arith.constant 0 : index
    %c1 = arith.constant 1 : index
    %c0_8 = arith.constant 0 : index
    %7 = vector.load %arg1[%c0_6, %c0_7, %c1, %c0_8] : memref<1x10x10x32xf32, #tpu.memory_space<vmem>>, vector<1x8x8x32xf32>
    %8 = vector.shape_cast %7 : vector<1x8x8x32xf32> to vector<8x8x32xf32>
    %9 = vector.shape_cast %8 : vector<8x8x32xf32> to vector<64x32xf32>
    %10 = arith.truncf %9 : vector<64x32xf32> to vector<64x32xbf16>
    %c1_9 = arith.constant 1 : index
    %c0_10 = arith.constant 0 : index
    %c0_11 = arith.constant 0 : index
    %11 = vector.load %arg2[%c1_9, %c0_10, %c0_11] : memref<9x32x32xbf16, #tpu.memory_space<vmem>>, vector<1x32x32xbf16>
    %12 = vector.shape_cast %11 : vector<1x32x32xbf16> to vector<32x32xbf16>
    %cst_12 = arith.constant dense<0.000000e+00> : vector<64x32xf32>
    %13 = tpu.matmul %10, %12, %cst_12 {dimension_numbers = #tpu.dot_dimension_numbers<[1], [0], [0], [1], [0, 0, 1, 1], [], []>} : vector<64x32xbf16>, vector<32x32xbf16>, vector<64x32xf32> -> vector<64x32xf32>
    %14 = arith.addf %6, %13 : vector<64x32xf32>
    %c0_13 = arith.constant 0 : index
    %c0_14 = arith.constant 0 : index
    %c2 = arith.constant 2 : index
    %c0_15 = arith.constant 0 : index
    %15 = vector.load %arg1[%c0_13, %c0_14, %c2, %c0_15] : memref<1x10x10x32xf32, #tpu.memory_space<vmem>>, vector<1x8x8x32xf32>
    %16 = vector.shape_cast %15 : vector<1x8x8x32xf32> to vector<8x8x32xf32>
    %17 = vector.shape_cast %16 : vector<8x8x32xf32> to vector<64x32xf32>
    %18 = arith.truncf %17 : vector<64x32xf32> to vector<64x32xbf16>
    %c2_16 = arith.constant 2 : index
    %c0_17 = arith.constant 0 : index
    %c0_18 = arith.constant 0 : index
    %19 = vector.load %arg2[%c2_16, %c0_17, %c0_18] : memref<9x32x32xbf16, #tpu.memory_space<vmem>>, vector<1x32x32xbf16>
    %20 = vector.shape_cast %19 : vector<1x32x32xbf16> to vector<32x32xbf16>
    %cst_19 = arith.constant dense<0.000000e+00> : vector<64x32xf32>
    %21 = tpu.matmul %18, %20, %cst_19 {dimension_numbers = #tpu.dot_dimension_numbers<[1], [0], [0], [1], [0, 0, 1, 1], [], []>} : vector<64x32xbf16>, vector<32x32xbf16>, vector<64x32xf32> -> vector<64x32xf32>
    %22 = arith.addf %14, %21 : vector<64x32xf32>
    %c0_20 = arith.constant 0 : index
    %c1_21 = arith.constant 1 : index
    %c0_22 = arith.constant 0 : index
    %c0_23 = arith.constant 0 : index
    %23 = vector.load %arg1[%c0_20, %c1_21, %c0_22, %c0_23] : memref<1x10x10x32xf32, #tpu.memory_space<vmem>>, vector<1x8x8x32xf32>
    %24 = vector.shape_cast %23 : vector<1x8x8x32xf32> to vector<8x8x32xf32>
    %25 = vector.shape_cast %24 : vector<8x8x32xf32> to vector<64x32xf32>
    %26 = arith.truncf %25 : vector<64x32xf32> to vector<64x32xbf16>
    %c3 = arith.constant 3 : index
    %c0_24 = arith.constant 0 : index
    %c0_25 = arith.constant 0 : index
    %27 = vector.load %arg2[%c3, %c0_24, %c0_25] : memref<9x32x32xbf16, #tpu.memory_space<vmem>>, vector<1x32x32xbf16>
    %28 = vector.shape_cast %27 : vector<1x32x32xbf16> to vector<32x32xbf16>
    %cst_26 = arith.constant dense<0.000000e+00> : vector<64x32xf32>
    %29 = tpu.matmul %26, %28, %cst_26 {dimension_numbers = #tpu.dot_dimension_numbers<[1], [0], [0], [1], [0, 0, 1, 1], [], []>} : vector<64x32xbf16>, vector<32x32xbf16>, vector<64x32xf32> -> vector<64x32xf32>
    %30 = arith.addf %22, %29 : vector<64x32xf32>
    %c0_27 = arith.constant 0 : index
    %c1_28 = arith.constant 1 : index
    %c1_29 = arith.constant 1 : index
    %c0_30 = arith.constant 0 : index
    %31 = vector.load %arg1[%c0_27, %c1_28, %c1_29, %c0_30] : memref<1x10x10x32xf32, #tpu.memory_space<vmem>>, vector<1x8x8x32xf32>
    %32 = vector.shape_cast %31 : vector<1x8x8x32xf32> to vector<8x8x32xf32>
    %33 = vector.shape_cast %32 : vector<8x8x32xf32> to vector<64x32xf32>
    %34 = arith.truncf %33 : vector<64x32xf32> to vector<64x32xbf16>
    %c4 = arith.constant 4 : index
    %c0_31 = arith.constant 0 : index
    %c0_32 = arith.constant 0 : index
    %35 = vector.load %arg2[%c4, %c0_31, %c0_32] : memref<9x32x32xbf16, #tpu.memory_space<vmem>>, vector<1x32x32xbf16>
    %36 = vector.shape_cast %35 : vector<1x32x32xbf16> to vector<32x32xbf16>
    %cst_33 = arith.constant dense<0.000000e+00> : vector<64x32xf32>
    %37 = tpu.matmul %34, %36, %cst_33 {dimension_numbers = #tpu.dot_dimension_numbers<[1], [0], [0], [1], [0, 0, 1, 1], [], []>} : vector<64x32xbf16>, vector<32x32xbf16>, vector<64x32xf32> -> vector<64x32xf32>
    %38 = arith.addf %30, %37 : vector<64x32xf32>
    %c0_34 = arith.constant 0 : index
    %c1_35 = arith.constant 1 : index
    %c2_36 = arith.constant 2 : index
    %c0_37 = arith.constant 0 : index
    %39 = vector.load %arg1[%c0_34, %c1_35, %c2_36, %c0_37] : memref<1x10x10x32xf32, #tpu.memory_space<vmem>>, vector<1x8x8x32xf32>
    %40 = vector.shape_cast %39 : vector<1x8x8x32xf32> to vector<8x8x32xf32>
    %41 = vector.shape_cast %40 : vector<8x8x32xf32> to vector<64x32xf32>
    %42 = arith.truncf %41 : vector<64x32xf32> to vector<64x32xbf16>
    %c5 = arith.constant 5 : index
    %c0_38 = arith.constant 0 : index
    %c0_39 = arith.constant 0 : index
    %43 = vector.load %arg2[%c5, %c0_38, %c0_39] : memref<9x32x32xbf16, #tpu.memory_space<vmem>>, vector<1x32x32xbf16>
    %44 = vector.shape_cast %43 : vector<1x32x32xbf16> to vector<32x32xbf16>
    %cst_40 = arith.constant dense<0.000000e+00> : vector<64x32xf32>
    %45 = tpu.matmul %42, %44, %cst_40 {dimension_numbers = #tpu.dot_dimension_numbers<[1], [0], [0], [1], [0, 0, 1, 1], [], []>} : vector<64x32xbf16>, vector<32x32xbf16>, vector<64x32xf32> -> vector<64x32xf32>
    %46 = arith.addf %38, %45 : vector<64x32xf32>
    %c0_41 = arith.constant 0 : index
    %c2_42 = arith.constant 2 : index
    %c0_43 = arith.constant 0 : index
    %c0_44 = arith.constant 0 : index
    %47 = vector.load %arg1[%c0_41, %c2_42, %c0_43, %c0_44] : memref<1x10x10x32xf32, #tpu.memory_space<vmem>>, vector<1x8x8x32xf32>
    %48 = vector.shape_cast %47 : vector<1x8x8x32xf32> to vector<8x8x32xf32>
    %49 = vector.shape_cast %48 : vector<8x8x32xf32> to vector<64x32xf32>
    %50 = arith.truncf %49 : vector<64x32xf32> to vector<64x32xbf16>
    %c6 = arith.constant 6 : index
    %c0_45 = arith.constant 0 : index
    %c0_46 = arith.constant 0 : index
    %51 = vector.load %arg2[%c6, %c0_45, %c0_46] : memref<9x32x32xbf16, #tpu.memory_space<vmem>>, vector<1x32x32xbf16>
    %52 = vector.shape_cast %51 : vector<1x32x32xbf16> to vector<32x32xbf16>
    %cst_47 = arith.constant dense<0.000000e+00> : vector<64x32xf32>
    %53 = tpu.matmul %50, %52, %cst_47 {dimension_numbers = #tpu.dot_dimension_numbers<[1], [0], [0], [1], [0, 0, 1, 1], [], []>} : vector<64x32xbf16>, vector<32x32xbf16>, vector<64x32xf32> -> vector<64x32xf32>
    %54 = arith.addf %46, %53 : vector<64x32xf32>
    %c0_48 = arith.constant 0 : index
    %c2_49 = arith.constant 2 : index
    %c1_50 = arith.constant 1 : index
    %c0_51 = arith.constant 0 : index
    %55 = vector.load %arg1[%c0_48, %c2_49, %c1_50, %c0_51] : memref<1x10x10x32xf32, #tpu.memory_space<vmem>>, vector<1x8x8x32xf32>
    %56 = vector.shape_cast %55 : vector<1x8x8x32xf32> to vector<8x8x32xf32>
    %57 = vector.shape_cast %56 : vector<8x8x32xf32> to vector<64x32xf32>
    %58 = arith.truncf %57 : vector<64x32xf32> to vector<64x32xbf16>
    %c7 = arith.constant 7 : index
    %c0_52 = arith.constant 0 : index
    %c0_53 = arith.constant 0 : index
    %59 = vector.load %arg2[%c7, %c0_52, %c0_53] : memref<9x32x32xbf16, #tpu.memory_space<vmem>>, vector<1x32x32xbf16>
    %60 = vector.shape_cast %59 : vector<1x32x32xbf16> to vector<32x32xbf16>
    %cst_54 = arith.constant dense<0.000000e+00> : vector<64x32xf32>
    %61 = tpu.matmul %58, %60, %cst_54 {dimension_numbers = #tpu.dot_dimension_numbers<[1], [0], [0], [1], [0, 0, 1, 1], [], []>} : vector<64x32xbf16>, vector<32x32xbf16>, vector<64x32xf32> -> vector<64x32xf32>
    %62 = arith.addf %54, %61 : vector<64x32xf32>
    %c0_55 = arith.constant 0 : index
    %c2_56 = arith.constant 2 : index
    %c2_57 = arith.constant 2 : index
    %c0_58 = arith.constant 0 : index
    %63 = vector.load %arg1[%c0_55, %c2_56, %c2_57, %c0_58] : memref<1x10x10x32xf32, #tpu.memory_space<vmem>>, vector<1x8x8x32xf32>
    %64 = vector.shape_cast %63 : vector<1x8x8x32xf32> to vector<8x8x32xf32>
    %65 = vector.shape_cast %64 : vector<8x8x32xf32> to vector<64x32xf32>
    %66 = arith.truncf %65 : vector<64x32xf32> to vector<64x32xbf16>
    %c8 = arith.constant 8 : index
    %c0_59 = arith.constant 0 : index
    %c0_60 = arith.constant 0 : index
    %67 = vector.load %arg2[%c8, %c0_59, %c0_60] : memref<9x32x32xbf16, #tpu.memory_space<vmem>>, vector<1x32x32xbf16>
    %68 = vector.shape_cast %67 : vector<1x32x32xbf16> to vector<32x32xbf16>
    %cst_61 = arith.constant dense<0.000000e+00> : vector<64x32xf32>
    %69 = tpu.matmul %66, %68, %cst_61 {dimension_numbers = #tpu.dot_dimension_numbers<[1], [0], [0], [1], [0, 0, 1, 1], [], []>} : vector<64x32xbf16>, vector<32x32xbf16>, vector<64x32xf32> -> vector<64x32xf32>
    %70 = arith.addf %62, %69 : vector<64x32xf32>
    %c0_62 = arith.constant 0 : index
    %c0_63 = arith.constant 0 : index
    %71 = vector.load %arg3[%c0_62, %c0_63] : memref<8x32xf32, #tpu.memory_space<vmem>>, vector<1x32xf32>
    %c1_64 = arith.constant 1 : index
    %c0_65 = arith.constant 0 : index
    %72 = vector.load %arg3[%c1_64, %c0_65] : memref<8x32xf32, #tpu.memory_space<vmem>>, vector<1x32xf32>
    %c2_66 = arith.constant 2 : index
    %c0_67 = arith.constant 0 : index
    %73 = vector.load %arg3[%c2_66, %c0_67] : memref<8x32xf32, #tpu.memory_space<vmem>>, vector<1x32xf32>
    %74 = vector.broadcast %71 : vector<1x32xf32> to vector<64x32xf32>
    %75 = arith.addf %70, %74 : vector<64x32xf32>
    %cst_68 = arith.constant 0.000000e+00 : f32
    %76 = vector.broadcast %cst_68 : f32 to vector<64x32xf32>
    %77 = arith.maximumf %75, %76 : vector<64x32xf32>
    %78 = vector.broadcast %72 : vector<1x32xf32> to vector<64x32xf32>
    %79 = arith.mulf %77, %78 : vector<64x32xf32>
    %80 = vector.broadcast %73 : vector<1x32xf32> to vector<64x32xf32>
    %81 = arith.addf %79, %80 : vector<64x32xf32>
    %c0_69 = arith.constant 0 : index
    %c0_70 = arith.constant 0 : index
    %82 = vector.load %arg4[%c0_69, %c0_70] : memref<64x32xf32, #tpu.memory_space<vmem>>, vector<64x32xf32>
    tpu.vector_store %arg4[%c0_69, %c0_70], %81 {strides = array<i32>} : memref<64x32xf32, #tpu.memory_space<vmem>>, vector<64x32xf32>,
    return
  }
  func.func @transform_0(%arg0: i32) -> (i32, i32, i32, i32) {
    %c0_i32 = arith.constant 0 : i32
    %c0_i32_0 = arith.constant 0 : i32
    %c0_i32_1 = arith.constant 0 : i32
    %c0_i32_2 = arith.constant 0 : i32
    return %arg0, %c0_i32, %c0_i32_0, %c0_i32_1 : i32, i32, i32, i32
  }
  func.func @transform_1(%arg0: i32) -> (i32, i32, i32) {
    %c0_i32 = arith.constant 0 : i32
    %c0_i32_0 = arith.constant 0 : i32
    %c0_i32_1 = arith.constant 0 : i32
    %c0_i32_2 = arith.constant 0 : i32
    return %c0_i32, %c0_i32_0, %c0_i32_1 : i32, i32, i32
  }
  func.func @transform_2(%arg0: i32) -> (i32, i32) {
    %c0_i32 = arith.constant 0 : i32
    %c0_i32_0 = arith.constant 0 : i32
    %c0_i32_1 = arith.constant 0 : i32
    return %c0_i32, %c0_i32_0 : i32, i32
  }
  func.func @transform_3(%arg0: i32) -> (i32, i32) {
    %c0_i32 = arith.constant 0 : i32
    %c0_i32_0 = arith.constant 0 : i32
    return %arg0, %c0_i32 : i32, i32
  }
}

module attributes {stable_mosaic.version = 11 : i64} {
  func.func @_pool3x3_conv1x1_kernel(%arg0: i32, %arg1: memref<1x10x10x128xf32, #tpu.memory_space<vmem>>, %arg2: memref<128x32xbf16, #tpu.memory_space<vmem>>, %arg3: memref<8x32xf32, #tpu.memory_space<vmem>>, %arg4: memref<64x32xf32, #tpu.memory_space<vmem>>) attributes {dimension_semantics = [#tpu.dimension_semantics<parallel>], iteration_bounds = array<i64: 2>, scalar_prefetch = 0 : i64, scratch_operands = 0 : i64, tpu.core_type = #tpu.core_type<tc>, window_params = [{transform_indices = @transform_0, window_bounds = array<i64: 1, 10, 10, 128>}, {pipeline_mode = #tpu.pipeline_mode<synchronous>, transform_indices = @transform_1, window_bounds = array<i64: 128, 32>}, {pipeline_mode = #tpu.pipeline_mode<synchronous>, transform_indices = @transform_2, window_bounds = array<i64: 8, 32>}, {transform_indices = @transform_3, window_bounds = array<i64: 64, 32>}]} {
    %c0 = arith.constant 0 : index
    %c0_0 = arith.constant 0 : index
    %c0_1 = arith.constant 0 : index
    %c0_2 = arith.constant 0 : index
    %0 = vector.load %arg1[%c0, %c0_0, %c0_1, %c0_2] : memref<1x10x10x128xf32, #tpu.memory_space<vmem>>, vector<1x8x8x128xf32>
    %1 = vector.shape_cast %0 : vector<1x8x8x128xf32> to vector<8x8x128xf32>
    %c0_3 = arith.constant 0 : index
    %c0_4 = arith.constant 0 : index
    %c1 = arith.constant 1 : index
    %c0_5 = arith.constant 0 : index
    %2 = vector.load %arg1[%c0_3, %c0_4, %c1, %c0_5] : memref<1x10x10x128xf32, #tpu.memory_space<vmem>>, vector<1x8x8x128xf32>
    %3 = vector.shape_cast %2 : vector<1x8x8x128xf32> to vector<8x8x128xf32>
    %4 = arith.maximumf %1, %3 : vector<8x8x128xf32>
    %c0_6 = arith.constant 0 : index
    %c0_7 = arith.constant 0 : index
    %c2 = arith.constant 2 : index
    %c0_8 = arith.constant 0 : index
    %5 = vector.load %arg1[%c0_6, %c0_7, %c2, %c0_8] : memref<1x10x10x128xf32, #tpu.memory_space<vmem>>, vector<1x8x8x128xf32>
    %6 = vector.shape_cast %5 : vector<1x8x8x128xf32> to vector<8x8x128xf32>
    %7 = arith.maximumf %4, %6 : vector<8x8x128xf32>
    %c0_9 = arith.constant 0 : index
    %c1_10 = arith.constant 1 : index
    %c0_11 = arith.constant 0 : index
    %c0_12 = arith.constant 0 : index
    %8 = vector.load %arg1[%c0_9, %c1_10, %c0_11, %c0_12] : memref<1x10x10x128xf32, #tpu.memory_space<vmem>>, vector<1x8x8x128xf32>
    %9 = vector.shape_cast %8 : vector<1x8x8x128xf32> to vector<8x8x128xf32>
    %10 = arith.maximumf %7, %9 : vector<8x8x128xf32>
    %c0_13 = arith.constant 0 : index
    %c1_14 = arith.constant 1 : index
    %c1_15 = arith.constant 1 : index
    %c0_16 = arith.constant 0 : index
    %11 = vector.load %arg1[%c0_13, %c1_14, %c1_15, %c0_16] : memref<1x10x10x128xf32, #tpu.memory_space<vmem>>, vector<1x8x8x128xf32>
    %12 = vector.shape_cast %11 : vector<1x8x8x128xf32> to vector<8x8x128xf32>
    %13 = arith.maximumf %10, %12 : vector<8x8x128xf32>
    %c0_17 = arith.constant 0 : index
    %c1_18 = arith.constant 1 : index
    %c2_19 = arith.constant 2 : index
    %c0_20 = arith.constant 0 : index
    %14 = vector.load %arg1[%c0_17, %c1_18, %c2_19, %c0_20] : memref<1x10x10x128xf32, #tpu.memory_space<vmem>>, vector<1x8x8x128xf32>
    %15 = vector.shape_cast %14 : vector<1x8x8x128xf32> to vector<8x8x128xf32>
    %16 = arith.maximumf %13, %15 : vector<8x8x128xf32>
    %c0_21 = arith.constant 0 : index
    %c2_22 = arith.constant 2 : index
    %c0_23 = arith.constant 0 : index
    %c0_24 = arith.constant 0 : index
    %17 = vector.load %arg1[%c0_21, %c2_22, %c0_23, %c0_24] : memref<1x10x10x128xf32, #tpu.memory_space<vmem>>, vector<1x8x8x128xf32>
    %18 = vector.shape_cast %17 : vector<1x8x8x128xf32> to vector<8x8x128xf32>
    %19 = arith.maximumf %16, %18 : vector<8x8x128xf32>
    %c0_25 = arith.constant 0 : index
    %c2_26 = arith.constant 2 : index
    %c1_27 = arith.constant 1 : index
    %c0_28 = arith.constant 0 : index
    %20 = vector.load %arg1[%c0_25, %c2_26, %c1_27, %c0_28] : memref<1x10x10x128xf32, #tpu.memory_space<vmem>>, vector<1x8x8x128xf32>
    %21 = vector.shape_cast %20 : vector<1x8x8x128xf32> to vector<8x8x128xf32>
    %22 = arith.maximumf %19, %21 : vector<8x8x128xf32>
    %c0_29 = arith.constant 0 : index
    %c2_30 = arith.constant 2 : index
    %c2_31 = arith.constant 2 : index
    %c0_32 = arith.constant 0 : index
    %23 = vector.load %arg1[%c0_29, %c2_30, %c2_31, %c0_32] : memref<1x10x10x128xf32, #tpu.memory_space<vmem>>, vector<1x8x8x128xf32>
    %24 = vector.shape_cast %23 : vector<1x8x8x128xf32> to vector<8x8x128xf32>
    %25 = arith.maximumf %22, %24 : vector<8x8x128xf32>
    %26 = vector.shape_cast %25 : vector<8x8x128xf32> to vector<64x128xf32>
    %27 = arith.truncf %26 : vector<64x128xf32> to vector<64x128xbf16>
    %c0_33 = arith.constant 0 : index
    %c0_34 = arith.constant 0 : index
    %28 = vector.load %arg2[%c0_33, %c0_34] : memref<128x32xbf16, #tpu.memory_space<vmem>>, vector<128x32xbf16>
    %cst = arith.constant dense<0.000000e+00> : vector<64x32xf32>
    %29 = tpu.matmul %27, %28, %cst {dimension_numbers = #tpu.dot_dimension_numbers<[1], [0], [0], [1], [0, 0, 1, 1], [], []>} : vector<64x128xbf16>, vector<128x32xbf16>, vector<64x32xf32> -> vector<64x32xf32>
    %c0_35 = arith.constant 0 : index
    %c0_36 = arith.constant 0 : index
    %30 = vector.load %arg3[%c0_35, %c0_36] : memref<8x32xf32, #tpu.memory_space<vmem>>, vector<1x32xf32>
    %c1_37 = arith.constant 1 : index
    %c0_38 = arith.constant 0 : index
    %31 = vector.load %arg3[%c1_37, %c0_38] : memref<8x32xf32, #tpu.memory_space<vmem>>, vector<1x32xf32>
    %c2_39 = arith.constant 2 : index
    %c0_40 = arith.constant 0 : index
    %32 = vector.load %arg3[%c2_39, %c0_40] : memref<8x32xf32, #tpu.memory_space<vmem>>, vector<1x32xf32>
    %33 = vector.broadcast %30 : vector<1x32xf32> to vector<64x32xf32>
    %34 = arith.addf %29, %33 : vector<64x32xf32>
    %cst_41 = arith.constant 0.000000e+00 : f32
    %35 = vector.broadcast %cst_41 : f32 to vector<64x32xf32>
    %36 = arith.maximumf %34, %35 : vector<64x32xf32>
    %37 = vector.broadcast %31 : vector<1x32xf32> to vector<64x32xf32>
    %38 = arith.mulf %36, %37 : vector<64x32xf32>
    %39 = vector.broadcast %32 : vector<1x32xf32> to vector<64x32xf32>
    %40 = arith.addf %38, %39 : vector<64x32xf32>
    %c0_42 = arith.constant 0 : index
    %c0_43 = arith.constant 0 : index
    %41 = vector.load %arg4[%c0_42, %c0_43] : memref<64x32xf32, #tpu.memory_space<vmem>>, vector<64x32xf32>
    tpu.vector_store %arg4[%c0_42, %c0_43], %40 {strides = array<i32>} : memref<64x32xf32, #tpu.memory_space<vmem>>, vector<64x32xf32>,
    return
  }
  func.func @transform_0(%arg0: i32) -> (i32, i32, i32, i32) {
    %c0_i32 = arith.constant 0 : i32
    %c0_i32_0 = arith.constant 0 : i32
    %c0_i32_1 = arith.constant 0 : i32
    %c0_i32_2 = arith.constant 0 : i32
    return %arg0, %c0_i32, %c0_i32_0, %c0_i32_1 : i32, i32, i32, i32
  }
  func.func @transform_1(%arg0: i32) -> (i32, i32) {
    %c0_i32 = arith.constant 0 : i32
    %c0_i32_0 = arith.constant 0 : i32
    %c0_i32_1 = arith.constant 0 : i32
    return %c0_i32, %c0_i32_0 : i32, i32
  }
  func.func @transform_2(%arg0: i32) -> (i32, i32) {
    %c0_i32 = arith.constant 0 : i32
    %c0_i32_0 = arith.constant 0 : i32
    %c0_i32_1 = arith.constant 0 : i32
    return %c0_i32, %c0_i32_0 : i32, i32
  }
  func.func @transform_3(%arg0: i32) -> (i32, i32) {
    %c0_i32 = arith.constant 0 : i32
    %c0_i32_0 = arith.constant 0 : i32
    return %arg0, %c0_i32 : i32, i32
  }
}

module attributes {stable_mosaic.version = 11 : i64} {
  func.func @_conv3x3_kernel(%arg0: i32, %arg1: memref<1x10x10x256xf32, #tpu.memory_space<vmem>>, %arg2: memref<9x256x256xbf16, #tpu.memory_space<vmem>>, %arg3: memref<8x256xf32, #tpu.memory_space<vmem>>, %arg4: memref<64x256xf32, #tpu.memory_space<vmem>>) attributes {dimension_semantics = [#tpu.dimension_semantics<parallel>], iteration_bounds = array<i64: 2>, scalar_prefetch = 0 : i64, scratch_operands = 0 : i64, tpu.core_type = #tpu.core_type<tc>, window_params = [{transform_indices = @transform_0, window_bounds = array<i64: 1, 10, 10, 256>}, {pipeline_mode = #tpu.pipeline_mode<synchronous>, transform_indices = @transform_1, window_bounds = array<i64: 9, 256, 256>}, {pipeline_mode = #tpu.pipeline_mode<synchronous>, transform_indices = @transform_2, window_bounds = array<i64: 8, 256>}, {transform_indices = @transform_3, window_bounds = array<i64: 64, 256>}]} {
    %c0 = arith.constant 0 : index
    %c0_0 = arith.constant 0 : index
    %c0_1 = arith.constant 0 : index
    %c0_2 = arith.constant 0 : index
    %0 = vector.load %arg1[%c0, %c0_0, %c0_1, %c0_2] : memref<1x10x10x256xf32, #tpu.memory_space<vmem>>, vector<1x8x8x256xf32>
    %1 = vector.shape_cast %0 : vector<1x8x8x256xf32> to vector<8x8x256xf32>
    %2 = vector.shape_cast %1 : vector<8x8x256xf32> to vector<64x256xf32>
    %3 = arith.truncf %2 : vector<64x256xf32> to vector<64x256xbf16>
    %c0_3 = arith.constant 0 : index
    %c0_4 = arith.constant 0 : index
    %c0_5 = arith.constant 0 : index
    %4 = vector.load %arg2[%c0_3, %c0_4, %c0_5] : memref<9x256x256xbf16, #tpu.memory_space<vmem>>, vector<1x256x256xbf16>
    %5 = vector.shape_cast %4 : vector<1x256x256xbf16> to vector<256x256xbf16>
    %cst = arith.constant dense<0.000000e+00> : vector<64x256xf32>
    %6 = tpu.matmul %3, %5, %cst {dimension_numbers = #tpu.dot_dimension_numbers<[1], [0], [0], [1], [0, 0, 1, 1], [], []>} : vector<64x256xbf16>, vector<256x256xbf16>, vector<64x256xf32> -> vector<64x256xf32>
    %c0_6 = arith.constant 0 : index
    %c0_7 = arith.constant 0 : index
    %c1 = arith.constant 1 : index
    %c0_8 = arith.constant 0 : index
    %7 = vector.load %arg1[%c0_6, %c0_7, %c1, %c0_8] : memref<1x10x10x256xf32, #tpu.memory_space<vmem>>, vector<1x8x8x256xf32>
    %8 = vector.shape_cast %7 : vector<1x8x8x256xf32> to vector<8x8x256xf32>
    %9 = vector.shape_cast %8 : vector<8x8x256xf32> to vector<64x256xf32>
    %10 = arith.truncf %9 : vector<64x256xf32> to vector<64x256xbf16>
    %c1_9 = arith.constant 1 : index
    %c0_10 = arith.constant 0 : index
    %c0_11 = arith.constant 0 : index
    %11 = vector.load %arg2[%c1_9, %c0_10, %c0_11] : memref<9x256x256xbf16, #tpu.memory_space<vmem>>, vector<1x256x256xbf16>
    %12 = vector.shape_cast %11 : vector<1x256x256xbf16> to vector<256x256xbf16>
    %cst_12 = arith.constant dense<0.000000e+00> : vector<64x256xf32>
    %13 = tpu.matmul %10, %12, %cst_12 {dimension_numbers = #tpu.dot_dimension_numbers<[1], [0], [0], [1], [0, 0, 1, 1], [], []>} : vector<64x256xbf16>, vector<256x256xbf16>, vector<64x256xf32> -> vector<64x256xf32>
    %14 = arith.addf %6, %13 : vector<64x256xf32>
    %c0_13 = arith.constant 0 : index
    %c0_14 = arith.constant 0 : index
    %c2 = arith.constant 2 : index
    %c0_15 = arith.constant 0 : index
    %15 = vector.load %arg1[%c0_13, %c0_14, %c2, %c0_15] : memref<1x10x10x256xf32, #tpu.memory_space<vmem>>, vector<1x8x8x256xf32>
    %16 = vector.shape_cast %15 : vector<1x8x8x256xf32> to vector<8x8x256xf32>
    %17 = vector.shape_cast %16 : vector<8x8x256xf32> to vector<64x256xf32>
    %18 = arith.truncf %17 : vector<64x256xf32> to vector<64x256xbf16>
    %c2_16 = arith.constant 2 : index
    %c0_17 = arith.constant 0 : index
    %c0_18 = arith.constant 0 : index
    %19 = vector.load %arg2[%c2_16, %c0_17, %c0_18] : memref<9x256x256xbf16, #tpu.memory_space<vmem>>, vector<1x256x256xbf16>
    %20 = vector.shape_cast %19 : vector<1x256x256xbf16> to vector<256x256xbf16>
    %cst_19 = arith.constant dense<0.000000e+00> : vector<64x256xf32>
    %21 = tpu.matmul %18, %20, %cst_19 {dimension_numbers = #tpu.dot_dimension_numbers<[1], [0], [0], [1], [0, 0, 1, 1], [], []>} : vector<64x256xbf16>, vector<256x256xbf16>, vector<64x256xf32> -> vector<64x256xf32>
    %22 = arith.addf %14, %21 : vector<64x256xf32>
    %c0_20 = arith.constant 0 : index
    %c1_21 = arith.constant 1 : index
    %c0_22 = arith.constant 0 : index
    %c0_23 = arith.constant 0 : index
    %23 = vector.load %arg1[%c0_20, %c1_21, %c0_22, %c0_23] : memref<1x10x10x256xf32, #tpu.memory_space<vmem>>, vector<1x8x8x256xf32>
    %24 = vector.shape_cast %23 : vector<1x8x8x256xf32> to vector<8x8x256xf32>
    %25 = vector.shape_cast %24 : vector<8x8x256xf32> to vector<64x256xf32>
    %26 = arith.truncf %25 : vector<64x256xf32> to vector<64x256xbf16>
    %c3 = arith.constant 3 : index
    %c0_24 = arith.constant 0 : index
    %c0_25 = arith.constant 0 : index
    %27 = vector.load %arg2[%c3, %c0_24, %c0_25] : memref<9x256x256xbf16, #tpu.memory_space<vmem>>, vector<1x256x256xbf16>
    %28 = vector.shape_cast %27 : vector<1x256x256xbf16> to vector<256x256xbf16>
    %cst_26 = arith.constant dense<0.000000e+00> : vector<64x256xf32>
    %29 = tpu.matmul %26, %28, %cst_26 {dimension_numbers = #tpu.dot_dimension_numbers<[1], [0], [0], [1], [0, 0, 1, 1], [], []>} : vector<64x256xbf16>, vector<256x256xbf16>, vector<64x256xf32> -> vector<64x256xf32>
    %30 = arith.addf %22, %29 : vector<64x256xf32>
    %c0_27 = arith.constant 0 : index
    %c1_28 = arith.constant 1 : index
    %c1_29 = arith.constant 1 : index
    %c0_30 = arith.constant 0 : index
    %31 = vector.load %arg1[%c0_27, %c1_28, %c1_29, %c0_30] : memref<1x10x10x256xf32, #tpu.memory_space<vmem>>, vector<1x8x8x256xf32>
    %32 = vector.shape_cast %31 : vector<1x8x8x256xf32> to vector<8x8x256xf32>
    %33 = vector.shape_cast %32 : vector<8x8x256xf32> to vector<64x256xf32>
    %34 = arith.truncf %33 : vector<64x256xf32> to vector<64x256xbf16>
    %c4 = arith.constant 4 : index
    %c0_31 = arith.constant 0 : index
    %c0_32 = arith.constant 0 : index
    %35 = vector.load %arg2[%c4, %c0_31, %c0_32] : memref<9x256x256xbf16, #tpu.memory_space<vmem>>, vector<1x256x256xbf16>
    %36 = vector.shape_cast %35 : vector<1x256x256xbf16> to vector<256x256xbf16>
    %cst_33 = arith.constant dense<0.000000e+00> : vector<64x256xf32>
    %37 = tpu.matmul %34, %36, %cst_33 {dimension_numbers = #tpu.dot_dimension_numbers<[1], [0], [0], [1], [0, 0, 1, 1], [], []>} : vector<64x256xbf16>, vector<256x256xbf16>, vector<64x256xf32> -> vector<64x256xf32>
    %38 = arith.addf %30, %37 : vector<64x256xf32>
    %c0_34 = arith.constant 0 : index
    %c1_35 = arith.constant 1 : index
    %c2_36 = arith.constant 2 : index
    %c0_37 = arith.constant 0 : index
    %39 = vector.load %arg1[%c0_34, %c1_35, %c2_36, %c0_37] : memref<1x10x10x256xf32, #tpu.memory_space<vmem>>, vector<1x8x8x256xf32>
    %40 = vector.shape_cast %39 : vector<1x8x8x256xf32> to vector<8x8x256xf32>
    %41 = vector.shape_cast %40 : vector<8x8x256xf32> to vector<64x256xf32>
    %42 = arith.truncf %41 : vector<64x256xf32> to vector<64x256xbf16>
    %c5 = arith.constant 5 : index
    %c0_38 = arith.constant 0 : index
    %c0_39 = arith.constant 0 : index
    %43 = vector.load %arg2[%c5, %c0_38, %c0_39] : memref<9x256x256xbf16, #tpu.memory_space<vmem>>, vector<1x256x256xbf16>
    %44 = vector.shape_cast %43 : vector<1x256x256xbf16> to vector<256x256xbf16>
    %cst_40 = arith.constant dense<0.000000e+00> : vector<64x256xf32>
    %45 = tpu.matmul %42, %44, %cst_40 {dimension_numbers = #tpu.dot_dimension_numbers<[1], [0], [0], [1], [0, 0, 1, 1], [], []>} : vector<64x256xbf16>, vector<256x256xbf16>, vector<64x256xf32> -> vector<64x256xf32>
    %46 = arith.addf %38, %45 : vector<64x256xf32>
    %c0_41 = arith.constant 0 : index
    %c2_42 = arith.constant 2 : index
    %c0_43 = arith.constant 0 : index
    %c0_44 = arith.constant 0 : index
    %47 = vector.load %arg1[%c0_41, %c2_42, %c0_43, %c0_44] : memref<1x10x10x256xf32, #tpu.memory_space<vmem>>, vector<1x8x8x256xf32>
    %48 = vector.shape_cast %47 : vector<1x8x8x256xf32> to vector<8x8x256xf32>
    %49 = vector.shape_cast %48 : vector<8x8x256xf32> to vector<64x256xf32>
    %50 = arith.truncf %49 : vector<64x256xf32> to vector<64x256xbf16>
    %c6 = arith.constant 6 : index
    %c0_45 = arith.constant 0 : index
    %c0_46 = arith.constant 0 : index
    %51 = vector.load %arg2[%c6, %c0_45, %c0_46] : memref<9x256x256xbf16, #tpu.memory_space<vmem>>, vector<1x256x256xbf16>
    %52 = vector.shape_cast %51 : vector<1x256x256xbf16> to vector<256x256xbf16>
    %cst_47 = arith.constant dense<0.000000e+00> : vector<64x256xf32>
    %53 = tpu.matmul %50, %52, %cst_47 {dimension_numbers = #tpu.dot_dimension_numbers<[1], [0], [0], [1], [0, 0, 1, 1], [], []>} : vector<64x256xbf16>, vector<256x256xbf16>, vector<64x256xf32> -> vector<64x256xf32>
    %54 = arith.addf %46, %53 : vector<64x256xf32>
    %c0_48 = arith.constant 0 : index
    %c2_49 = arith.constant 2 : index
    %c1_50 = arith.constant 1 : index
    %c0_51 = arith.constant 0 : index
    %55 = vector.load %arg1[%c0_48, %c2_49, %c1_50, %c0_51] : memref<1x10x10x256xf32, #tpu.memory_space<vmem>>, vector<1x8x8x256xf32>
    %56 = vector.shape_cast %55 : vector<1x8x8x256xf32> to vector<8x8x256xf32>
    %57 = vector.shape_cast %56 : vector<8x8x256xf32> to vector<64x256xf32>
    %58 = arith.truncf %57 : vector<64x256xf32> to vector<64x256xbf16>
    %c7 = arith.constant 7 : index
    %c0_52 = arith.constant 0 : index
    %c0_53 = arith.constant 0 : index
    %59 = vector.load %arg2[%c7, %c0_52, %c0_53] : memref<9x256x256xbf16, #tpu.memory_space<vmem>>, vector<1x256x256xbf16>
    %60 = vector.shape_cast %59 : vector<1x256x256xbf16> to vector<256x256xbf16>
    %cst_54 = arith.constant dense<0.000000e+00> : vector<64x256xf32>
    %61 = tpu.matmul %58, %60, %cst_54 {dimension_numbers = #tpu.dot_dimension_numbers<[1], [0], [0], [1], [0, 0, 1, 1], [], []>} : vector<64x256xbf16>, vector<256x256xbf16>, vector<64x256xf32> -> vector<64x256xf32>
    %62 = arith.addf %54, %61 : vector<64x256xf32>
    %c0_55 = arith.constant 0 : index
    %c2_56 = arith.constant 2 : index
    %c2_57 = arith.constant 2 : index
    %c0_58 = arith.constant 0 : index
    %63 = vector.load %arg1[%c0_55, %c2_56, %c2_57, %c0_58] : memref<1x10x10x256xf32, #tpu.memory_space<vmem>>, vector<1x8x8x256xf32>
    %64 = vector.shape_cast %63 : vector<1x8x8x256xf32> to vector<8x8x256xf32>
    %65 = vector.shape_cast %64 : vector<8x8x256xf32> to vector<64x256xf32>
    %66 = arith.truncf %65 : vector<64x256xf32> to vector<64x256xbf16>
    %c8 = arith.constant 8 : index
    %c0_59 = arith.constant 0 : index
    %c0_60 = arith.constant 0 : index
    %67 = vector.load %arg2[%c8, %c0_59, %c0_60] : memref<9x256x256xbf16, #tpu.memory_space<vmem>>, vector<1x256x256xbf16>
    %68 = vector.shape_cast %67 : vector<1x256x256xbf16> to vector<256x256xbf16>
    %cst_61 = arith.constant dense<0.000000e+00> : vector<64x256xf32>
    %69 = tpu.matmul %66, %68, %cst_61 {dimension_numbers = #tpu.dot_dimension_numbers<[1], [0], [0], [1], [0, 0, 1, 1], [], []>} : vector<64x256xbf16>, vector<256x256xbf16>, vector<64x256xf32> -> vector<64x256xf32>
    %70 = arith.addf %62, %69 : vector<64x256xf32>
    %c0_62 = arith.constant 0 : index
    %c0_63 = arith.constant 0 : index
    %71 = vector.load %arg3[%c0_62, %c0_63] : memref<8x256xf32, #tpu.memory_space<vmem>>, vector<1x256xf32>
    %c1_64 = arith.constant 1 : index
    %c0_65 = arith.constant 0 : index
    %72 = vector.load %arg3[%c1_64, %c0_65] : memref<8x256xf32, #tpu.memory_space<vmem>>, vector<1x256xf32>
    %c2_66 = arith.constant 2 : index
    %c0_67 = arith.constant 0 : index
    %73 = vector.load %arg3[%c2_66, %c0_67] : memref<8x256xf32, #tpu.memory_space<vmem>>, vector<1x256xf32>
    %74 = vector.broadcast %71 : vector<1x256xf32> to vector<64x256xf32>
    %75 = arith.addf %70, %74 : vector<64x256xf32>
    %cst_68 = arith.constant 0.000000e+00 : f32
    %76 = vector.broadcast %cst_68 : f32 to vector<64x256xf32>
    %77 = arith.maximumf %75, %76 : vector<64x256xf32>
    %78 = vector.broadcast %72 : vector<1x256xf32> to vector<64x256xf32>
    %79 = arith.mulf %77, %78 : vector<64x256xf32>
    %80 = vector.broadcast %73 : vector<1x256xf32> to vector<64x256xf32>
    %81 = arith.addf %79, %80 : vector<64x256xf32>
    %c0_69 = arith.constant 0 : index
    %c0_70 = arith.constant 0 : index
    %82 = vector.load %arg4[%c0_69, %c0_70] : memref<64x256xf32, #tpu.memory_space<vmem>>, vector<64x256xf32>
    tpu.vector_store %arg4[%c0_69, %c0_70], %81 {strides = array<i32>} : memref<64x256xf32, #tpu.memory_space<vmem>>, vector<64x256xf32>,
    return
  }
  func.func @transform_0(%arg0: i32) -> (i32, i32, i32, i32) {
    %c0_i32 = arith.constant 0 : i32
    %c0_i32_0 = arith.constant 0 : i32
    %c0_i32_1 = arith.constant 0 : i32
    %c0_i32_2 = arith.constant 0 : i32
    return %arg0, %c0_i32, %c0_i32_0, %c0_i32_1 : i32, i32, i32, i32
  }
  func.func @transform_1(%arg0: i32) -> (i32, i32, i32) {
    %c0_i32 = arith.constant 0 : i32
    %c0_i32_0 = arith.constant 0 : i32
    %c0_i32_1 = arith.constant 0 : i32
    %c0_i32_2 = arith.constant 0 : i32
    return %c0_i32, %c0_i32_0, %c0_i32_1 : i32, i32, i32
  }
  func.func @transform_2(%arg0: i32) -> (i32, i32) {
    %c0_i32 = arith.constant 0 : i32
    %c0_i32_0 = arith.constant 0 : i32
    %c0_i32_1 = arith.constant 0 : i32
    return %c0_i32, %c0_i32_0 : i32, i32
  }
  func.func @transform_3(%arg0: i32) -> (i32, i32) {
    %c0_i32 = arith.constant 0 : i32
    %c0_i32_0 = arith.constant 0 : i32
    return %arg0, %c0_i32 : i32, i32
  }
}

</mosaic_0001>

<bundles_post_ra>
// kernel: feature_conv_layer_single.6
= control target key start
LH: loop header
LB: loop body
LE: loop exit
PB: predicated region body
PF: predicated region fallthrough
CT: control target
= control target key end

     0   :  { %13 = vsyncpa [#allocation3], 0  ;;  %s1042_s24 = smov 0   ;;  %s1327_s0 = inlined_call_operand.vmem [shape: f32[2,8,8,128], index: 0, kind: input, shape index: {}]   ;;  %s1328_s1 = inlined_call_operand.vmem [shape: f32[2,8,8,128], index: 1, kind: input, shape index: {}]   ;;  %s1329_s2 = inlined_call_operand.vmem [shape: f32[2,8,8,128], index: 2, kind: input, shape index: {}]   ;;  %s1330_s3 = inlined_call_operand.vmem [shape: f32[2,8,8,128], index: 3, kind: input, shape index: {}]   ;;  %s1331_s4 = inlined_call_operand.vmem [shape: bf16[128,176], index: 4, kind: input, shape index: {}]   ;;  %s1332_s5 = inlined_call_operand.hbm [shape: f32[8,176], index: 5, kind: input, shape index: {}]   ;;  %s1333_s6 = inlined_call_operand.vmem [shape: f32[128,176], index: 6, kind: output, shape index: {0}]   ;;  %s1334_s7 = inlined_call_operand.vmem [shape: f32[2,8,8,128], index: 7, kind: output, shape index: {1}]  }
   0x1 LB: > { %s1048_s25 = sadd.s32 4294967295, %s999_s24   ;;  %p818_p0 = scmp.ge.s32.totalorder %s999_s24, 1  ;;  %s999_s24 = sphi %s1042_s24, %s19_s24  }
   0x2   : > { %p222_p1 = scmp.lt.s32.totalorder %s999_s24, 3  ;;  %s237_s28 = sshll.u32 %s1332_s5, 4  ;;  %s238_s28 = int_to_ptr.hbm [resolvable:$true] %s237_s28 }
   0x3   : > { %p948_p3 = scmp.eq.s32.totalorder %s1048_s25, 0  ;;  %s1001_s29 = smov [#allocation2]  }
   0x4   : > { %p223_p2 = pnand %p818_p0, %p222_p1  ;;  %s239_s30 = sshll.u32 %s1001_s29, 4  ;;  %s240_s30 = int_to_ptr.vmem [resolvable:$true] %s239_s30 }
   0x6   : > { %p944_p4 = pneg %p223_p2  ;;  %284 = sbr.rel (%p223_p2) target bundleno = 213 (0xd5), region = 44 }
   0x8   : > { %p945_p5 = pnand %p948_p3, %p944_p4 }
   0xa   : > { %947 = dma.hbm_to_vmem [thread:$0]  (!%p945_p5), %s238_s28, 256, %s240_s30, [#allocation3]  }
   0xb   : > { %994 = dma.done.wait (%p948_p3), [#allocation3], 256  }
   0xc   : > { %996 = vsyncadd (%p948_p3), [#allocation3], 4294967040  ;;  %p338_p6 = scmp.lt.s32.totalorder %s1048_s25, 1  ;;  %v894_v0 = vld [vmem:[%s1331_s4 + $0x70] sm:$0xf]  ;;  %vm661_vm0 = vcmask 392192  }
   0xd   : > { %v923_v1 = vld [vmem:[%s1331_s4 + $0x74] sm:$0xf0]  ;;  %v922_v2 = vld [vmem:[%s1331_s4 + $0x74] sm:$0xf]  ;;  %v896_v4 = vld [vmem:[%s1331_s4 + $0x78] sm:$0xf0] }
   0xe   : > { %s339_s8 = scalar_select %p338_p6, %s1048_s25, 1  ;;  %v895_v3 = vor.u32 %v923_v1, %v894_v0  ;;  %v886_v5 = vld [vmem:[%s1331_s4 + $0x60] sm:$0xf]  ;;  %v921_v6 = vld [vmem:[%s1331_s4 + $0x64] sm:$0xf0]  ;;  %v899_v7 = vor.u32 %v922_v2, %v896_v4 }
   0xf   : > { %v920_v8 = vld [vmem:[%s1331_s4 + $0x64] sm:$0xf]  ;;  %v888_v9 = vld [vmem:[%s1331_s4 + $0x68] sm:$0xf0]  ;;  %v887_v10 = vor.u32 %v921_v6, %v886_v5  ;;  %v878_v12 = vld [vmem:[%s1331_s4 + $0x50] sm:$0xf] }
  0x10   : > { %544 = vmatpush.bf16.msra.mxu0 %v895_v3  ;;  %924 = vmatpush.bf16.msra.mxu2 %v895_v3  ;;  %v891_v11 = vor.u32 %v920_v8, %v888_v9  ;;  %v919_v13 = vld [vmem:[%s1331_s4 + $0x54] sm:$0xf0]  ;;  %s1088_s9 = sshll.u32 %s339_s8, 6  ;;  %v918_v14 = vld [vmem:[%s1331_s4 + $0x54] sm:$0xf] }
  0x11   : > { %573 = vmatpush.bf16.msra.mxu1 %v899_v7  ;;  %932 = vmatpush.bf16.msra.mxu3 %v899_v7  ;;  %v880_v15 = vld [vmem:[%s1331_s4 + $0x58] sm:$0xf0]  ;;  %v879_v16 = vor.u32 %v919_v13, %v878_v12  ;;  %s1100_s8 = scalar_lea.vmem %s1327_s0, %s1088_s9  ;;  %v870_v18 = vld [vmem:[%s1331_s4 + $0x40] sm:$0xf]  ;;  %v917_v19 = vld [vmem:[%s1331_s4 + $0x44] sm:$0xf0]  ;;  %s1115_s26 = scalar_lea.vmem %s1328_s1, %s1088_s9 }
  0x12   : > { %v883_v17 = vor.u32 %v918_v14, %v880_v15  ;;  %v916_v20 = vld [vmem:[%s1331_s4 + $0x44] sm:$0xf]  ;;  %v872_v21 = vld [vmem:[%s1331_s4 + $0x48] sm:$0xf0]  ;;  %v862_v22 = vld [vmem:[%s1331_s4 + $0x30] sm:$0xf]  ;;  %s1130_s14 = scalar_lea.vmem %s1329_s2, %s1088_s9  ;;  %s1136_s17 = scalar_lea.vmem %s1330_s3, %s1088_s9  ;;  %v871_v27 = vor.u32 %v917_v19, %v870_v18 }
  0x13   : > { %v915_v23 = vld [vmem:[%s1331_s4 + $0x34] sm:$0xf0]  ;;  %v914_v24 = vld [vmem:[%s1331_s4 + $0x34] sm:$0xf]  ;;  %v864_v25 = vld [vmem:[%s1331_s4 + $0x38] sm:$0xf0]  ;;  %v875_v31 = vor.u32 %v916_v20, %v872_v21  ;;  %s1164_s10 = scalar_lea.vmem %s1334_s7, %s1088_s9 }
  0x14   : > { %545 = vmatpush.bf16.msra.mxu0 %v887_v10  ;;  %925 = vmatpush.bf16.msra.mxu2 %v887_v10  ;;  %v370_v26 = vld [vmem:[%s1100_s8] sm:$0xff]  ;;  %v371_v28 = vld [vmem:[%s1100_s8 + $0x8] sm:$0xff]  ;;  %v863_v43 = vor.u32 %v915_v23, %v862_v22  ;;  %v867_v44 = vor.u32 %v914_v24, %v864_v25  ;;  %v372_v60 = vld [vmem:[%s1100_s8 + $0x10] sm:$0xff] }
  0x15   : > { %574 = vmatpush.bf16.msra.mxu1 %v891_v11  ;;  %933 = vmatpush.bf16.msra.mxu3 %v891_v11  ;;  %v378_v29 = vld [vmem:[%s1115_s26] sm:$0xff]  ;;  %v379_v30 = vld [vmem:[%s1115_s26 + $0x8] sm:$0xff]  ;;  %v373_v61 = vld [vmem:[%s1100_s8 + $0x18] sm:$0xff] }
  0x16   : > { %v386_v32 = vmax.f32 %v370_v26, %v378_v29  ;;  %v387_v33 = vmax.f32 %v371_v28, %v379_v30  ;;  %v394_v34 = vld [vmem:[%s1130_s14] sm:$0xff]  ;;  %v395_v35 = vld [vmem:[%s1130_s14 + $0x8] sm:$0xff]  ;;  %v380_v62 = vld [vmem:[%s1115_s26 + $0x10] sm:$0xff] }
  0x17   : > { %v402_v36 = vld [vmem:[%s1136_s17] sm:$0xff]  ;;  %v913_v38 = vld [vmem:[%s1331_s4 + $0x24] sm:$0xf0]  ;;  %v856_v50 = vld [vmem:[%s1331_s4 + $0x28] sm:$0xf0]  ;;  %v388_v0 = vmax.f32 %v372_v60, %v380_v62 }
  0x18   : > { %546 = vmatpush.bf16.msra.mxu0 %v879_v16  ;;  %926 = vmatpush.bf16.msra.mxu2 %v879_v16  ;;  %v854_v37 = vld [vmem:[%s1331_s4 + $0x20] sm:$0xf]  ;;  %v403_v39 = vld [vmem:[%s1136_s17 + $0x8] sm:$0xff]  ;;  %v410_v40 = vmax.f32 %v394_v34, %v402_v36  ;;  %v912_v49 = vld [vmem:[%s1331_s4 + $0x24] sm:$0xf] }
  0x19   : > { %575 = vmatpush.bf16.msra.mxu1 %v883_v17  ;;  %934 = vmatpush.bf16.msra.mxu3 %v883_v17  ;;  %v374_v41 = vld [vmem:[%s1100_s8 + $0x20] sm:$0xff]  ;;  %v375_v42 = vld [vmem:[%s1100_s8 + $0x28] sm:$0xff]  ;;  %v411_v45 = vmax.f32 %v395_v35, %v403_v39  ;;  %v381_v63 = vld [vmem:[%s1115_s26 + $0x18] sm:$0xff]  ;;  %v855_v3 = vor.u32 %v913_v38, %v854_v37  ;;  %v859_v17 = vor.u32 %v912_v49, %v856_v50 }
  0x1a   : > { %v382_v46 = vld [vmem:[%s1115_s26 + $0x20] sm:$0xff]  ;;  %v383_v47 = vld [vmem:[%s1115_s26 + $0x28] sm:$0xff]  ;;  %v1175_v51 = vmax.f32 %v386_v32, %v410_v40  ;;  %v396_v1 = vld [vmem:[%s1130_s14 + $0x10] sm:$0xff]  ;;  %v389_v7 = vmax.f32 %v373_v61, %v381_v63 }
  0x1b   : > { %v398_v48 = vld [vmem:[%s1130_s14 + $0x20] sm:$0xff]  ;;  %v390_v52 = vmax.f32 %v374_v41, %v382_v46  ;;  %v391_v53 = vmax.f32 %v375_v42, %v383_v47  ;;  %v399_v54 = vld [vmem:[%s1130_s14 + $0x28] sm:$0xff]  ;;  %v1180_v57 = vmax.f32 %v387_v33, %v411_v45  ;;  %v397_v2 = vld [vmem:[%s1130_s14 + $0x18] sm:$0xff] }
  0x1c   : > { %547 = vmatpush.bf16.msra.mxu0 %v871_v27  ;;  %927 = vmatpush.bf16.msra.mxu2 %v871_v27  ;;  %v406_v55 = vld [vmem:[%s1136_s17 + $0x20] sm:$0xff]  ;;  %v407_v56 = vld [vmem:[%s1136_s17 + $0x28] sm:$0xff]  ;;  %426 = vst [vmem:[%s1164_s10] sm:$0xff] %v1175_v51  ;;  %v846_v4 = vld [vmem:[%s1331_s4 + $0x10] sm:$0xf] }
  0x1d   : > { %576 = vmatpush.bf16.msra.mxu1 %v875_v31  ;;  %935 = vmatpush.bf16.msra.mxu3 %v875_v31  ;;  %v414_v58 = vmax.f32 %v398_v48, %v406_v55  ;;  %v415_v59 = vmax.f32 %v399_v54, %v407_v56  ;;  %v911_v5 = vld [vmem:[%s1331_s4 + $0x14] sm:$0xf0]  ;;  %427 = vst [vmem:[%s1164_s10 + $0x8] sm:$0xff] %v1180_v57  ;;  %v404_v8 = vld [vmem:[%s1136_s17 + $0x10] sm:$0xff]  ;;  %v848_v24 = vld [vmem:[%s1331_s4 + $0x18] sm:$0xf0] }
  0x1e   : > { %v405_v9 = vld [vmem:[%s1136_s17 + $0x18] sm:$0xff]  ;;  %v376_v10 = vld [vmem:[%s1100_s8 + $0x30] sm:$0xff]  ;;  %v412_v12 = vmax.f32 %v396_v1, %v404_v8  ;;  %v847_v30 = vor.u32 %v911_v5, %v846_v4  ;;  %v838_v33 = vld [vmem:[%s1331_s4] sm:$0xf]  ;;  %v434_v40 = vpack.c.bf16 %v1180_v57, %v1175_v51 }
  0x1f   : > { %v422_v6 = vmax.f32 %v390_v52, %v414_v58  ;;  %v423_v11 = vmax.f32 %v391_v53, %v415_v59  ;;  %v413_v13 = vmax.f32 %v397_v2, %v405_v9  ;;  %v377_v14 = vld [vmem:[%s1100_s8 + $0x38] sm:$0xff]  ;;  %v384_v15 = vld [vmem:[%s1115_s26 + $0x30] sm:$0xff]  ;;  %v909_v34 = vld [vmem:[%s1331_s4 + $0x4] sm:$0xf0] }
  0x20   : > { %548 = vmatpush.bf16.msra.mxu0 %v863_v43  ;;  %928 = vmatpush.bf16.msra.mxu2 %v863_v43  ;;  %v385_v16 = vld [vmem:[%s1115_s26 + $0x38] sm:$0xff]  ;;  %v392_v18 = vmax.f32 %v376_v10, %v384_v15  ;;  %v400_v20 = vld [vmem:[%s1130_s14 + $0x30] sm:$0xff]  ;;  %v420_v25 = vmax.f32 %v388_v0, %v412_v12  ;;  %v908_v36 = vld [vmem:[%s1331_s4 + $0x4] sm:$0xf]  ;;  %v839_v38 = vor.u32 %v909_v34, %v838_v33 }
  0x21   : > { %577 = vmatpush.bf16.msra.mxu1 %v867_v44  ;;  %936 = vmatpush.bf16.msra.mxu3 %v867_v44  ;;  %430 = vst [vmem:[%s1164_s10 + $0x20] sm:$0xff] %v422_v6  ;;  %v393_v19 = vmax.f32 %v377_v14, %v385_v16  ;;  %v401_v21 = vld [vmem:[%s1130_s14 + $0x38] sm:$0xff]  ;;  %v408_v22 = vld [vmem:[%s1136_s17 + $0x30] sm:$0xff]  ;;  %v421_v28 = vmax.f32 %v389_v7, %v413_v13  ;;  %v840_v37 = vld [vmem:[%s1331_s4 + $0x8] sm:$0xf0] }
  0x22   : > { %v910_v23 = vld [vmem:[%s1331_s4 + $0x14] sm:$0xf]  ;;  %431 = vst [vmem:[%s1164_s10 + $0x28] sm:$0xff] %v423_v11  ;;  %v409_v26 = vld [vmem:[%s1136_s17 + $0x38] sm:$0xff]  ;;  %v416_v27 = vmax.f32 %v400_v20, %v408_v22  ;;  %v843_v39 = vor.u32 %v908_v36, %v840_v37  ;;  %v436_v41 = vpack.c.bf16 %v423_v11, %v422_v6 }
  0x23   : > { %v417_v29 = vmax.f32 %v401_v21, %v409_v26  ;;  %428 = vst [vmem:[%s1164_s10 + $0x10] sm:$0xff] %v420_v25  ;;  %v851_v32 = vor.u32 %v910_v23, %v848_v24  ;;  %v435_v42 = vpack.c.bf16 %v421_v28, %v420_v25  ;;  %v454_v44 = vld [vmem:[#allocation2] ss:$8 sm:$0x3] }
  0x24   : > { %549 = vmatpush.bf16.msra.mxu0 %v855_v3  ;;  %929 = vmatpush.bf16.msra.mxu2 %v855_v3  ;;  %v424_v31 = vmax.f32 %v392_v18, %v416_v27  ;;  %429 = vst [vmem:[%s1164_s10 + $0x18] sm:$0xff] %v421_v28  ;;  %v1235_v45 = vperm.slane %v454_v44, 0  ;;  %v456_v46 = vld [vmem:[#allocation2 + $0x1] ss:$8 sm:$0x3]  ;;  %v1237_v47 = vperm.slane %v454_v44, 1 }
  0x25   : > { %578 = vmatpush.bf16.msra.mxu1 %v859_v17  ;;  %937 = vmatpush.bf16.msra.mxu3 %v859_v17  ;;  %v425_v35 = vmax.f32 %v393_v19, %v417_v29  ;;  %v458_v48 = vld [vmem:[#allocation2 + $0x2] ss:$8 sm:$0x3]  ;;  %v1240_v51 = vperm.slane %v456_v46, 0  ;;  %v1243_v54 = vperm.slane %v456_v46, 1 }
  0x26   : > { %432 = vst [vmem:[%s1164_s10 + $0x30] sm:$0xff] %v424_v31  ;;  %v1245_v56 = vperm.slane %v458_v48, 0  ;;  %v1247_v58 = vperm.slane %v458_v48, 1 }
  0x27   : > { %433 = vst [vmem:[%s1164_s10 + $0x38] sm:$0xff] %v425_v35  ;;  %v437_v43 = vpack.c.bf16 %v425_v35, %v424_v31  ;;  %s831_s10 = sshll.u32 %s1048_s25, 3 }
  0x28   : > { %550 = vmatpush.bf16.msra.mxu0 %v847_v30  ;;  %930 = vmatpush.bf16.msra.mxu2 %v847_v30  ;;  %p359_p7 = scmp.lt.s32.totalorder %s831_s10, 15 }
  0x29   : > { %579 = vmatpush.bf16.msra.mxu1 %v851_v32  ;;  %938 = vmatpush.bf16.msra.mxu3 %v851_v32 }
  0x2a   : > { %s1336_s10 = smov (!%p359_p7, %s831_s10), 15 }
  0x2b   : > { %s906_s25 = sshll.u32 %s1336_s10, 4 }
  0x2c   : > { %551 = vmatpush.bf16.msra.mxu0 %v839_v38  ;;  %931 = vmatpush.bf16.msra.mxu2 %v839_v38  ;;  %s1253_s13 = scalar_lea.vmem %s1333_s6, %s906_s25 }
  0x2d   : > { %580 = vmatpush.bf16.msra.mxu1 %v843_v39  ;;  %939 = vmatpush.bf16.msra.mxu3 %v843_v39 }
  0x2f   : > { %552 = vmatmul.bf16.vlgmr.msra.gmra.mxu0 %v434_v40  ;;  %562 = vmatmul.bf16.vlgmr.msra.gmra.mxu2 %v436_v41 }
  0x30   : > { %581 = vmatmul.bf16.vlgmr.msra.gmra.mxu1 %v434_v40  ;;  %591 = vmatmul.bf16.vlgmr.msra.gmra.mxu3 %v436_v41 }
  0x3f   : > { %557 = vmatmul.bf16.gmra.mxu0 %v435_v42  ;;  %567 = vmatmul.bf16.gmra.mxu2 %v437_v43 }
  0x40   : > { %586 = vmatmul.bf16.gmra.mxu1 %v435_v42  ;;  %596 = vmatmul.bf16.gmra.mxu3 %v437_v43 }
  0xac   : > { %v553_v49 = vpop.f32.mrf.mxu0 }
  0xad   : > { %v554_v50 = vadd.f32 %v553_v49, %v1235_v45  ;;  %v582_v52 = vpop.f32.mrf.mxu1 }
  0xae   : > { %v583_v53 = vadd.f32 %v582_v52, %v1237_v47 }
  0xaf   : > { %v602_v55 = vmax.f32 %v554_v50, 0.0 }
  0xb0   : > { %v603_v57 = vmax.f32 %v583_v53, 0.0 }
  0xb1   : > { %v623_v59 = vmul.f32 %v1240_v51, %v602_v55 }
  0xb2   : > { %v624_v60 = vmul.f32 %v1243_v54, %v603_v57  ;;  %v563_v61 = vpop.f32.mrf.mxu2 }
  0xb3   : > { %v644_v62 = vadd.f32 %v1245_v56, %v623_v59  ;;  %v564_v63 = vadd.f32 %v563_v61, %v1235_v45  ;;  %v592_v0 = vpop.f32.mrf.mxu3 }
  0xb4   : > { %v645_v1 = vadd.f32 %v1247_v58, %v624_v60  ;;  %v593_v2 = vadd.f32 %v592_v0, %v1237_v47  ;;  %v555_v3 = vpop.f32.mrf.mxu0 }
  0xb5   : > { %660 = vst [vmem:[%s1253_s13] sm:$0xff] %v644_v62  ;;  %v610_v4 = vmax.f32 %v564_v63, 0.0  ;;  %v556_v5 = vadd.f32 %v555_v3, %v1235_v45  ;;  %v584_v6 = vpop.f32.mrf.mxu1 }
  0xb6   : > { %662 = vst.msk [vmem:[%s1253_s13 + $0x8] sm:$0xff] %vm661_vm0, %v645_v1  ;;  %v611_v7 = vmax.f32 %v593_v2, 0.0  ;;  %v585_v8 = vadd.f32 %v584_v6, %v1237_v47 }
  0xb7   : > { %v631_v9 = vmul.f32 %v1240_v51, %v610_v4  ;;  %v604_v10 = vmax.f32 %v556_v5, 0.0 }
  0xb8   : > { %v632_v11 = vmul.f32 %v1243_v54, %v611_v7  ;;  %v605_v12 = vmax.f32 %v585_v8, 0.0 }
  0xb9   : > { %v652_v13 = vadd.f32 %v1245_v56, %v631_v9  ;;  %v625_v14 = vmul.f32 %v1240_v51, %v604_v10 }
  0xba   : > { %v653_v15 = vadd.f32 %v1247_v58, %v632_v11  ;;  %v626_v16 = vmul.f32 %v1243_v54, %v605_v12  ;;  %v565_v17 = vpop.f32.mrf.mxu2 }
  0xbb   : > { %669 = vst [vmem:[%s1253_s13 + $0x40] sm:$0xff] %v652_v13  ;;  %v646_v18 = vadd.f32 %v1245_v56, %v625_v14  ;;  %v566_v19 = vadd.f32 %v565_v17, %v1235_v45  ;;  %v594_v20 = vpop.f32.mrf.mxu3 }
  0xbc   : > { %670 = vst.msk [vmem:[%s1253_s13 + $0x48] sm:$0xff] %vm661_vm0, %v653_v15  ;;  %v647_v21 = vadd.f32 %v1247_v58, %v626_v16  ;;  %v595_v22 = vadd.f32 %v594_v20, %v1237_v47  ;;  %v558_v23 = vpop.f32.mrf.mxu0 }
  0xbd   : > { %663 = vst [vmem:[%s1253_s13 + $0x10] sm:$0xff] %v646_v18  ;;  %v612_v24 = vmax.f32 %v566_v19, 0.0  ;;  %v559_v25 = vadd.f32 %v558_v23, %v1235_v45  ;;  %v587_v26 = vpop.f32.mrf.mxu1 }
  0xbe   : > { %664 = vst.msk [vmem:[%s1253_s13 + $0x18] sm:$0xff] %vm661_vm0, %v647_v21  ;;  %v613_v27 = vmax.f32 %v595_v22, 0.0  ;;  %v588_v28 = vadd.f32 %v587_v26, %v1237_v47 }
  0xbf   : > { %v633_v29 = vmul.f32 %v1240_v51, %v612_v24  ;;  %v606_v30 = vmax.f32 %v559_v25, 0.0 }
  0xc0   : > { %v634_v31 = vmul.f32 %v1243_v54, %v613_v27  ;;  %v607_v32 = vmax.f32 %v588_v28, 0.0 }
  0xc1   : > { %v654_v33 = vadd.f32 %v1245_v56, %v633_v29  ;;  %v627_v34 = vmul.f32 %v1240_v51, %v606_v30 }
  0xc2   : > { %v655_v35 = vadd.f32 %v1247_v58, %v634_v31  ;;  %v628_v36 = vmul.f32 %v1243_v54, %v607_v32  ;;  %v568_v37 = vpop.f32.mrf.mxu2 }
  0xc3   : > { %671 = vst [vmem:[%s1253_s13 + $0x50] sm:$0xff] %v654_v33  ;;  %v648_v38 = vadd.f32 %v1245_v56, %v627_v34  ;;  %v569_v39 = vadd.f32 %v568_v37, %v1235_v45  ;;  %v597_v40 = vpop.f32.mrf.mxu3 }
  0xc4   : > { %672 = vst.msk [vmem:[%s1253_s13 + $0x58] sm:$0xff] %vm661_vm0, %v655_v35  ;;  %v649_v41 = vadd.f32 %v1247_v58, %v628_v36  ;;  %v598_v42 = vadd.f32 %v597_v40, %v1237_v47  ;;  %v560_v43 = vpop.f32.mrf.mxu0 }
  0xc5   : > { %665 = vst [vmem:[%s1253_s13 + $0x20] sm:$0xff] %v648_v38  ;;  %v614_v44 = vmax.f32 %v569_v39, 0.0  ;;  %v561_v46 = vadd.f32 %v560_v43, %v1235_v45  ;;  %v589_v48 = vpop.f32.mrf.mxu1 }
  0xc6   : > { %666 = vst.msk [vmem:[%s1253_s13 + $0x28] sm:$0xff] %vm661_vm0, %v649_v41  ;;  %v615_v49 = vmax.f32 %v598_v42, 0.0  ;;  %v590_v50 = vadd.f32 %v589_v48, %v1237_v47 }
  0xc7   : > { %v635_v52 = vmul.f32 %v1240_v51, %v614_v44  ;;  %v608_v53 = vmax.f32 %v561_v46, 0.0 }
  0xc8   : > { %v636_v55 = vmul.f32 %v1243_v54, %v615_v49  ;;  %v609_v57 = vmax.f32 %v590_v50, 0.0 }
  0xc9   : > { %v656_v59 = vadd.f32 %v1245_v56, %v635_v52  ;;  %v629_v60 = vmul.f32 %v1240_v51, %v608_v53 }
  0xca   : > { %v657_v61 = vadd.f32 %v1247_v58, %v636_v55  ;;  %v630_v62 = vmul.f32 %v1243_v54, %v609_v57  ;;  %v570_v63 = vpop.f32.mrf.mxu2 }
  0xcb   : > { %673 = vst [vmem:[%s1253_s13 + $0x60] sm:$0xff] %v656_v59  ;;  %v650_v0 = vadd.f32 %v1245_v56, %v629_v60  ;;  %v571_v1 = vadd.f32 %v570_v63, %v1235_v45  ;;  %v599_v2 = vpop.f32.mrf.mxu3 }
  0xcc   : > { %674 = vst.msk [vmem:[%s1253_s13 + $0x68] sm:$0xff] %vm661_vm0, %v657_v61  ;;  %v651_v3 = vadd.f32 %v1247_v58, %v630_v62  ;;  %v600_v4 = vadd.f32 %v599_v2, %v1237_v47 }
  0xcd   : > { %667 = vst [vmem:[%s1253_s13 + $0x30] sm:$0xff] %v650_v0  ;;  %v616_v5 = vmax.f32 %v571_v1, 0.0 }
  0xce   : > { %668 = vst.msk [vmem:[%s1253_s13 + $0x38] sm:$0xff] %vm661_vm0, %v651_v3  ;;  %v617_v6 = vmax.f32 %v600_v4, 0.0 }
  0xcf   : > { %v637_v7 = vmul.f32 %v1240_v51, %v616_v5 }
  0xd0   : > { %v638_v8 = vmul.f32 %v1243_v54, %v617_v6 }
  0xd1   : > { %v658_v9 = vadd.f32 %v1245_v56, %v637_v7 }
  0xd2   : > { %v659_v45 = vadd.f32 %v1247_v58, %v638_v8 }
  0xd3   : > { %675 = vst [vmem:[%s1253_s13 + $0x70] sm:$0xff] %v658_v9 }
  0xd4   : > { %676 = vst.msk [vmem:[%s1253_s13 + $0x78] sm:$0xff] %vm661_vm0, %v659_v45 }
  0xd5 PF: > { %s19_s24 = sadd.s32 1, %s999_s24  }
  0xd6   : > { %p16_p8 = scmp.ge.s32.totalorder %s19_s24, 4  }
  0xd8   :  { %18 = sbr.rel (!%p16_p8) target bundleno = 1 (0x1), region = 102 }
  0xdd   :  { %717 = vsyncpa [#allocation3], 1 }
  0xde   :  { %719 = vsyncpa [#allocation3 + $0x1], 1 }

// kernel: feature_conv_layer_single.7
= control target key start
LH: loop header
LB: loop body
LE: loop exit
PB: predicated region body
PF: predicated region fallthrough
CT: control target
= control target key end

     0   :  { %s1763_s12 = smov 0   ;;  %s2195_s0 = inlined_call_operand.vmem [shape: f32[2,10,10,96], index: 0, kind: input, shape index: {}]   ;;  %s2196_s1 = inlined_call_operand.vmem [shape: bf16[9,96,128], index: 1, kind: input, shape index: {}]   ;;  %s2197_s2 = inlined_call_operand.vmem [shape: f32[8,128], index: 2, kind: input, shape index: {}]   ;;  %s2198_s3 = inlined_call_operand.vmem [shape: f32[128,128], index: 3, kind: output, shape index: {}]  }
   0x1 LB: > { %s1769_s13 = sadd.s32 4294967295, %s1741_s12   ;;  %p1255_p0 = scmp.ge.s32.totalorder %s1741_s12, 1  ;;  %s1741_s12 = sphi %s1763_s12, %s13_s12  }
   0x2   : > { %p137_p1 = scmp.lt.s32.totalorder %s1741_s12, 3 }
   0x4   : > { %p138_p2 = pnand %p1255_p0, %p137_p1 }
   0x5   : > { %p161_p3 = scmp.lt.s32.totalorder (!%p138_p2), %s1769_s13, 1 }
   0x6   : > { %141 = sbr.rel (%p138_p2) target bundleno = 330 (0x14a), region = 32 }
   0xb   : > { %v1668_v0 = vld [vmem:[%s2196_s1 + $0x58] sm:$0xff]  ;;  %v1674_v1 = vld [vmem:[%s2196_s1 + $0x88] sm:$0xff]  ;;  %v1667_v2 = vld [vmem:[%s2196_s1 + $0x50] sm:$0xff]  ;;  %s162_s28 = scalar_select %p161_p3, %s1769_s13, 1  ;;  %vm258_vm0 = vcmask 785408  }
   0xc   : > { %1711 = vmatpush.bf16.msra.mxu1 %v1668_v0  ;;  %273 = vmatpush.bf16.msra.mxu0 %v1668_v0  ;;  %v1673_v3 = vld [vmem:[%s2196_s1 + $0x80] sm:$0xff]  ;;  %v1680_v4 = vld [vmem:[%s2196_s1 + $0xb8] sm:$0xff]  ;;  %v1679_v5 = vld [vmem:[%s2196_s1 + $0xb0] sm:$0xff] }
   0xd   : > { %452 = vmatpush.bf16.msra.mxu2 %v1674_v1  ;;  %563 = vmatpush.bf16.msra.mxu3 %v1680_v4  ;;  %v1666_v6 = vld [vmem:[%s2196_s1 + $0x48] sm:$0xff]  ;;  %v1672_v7 = vld [vmem:[%s2196_s1 + $0x78] sm:$0xff]  ;;  %v1665_v9 = vld [vmem:[%s2196_s1 + $0x40] sm:$0xff]  ;;  %s1723_s8 = smul.u32 160, %s162_s28 }
   0xe   : > { %v1678_v8 = vld [vmem:[%s2196_s1 + $0xa8] sm:$0xff]  ;;  %v1671_v10 = vld [vmem:[%s2196_s1 + $0x70] sm:$0xff]  ;;  %v1677_v11 = vld [vmem:[%s2196_s1 + $0xa0] sm:$0xff] }
   0xf   : > { %v1664_v12 = vld [vmem:[%s2196_s1 + $0x38] sm:$0xff]  ;;  %s1817_s19 = scalar_lea.vmem %s2195_s0, %s1723_s8  ;;  %v1670_v13 = vld [vmem:[%s2196_s1 + $0x68] sm:$0xff]  ;;  %v1663_v14 = vld [vmem:[%s2196_s1 + $0x30] sm:$0xff] }
  0x10   : > { %1712 = vmatpush.bf16.msra.mxu1 %v1667_v2  ;;  %274 = vmatpush.bf16.msra.mxu0 %v1667_v2  ;;  %v1826_v15 = vld [vmem:[%s1817_s19 + $0x41] sm:$0xff]  ;;  %v1676_v17 = vld [vmem:[%s2196_s1 + $0x98] sm:$0xff]  ;;  %v1675_v29 = vld [vmem:[%s2196_s1 + $0x90] sm:$0xff] }
  0x11   : > { %453 = vmatpush.bf16.msra.mxu2 %v1673_v3  ;;  %564 = vmatpush.bf16.msra.mxu3 %v1679_v5  ;;  %v1662_v16 = vld [vmem:[%s2196_s1 + $0x28] sm:$0xff]  ;;  %v1835_v18 = vld [vmem:[%s1817_s19 + $0x51] sm:$0xff]  ;;  %v1669_v21 = vld [vmem:[%s2196_s1 + $0x60] sm:$0xff] }
  0x12   : > { %v197_v19 = vld [vmem:[%s1817_s19 + $0x1] sm:$0xff]  ;;  %v1839_v20 = vld [vmem:[%s1817_s19 + $0x11] sm:$0xff]  ;;  %v1856_v26 = vpack.c.bf16 %v1835_v18, %v1826_v15 }
  0x13   : > { %v377_v22 = vld [vmem:[%s1817_s19 + $0x2] sm:$0xff]  ;;  %v1846_v23 = vld [vmem:[%s1817_s19 + $0x12] sm:$0xff]  ;;  %v205_v27 = vpack.c.bf16 %v1839_v20, %v197_v19 }
  0x14   : > { %1713 = vmatpush.bf16.msra.mxu1 %v1666_v6  ;;  %275 = vmatpush.bf16.msra.mxu0 %v1666_v6  ;;  %v1686_v24 = vld [vmem:[%s2196_s1 + $0xe8] sm:$0xff]  ;;  %v385_v28 = vpack.c.bf16 %v1846_v23, %v377_v22  ;;  %v1864_v30 = vld [vmem:[%s1817_s19 + $0x10] sm:$0xff]  ;;  %v1867_v31 = vld [vmem:[%s1817_s19 + $0x20] sm:$0xff] }
  0x15   : > { %454 = vmatpush.bf16.msra.mxu2 %v1672_v7  ;;  %565 = vmatpush.bf16.msra.mxu3 %v1678_v8  ;;  %v1698_v25 = vld [vmem:[%s2196_s1 + $0x148] sm:$0xff]  ;;  %v1661_v32 = vld [vmem:[%s2196_s1 + $0x20] sm:$0xff]  ;;  %v1704_v33 = vld [vmem:[%s2196_s1 + $0x178] sm:$0xff]  ;;  %v496_v36 = vpack.c.bf16 %v1867_v31, %v1864_v30 }
  0x16   : > { %v1685_v34 = vld [vmem:[%s2196_s1 + $0xe0] sm:$0xff]  ;;  %v1660_v37 = vld [vmem:[%s2196_s1 + $0x18] sm:$0xff]  ;;  %v1703_v38 = vld [vmem:[%s2196_s1 + $0x170] sm:$0xff] }
  0x17   : > { %v1697_v35 = vld [vmem:[%s2196_s1 + $0x140] sm:$0xff]  ;;  %v1684_v39 = vld [vmem:[%s2196_s1 + $0xd8] sm:$0xff]  ;;  %v1659_v41 = vld [vmem:[%s2196_s1 + $0x10] sm:$0xff] }
  0x18   : > { %1714 = vmatpush.bf16.msra.mxu1 %v1665_v9  ;;  %276 = vmatpush.bf16.msra.mxu0 %v1665_v9  ;;  %v1696_v40 = vld [vmem:[%s2196_s1 + $0x138] sm:$0xff]  ;;  %v1683_v42 = vld [vmem:[%s2196_s1 + $0xd0] sm:$0xff]  ;;  %v1907_v43 = vld [vmem:[%s1817_s19 + $0x61] sm:$0xff] }
  0x19   : > { %455 = vmatpush.bf16.msra.mxu2 %v1671_v10  ;;  %566 = vmatpush.bf16.msra.mxu3 %v1677_v11  ;;  %v1910_v44 = vld [vmem:[%s1817_s19 + $0x71] sm:$0xff]  ;;  %v199_v45 = vld [vmem:[%s1817_s19 + $0x21] sm:$0xff] }
  0x1a   : > { %v1914_v46 = vld [vmem:[%s1817_s19 + $0x31] sm:$0xff]  ;;  %v1658_v47 = vld [vmem:[%s2196_s1 + $0x8] sm:$0xff]  ;;  %v1930_v51 = vpack.c.bf16 %v1910_v44, %v1907_v43  ;;  %v1941_v55 = vld [vmem:[%s1817_s19 + $0x40] sm:$0xff]  ;;  %v606_v7 = vpack.c.bf16 %v199_v45, %v1839_v20 }
  0x1b   : > { %v1920_v48 = vld [vmem:[%s1817_s19 + $0x22] sm:$0xff]  ;;  %v1923_v49 = vld [vmem:[%s1817_s19 + $0x32] sm:$0xff]  ;;  %v1933_v52 = vpack.c.bf16 %v1914_v46, %v199_v45 }
  0x1c   : > { %1715 = vmatpush.bf16.msra.mxu1 %v1664_v12  ;;  %277 = vmatpush.bf16.msra.mxu0 %v1664_v12  ;;  %v1682_v50 = vld [vmem:[%s2196_s1 + $0xc8] sm:$0xff]  ;;  %v1937_v53 = vpack.c.bf16 %v1923_v49, %v1920_v48  ;;  %v1369_v54 = vld [vmem:[%s1817_s19 + $0x30] sm:$0xff]  ;;  %v1657_v56 = vld [vmem:[%s2196_s1] sm:$0xff] }
  0x1d   : > { %456 = vmatpush.bf16.msra.mxu2 %v1670_v13  ;;  %567 = vmatpush.bf16.msra.mxu3 %v1676_v17  ;;  %v1692_v57 = vld [vmem:[%s2196_s1 + $0x118] sm:$0xff]  ;;  %v1681_v58 = vld [vmem:[%s2196_s1 + $0xc0] sm:$0xff]  ;;  %v497_v59 = vpack.c.bf16 %v1941_v55, %v1369_v54  ;;  %v1695_v60 = vld [vmem:[%s2196_s1 + $0x130] sm:$0xff]  ;;  %v182_v22 = vpack.c.bf16 %v1369_v54, %v1867_v31 }
  0x1e   : > { %v1702_v61 = vld [vmem:[%s2196_s1 + $0x168] sm:$0xff]  ;;  %v1691_v0 = vld [vmem:[%s2196_s1 + $0x110] sm:$0xff]  ;;  %v1701_v1 = vld [vmem:[%s2196_s1 + $0x160] sm:$0xff] }
  0x1f   : > { %v1710_v62 = vld [vmem:[%s2196_s1 + $0x1a8] sm:$0xff]  ;;  %v173_v3 = vld [vmem:[%s1817_s19] sm:$0xff]  ;;  %v1986_v5 = vld [vmem:[%s1817_s19 + $0x52] sm:$0xff] }
  0x20   : > { %1716 = vmatpush.bf16.msra.mxu1 %v1663_v14  ;;  %278 = vmatpush.bf16.msra.mxu0 %v1663_v14  ;;  %v1694_v63 = vld [vmem:[%s2196_s1 + $0x128] sm:$0xff]  ;;  %v181_v6 = vpack.c.bf16 %v1864_v30, %v173_v3  ;;  %v1371_v9 = vld [vmem:[%s1817_s19 + $0x50] sm:$0xff]  ;;  %v1372_v10 = vld [vmem:[%s1817_s19 + $0x60] sm:$0xff] }
  0x21   : > { %457 = vmatpush.bf16.msra.mxu2 %v1669_v21  ;;  %568 = vmatpush.bf16.msra.mxu3 %v1675_v29  ;;  %v1690_v2 = vld [vmem:[%s2196_s1 + $0x108] sm:$0xff]  ;;  %v498_v11 = vpack.c.bf16 %v1372_v10, %v1371_v9  ;;  %v1689_v12 = vld [vmem:[%s2196_s1 + $0x100] sm:$0xff]  ;;  %v1688_v17 = vld [vmem:[%s2196_s1 + $0xf8] sm:$0xff] }
  0x22   : > { %v1983_v4 = vld [vmem:[%s1817_s19 + $0x42] sm:$0xff]  ;;  %v1708_v19 = vld [vmem:[%s2196_s1 + $0x198] sm:$0xff]  ;;  %v1699_v30 = vld [vmem:[%s2196_s1 + $0x150] sm:$0xff] }
  0x23   : > { %1297 = vmatmul.msk.bf16.vlgmr.msra.gmra.mxu1 %vm258_vm0, %v1856_v26  ;;  %1295 = vmatmul.msk.bf16.vlgmr.msra.gmra.mxu0 %vm258_vm0, %v205_v27  ;;  %v1992_v8 = vpack.c.bf16 %v1986_v5, %v1983_v4  ;;  %v1709_v13 = vld [vmem:[%s2196_s1 + $0x1a0] sm:$0xff]  ;;  %v2021_v21 = vld [vmem:[%s1817_s19 + $0x72] sm:$0xff] }
  0x24   : > { %350 = vmatpush.bf16.msrb.mxu1 %v1662_v16  ;;  %673 = vmatpush.bf16.msrb.mxu0 %v1686_v24  ;;  %v1693_v14 = vld [vmem:[%s2196_s1 + $0x120] sm:$0xff]  ;;  %v1700_v16 = vld [vmem:[%s2196_s1 + $0x158] sm:$0xff]  ;;  %v607_v24 = vpack.c.bf16 %v1826_v15, %v1914_v46  ;;  %v1373_v27 = vld [vmem:[%s1817_s19 + $0x70] sm:$0xff] }
  0x25   : > { %894 = vmatpush.bf16.msrb.mxu2 %v1698_v25  ;;  %1004 = vmatpush.bf16.msrb.mxu3 %v1704_v33  ;;  %v383_v20 = vld [vmem:[%s1817_s19 + $0x62] sm:$0xff]  ;;  %v1687_v31 = vld [vmem:[%s2196_s1 + $0xf0] sm:$0xff]  ;;  %v183_v33 = vpack.c.bf16 %v1371_v9, %v1941_v55 }
  0x26   : > { %1363 = vmatmul.msk.bf16.vlgmr.msra.gmra.mxu2 %vm258_vm0, %v385_v28  ;;  %1411 = vmatmul.msk.bf16.vlgmr.msra.gmra.mxu3 %vm258_vm0, %v496_v36  ;;  %v388_v25 = vpack.c.bf16 %v2021_v21, %v383_v20  ;;  %v1374_v28 = vld [vmem:[%s1817_s19 + $0x80] sm:$0xff]  ;;  %v1707_v15 = vld [vmem:[%s2196_s1 + $0x190] sm:$0xff] }
  0x27   : > { %v499_v29 = vpack.c.bf16 %v1374_v28, %v1373_v27  ;;  %v1422_v36 = vld [vmem:[%s1817_s19 + $0x81] sm:$0xff] }
  0x28   : > { %351 = vmatpush.bf16.msrb.mxu1 %v1661_v32  ;;  %674 = vmatpush.bf16.msrb.mxu0 %v1685_v34  ;;  %v1706_v32 = vld [vmem:[%s2196_s1 + $0x188] sm:$0xff]  ;;  %v608_v34 = vpack.c.bf16 %v1907_v43, %v1835_v18  ;;  %v609_v18 = vpack.c.bf16 %v1422_v36, %v1910_v44  ;;  %v1614_v43 = vld [vmem:[%s1817_s19 + $0x92] sm:$0xff]  ;;  %v718_v44 = vpack.c.bf16 %v383_v20, %v1986_v5 }
  0x29   : > { %895 = vmatpush.bf16.msrb.mxu2 %v1697_v35  ;;  %1005 = vmatpush.bf16.msrb.mxu3 %v1703_v38  ;;  %v1705_v35 = vld [vmem:[%s2196_s1 + $0x180] sm:$0xff]  ;;  %v716_v38 = vpack.c.bf16 %v1920_v48, %v1846_v23 }
  0x2c   : > { %352 = vmatpush.bf16.msrb.mxu1 %v1660_v37  ;;  %675 = vmatpush.bf16.msrb.mxu0 %v1684_v39  ;;  %v184_v37 = vpack.c.bf16 %v1373_v27, %v1372_v10  ;;  %v1518_v39 = vld [vmem:[%s1817_s19 + $0x90] sm:$0xff] }
  0x2d   : > { %896 = vmatpush.bf16.msrb.mxu2 %v1696_v40  ;;  %1006 = vmatpush.bf16.msrb.mxu3 %v1702_v61  ;;  %v717_v40 = vpack.c.bf16 %v1983_v4, %v1923_v49 }
  0x30   : > { %353 = vmatpush.bf16.msrb.mxu1 %v1659_v41  ;;  %676 = vmatpush.bf16.msrb.mxu0 %v1683_v42  ;;  %v830_v41 = vpack.c.bf16 %v1518_v39, %v1374_v28  ;;  %v1613_v42 = vld [vmem:[%s1817_s19 + $0x82] sm:$0xff] }
  0x31   : > { %897 = vmatpush.bf16.msrb.mxu2 %v1695_v60  ;;  %1007 = vmatpush.bf16.msrb.mxu3 %v1701_v1 }
  0x33   : > { %1298 = vmatmul.msk.bf16.gmra.mxu1 %vm258_vm0, %v1930_v51  ;;  %1296 = vmatmul.msk.bf16.gmra.mxu0 %vm258_vm0, %v1933_v52 }
  0x34   : > { %354 = vmatpush.bf16.msrb.mxu1 %v1658_v47  ;;  %677 = vmatpush.bf16.msrb.mxu0 %v1682_v50  ;;  %v1050_v47 = vpack.c.bf16 %v1614_v43, %v1613_v42 }
  0x35   : > { %898 = vmatpush.bf16.msrb.mxu2 %v1694_v63  ;;  %1008 = vmatpush.bf16.msrb.mxu3 %v1700_v16 }
  0x36   : > { %1364 = vmatmul.msk.bf16.gmra.mxu2 %vm258_vm0, %v1937_v53  ;;  %1412 = vmatmul.msk.bf16.gmra.mxu3 %vm258_vm0, %v497_v59 }
  0x38   : > { %355 = vmatpush.bf16.msrb.mxu1 %v1657_v56  ;;  %678 = vmatpush.bf16.msrb.mxu0 %v1681_v58 }
  0x39   : > { %899 = vmatpush.bf16.msrb.mxu2 %v1693_v14  ;;  %1009 = vmatpush.bf16.msrb.mxu3 %v1699_v30 }
  0x3c   : > { %783 = vmatpush.bf16.msra.mxu1 %v1692_v57  ;;  %1114 = vmatpush.bf16.msra.mxu0 %v1710_v62 }
  0x3d   : > { %1717 = vmatpush.bf16.msra.mxu2 %v1710_v62 }
  0x40   : > { %784 = vmatpush.bf16.msra.mxu1 %v1691_v0  ;;  %1115 = vmatpush.bf16.msra.mxu0 %v1709_v13 }
  0x41   : > { %1718 = vmatpush.bf16.msra.mxu2 %v1709_v13 }
  0x43   : > { %1323 = vmatmul.msk.bf16.vlgmr.msrb.gmra.mxu1 %vm258_vm0, %v181_v6  ;;  %1459 = vmatmul.msk.bf16.vlgmr.msrb.gmra.mxu0 %vm258_vm0, %v606_v7 }
  0x44   : > { %785 = vmatpush.bf16.msra.mxu1 %v1690_v2  ;;  %1116 = vmatpush.bf16.msra.mxu0 %v1708_v19 }
  0x45   : > { %1719 = vmatpush.bf16.msra.mxu2 %v1708_v19 }
  0x46   : > { %1365 = vmatmul.msk.bf16.gmra.mxu2 %vm258_vm0, %v1992_v8  ;;  %1413 = vmatmul.msk.bf16.gmra.mxu3 %vm258_vm0, %v498_v11 }
  0x48   : > { %786 = vmatpush.bf16.msra.mxu1 %v1689_v12  ;;  %1117 = vmatpush.bf16.msra.mxu0 %v1707_v15 }
  0x49   : > { %1720 = vmatpush.bf16.msra.mxu2 %v1707_v15 }
  0x4c   : > { %787 = vmatpush.bf16.msra.mxu1 %v1688_v17  ;;  %1118 = vmatpush.bf16.msra.mxu0 %v1706_v32 }
  0x4d   : > { %1721 = vmatpush.bf16.msra.mxu2 %v1706_v32 }
  0x50   : > { %788 = vmatpush.bf16.msra.mxu1 %v1687_v31  ;;  %1119 = vmatpush.bf16.msra.mxu0 %v1705_v35 }
  0x51   : > { %1722 = vmatpush.bf16.msra.mxu2 %v1705_v35 }
  0x53   : > { %1324 = vmatmul.msk.bf16.gmra.mxu1 %vm258_vm0, %v182_v22  ;;  %1460 = vmatmul.msk.bf16.gmra.mxu0 %vm258_vm0, %v607_v24 }
  0x56   : > { %1366 = vmatmul.msk.bf16.gmra.mxu2 %vm258_vm0, %v388_v25  ;;  %1414 = vmatmul.msk.bf16.gmra.mxu3 %vm258_vm0, %v499_v29 }
  0x63   : > { %1325 = vmatmul.msk.bf16.gmra.mxu1 %vm258_vm0, %v183_v33  ;;  %1461 = vmatmul.msk.bf16.gmra.mxu0 %vm258_vm0, %v608_v34 }
  0x66   : > { %1555 = vmatmul.msk.bf16.vlgmr.msrb.gmra.mxu2 %vm258_vm0, %v182_v22  ;;  %1603 = vmatmul.msk.bf16.vlgmr.msrb.gmra.mxu3 %vm258_vm0, %v1933_v52  ;;  %v719_v52 = vpack.c.bf16 %v1613_v42, %v2021_v21 }
  0x73   : > { %1326 = vmatmul.msk.bf16.gmra.mxu1 %vm258_vm0, %v184_v37  ;;  %1462 = vmatmul.msk.bf16.gmra.mxu0 %vm258_vm0, %v609_v18 }
  0x76   : > { %1556 = vmatmul.msk.bf16.gmra.mxu2 %vm258_vm0, %v183_v33  ;;  %1604 = vmatmul.msk.bf16.gmra.mxu3 %vm258_vm0, %v1856_v26  ;;  %v1566_v26 = vld [vmem:[%s1817_s19 + $0x91] sm:$0xff]  ;;  %s1257_s19 = sshll.u32 %s1769_s13, 3 }
  0x77   : > { %v940_v23 = vpack.c.bf16 %v1566_v26, %v1422_v36  ;;  %p167_p4 = scmp.lt.s32.totalorder %s1257_s19, 15 }
  0x79   : > { %s2200_s19 = smov (!%p167_p4, %s1257_s19), 15 }
  0x7a   : > { %s1258_s6 = sshll.u32 %s2200_s19, 3 }
  0x7b   : > { %s2144_s11 = scalar_lea.vmem %s2198_s3, %s1258_s6 }
  0x83   : > { %1507 = vmatmul.msk.bf16.vlgmr.msra.gmra.mxu1 %vm258_vm0, %v716_v38  ;;  %1651 = vmatmul.msk.bf16.vlgmr.msra.gmra.mxu0 %vm258_vm0, %v1937_v53 }
  0x86   : > { %1557 = vmatmul.msk.bf16.gmra.mxu2 %vm258_vm0, %v184_v37  ;;  %1605 = vmatmul.msk.bf16.gmra.mxu3 %vm258_vm0, %v1930_v51 }
  0x93   : > { %1508 = vmatmul.msk.bf16.gmra.mxu1 %vm258_vm0, %v717_v40  ;;  %1652 = vmatmul.msk.bf16.gmra.mxu0 %vm258_vm0, %v1992_v8 }
  0x96   : > { %1558 = vmatmul.msk.bf16.gmra.mxu2 %vm258_vm0, %v830_v41  ;;  %1606 = vmatmul.msk.bf16.gmra.mxu3 %vm258_vm0, %v940_v23 }
  0xa0   : > { %v290_v45 = vpop.f32.mrf.mxu1  ;;  %v280_v46 = vpop.f32.mrf.mxu0 }
  0xa3   : > { %1509 = vmatmul.msk.bf16.gmra.mxu1 %vm258_vm0, %v718_v44  ;;  %1653 = vmatmul.msk.bf16.gmra.mxu0 %vm258_vm0, %v388_v25 }
  0xa6   : > { %1654 = vmatmul.msk.bf16.vlgmr.msra.gmra.mxu2 %vm258_vm0, %v1050_v47 }
  0xa8   : > { %v292_v49 = vpop.f32.mrf.mxu1  ;;  %v282_v50 = vpop.f32.mrf.mxu0 }
  0xa9   : > { %v459_v48 = vpop.f32.mrf.mxu2  ;;  %v570_v51 = vpop.f32.mrf.mxu3 }
  0xb0   : > { %v295_v54 = vpop.f32.mrf.mxu1  ;;  %v285_v55 = vpop.f32.mrf.mxu0 }
  0xb1   : > { %v461_v53 = vpop.f32.mrf.mxu2  ;;  %v572_v56 = vpop.f32.mrf.mxu3 }
  0xb3   : > { %1510 = vmatmul.msk.bf16.gmra.mxu1 %vm258_vm0, %v719_v52 }
  0xb8   : > { %v297_v58 = vpop.f32.mrf.mxu1  ;;  %v287_v59 = vpop.f32.mrf.mxu0 }
  0xb9   : > { %v464_v57 = vpop.f32.mrf.mxu2  ;;  %v2088_v60 = vpop.f32.mrf.mxu3 }
  0xc0   : > { %v357_v62 = vpop.f32.mrf.mxu1  ;;  %v680_v63 = vpop.f32.mrf.mxu0 }
  0xc1   : > { %v466_v61 = vpop.f32.mrf.mxu2  ;;  %v358_v0 = vadd.f32 %v357_v62, %v280_v46  ;;  %v2090_v2 = vpop.f32.mrf.mxu3 }
  0xc3   : > { %v479_v1 = vadd.f32 %v459_v48, %v358_v0 }
  0xc5   : > { %v590_v42 = vadd.f32 %v570_v51, %v479_v1  ;;  %v2138_v1 = vld [vmem:[%s2197_s2 + $0x2] ss:$0 sm:$0xff] }
  0xc7   : > { %v700_v44 = vadd.f32 %v680_v63, %v590_v42 }
  0xc8   : > { %v359_v4 = vpop.f32.mrf.mxu1  ;;  %v682_v5 = vpop.f32.mrf.mxu0 }
  0xc9   : > { %v469_v3 = vpop.f32.mrf.mxu2  ;;  %v360_v6 = vadd.f32 %v359_v4, %v282_v50  ;;  %v2092_v8 = vpop.f32.mrf.mxu3 }
  0xcb   : > { %v480_v7 = vadd.f32 %v461_v53, %v360_v6 }
  0xcd   : > { %v591_v50 = vadd.f32 %v572_v56, %v480_v7 }
  0xd0   : > { %v362_v10 = vpop.f32.mrf.mxu1  ;;  %v2094_v11 = vpop.f32.mrf.mxu0 }
  0xd1   : > { %v471_v9 = vpop.f32.mrf.mxu2  ;;  %v363_v12 = vadd.f32 %v362_v10, %v285_v55  ;;  %v2096_v16 = vpop.f32.mrf.mxu3  ;;  %v701_v55 = vadd.f32 %v682_v5, %v591_v50 }
  0xd3   : > { %v481_v13 = vadd.f32 %v464_v57, %v363_v12 }
  0xd5   : > { %v592_v63 = vadd.f32 %v2088_v60, %v481_v13 }
  0xd7   : > { %v702_v60 = vadd.f32 %v2094_v11, %v592_v63 }
  0xd8   : > { %v364_v17 = vpop.f32.mrf.mxu1  ;;  %v2098_v19 = vpop.f32.mrf.mxu0 }
  0xd9   : > { %v474_v14 = vpop.f32.mrf.mxu2  ;;  %v365_v20 = vadd.f32 %v364_v17, %v287_v59  ;;  %v2104_v28 = vpop.f32.mrf.mxu3 }
  0xdb   : > { %v2100_v21 = vadd.f32 %v466_v61, %v365_v20  ;;  %v2132_v61 = vld [vmem:[%s2197_s2 + $0x1] ss:$0 sm:$0xff] }
  0xdd   : > { %v593_v17 = vadd.f32 %v2090_v2, %v2100_v21 }
  0xe0   : > { %v367_v24 = vpop.f32.mrf.mxu1  ;;  %v2102_v25 = vpop.f32.mrf.mxu0 }
  0xe1   : > { %v476_v22 = vpop.f32.mrf.mxu2  ;;  %v368_v27 = vadd.f32 %v367_v24, %v290_v45  ;;  %v2112_v34 = vpop.f32.mrf.mxu3 }
  0xe3   : > { %v2106_v29 = vadd.f32 %v469_v3, %v368_v27 }
  0xe5   : > { %v594_v2 = vadd.f32 %v2092_v8, %v2106_v29 }
  0xe8   : > { %v369_v31 = vpop.f32.mrf.mxu1  ;;  %v2108_v15 = vpop.f32.mrf.mxu0 }
  0xe9   : > { %v901_v30 = vpop.f32.mrf.mxu2  ;;  %v370_v32 = vadd.f32 %v369_v31, %v292_v49  ;;  %v1011_v39 = vpop.f32.mrf.mxu3  ;;  %v703_v31 = vadd.f32 %v2098_v19, %v593_v17  ;;  %v704_v19 = vadd.f32 %v2102_v25, %v594_v2 }
  0xeb   : > { %v2110_v33 = vadd.f32 %v471_v9, %v370_v32 }
  0xed   : > { %v595_v8 = vadd.f32 %v2096_v16, %v2110_v33 }
  0xef   : > { %v705_v25 = vadd.f32 %v2108_v15, %v595_v8 }
  0xf0   : > { %v372_v36 = vpop.f32.mrf.mxu1  ;;  %v2114_v37 = vpop.f32.mrf.mxu0 }
  0xf1   : > { %v903_v35 = vpop.f32.mrf.mxu2  ;;  %v373_v18 = vadd.f32 %v372_v36, %v295_v54  ;;  %v1013_v45 = vpop.f32.mrf.mxu3  ;;  %v2126_v54 = vld [vmem:[%s2197_s2] ss:$0 sm:$0xff] }
  0xf3   : > { %v2116_v38 = vadd.f32 %v474_v14, %v373_v18 }
  0xf5   : > { %v596_v16 = vadd.f32 %v2104_v28, %v2116_v38 }
  0xf8   : > { %v374_v41 = vpop.f32.mrf.mxu1  ;;  %v2118_v26 = vpop.f32.mrf.mxu0 }
  0xf9   : > { %v906_v40 = vpop.f32.mrf.mxu2  ;;  %v375_v23 = vadd.f32 %v374_v41, %v297_v58  ;;  %v1016_v62 = vpop.f32.mrf.mxu3 }
  0xfb   : > { %v2120_v43 = vadd.f32 %v476_v22, %v375_v23 }
  0xfd   : > { %v597_v28 = vadd.f32 %v2112_v34, %v2120_v43 }
 0x100   : > { %v790_v46 = vpop.f32.mrf.mxu1  ;;  %v1121_v47 = vpop.f32.mrf.mxu0 }
 0x101   : > { %v810_v48 = vadd.f32 %v790_v46, %v700_v44  ;;  %v908_v49 = vpop.f32.mrf.mxu2  ;;  %v1018_v24 = vpop.f32.mrf.mxu3 }
 0x103   : > { %v921_v52 = vadd.f32 %v901_v30, %v810_v48 }
 0x105   : > { %v1031_v53 = vadd.f32 %v1011_v39, %v921_v52 }
 0x107   : > { %v1141_v51 = vadd.f32 %v1121_v47, %v1031_v53 }
 0x108   : > { %v792_v57 = vpop.f32.mrf.mxu1  ;;  %v1123_v58 = vpop.f32.mrf.mxu0 }
 0x109   : > { %v1153_v59 = vadd.f32 %v2126_v54, %v1141_v51  ;;  %v811_v56 = vadd.f32 %v792_v57, %v701_v55  ;;  %v911_v4 = vpop.f32.mrf.mxu2  ;;  %v1021_v44 = vpop.f32.mrf.mxu3 }
 0x10b   : > { %v1161_v0 = vmax.f32 %v1153_v59, 0.0  ;;  %v922_v3 = vadd.f32 %v903_v35, %v811_v56 }
 0x10d   : > { %v1170_v5 = vmul.f32 %v2132_v61, %v1161_v0  ;;  %v1032_v6 = vadd.f32 %v1013_v45, %v922_v3 }
 0x10f   : > { %v1179_v7 = vadd.f32 %v2138_v1, %v1170_v5  ;;  %v1142_v9 = vadd.f32 %v1123_v58, %v1032_v6  ;;  %v706_v6 = vadd.f32 %v2114_v37, %v596_v16  ;;  %v707_v37 = vadd.f32 %v2118_v26, %v597_v28 }
 0x110   : > { %v795_v10 = vpop.f32.mrf.mxu1  ;;  %v1126_v12 = vpop.f32.mrf.mxu0 }
 0x111   : > { %1187 = vst [vmem:[%s2144_s11] sm:$0xff] %v1179_v7  ;;  %v1154_v13 = vadd.f32 %v2126_v54, %v1142_v9  ;;  %v812_v14 = vadd.f32 %v795_v10, %v702_v60  ;;  %v913_v11 = vpop.f32.mrf.mxu2  ;;  %v1023_v59 = vpop.f32.mrf.mxu3 }
 0x113   : > { %v1162_v20 = vmax.f32 %v1154_v13, 0.0  ;;  %v923_v22 = vadd.f32 %v906_v40, %v812_v14 }
 0x115   : > { %v1171_v27 = vmul.f32 %v2132_v61, %v1162_v20  ;;  %v1033_v30 = vadd.f32 %v1016_v62, %v923_v22 }
 0x117   : > { %v1180_v32 = vadd.f32 %v2138_v1, %v1171_v27  ;;  %v1143_v35 = vadd.f32 %v1126_v12, %v1033_v30 }
 0x118   : > { %v797_v36 = vpop.f32.mrf.mxu1  ;;  %v1128_v18 = vpop.f32.mrf.mxu0 }
 0x119   : > { %1188 = vst [vmem:[%s2144_s11 + $0x8] sm:$0xff] %v1180_v32  ;;  %v1155_v39 = vadd.f32 %v2126_v54, %v1143_v35  ;;  %v813_v41 = vadd.f32 %v797_v36, %v703_v31  ;;  %v916_v47 = vpop.f32.mrf.mxu2  ;;  %v1026_v13 = vpop.f32.mrf.mxu3 }
 0x11b   : > { %v1163_v21 = vmax.f32 %v1155_v39, 0.0  ;;  %v924_v40 = vadd.f32 %v908_v49, %v813_v41 }
 0x11d   : > { %v1172_v23 = vmul.f32 %v2132_v61, %v1163_v21  ;;  %v1034_v42 = vadd.f32 %v1018_v24, %v924_v40 }
 0x11f   : > { %v1181_v45 = vadd.f32 %v2138_v1, %v1172_v23  ;;  %v1144_v46 = vadd.f32 %v1128_v18, %v1034_v42 }
 0x120   : > { %v800_v48 = vpop.f32.mrf.mxu1  ;;  %v1131_v53 = vpop.f32.mrf.mxu0 }
 0x121   : > { %1189 = vst [vmem:[%s2144_s11 + $0x10] sm:$0xff] %v1181_v45  ;;  %v1156_v50 = vadd.f32 %v2126_v54, %v1144_v46  ;;  %v814_v52 = vadd.f32 %v800_v48, %v704_v19  ;;  %v918_v0 = vpop.f32.mrf.mxu2  ;;  %v1028_v43 = vpop.f32.mrf.mxu3 }
 0x123   : > { %v1164_v29 = vmax.f32 %v1156_v50, 0.0  ;;  %v925_v49 = vadd.f32 %v911_v4, %v814_v52 }
 0x125   : > { %v1173_v55 = vmul.f32 %v2132_v61, %v1164_v29  ;;  %v1035_v51 = vadd.f32 %v1021_v44, %v925_v49 }
 0x127   : > { %v1182_v57 = vadd.f32 %v2138_v1, %v1173_v55  ;;  %v1145_v58 = vadd.f32 %v1131_v53, %v1035_v51 }
 0x128   : > { %v802_v56 = vpop.f32.mrf.mxu1  ;;  %v1133_v4 = vpop.f32.mrf.mxu0 }
 0x129   : > { %1190 = vst [vmem:[%s2144_s11 + $0x18] sm:$0xff] %v1182_v57  ;;  %v1157_v62 = vadd.f32 %v2126_v54, %v1145_v58  ;;  %v815_v63 = vadd.f32 %v802_v56, %v705_v25  ;;  %v1136_v17 = vpop.f32.mrf.mxu2 }
 0x12b   : > { %v1165_v33 = vmax.f32 %v1157_v62, 0.0  ;;  %v926_v3 = vadd.f32 %v913_v11, %v815_v63 }
 0x12d   : > { %v1174_v5 = vmul.f32 %v2132_v61, %v1165_v33  ;;  %v1036_v15 = vadd.f32 %v1023_v59, %v926_v3 }
 0x12f   : > { %v1183_v60 = vadd.f32 %v2138_v1, %v1174_v5  ;;  %v1146_v7 = vadd.f32 %v1133_v4, %v1036_v15 }
 0x130   : > { %v805_v9 = vpop.f32.mrf.mxu1 }
 0x131   : > { %1191 = vst [vmem:[%s2144_s11 + $0x20] sm:$0xff] %v1183_v60  ;;  %v1158_v10 = vadd.f32 %v2126_v54, %v1146_v7  ;;  %v816_v12 = vadd.f32 %v805_v9, %v706_v6  ;;  %v1138_v18 = vpop.f32.mrf.mxu2 }
 0x133   : > { %v1166_v38 = vmax.f32 %v1158_v10, 0.0  ;;  %v927_v14 = vadd.f32 %v916_v47, %v816_v12 }
 0x135   : > { %v1175_v20 = vmul.f32 %v2132_v61, %v1166_v38  ;;  %v1037_v22 = vadd.f32 %v1026_v13, %v927_v14 }
 0x137   : > { %v1184_v24 = vadd.f32 %v2138_v1, %v1175_v20  ;;  %v1147_v27 = vadd.f32 %v1136_v17, %v1037_v22 }
 0x138   : > { %v807_v30 = vpop.f32.mrf.mxu1 }
 0x139   : > { %1192 = vst [vmem:[%s2144_s11 + $0x28] sm:$0xff] %v1184_v24  ;;  %v1159_v11 = vadd.f32 %v2126_v54, %v1147_v27  ;;  %v817_v31 = vadd.f32 %v807_v30, %v707_v37 }
 0x13b   : > { %v1167_v32 = vmax.f32 %v1159_v11, 0.0  ;;  %v928_v34 = vadd.f32 %v918_v0, %v817_v31 }
 0x13d   : > { %v1176_v35 = vmul.f32 %v2132_v61, %v1167_v32  ;;  %v1038_v36 = vadd.f32 %v1028_v43, %v928_v34 }
 0x13f   : > { %v1185_v39 = vadd.f32 %v2138_v1, %v1176_v35  ;;  %v1148_v41 = vadd.f32 %v1138_v18, %v1038_v36 }
 0x141   : > { %1193 = vst [vmem:[%s2144_s11 + $0x30] sm:$0xff] %v1185_v39  ;;  %v1160_v26 = vadd.f32 %v2126_v54, %v1148_v41 }
 0x143   : > { %v1168_v2 = vmax.f32 %v1160_v26, 0.0 }
 0x145   : > { %v1177_v21 = vmul.f32 %v2132_v61, %v1168_v2 }
 0x147   : > { %v1186_v40 = vadd.f32 %v2138_v1, %v1177_v21 }
 0x149   : > { %1194 = vst [vmem:[%s2144_s11 + $0x38] sm:$0xff] %v1186_v40 }
 0x14a PF: > { %s13_s12 = sadd.s32 1, %s1741_s12  }
 0x14b   : > { %p10_p5 = scmp.ge.s32.totalorder %s13_s12, 4  }
 0x14d   :  { %12 = sbr.rel (!%p10_p5) target bundleno = 1 (0x1), region = 72 }

// kernel: feature_conv_layer_single.8
= control target key start
LH: loop header
LB: loop body
LE: loop exit
PB: predicated region body
PF: predicated region fallthrough
CT: control target
= control target key end

     0   :  { %s1090_s12 = smov 0   ;;  %s1355_s0 = inlined_call_operand.vmem [shape: f32[2,10,10,16], index: 0, kind: input, shape index: {}]   ;;  %s1356_s1 = inlined_call_operand.vmem [shape: bf16[9,16,32], index: 1, kind: input, shape index: {}]   ;;  %s1357_s2 = inlined_call_operand.vmem [shape: f32[8,32], index: 2, kind: input, shape index: {}]   ;;  %s1358_s3 = inlined_call_operand.vmem [shape: f32[128,32], index: 3, kind: output, shape index: {}]  }
   0x1 LB: > { %s1096_s13 = sadd.s32 4294967295, %s1068_s12   ;;  %p896_p0 = scmp.ge.s32.totalorder %s1068_s12, 1  ;;  %s1068_s12 = sphi %s1090_s12, %s13_s12  }
   0x2   : > { %p137_p1 = scmp.lt.s32.totalorder %s1068_s12, 3 }
   0x4   : > { %p138_p2 = pnand %p896_p0, %p137_p1 }
   0x5   : > { %p161_p3 = scmp.lt.s32.totalorder (!%p138_p2), %s1096_s13, 1  ;;  %s898_s10 = sshll.u32 (!%p138_p2), %s1096_s13, 3 }
   0x6   : > { %141 = sbr.rel (%p138_p2) target bundleno = 303 (0x12f), region = 32  ;;  %p167_p4 = scmp.lt.s32.totalorder (!%p138_p2), %s898_s10, 15 }
   0xb   : > { %v1039_v0 = vld [vmem:[%s1356_s1 + $0x8] sm:$0xff]  ;;  %v1040_v1 = vld [vmem:[%s1356_s1 + $0x10] sm:$0xff]  ;;  %v1041_v2 = vld [vmem:[%s1356_s1 + $0x18] sm:$0xff]  ;;  %s162_s24 = scalar_select %p161_p3, %s1096_s13, 1  ;;  %vm208_vm0 = vcmask 130048   ;;  %vm827_vm1 = vcmask 261120  }
   0xc   : > { %v1038_v3 = vld [vmem:[%s1356_s1] sm:$0xff]  ;;  %1047 = vmatpush.bf16.msra.mxu1 %v1039_v0  ;;  %1048 = vmatpush.bf16.msra.mxu2 %v1039_v0  ;;  %v1044_v5 = vld [vmem:[%s1356_s1 + $0x30] sm:$0xff]  ;;  %v1045_v9 = vld [vmem:[%s1356_s1 + $0x38] sm:$0xff]  ;;  %s1360_s10 = smov (!%p167_p4, %s898_s10), 15 }
   0xd   : > { %v1042_v4 = vld [vmem:[%s1356_s1 + $0x20] sm:$0xff]  ;;  %1049 = vmatpush.bf16.msra.mxu3 %v1039_v0  ;;  %228 = vmatpush.bf16.msra.mxu0 %v1039_v0  ;;  %s1050_s25 = smul.u32 160, %s162_s24  ;;  %v1043_v18 = vld [vmem:[%s1356_s1 + $0x28] sm:$0xff]  ;;  %s899_s16 = sshll.u32 %s1360_s10, 3 }
   0xe   : > { %v1046_v20 = vld [vmem:[%s1356_s1 + $0x40] sm:$0xff]  ;;  %s1289_s21 = scalar_lea.vmem %s1358_s3, %s899_s16 }
   0xf   : > { %s1120_s28 = scalar_lea.vmem %s1355_s0, %s1050_s25 }
  0x10   : > { %337 = vmatpush.bf16.msrb.mxu2 %v1040_v1  ;;  %275 = vmatpush.bf16.msrb.mxu1 %v1038_v3  ;;  %v189_v6 = vld [vmem:[%s1120_s28 + $0x21] sm:$0xff]  ;;  %v190_v7 = vld [vmem:[%s1120_s28 + $0x31] sm:$0xff] }
  0x11   : > { %408 = vmatpush.bf16.msrb.mxu3 %v1041_v2  ;;  %478 = vmatpush.bf16.msrb.mxu0 %v1042_v4  ;;  %v191_v8 = vld [vmem:[%s1120_s28 + $0x41] sm:$0xff]  ;;  %v1131_v10 = vpack.c.bf16 %v190_v7, %v189_v6  ;;  %v192_v11 = vld [vmem:[%s1120_s28 + $0x51] sm:$0xff] }
  0x12   : > { %v193_v12 = vld [vmem:[%s1120_s28 + $0x61] sm:$0xff]  ;;  %v1136_v13 = vld [vmem:[%s1120_s28 + $0x71] sm:$0xff]  ;;  %v1138_v14 = vpack.c.bf16 %v192_v11, %v191_v8  ;;  %v447_v37 = vpack.c.bf16 %v191_v8, %v190_v7 }
  0x13   : > { %v1141_v15 = vpack.c.bf16 %v1136_v13, %v193_v12  ;;  %v187_v16 = vld [vmem:[%s1120_s28 + $0x1] sm:$0xff]  ;;  %v188_v17 = vld [vmem:[%s1120_s28 + $0x11] sm:$0xff]  ;;  %907 = vmatmul.msk.bf16.vlgmr.msra.gmra.mxu1 %vm208_vm0, %v1131_v10  ;;  %v448_v45 = vpack.c.bf16 %v193_v12, %v192_v11 }
  0x14   : > { %v195_v19 = vpack.c.bf16 %v188_v17, %v187_v16  ;;  %908 = vmatmul.msk.bf16.vlgmr.msra.gmra.mxu2 %vm208_vm0, %v1138_v14  ;;  %548 = vmatpush.bf16.msra.mxu1 %v1043_v18  ;;  %v173_v21 = vld [vmem:[%s1120_s28] sm:$0xff]  ;;  %v174_v22 = vld [vmem:[%s1120_s28 + $0x10] sm:$0xff]  ;;  %v446_v29 = vpack.c.bf16 %v189_v6, %v188_v17 }
  0x15   : > { %909 = vmatmul.msk.bf16.vlgmr.msra.gmra.mxu3 %vm208_vm0, %v1141_v15  ;;  %619 = vmatpush.bf16.msra.mxu2 %v1044_v5  ;;  %v297_v23 = vld [vmem:[%s1120_s28 + $0x2] sm:$0xff]  ;;  %v298_v24 = vld [vmem:[%s1120_s28 + $0x12] sm:$0xff]  ;;  %v181_v26 = vpack.c.bf16 %v174_v22, %v173_v21 }
  0x16   : > { %906 = vmatmul.msk.bf16.vlgmr.msra.gmra.mxu0 %vm208_vm0, %v195_v19  ;;  %689 = vmatpush.bf16.msra.mxu3 %v1045_v9  ;;  %v929_v25 = vld [vmem:[%s1120_s28 + $0x20] sm:$0xff]  ;;  %v305_v27 = vpack.c.bf16 %v298_v24, %v297_v23  ;;  %v176_v30 = vld [vmem:[%s1120_s28 + $0x30] sm:$0xff] }
  0x17   : > { %759 = vmatpush.bf16.msra.mxu0 %v1046_v20  ;;  %v376_v28 = vpack.c.bf16 %v929_v25, %v174_v22  ;;  %v299_v31 = vld [vmem:[%s1120_s28 + $0x22] sm:$0xff]  ;;  %v300_v32 = vld [vmem:[%s1120_s28 + $0x32] sm:$0xff]  ;;  %v182_v34 = vpack.c.bf16 %v176_v30, %v929_v25 }
  0x18   : > { %v931_v33 = vld [vmem:[%s1120_s28 + $0x40] sm:$0xff]  ;;  %v306_v35 = vpack.c.bf16 %v300_v32, %v299_v31  ;;  %v178_v38 = vld [vmem:[%s1120_s28 + $0x50] sm:$0xff]  ;;  %v516_v55 = vpack.c.bf16 %v299_v31, %v298_v24 }
  0x19   : > { %v377_v36 = vpack.c.bf16 %v931_v33, %v176_v30  ;;  %v301_v39 = vld [vmem:[%s1120_s28 + $0x42] sm:$0xff]  ;;  %v302_v40 = vld [vmem:[%s1120_s28 + $0x52] sm:$0xff]  ;;  %v183_v42 = vpack.c.bf16 %v178_v38, %v931_v33 }
  0x1a   : > { %v933_v41 = vld [vmem:[%s1120_s28 + $0x60] sm:$0xff]  ;;  %v307_v43 = vpack.c.bf16 %v302_v40, %v301_v39  ;;  %v180_v46 = vld [vmem:[%s1120_s28 + $0x70] sm:$0xff]  ;;  %v517_v56 = vpack.c.bf16 %v301_v39, %v300_v32 }
  0x1b   : > { %v378_v44 = vpack.c.bf16 %v933_v41, %v178_v38  ;;  %v303_v47 = vld [vmem:[%s1120_s28 + $0x62] sm:$0xff]  ;;  %v304_v48 = vld [vmem:[%s1120_s28 + $0x72] sm:$0xff]  ;;  %v184_v51 = vpack.c.bf16 %v180_v46, %v933_v41 }
  0x1c   : > { %v935_v49 = vld [vmem:[%s1120_s28 + $0x80] sm:$0xff]  ;;  %v308_v52 = vpack.c.bf16 %v304_v48, %v303_v47  ;;  %v518_v57 = vpack.c.bf16 %v303_v47, %v302_v40  ;;  %v989_v59 = vld [vmem:[%s1120_s28 + $0x90] sm:$0xff] }
  0x1d   : > { %v953_v50 = vld [vmem:[%s1120_s28 + $0x81] sm:$0xff]  ;;  %v379_v53 = vpack.c.bf16 %v935_v49, %v180_v46  ;;  %v1007_v60 = vld [vmem:[%s1120_s28 + $0x91] sm:$0xff]  ;;  %v590_v0 = vpack.c.bf16 %v989_v59, %v935_v49 }
  0x1e   : > { %v449_v54 = vpack.c.bf16 %v953_v50, %v1136_v13  ;;  %v971_v58 = vld [vmem:[%s1120_s28 + $0x82] sm:$0xff]  ;;  %v1025_v61 = vld [vmem:[%s1120_s28 + $0x92] sm:$0xff]  ;;  %v660_v1 = vpack.c.bf16 %v1007_v60, %v953_v50 }
  0x1f   : > { %v519_v62 = vpack.c.bf16 %v971_v58, %v304_v48  ;;  %v730_v2 = vpack.c.bf16 %v1025_v61, %v971_v58  ;;  %v1271_v58 = vld [vmem:[%s1357_s2] ss:$0 sm:$0xff] }
  0x23   : > { %914 = vmatmul.msk.bf16.vlgmr.msrb.gmra.mxu1 %vm208_vm0, %v181_v26 }
  0x24   : > { %924 = vmatmul.msk.bf16.vlgmr.msrb.gmra.mxu2 %vm208_vm0, %v305_v27 }
  0x25   : > { %942 = vmatmul.msk.bf16.vlgmr.msrb.gmra.mxu3 %vm208_vm0, %v376_v28 }
  0x26   : > { %960 = vmatmul.msk.bf16.vlgmr.msrb.gmra.mxu0 %vm208_vm0, %v446_v29 }
  0x33   : > { %915 = vmatmul.msk.bf16.gmra.mxu1 %vm208_vm0, %v182_v34 }
  0x34   : > { %925 = vmatmul.msk.bf16.gmra.mxu2 %vm208_vm0, %v306_v35 }
  0x35   : > { %943 = vmatmul.msk.bf16.gmra.mxu3 %vm208_vm0, %v377_v36 }
  0x36   : > { %961 = vmatmul.msk.bf16.gmra.mxu0 %vm208_vm0, %v447_v37 }
  0x43   : > { %916 = vmatmul.msk.bf16.gmra.mxu1 %vm208_vm0, %v183_v42 }
  0x44   : > { %926 = vmatmul.msk.bf16.gmra.mxu2 %vm208_vm0, %v307_v43 }
  0x45   : > { %944 = vmatmul.msk.bf16.gmra.mxu3 %vm208_vm0, %v378_v44 }
  0x46   : > { %962 = vmatmul.msk.bf16.gmra.mxu0 %vm208_vm0, %v448_v45 }
  0x53   : > { %917 = vmatmul.msk.bf16.gmra.mxu1 %vm208_vm0, %v184_v51 }
  0x54   : > { %927 = vmatmul.msk.bf16.gmra.mxu2 %vm208_vm0, %v308_v52 }
  0x55   : > { %945 = vmatmul.msk.bf16.gmra.mxu3 %vm208_vm0, %v379_v53 }
  0x56   : > { %963 = vmatmul.msk.bf16.gmra.mxu0 %vm208_vm0, %v449_v54 }
  0x63   : > { %978 = vmatmul.msk.bf16.vlgmr.msra.gmra.mxu1 %vm208_vm0, %v516_v55 }
  0x64   : > { %996 = vmatmul.msk.bf16.vlgmr.msra.gmra.mxu2 %vm208_vm0, %v182_v34 }
  0x65   : > { %1014 = vmatmul.msk.bf16.vlgmr.msra.gmra.mxu3 %vm208_vm0, %v1131_v10 }
  0x66   : > { %1032 = vmatmul.msk.bf16.vlgmr.msra.gmra.mxu0 %vm208_vm0, %v306_v35 }
  0x73   : > { %979 = vmatmul.msk.bf16.gmra.mxu1 %vm208_vm0, %v517_v56 }
  0x74   : > { %997 = vmatmul.msk.bf16.gmra.mxu2 %vm208_vm0, %v183_v42 }
  0x75   : > { %1015 = vmatmul.msk.bf16.gmra.mxu3 %vm208_vm0, %v1138_v14 }
  0x76   : > { %1033 = vmatmul.msk.bf16.gmra.mxu0 %vm208_vm0, %v307_v43 }
  0x83   : > { %980 = vmatmul.msk.bf16.gmra.mxu1 %vm208_vm0, %v518_v57 }
  0x84   : > { %998 = vmatmul.msk.bf16.gmra.mxu2 %vm208_vm0, %v184_v51 }
  0x85   : > { %1016 = vmatmul.msk.bf16.gmra.mxu3 %vm208_vm0, %v1141_v15 }
  0x86   : > { %1034 = vmatmul.msk.bf16.gmra.mxu0 %vm208_vm0, %v308_v52 }
  0x90   : > { %v1212_v63 = vpop.f32.mrf.mxu1 }
  0x93   : > { %v230_v3 = vpop.f32.mrf.mxu0  ;;  %981 = vmatmul.msk.bf16.gmra.mxu1 %vm208_vm0, %v519_v62 }
  0x94   : > { %999 = vmatmul.msk.bf16.gmra.mxu2 %vm208_vm0, %v590_v0 }
  0x95   : > { %1017 = vmatmul.msk.bf16.gmra.mxu3 %vm208_vm0, %v660_v1  ;;  %v1277_v1 = vld [vmem:[%s1357_s2 + $0x1] ss:$0 sm:$0xff] }
  0x96   : > { %1035 = vmatmul.msk.bf16.gmra.mxu0 %vm208_vm0, %v730_v2 }
  0x97   : > { %v1218_v4 = vpop.f32.mrf.mxu2 }
  0x98   : > { %v1220_v5 = vpop.f32.mrf.mxu3  ;;  %v1222_v6 = vpop.f32.mrf.mxu1 }
  0x9b   : > { %v232_v7 = vpop.f32.mrf.mxu0 }
  0x9f   : > { %v1224_v8 = vpop.f32.mrf.mxu2 }
  0xa0   : > { %v1226_v9 = vpop.f32.mrf.mxu3  ;;  %v277_v10 = vpop.f32.mrf.mxu1 }
  0xa1   : > { %v278_v39 = vadd.f32 %v277_v10, %v230_v3 }
  0xa3   : > { %v480_v11 = vpop.f32.mrf.mxu0 }
  0xa7   : > { %v339_v12 = vpop.f32.mrf.mxu2 }
  0xa8   : > { %v410_v13 = vpop.f32.mrf.mxu3  ;;  %v279_v14 = vpop.f32.mrf.mxu1  ;;  %v359_v41 = vadd.f32 %v339_v12, %v278_v39 }
  0xa9   : > { %v280_v46 = vadd.f32 %v279_v14, %v232_v7 }
  0xaa   : > { %v430_v44 = vadd.f32 %v410_v13, %v359_v41 }
  0xab   : > { %v482_v15 = vpop.f32.mrf.mxu0 }
  0xac   : > { %v500_v49 = vadd.f32 %v480_v11, %v430_v44  ;;  %v1282_v11 = vld [vmem:[%s1357_s2 + $0x2] ss:$0 sm:$0xff] }
  0xaf   : > { %v341_v16 = vpop.f32.mrf.mxu2 }
  0xb0   : > { %v412_v17 = vpop.f32.mrf.mxu3  ;;  %v282_v18 = vpop.f32.mrf.mxu1  ;;  %v360_v48 = vadd.f32 %v341_v16, %v280_v46 }
  0xb1   : > { %v283_v56 = vadd.f32 %v282_v18, %v1212_v63 }
  0xb2   : > { %v431_v53 = vadd.f32 %v412_v17, %v360_v48 }
  0xb3   : > { %v1228_v19 = vpop.f32.mrf.mxu0 }
  0xb4   : > { %v501_v62 = vadd.f32 %v482_v15, %v431_v53 }
  0xb7   : > { %v344_v20 = vpop.f32.mrf.mxu2 }
  0xb8   : > { %v415_v21 = vpop.f32.mrf.mxu3  ;;  %v284_v22 = vpop.f32.mrf.mxu1  ;;  %v361_v60 = vadd.f32 %v344_v20, %v283_v56 }
  0xb9   : > { %v285_v14 = vadd.f32 %v284_v22, %v1222_v6 }
  0xba   : > { %v432_v7 = vadd.f32 %v415_v21, %v361_v60 }
  0xbb   : > { %v1230_v23 = vpop.f32.mrf.mxu0 }
  0xbc   : > { %v502_v39 = vadd.f32 %v1228_v19, %v432_v7 }
  0xbf   : > { %v346_v24 = vpop.f32.mrf.mxu2 }
  0xc0   : > { %v1232_v25 = vpop.f32.mrf.mxu3  ;;  %v1234_v26 = vpop.f32.mrf.mxu1  ;;  %v362_v18 = vadd.f32 %v346_v24, %v285_v14 }
  0xc1   : > { %v288_v24 = vadd.f32 %v1234_v26, %v1218_v4 }
  0xc3   : > { %v1236_v27 = vpop.f32.mrf.mxu0 }
  0xc7   : > { %v1238_v28 = vpop.f32.mrf.mxu2 }
  0xc8   : > { %v1240_v29 = vpop.f32.mrf.mxu3  ;;  %v1242_v30 = vpop.f32.mrf.mxu1 }
  0xcb   : > { %v1244_v31 = vpop.f32.mrf.mxu0 }
  0xcf   : > { %v1246_v32 = vpop.f32.mrf.mxu2 }
  0xd0   : > { %v1248_v33 = vpop.f32.mrf.mxu3  ;;  %v1250_v34 = vpop.f32.mrf.mxu1 }
  0xd3   : > { %v1252_v35 = vpop.f32.mrf.mxu0 }
  0xd7   : > { %v1254_v36 = vpop.f32.mrf.mxu2 }
  0xd8   : > { %v1256_v37 = vpop.f32.mrf.mxu3  ;;  %v1258_v38 = vpop.f32.mrf.mxu1 }
  0xdb   : > { %v1260_v40 = vpop.f32.mrf.mxu0 }
  0xdf   : > { %v1262_v42 = vpop.f32.mrf.mxu2 }
  0xe0   : > { %v1264_v43 = vpop.f32.mrf.mxu3  ;;  %v550_v45 = vpop.f32.mrf.mxu1 }
  0xe1   : > { %v570_v50 = vadd.f32 %v550_v45, %v500_v49  ;;  %v433_v45 = vadd.f32 %v1232_v25, %v362_v18 }
  0xe3   : > { %v761_v47 = vpop.f32.mrf.mxu0 }
  0xe7   : > { %v621_v51 = vpop.f32.mrf.mxu2 }
  0xe8   : > { %v691_v52 = vpop.f32.mrf.mxu3  ;;  %v641_v54 = vadd.f32 %v621_v51, %v570_v50  ;;  %v552_v55 = vpop.f32.mrf.mxu1  ;;  %v363_v51 = vadd.f32 %v1238_v28, %v288_v24  ;;  %v290_v28 = vadd.f32 %v1242_v30, %v1224_v8 }
  0xe9   : > { %v571_v2 = vadd.f32 %v552_v55, %v501_v62 }
  0xea   : > { %v711_v57 = vadd.f32 %v691_v52, %v641_v54  ;;  %v503_v54 = vadd.f32 %v1230_v23, %v433_v45  ;;  %v434_v4 = vadd.f32 %v1240_v29, %v363_v51  ;;  %v364_v23 = vadd.f32 %v1246_v32, %v290_v28 }
  0xeb   : > { %v763_v59 = vpop.f32.mrf.mxu0  ;;  %v293_v32 = vadd.f32 %v1250_v34, %v1220_v5 }
  0xec   : > { %v781_v61 = vadd.f32 %v761_v47, %v711_v57  ;;  %v435_v8 = vadd.f32 %v1248_v33, %v364_v23 }
  0xee   : > { %v793_v0 = vadd.f32 %v1271_v58, %v781_v61 }
  0xef   : > { %v623_v63 = vpop.f32.mrf.mxu2 }
  0xf0   : > { %v693_v3 = vpop.f32.mrf.mxu3  ;;  %v801_v10 = vmax.f32 %v793_v0, 0.0  ;;  %v642_v12 = vadd.f32 %v623_v63, %v571_v2  ;;  %v555_v13 = vpop.f32.mrf.mxu1  ;;  %v504_v63 = vadd.f32 %v1236_v27, %v434_v4 }
  0xf1   : > { %v572_v22 = vadd.f32 %v555_v13, %v502_v39 }
  0xf2   : > { %v810_v15 = vmul.f32 %v1277_v1, %v801_v10  ;;  %v712_v16 = vadd.f32 %v693_v3, %v642_v12 }
  0xf3   : > { %v766_v17 = vpop.f32.mrf.mxu0 }
  0xf4   : > { %v819_v20 = vadd.f32 %v1282_v11, %v810_v15  ;;  %v782_v21 = vadd.f32 %v763_v59, %v712_v16  ;;  %v365_v16 = vadd.f32 %v1254_v36, %v293_v32  ;;  %v295_v36 = vadd.f32 %v1258_v38, %v1226_v9 }
  0xf6   : > { %828 = vst.msk [vmem:[%s1289_s21] sm:$0xff] %vm827_vm1, %v819_v20  ;;  %v794_v6 = vadd.f32 %v1271_v58, %v782_v21  ;;  %v505_v20 = vadd.f32 %v1244_v31, %v435_v8  ;;  %v436_v5 = vadd.f32 %v1256_v37, %v365_v16 }
  0xf7   : > { %v626_v41 = vpop.f32.mrf.mxu2 }
  0xf8   : > { %v696_v44 = vpop.f32.mrf.mxu3  ;;  %v802_v46 = vmax.f32 %v794_v6, 0.0  ;;  %v643_v47 = vadd.f32 %v626_v41, %v572_v22  ;;  %v557_v48 = vpop.f32.mrf.mxu1  ;;  %v506_v24 = vadd.f32 %v1252_v35, %v436_v5 }
  0xf9   : > { %v573_v55 = vadd.f32 %v557_v48, %v503_v54 }
  0xfa   : > { %v811_v49 = vmul.f32 %v1277_v1, %v802_v46  ;;  %v713_v50 = vadd.f32 %v696_v44, %v643_v47  ;;  %v366_v46 = vadd.f32 %v1262_v42, %v295_v36 }
  0xfb   : > { %v768_v19 = vpop.f32.mrf.mxu0 }
  0xfc   : > { %v820_v52 = vadd.f32 %v1282_v11, %v811_v49  ;;  %v783_v53 = vadd.f32 %v766_v17, %v713_v50  ;;  %v437_v9 = vadd.f32 %v1264_v43, %v366_v46 }
  0xfe   : > { %829 = vst.msk [vmem:[%s1289_s21 + $0x8] sm:$0xff] %vm827_vm1, %v820_v52  ;;  %v795_v25 = vadd.f32 %v1271_v58, %v783_v53 }
  0xff   : > { %v628_v56 = vpop.f32.mrf.mxu2 }
 0x100   : > { %v698_v57 = vpop.f32.mrf.mxu3  ;;  %v803_v26 = vmax.f32 %v795_v25, 0.0  ;;  %v644_v59 = vadd.f32 %v628_v56, %v573_v55  ;;  %v560_v60 = vpop.f32.mrf.mxu1  ;;  %v507_v55 = vadd.f32 %v1260_v40, %v437_v9 }
 0x101   : > { %v574_v7 = vadd.f32 %v560_v60, %v504_v63 }
 0x102   : > { %v812_v61 = vmul.f32 %v1277_v1, %v803_v26  ;;  %v714_v62 = vadd.f32 %v698_v57, %v644_v59 }
 0x103   : > { %v771_v3 = vpop.f32.mrf.mxu0 }
 0x104   : > { %v821_v0 = vadd.f32 %v1282_v11, %v812_v61  ;;  %v784_v2 = vadd.f32 %v768_v19, %v714_v62 }
 0x106   : > { %830 = vst.msk [vmem:[%s1289_s21 + $0x10] sm:$0xff] %vm827_vm1, %v821_v0  ;;  %v796_v29 = vadd.f32 %v1271_v58, %v784_v2 }
 0x107   : > { %v631_v10 = vpop.f32.mrf.mxu2 }
 0x108   : > { %v701_v12 = vpop.f32.mrf.mxu3  ;;  %v804_v30 = vmax.f32 %v796_v29, 0.0  ;;  %v645_v13 = vadd.f32 %v631_v10, %v574_v7  ;;  %v562_v14 = vpop.f32.mrf.mxu1 }
 0x109   : > { %v575_v21 = vadd.f32 %v562_v14, %v505_v20 }
 0x10a   : > { %v813_v15 = vmul.f32 %v1277_v1, %v804_v30  ;;  %v715_v27 = vadd.f32 %v701_v12, %v645_v13 }
 0x10b   : > { %v773_v39 = vpop.f32.mrf.mxu0 }
 0x10c   : > { %v822_v17 = vadd.f32 %v1282_v11, %v813_v15  ;;  %v785_v18 = vadd.f32 %v771_v3, %v715_v27 }
 0x10e   : > { %831 = vst.msk [vmem:[%s1289_s21 + $0x18] sm:$0xff] %vm827_vm1, %v822_v17  ;;  %v797_v33 = vadd.f32 %v1271_v58, %v785_v18 }
 0x10f   : > { %v633_v6 = vpop.f32.mrf.mxu2 }
 0x110   : > { %v703_v22 = vpop.f32.mrf.mxu3  ;;  %v805_v34 = vmax.f32 %v797_v33, 0.0  ;;  %v646_v41 = vadd.f32 %v633_v6, %v575_v21  ;;  %v565_v44 = vpop.f32.mrf.mxu1 }
 0x111   : > { %v576_v49 = vadd.f32 %v565_v44, %v506_v24 }
 0x112   : > { %v814_v45 = vmul.f32 %v1277_v1, %v805_v34  ;;  %v716_v31 = vadd.f32 %v703_v22, %v646_v41 }
 0x113   : > { %v776_v52 = vpop.f32.mrf.mxu0 }
 0x114   : > { %v823_v47 = vadd.f32 %v1282_v11, %v814_v45  ;;  %v786_v48 = vadd.f32 %v773_v39, %v716_v31 }
 0x116   : > { %832 = vst.msk [vmem:[%s1289_s21 + $0x20] sm:$0xff] %vm827_vm1, %v823_v47  ;;  %v798_v37 = vadd.f32 %v1271_v58, %v786_v48 }
 0x117   : > { %v636_v50 = vpop.f32.mrf.mxu2 }
 0x118   : > { %v706_v19 = vpop.f32.mrf.mxu3  ;;  %v806_v38 = vmax.f32 %v798_v37, 0.0  ;;  %v647_v51 = vadd.f32 %v636_v50, %v576_v49  ;;  %v567_v54 = vpop.f32.mrf.mxu1 }
 0x119   : > { %v577_v57 = vadd.f32 %v567_v54, %v507_v55 }
 0x11a   : > { %v815_v42 = vmul.f32 %v1277_v1, %v806_v38  ;;  %v717_v53 = vadd.f32 %v706_v19, %v647_v51 }
 0x11b   : > { %v778_v61 = vpop.f32.mrf.mxu0 }
 0x11c   : > { %v824_v35 = vadd.f32 %v1282_v11, %v815_v42  ;;  %v787_v25 = vadd.f32 %v776_v52, %v717_v53 }
 0x11e   : > { %833 = vst.msk [vmem:[%s1289_s21 + $0x28] sm:$0xff] %vm827_vm1, %v824_v35  ;;  %v799_v56 = vadd.f32 %v1271_v58, %v787_v25 }
 0x11f   : > { %v638_v43 = vpop.f32.mrf.mxu2 }
 0x120   : > { %v807_v4 = vmax.f32 %v799_v56, 0.0  ;;  %v648_v26 = vadd.f32 %v638_v43, %v577_v57  ;;  %v708_v59 = vpop.f32.mrf.mxu3 }
 0x122   : > { %v816_v60 = vmul.f32 %v1277_v1, %v807_v4  ;;  %v718_v28 = vadd.f32 %v708_v59, %v648_v26 }
 0x124   : > { %v825_v62 = vadd.f32 %v1282_v11, %v816_v60  ;;  %v788_v23 = vadd.f32 %v778_v61, %v718_v28 }
 0x126   : > { %834 = vst.msk [vmem:[%s1289_s21 + $0x30] sm:$0xff] %vm827_vm1, %v825_v62  ;;  %v800_v40 = vadd.f32 %v1271_v58, %v788_v23 }
 0x128   : > { %v808_v0 = vmax.f32 %v800_v40, 0.0 }
 0x12a   : > { %v817_v2 = vmul.f32 %v1277_v1, %v808_v0 }
 0x12c   : > { %v826_v63 = vadd.f32 %v1282_v11, %v817_v2 }
 0x12e   : > { %835 = vst.msk [vmem:[%s1289_s21 + $0x38] sm:$0xff] %vm827_vm1, %v826_v63 }
 0x12f PF: > { %s13_s12 = sadd.s32 1, %s1068_s12  }
 0x130   : > { %p10_p5 = scmp.ge.s32.totalorder %s13_s12, 4  }
 0x132   :  { %12 = sbr.rel (!%p10_p5) target bundleno = 1 (0x1), region = 72 }

// kernel: feature_conv_layer_single.9
= control target key start
LH: loop header
LB: loop body
LE: loop exit
PB: predicated region body
PF: predicated region fallthrough
CT: control target
= control target key end

     0   :  { %s1225_s12 = smov 0   ;;  %s1533_s0 = inlined_call_operand.vmem [shape: f32[2,10,10,32], index: 0, kind: input, shape index: {}]   ;;  %s1534_s1 = inlined_call_operand.vmem [shape: bf16[9,32,32], index: 1, kind: input, shape index: {}]   ;;  %s1535_s2 = inlined_call_operand.vmem [shape: f32[8,32], index: 2, kind: input, shape index: {}]   ;;  %s1536_s3 = inlined_call_operand.vmem [shape: f32[128,32], index: 3, kind: output, shape index: {}]  }
   0x1 LB: > { %s1231_s13 = sadd.s32 4294967295, %s1203_s12   ;;  %p967_p0 = scmp.ge.s32.totalorder %s1203_s12, 1  ;;  %s1203_s12 = sphi %s1225_s12, %s13_s12  }
   0x2   : > { %p137_p1 = scmp.lt.s32.totalorder %s1203_s12, 3 }
   0x4   : > { %p138_p2 = pnand %p967_p0, %p137_p1 }
   0x5   : > { %p161_p3 = scmp.lt.s32.totalorder (!%p138_p2), %s1231_s13, 1 }
   0x6   : > { %141 = sbr.rel (%p138_p2) target bundleno = 305 (0x131), region = 32 }
   0xb   : > { %v1164_v0 = vld [vmem:[%s1534_s1 + $0x18] sm:$0xff]  ;;  %v1163_v1 = vld [vmem:[%s1534_s1 + $0x10] sm:$0xff]  ;;  %s162_s18 = scalar_select %p161_p3, %s1231_s13, 1  ;;  %v1166_v2 = vld [vmem:[%s1534_s1 + $0x28] sm:$0xff]  ;;  %vm218_vm0 = vcmask 261120  }
   0xc   : > { %1179 = vmatpush.bf16.msra.mxu1 %v1164_v0  ;;  %1180 = vmatpush.bf16.msra.mxu2 %v1164_v0  ;;  %v1168_v3 = vld [vmem:[%s1534_s1 + $0x38] sm:$0xff]  ;;  %v1162_v4 = vld [vmem:[%s1534_s1 + $0x8] sm:$0xff]  ;;  %v1165_v6 = vld [vmem:[%s1534_s1 + $0x20] sm:$0xff] }
   0xd   : > { %1181 = vmatpush.bf16.msra.mxu3 %v1164_v0  ;;  %237 = vmatpush.bf16.msra.mxu0 %v1164_v0  ;;  %s1185_s21 = smul.u32 160, %s162_s18  ;;  %v1170_v5 = vld [vmem:[%s1534_s1 + $0x48] sm:$0xff]  ;;  %v1167_v10 = vld [vmem:[%s1534_s1 + $0x30] sm:$0xff]  ;;  %v1161_v19 = vld [vmem:[%s1534_s1] sm:$0xff] }
   0xe   : > { %v1169_v21 = vld [vmem:[%s1534_s1 + $0x40] sm:$0xff]  ;;  %v1174_v22 = vld [vmem:[%s1534_s1 + $0x68] sm:$0xff]  ;;  %v1176_v23 = vld [vmem:[%s1534_s1 + $0x78] sm:$0xff] }
   0xf   : > { %s1258_s30 = scalar_lea.vmem %s1533_s0, %s1185_s21  ;;  %v1172_v24 = vld [vmem:[%s1534_s1 + $0x58] sm:$0xff]  ;;  %v1178_v25 = vld [vmem:[%s1534_s1 + $0x88] sm:$0xff]  ;;  %v1173_v35 = vld [vmem:[%s1534_s1 + $0x60] sm:$0xff] }
  0x10   : > { %1182 = vmatpush.bf16.msra.mxu1 %v1163_v1  ;;  %1183 = vmatpush.bf16.msra.mxu2 %v1163_v1  ;;  %v191_v7 = vld [vmem:[%s1258_s30 + $0x21] sm:$0xff]  ;;  %v1265_v8 = vld [vmem:[%s1258_s30 + $0x31] sm:$0xff] }
  0x11   : > { %1184 = vmatpush.bf16.msra.mxu3 %v1163_v1  ;;  %238 = vmatpush.bf16.msra.mxu0 %v1163_v1  ;;  %v1268_v9 = vld [vmem:[%s1258_s30 + $0x41] sm:$0xff]  ;;  %v1274_v11 = vpack.c.bf16 %v1265_v8, %v191_v7  ;;  %v1277_v12 = vld [vmem:[%s1258_s30 + $0x51] sm:$0xff] }
  0x12   : > { %v1280_v13 = vld [vmem:[%s1258_s30 + $0x61] sm:$0xff]  ;;  %v1283_v14 = vld [vmem:[%s1258_s30 + $0x71] sm:$0xff]  ;;  %v1287_v15 = vpack.c.bf16 %v1277_v12, %v1268_v9  ;;  %v479_v46 = vpack.c.bf16 %v1268_v9, %v1265_v8 }
  0x13   : > { %v1291_v16 = vpack.c.bf16 %v1283_v14, %v1280_v13  ;;  %v189_v17 = vld [vmem:[%s1258_s30 + $0x1] sm:$0xff]  ;;  %v190_v18 = vld [vmem:[%s1258_s30 + $0x11] sm:$0xff]  ;;  %984 = vmatmul.msk.bf16.vlgmr.msra.gmra.mxu1 %vm218_vm0, %v1274_v11  ;;  %v480_v54 = vpack.c.bf16 %v1280_v13, %v1277_v12 }
  0x14   : > { %360 = vmatpush.bf16.msrb.mxu2 %v1166_v2  ;;  %290 = vmatpush.bf16.msrb.mxu1 %v1162_v4  ;;  %v197_v20 = vpack.c.bf16 %v190_v18, %v189_v17  ;;  %v173_v26 = vld [vmem:[%s1258_s30] sm:$0xff]  ;;  %v174_v27 = vld [vmem:[%s1258_s30 + $0x10] sm:$0xff]  ;;  %v478_v34 = vpack.c.bf16 %v191_v7, %v190_v18 }
  0x15   : > { %439 = vmatpush.bf16.msrb.mxu3 %v1168_v3  ;;  %517 = vmatpush.bf16.msrb.mxu0 %v1170_v5  ;;  %v313_v28 = vld [vmem:[%s1258_s30 + $0x2] sm:$0xff]  ;;  %v314_v29 = vld [vmem:[%s1258_s30 + $0x12] sm:$0xff]  ;;  %v181_v31 = vpack.c.bf16 %v174_v27, %v173_v26 }
  0x16   : > { %985 = vmatmul.msk.bf16.vlgmr.msra.gmra.mxu2 %vm218_vm0, %v1287_v15  ;;  %986 = vmatmul.msk.bf16.vlgmr.msra.gmra.mxu3 %vm218_vm0, %v1291_v16  ;;  %v1016_v30 = vld [vmem:[%s1258_s30 + $0x20] sm:$0xff]  ;;  %v321_v32 = vpack.c.bf16 %v314_v29, %v313_v28  ;;  %v1175_v36 = vld [vmem:[%s1534_s1 + $0x70] sm:$0xff] }
  0x17   : > { %983 = vmatmul.msk.bf16.vlgmr.msra.gmra.mxu0 %vm218_vm0, %v197_v20  ;;  %v400_v33 = vpack.c.bf16 %v1016_v30, %v174_v27  ;;  %v1171_v37 = vld [vmem:[%s1534_s1 + $0x50] sm:$0xff]  ;;  %v1177_v38 = vld [vmem:[%s1534_s1 + $0x80] sm:$0xff] }
  0x18   : > { %361 = vmatpush.bf16.msrb.mxu2 %v1165_v6  ;;  %291 = vmatpush.bf16.msrb.mxu1 %v1161_v19  ;;  %v176_v39 = vld [vmem:[%s1258_s30 + $0x30] sm:$0xff]  ;;  %v315_v40 = vld [vmem:[%s1258_s30 + $0x22] sm:$0xff] }
  0x19   : > { %440 = vmatpush.bf16.msrb.mxu3 %v1167_v10  ;;  %518 = vmatpush.bf16.msrb.mxu0 %v1169_v21  ;;  %v316_v41 = vld [vmem:[%s1258_s30 + $0x32] sm:$0xff]  ;;  %v1018_v42 = vld [vmem:[%s1258_s30 + $0x40] sm:$0xff]  ;;  %v182_v43 = vpack.c.bf16 %v176_v39, %v1016_v30  ;;  %v556_v0 = vpack.c.bf16 %v315_v40, %v314_v29 }
  0x1a   : > { %v322_v44 = vpack.c.bf16 %v316_v41, %v315_v40  ;;  %v401_v45 = vpack.c.bf16 %v1018_v42, %v176_v39  ;;  %v178_v47 = vld [vmem:[%s1258_s30 + $0x50] sm:$0xff]  ;;  %v317_v48 = vld [vmem:[%s1258_s30 + $0x42] sm:$0xff] }
  0x1b   : > { %v318_v49 = vld [vmem:[%s1258_s30 + $0x52] sm:$0xff]  ;;  %v1020_v50 = vld [vmem:[%s1258_s30 + $0x60] sm:$0xff]  ;;  %v183_v51 = vpack.c.bf16 %v178_v47, %v1018_v42  ;;  %v557_v1 = vpack.c.bf16 %v317_v48, %v316_v41 }
  0x1c   : > { %674 = vmatpush.bf16.msra.mxu2 %v1174_v22  ;;  %595 = vmatpush.bf16.msra.mxu1 %v1172_v24  ;;  %v323_v52 = vpack.c.bf16 %v318_v49, %v317_v48  ;;  %v402_v53 = vpack.c.bf16 %v1020_v50, %v178_v47  ;;  %v180_v55 = vld [vmem:[%s1258_s30 + $0x70] sm:$0xff]  ;;  %v319_v56 = vld [vmem:[%s1258_s30 + $0x62] sm:$0xff] }
  0x1d   : > { %752 = vmatpush.bf16.msra.mxu3 %v1176_v23  ;;  %830 = vmatpush.bf16.msra.mxu0 %v1178_v25  ;;  %v320_v57 = vld [vmem:[%s1258_s30 + $0x72] sm:$0xff]  ;;  %v1022_v58 = vld [vmem:[%s1258_s30 + $0x80] sm:$0xff]  ;;  %v184_v60 = vpack.c.bf16 %v180_v55, %v1020_v50  ;;  %v558_v2 = vpack.c.bf16 %v319_v56, %v318_v49 }
  0x1e   : > { %v1046_v59 = vld [vmem:[%s1258_s30 + $0x81] sm:$0xff]  ;;  %v324_v61 = vpack.c.bf16 %v320_v57, %v319_v56  ;;  %v403_v62 = vpack.c.bf16 %v1022_v58, %v180_v55  ;;  %v1094_v4 = vld [vmem:[%s1258_s30 + $0x90] sm:$0xff] }
  0x1f   : > { %v481_v63 = vpack.c.bf16 %v1046_v59, %v1283_v14  ;;  %v1070_v3 = vld [vmem:[%s1258_s30 + $0x82] sm:$0xff]  ;;  %v1118_v5 = vld [vmem:[%s1258_s30 + $0x91] sm:$0xff]  ;;  %v638_v9 = vpack.c.bf16 %v1094_v4, %v1022_v58 }
  0x20   : > { %675 = vmatpush.bf16.msra.mxu2 %v1173_v35  ;;  %596 = vmatpush.bf16.msra.mxu1 %v1171_v37  ;;  %v1142_v6 = vld [vmem:[%s1258_s30 + $0x92] sm:$0xff]  ;;  %v559_v7 = vpack.c.bf16 %v1070_v3, %v320_v57  ;;  %v716_v10 = vpack.c.bf16 %v1118_v5, %v1046_v59  ;;  %s969_s30 = sshll.u32 %s1231_s13, 3 }
  0x21   : > { %753 = vmatpush.bf16.msra.mxu3 %v1175_v36  ;;  %831 = vmatpush.bf16.msra.mxu0 %v1177_v38  ;;  %p167_p4 = scmp.lt.s32.totalorder %s969_s30, 15 }
  0x23   : > { %995 = vmatmul.msk.bf16.vlgmr.msrb.gmra.mxu1 %vm218_vm0, %v181_v31  ;;  %s1538_s30 = smov (!%p167_p4, %s969_s30), 15 }
  0x24   : > { %s970_s7 = sshll.u32 %s1538_s30, 3 }
  0x25   : > { %s1467_s14 = scalar_lea.vmem %s1536_s3, %s970_s7 }
  0x26   : > { %1011 = vmatmul.msk.bf16.vlgmr.msrb.gmra.mxu2 %vm218_vm0, %v321_v32  ;;  %1035 = vmatmul.msk.bf16.vlgmr.msrb.gmra.mxu3 %vm218_vm0, %v400_v33 }
  0x27   : > { %1059 = vmatmul.msk.bf16.vlgmr.msrb.gmra.mxu0 %vm218_vm0, %v478_v34 }
  0x33   : > { %996 = vmatmul.msk.bf16.gmra.mxu1 %vm218_vm0, %v182_v43 }
  0x36   : > { %1012 = vmatmul.msk.bf16.gmra.mxu2 %vm218_vm0, %v322_v44  ;;  %1036 = vmatmul.msk.bf16.gmra.mxu3 %vm218_vm0, %v401_v45 }
  0x37   : > { %1060 = vmatmul.msk.bf16.gmra.mxu0 %vm218_vm0, %v479_v46 }
  0x43   : > { %997 = vmatmul.msk.bf16.gmra.mxu1 %vm218_vm0, %v183_v51 }
  0x46   : > { %1013 = vmatmul.msk.bf16.gmra.mxu2 %vm218_vm0, %v323_v52  ;;  %1037 = vmatmul.msk.bf16.gmra.mxu3 %vm218_vm0, %v402_v53 }
  0x47   : > { %1061 = vmatmul.msk.bf16.gmra.mxu0 %vm218_vm0, %v480_v54 }
  0x53   : > { %998 = vmatmul.msk.bf16.gmra.mxu1 %vm218_vm0, %v184_v60 }
  0x56   : > { %1014 = vmatmul.msk.bf16.gmra.mxu2 %vm218_vm0, %v324_v61  ;;  %1038 = vmatmul.msk.bf16.gmra.mxu3 %vm218_vm0, %v403_v62 }
  0x57   : > { %1062 = vmatmul.msk.bf16.gmra.mxu0 %vm218_vm0, %v481_v63 }
  0x63   : > { %1083 = vmatmul.msk.bf16.vlgmr.msra.gmra.mxu1 %vm218_vm0, %v556_v0 }
  0x66   : > { %1107 = vmatmul.msk.bf16.vlgmr.msra.gmra.mxu2 %vm218_vm0, %v182_v43  ;;  %1131 = vmatmul.msk.bf16.vlgmr.msra.gmra.mxu3 %vm218_vm0, %v1274_v11  ;;  %v794_v11 = vpack.c.bf16 %v1142_v6, %v1070_v3  ;;  %v1449_v3 = vld [vmem:[%s1535_s2] ss:$0 sm:$0xff] }
  0x67   : > { %1155 = vmatmul.msk.bf16.vlgmr.msra.gmra.mxu0 %vm218_vm0, %v322_v44 }
  0x73   : > { %1084 = vmatmul.msk.bf16.gmra.mxu1 %vm218_vm0, %v557_v1 }
  0x76   : > { %1108 = vmatmul.msk.bf16.gmra.mxu2 %vm218_vm0, %v183_v51  ;;  %1132 = vmatmul.msk.bf16.gmra.mxu3 %vm218_vm0, %v1287_v15 }
  0x77   : > { %1156 = vmatmul.msk.bf16.gmra.mxu0 %vm218_vm0, %v323_v52 }
  0x83   : > { %1085 = vmatmul.msk.bf16.gmra.mxu1 %vm218_vm0, %v558_v2 }
  0x86   : > { %1109 = vmatmul.msk.bf16.gmra.mxu2 %vm218_vm0, %v184_v60  ;;  %1133 = vmatmul.msk.bf16.gmra.mxu3 %vm218_vm0, %v1291_v16 }
  0x87   : > { %1157 = vmatmul.msk.bf16.gmra.mxu0 %vm218_vm0, %v324_v61 }
  0x90   : > { %v1390_v8 = vpop.f32.mrf.mxu1 }
  0x93   : > { %1086 = vmatmul.msk.bf16.gmra.mxu1 %vm218_vm0, %v559_v7 }
  0x94   : > { %v240_v12 = vpop.f32.mrf.mxu0 }
  0x96   : > { %1110 = vmatmul.msk.bf16.gmra.mxu2 %vm218_vm0, %v638_v9  ;;  %1134 = vmatmul.msk.bf16.gmra.mxu3 %vm218_vm0, %v716_v10  ;;  %v1455_v10 = vld [vmem:[%s1535_s2 + $0x1] ss:$0 sm:$0xff] }
  0x97   : > { %1158 = vmatmul.msk.bf16.gmra.mxu0 %vm218_vm0, %v794_v11 }
  0x98   : > { %v1400_v15 = vpop.f32.mrf.mxu1 }
  0x99   : > { %v1396_v13 = vpop.f32.mrf.mxu2  ;;  %v1398_v14 = vpop.f32.mrf.mxu3 }
  0x9c   : > { %v242_v16 = vpop.f32.mrf.mxu0 }
  0xa0   : > { %v293_v19 = vpop.f32.mrf.mxu1 }
  0xa1   : > { %v1402_v17 = vpop.f32.mrf.mxu2  ;;  %v1404_v18 = vpop.f32.mrf.mxu3  ;;  %v294_v48 = vadd.f32 %v293_v19, %v240_v12 }
  0xa4   : > { %v520_v20 = vpop.f32.mrf.mxu0 }
  0xa8   : > { %v295_v23 = vpop.f32.mrf.mxu1 }
  0xa9   : > { %v363_v21 = vpop.f32.mrf.mxu2  ;;  %v442_v22 = vpop.f32.mrf.mxu3  ;;  %v296_v55 = vadd.f32 %v295_v23, %v242_v16 }
  0xaa   : > { %v383_v50 = vadd.f32 %v363_v21, %v294_v48 }
  0xac   : > { %v522_v24 = vpop.f32.mrf.mxu0  ;;  %v462_v53 = vadd.f32 %v442_v22, %v383_v50 }
  0xae   : > { %v540_v58 = vadd.f32 %v520_v20, %v462_v53  ;;  %v1460_v20 = vld [vmem:[%s1535_s2 + $0x2] ss:$0 sm:$0xff] }
  0xb0   : > { %v298_v27 = vpop.f32.mrf.mxu1 }
  0xb1   : > { %v365_v25 = vpop.f32.mrf.mxu2  ;;  %v444_v26 = vpop.f32.mrf.mxu3  ;;  %v299_v1 = vadd.f32 %v298_v27, %v1390_v8 }
  0xb2   : > { %v384_v57 = vadd.f32 %v365_v25, %v296_v55 }
  0xb4   : > { %v1406_v28 = vpop.f32.mrf.mxu0  ;;  %v463_v62 = vadd.f32 %v444_v26, %v384_v57 }
  0xb6   : > { %v541_v7 = vadd.f32 %v522_v24, %v463_v62 }
  0xb8   : > { %v300_v31 = vpop.f32.mrf.mxu1 }
  0xb9   : > { %v368_v29 = vpop.f32.mrf.mxu2  ;;  %v447_v30 = vpop.f32.mrf.mxu3  ;;  %v301_v23 = vadd.f32 %v300_v31, %v1400_v15 }
  0xba   : > { %v385_v5 = vadd.f32 %v368_v29, %v299_v1 }
  0xbc   : > { %v1408_v32 = vpop.f32.mrf.mxu0  ;;  %v464_v16 = vadd.f32 %v447_v30, %v385_v5 }
  0xbe   : > { %v542_v48 = vadd.f32 %v1406_v28, %v464_v16 }
  0xc0   : > { %v1412_v35 = vpop.f32.mrf.mxu1 }
  0xc1   : > { %v370_v33 = vpop.f32.mrf.mxu2  ;;  %v1410_v34 = vpop.f32.mrf.mxu3 }
  0xc2   : > { %v386_v27 = vadd.f32 %v370_v33, %v301_v23  ;;  %v304_v33 = vadd.f32 %v1412_v35, %v1396_v13 }
  0xc4   : > { %v1414_v36 = vpop.f32.mrf.mxu0 }
  0xc8   : > { %v1420_v39 = vpop.f32.mrf.mxu1 }
  0xc9   : > { %v1416_v37 = vpop.f32.mrf.mxu2  ;;  %v1418_v38 = vpop.f32.mrf.mxu3 }
  0xcc   : > { %v1422_v40 = vpop.f32.mrf.mxu0 }
  0xd0   : > { %v1428_v43 = vpop.f32.mrf.mxu1 }
  0xd1   : > { %v1424_v41 = vpop.f32.mrf.mxu2  ;;  %v1426_v42 = vpop.f32.mrf.mxu3 }
  0xd4   : > { %v1430_v44 = vpop.f32.mrf.mxu0 }
  0xd8   : > { %v1436_v47 = vpop.f32.mrf.mxu1 }
  0xd9   : > { %v1432_v45 = vpop.f32.mrf.mxu2  ;;  %v1434_v46 = vpop.f32.mrf.mxu3 }
  0xdc   : > { %v1438_v49 = vpop.f32.mrf.mxu0 }
  0xe0   : > { %v598_v54 = vpop.f32.mrf.mxu1 }
  0xe1   : > { %v1440_v51 = vpop.f32.mrf.mxu2  ;;  %v1442_v52 = vpop.f32.mrf.mxu3  ;;  %v618_v59 = vadd.f32 %v598_v54, %v540_v58  ;;  %v465_v54 = vadd.f32 %v1410_v34, %v386_v27 }
  0xe4   : > { %v833_v56 = vpop.f32.mrf.mxu0 }
  0xe8   : > { %v600_v0 = vpop.f32.mrf.mxu1 }
  0xe9   : > { %v677_v60 = vpop.f32.mrf.mxu2  ;;  %v755_v61 = vpop.f32.mrf.mxu3  ;;  %v619_v11 = vadd.f32 %v600_v0, %v541_v7 }
  0xea   : > { %v697_v63 = vadd.f32 %v677_v60, %v618_v59  ;;  %v387_v60 = vadd.f32 %v1416_v37, %v304_v33  ;;  %v306_v37 = vadd.f32 %v1420_v39, %v1402_v17 }
  0xec   : > { %v775_v2 = vadd.f32 %v755_v61, %v697_v63  ;;  %v835_v4 = vpop.f32.mrf.mxu0  ;;  %v543_v63 = vadd.f32 %v1408_v32, %v465_v54  ;;  %v466_v13 = vadd.f32 %v1418_v38, %v387_v60  ;;  %v388_v32 = vadd.f32 %v1424_v41, %v306_v37 }
  0xed   : > { %v309_v41 = vadd.f32 %v1428_v43, %v1398_v14 }
  0xee   : > { %v853_v6 = vadd.f32 %v833_v56, %v775_v2  ;;  %v467_v17 = vadd.f32 %v1426_v42, %v388_v32 }
  0xf0   : > { %v865_v9 = vadd.f32 %v1449_v3, %v853_v6  ;;  %v603_v22 = vpop.f32.mrf.mxu1 }
  0xf1   : > { %v679_v8 = vpop.f32.mrf.mxu2  ;;  %v757_v12 = vpop.f32.mrf.mxu3  ;;  %v620_v31 = vadd.f32 %v603_v22, %v542_v48 }
  0xf2   : > { %v873_v19 = vmax.f32 %v865_v9, 0.0  ;;  %v698_v21 = vadd.f32 %v679_v8, %v619_v11  ;;  %v544_v8 = vadd.f32 %v1414_v36, %v466_v13 }
  0xf4   : > { %v882_v24 = vmul.f32 %v1455_v10, %v873_v19  ;;  %v776_v25 = vadd.f32 %v757_v12, %v698_v21  ;;  %v838_v26 = vpop.f32.mrf.mxu0 }
  0xf6   : > { %v891_v29 = vadd.f32 %v1460_v20, %v882_v24  ;;  %v854_v30 = vadd.f32 %v835_v4, %v776_v25  ;;  %v389_v25 = vadd.f32 %v1432_v45, %v309_v41  ;;  %v311_v45 = vadd.f32 %v1436_v47, %v1404_v18 }
  0xf8   : > { %899 = vst.msk [vmem:[%s1467_s14] sm:$0xff] %vm218_vm0, %v891_v29  ;;  %v866_v15 = vadd.f32 %v1449_v3, %v854_v30  ;;  %v605_v57 = vpop.f32.mrf.mxu1  ;;  %v545_v29 = vadd.f32 %v1422_v40, %v467_v17  ;;  %v468_v14 = vadd.f32 %v1434_v46, %v389_v25 }
  0xf9   : > { %v682_v50 = vpop.f32.mrf.mxu2  ;;  %v760_v53 = vpop.f32.mrf.mxu3  ;;  %v621_v0 = vadd.f32 %v605_v57, %v543_v63 }
  0xfa   : > { %v874_v55 = vmax.f32 %v866_v15, 0.0  ;;  %v699_v56 = vadd.f32 %v682_v50, %v620_v31  ;;  %v546_v33 = vadd.f32 %v1430_v44, %v468_v14 }
  0xfc   : > { %v883_v58 = vmul.f32 %v1455_v10, %v874_v55  ;;  %v777_v59 = vadd.f32 %v760_v53, %v699_v56  ;;  %v840_v28 = vpop.f32.mrf.mxu0  ;;  %v390_v55 = vadd.f32 %v1440_v51, %v311_v45 }
  0xfe   : > { %v892_v61 = vadd.f32 %v1460_v20, %v883_v58  ;;  %v855_v62 = vadd.f32 %v838_v26, %v777_v59  ;;  %v469_v18 = vadd.f32 %v1442_v52, %v390_v55 }
 0x100   : > { %900 = vst.msk [vmem:[%s1467_s14 + $0x8] sm:$0xff] %vm218_vm0, %v892_v61  ;;  %v867_v34 = vadd.f32 %v1449_v3, %v855_v62  ;;  %v608_v5 = vpop.f32.mrf.mxu1 }
 0x101   : > { %v684_v1 = vpop.f32.mrf.mxu2  ;;  %v762_v2 = vpop.f32.mrf.mxu3  ;;  %v622_v16 = vadd.f32 %v608_v5, %v544_v8 }
 0x102   : > { %v875_v35 = vmax.f32 %v867_v34, 0.0  ;;  %v700_v4 = vadd.f32 %v684_v1, %v621_v0  ;;  %v547_v0 = vadd.f32 %v1438_v49, %v469_v18 }
 0x104   : > { %v884_v6 = vmul.f32 %v1455_v10, %v875_v35  ;;  %v778_v7 = vadd.f32 %v762_v2, %v700_v4  ;;  %v843_v12 = vpop.f32.mrf.mxu0 }
 0x106   : > { %v893_v9 = vadd.f32 %v1460_v20, %v884_v6  ;;  %v856_v11 = vadd.f32 %v840_v28, %v778_v7 }
 0x108   : > { %901 = vst.msk [vmem:[%s1467_s14 + $0x10] sm:$0xff] %vm218_vm0, %v893_v9  ;;  %v868_v38 = vadd.f32 %v1449_v3, %v856_v11  ;;  %v610_v23 = vpop.f32.mrf.mxu1 }
 0x109   : > { %v687_v19 = vpop.f32.mrf.mxu2  ;;  %v765_v21 = vpop.f32.mrf.mxu3  ;;  %v623_v30 = vadd.f32 %v610_v23, %v545_v29 }
 0x10a   : > { %v876_v39 = vmax.f32 %v868_v38, 0.0  ;;  %v701_v22 = vadd.f32 %v687_v19, %v622_v16 }
 0x10c   : > { %v885_v24 = vmul.f32 %v1455_v10, %v876_v39  ;;  %v779_v36 = vadd.f32 %v765_v21, %v701_v22  ;;  %v845_v48 = vpop.f32.mrf.mxu0 }
 0x10e   : > { %v894_v26 = vadd.f32 %v1460_v20, %v885_v24  ;;  %v857_v27 = vadd.f32 %v843_v12, %v779_v36 }
 0x110   : > { %902 = vst.msk [vmem:[%s1467_s14 + $0x18] sm:$0xff] %vm218_vm0, %v894_v26  ;;  %v869_v42 = vadd.f32 %v1449_v3, %v857_v27  ;;  %v613_v53 = vpop.f32.mrf.mxu1 }
 0x111   : > { %v689_v15 = vpop.f32.mrf.mxu2  ;;  %v767_v31 = vpop.f32.mrf.mxu3  ;;  %v624_v58 = vadd.f32 %v613_v53, %v546_v33 }
 0x112   : > { %v877_v43 = vmax.f32 %v869_v42, 0.0  ;;  %v702_v50 = vadd.f32 %v689_v15, %v623_v30 }
 0x114   : > { %v886_v54 = vmul.f32 %v1455_v10, %v877_v43  ;;  %v780_v40 = vadd.f32 %v767_v31, %v702_v50  ;;  %v848_v61 = vpop.f32.mrf.mxu0 }
 0x116   : > { %v895_v56 = vadd.f32 %v1460_v20, %v886_v54  ;;  %v858_v57 = vadd.f32 %v845_v48, %v780_v40 }
 0x118   : > { %903 = vst.msk [vmem:[%s1467_s14 + $0x20] sm:$0xff] %vm218_vm0, %v895_v56  ;;  %v870_v46 = vadd.f32 %v1449_v3, %v858_v57  ;;  %v615_v63 = vpop.f32.mrf.mxu1 }
 0x119   : > { %v692_v59 = vpop.f32.mrf.mxu2  ;;  %v770_v28 = vpop.f32.mrf.mxu3  ;;  %v625_v2 = vadd.f32 %v615_v63, %v547_v0 }
 0x11a   : > { %v878_v47 = vmax.f32 %v870_v46, 0.0  ;;  %v703_v60 = vadd.f32 %v692_v59, %v624_v58 }
 0x11c   : > { %v887_v51 = vmul.f32 %v1455_v10, %v878_v47  ;;  %v781_v62 = vadd.f32 %v770_v28, %v703_v60  ;;  %v850_v6 = vpop.f32.mrf.mxu0 }
 0x11e   : > { %v896_v44 = vadd.f32 %v1460_v20, %v887_v51  ;;  %v859_v34 = vadd.f32 %v848_v61, %v781_v62 }
 0x120   : > { %904 = vst.msk [vmem:[%s1467_s14 + $0x28] sm:$0xff] %vm218_vm0, %v896_v44  ;;  %v871_v1 = vadd.f32 %v1449_v3, %v859_v34 }
 0x121   : > { %v694_v52 = vpop.f32.mrf.mxu2  ;;  %v772_v4 = vpop.f32.mrf.mxu3 }
 0x122   : > { %v879_v13 = vmax.f32 %v871_v1, 0.0  ;;  %v704_v35 = vadd.f32 %v694_v52, %v625_v2 }
 0x124   : > { %v888_v5 = vmul.f32 %v1455_v10, %v879_v13  ;;  %v782_v37 = vadd.f32 %v772_v4, %v704_v35 }
 0x126   : > { %v897_v7 = vadd.f32 %v1460_v20, %v888_v5  ;;  %v860_v32 = vadd.f32 %v850_v6, %v782_v37 }
 0x128   : > { %905 = vst.msk [vmem:[%s1467_s14 + $0x30] sm:$0xff] %vm218_vm0, %v897_v7  ;;  %v872_v49 = vadd.f32 %v1449_v3, %v860_v32 }
 0x12a   : > { %v880_v9 = vmax.f32 %v872_v49, 0.0 }
 0x12c   : > { %v889_v11 = vmul.f32 %v1455_v10, %v880_v9 }
 0x12e   : > { %v898_v8 = vadd.f32 %v1460_v20, %v889_v11 }
 0x130   : > { %906 = vst.msk [vmem:[%s1467_s14 + $0x38] sm:$0xff] %vm218_vm0, %v898_v8 }
 0x131 PF: > { %s13_s12 = sadd.s32 1, %s1203_s12  }
 0x132   : > { %p10_p5 = scmp.ge.s32.totalorder %s13_s12, 4  }
 0x134   :  { %12 = sbr.rel (!%p10_p5) target bundleno = 1 (0x1), region = 72 }

// kernel: feature_conv_layer_single.10
= control target key start
LH: loop header
LB: loop body
LE: loop exit
PB: predicated region body
PF: predicated region fallthrough
CT: control target
= control target key end

     0   :  { %s664_s12 = smov 0   ;;  %s819_s0 = inlined_call_operand.vmem [shape: f32[2,10,10,128], index: 0, kind: input, shape index: {}]   ;;  %s820_s1 = inlined_call_operand.vmem [shape: bf16[128,32], index: 1, kind: input, shape index: {}]   ;;  %s821_s2 = inlined_call_operand.vmem [shape: f32[8,32], index: 2, kind: input, shape index: {}]   ;;  %s822_s3 = inlined_call_operand.vmem [shape: f32[128,32], index: 3, kind: output, shape index: {}]  }
   0x1 LB: > { %s670_s13 = sadd.s32 4294967295, %s642_s12   ;;  %p506_p0 = scmp.ge.s32.totalorder %s642_s12, 1  ;;  %s642_s12 = sphi %s664_s12, %s13_s12  }
   0x2   : > { %p137_p1 = scmp.lt.s32.totalorder %s642_s12, 3 }
   0x4   : > { %p138_p2 = pnand %p506_p0, %p137_p1 }
   0x5   : > { %p161_p3 = scmp.lt.s32.totalorder (!%p138_p2), %s670_s13, 1  ;;  %s508_s8 = sshll.u32 (!%p138_p2), %s670_s13, 3 }
   0x6   : > { %141 = sbr.rel (%p138_p2) target bundleno = 198 (0xc6), region = 32  ;;  %p167_p4 = scmp.lt.s32.totalorder (!%p138_p2), %s508_s8, 15 }
   0xb   : > { %v599_v0 = vld [vmem:[%s820_s1 + $0x38] sm:$0xff]  ;;  %v598_v1 = vld [vmem:[%s820_s1 + $0x30] sm:$0xff]  ;;  %s162_s18 = scalar_select %p161_p3, %s670_s13, 1  ;;  %v597_v2 = vld [vmem:[%s820_s1 + $0x28] sm:$0xff]  ;;  %vm437_vm0 = vcmask 261120  }
   0xc   : > { %382 = vmatpush.bf16.msra.mxu0 %v599_v0  ;;  %600 = vmatpush.bf16.msra.mxu1 %v599_v0  ;;  %v596_v6 = vld [vmem:[%s820_s1 + $0x20] sm:$0xff]  ;;  %v595_v36 = vld [vmem:[%s820_s1 + $0x18] sm:$0xff]  ;;  %v594_v54 = vld [vmem:[%s820_s1 + $0x10] sm:$0xff]  ;;  %s824_s8 = smov (!%p167_p4, %s508_s8), 15 }
   0xd   : > { %601 = vmatpush.bf16.msra.mxu2 %v599_v0  ;;  %602 = vmatpush.bf16.msra.mxu3 %v599_v0  ;;  %s624_s19 = smul.u32 160, %s162_s18  ;;  %s509_s15 = sshll.u32 %s824_s8, 3 }
   0xf   : > { %s688_s24 = scalar_lea.vmem %s819_s0, %s624_s19  ;;  %s798_s19 = scalar_lea.vmem %s822_s3, %s509_s15 }
  0x10   : > { %383 = vmatpush.bf16.msra.mxu0 %v598_v1  ;;  %603 = vmatpush.bf16.msra.mxu1 %v598_v1  ;;  %v172_v3 = vld [vmem:[%s688_s24] sm:$0xff]  ;;  %v173_v4 = vld [vmem:[%s688_s24 + $0x10] sm:$0xff] }
  0x11   : > { %604 = vmatpush.bf16.msra.mxu2 %v598_v1  ;;  %605 = vmatpush.bf16.msra.mxu3 %v598_v1  ;;  %v180_v5 = vld [vmem:[%s688_s24 + $0x1] sm:$0xff]  ;;  %v181_v7 = vld [vmem:[%s688_s24 + $0x11] sm:$0xff] }
  0x12   : > { %v188_v8 = vmax.f32 %v172_v3, %v180_v5  ;;  %v196_v9 = vld [vmem:[%s688_s24 + $0x2] sm:$0xff]  ;;  %v197_v10 = vld [vmem:[%s688_s24 + $0x12] sm:$0xff]  ;;  %v189_v11 = vmax.f32 %v173_v4, %v181_v7 }
  0x13   : > { %v511_v12 = vld [vmem:[%s688_s24 + $0x20] sm:$0xff]  ;;  %v535_v16 = vld [vmem:[%s688_s24 + $0x30] sm:$0xff] }
  0x14   : > { %v701_v13 = vld [vmem:[%s688_s24 + $0x21] sm:$0xff]  ;;  %384 = vmatpush.bf16.msra.mxu0 %v597_v2  ;;  %606 = vmatpush.bf16.msra.mxu1 %v597_v2  ;;  %v204_v15 = vmax.f32 %v188_v8, %v196_v9  ;;  %v708_v17 = vld [vmem:[%s688_s24 + $0x31] sm:$0xff]  ;;  %v205_v20 = vmax.f32 %v189_v11, %v197_v10 }
  0x15   : > { %v704_v14 = vld [vmem:[%s688_s24 + $0x22] sm:$0xff]  ;;  %v711_v18 = vld [vmem:[%s688_s24 + $0x32] sm:$0xff]  ;;  %v190_v19 = vmax.f32 %v511_v12, %v701_v13  ;;  %607 = vmatpush.bf16.msra.mxu2 %v597_v2  ;;  %608 = vmatpush.bf16.msra.mxu3 %v597_v2  ;;  %v191_v21 = vmax.f32 %v535_v16, %v708_v17 }
  0x16   : > { %v513_v22 = vld [vmem:[%s688_s24 + $0x40] sm:$0xff]  ;;  %v221_v25 = vmax.f32 %v204_v15, %v173_v4  ;;  %v537_v27 = vld [vmem:[%s688_s24 + $0x50] sm:$0xff]  ;;  %v222_v31 = vmax.f32 %v205_v20, %v511_v12 }
  0x17   : > { %v717_v23 = vld [vmem:[%s688_s24 + $0x41] sm:$0xff]  ;;  %v206_v26 = vmax.f32 %v190_v19, %v704_v14  ;;  %v725_v28 = vld [vmem:[%s688_s24 + $0x51] sm:$0xff]  ;;  %v207_v32 = vmax.f32 %v191_v21, %v711_v18 }
  0x18   : > { %v720_v24 = vld [vmem:[%s688_s24 + $0x42] sm:$0xff]  ;;  %v728_v29 = vld [vmem:[%s688_s24 + $0x52] sm:$0xff]  ;;  %v192_v30 = vmax.f32 %v513_v22, %v717_v23  ;;  %v193_v33 = vmax.f32 %v537_v27, %v725_v28  ;;  %385 = vmatpush.bf16.msra.mxu0 %v596_v6  ;;  %609 = vmatpush.bf16.msra.mxu1 %v596_v6  ;;  %v237_v37 = vmax.f32 %v221_v25, %v181_v7 }
  0x19   : > { %v515_v34 = vld [vmem:[%s688_s24 + $0x60] sm:$0xff]  ;;  %v223_v38 = vmax.f32 %v206_v26, %v535_v16  ;;  %v539_v40 = vld [vmem:[%s688_s24 + $0x70] sm:$0xff]  ;;  %610 = vmatpush.bf16.msra.mxu2 %v596_v6  ;;  %611 = vmatpush.bf16.msra.mxu3 %v596_v6  ;;  %v238_v42 = vmax.f32 %v222_v31, %v701_v13  ;;  %v224_v43 = vmax.f32 %v207_v32, %v513_v22  ;;  %v593_v7 = vld [vmem:[%s820_s1 + $0x8] sm:$0xff] }
  0x1a   : > { %v735_v35 = vld [vmem:[%s688_s24 + $0x61] sm:$0xff]  ;;  %v208_v39 = vmax.f32 %v192_v30, %v720_v24  ;;  %v743_v41 = vld [vmem:[%s688_s24 + $0x71] sm:$0xff]  ;;  %v209_v44 = vmax.f32 %v193_v33, %v728_v29  ;;  %v253_v45 = vmax.f32 %v237_v37, %v197_v10 }
  0x1b   : > { %v239_v46 = vmax.f32 %v223_v38, %v708_v17  ;;  %v194_v48 = vmax.f32 %v515_v34, %v735_v35  ;;  %v254_v49 = vmax.f32 %v238_v42, %v704_v14  ;;  %v240_v50 = vmax.f32 %v224_v43, %v717_v23  ;;  %v531_v52 = vld [vmem:[%s688_s24 + $0x62] sm:$0xff]  ;;  %v555_v58 = vld [vmem:[%s688_s24 + $0x72] sm:$0xff]  ;;  %v633_v42 = vld [vmem:[%s821_s2] ss:$0 sm:$0xff] }
  0x1c   : > { %v225_v47 = vmax.f32 %v208_v39, %v537_v27  ;;  %v226_v51 = vmax.f32 %v209_v44, %v515_v34  ;;  %v195_v53 = vmax.f32 %v539_v40, %v743_v41  ;;  %386 = vmatpush.bf16.msra.mxu0 %v595_v36  ;;  %612 = vmatpush.bf16.msra.mxu1 %v595_v36  ;;  %v517_v6 = vld [vmem:[%s688_s24 + $0x80] sm:$0xff]  ;;  %v549_v32 = vld [vmem:[%s688_s24 + $0x91] sm:$0xff] }
  0x1d   : > { %v270_v55 = vmax.f32 %v253_v45, %v511_v12  ;;  %v255_v56 = vmax.f32 %v239_v46, %v711_v18  ;;  %613 = vmatpush.bf16.msra.mxu2 %v595_v36  ;;  %614 = vmatpush.bf16.msra.mxu3 %v595_v36  ;;  %v271_v59 = vmax.f32 %v254_v49, %v535_v16  ;;  %v525_v12 = vld [vmem:[%s688_s24 + $0x81] sm:$0xff]  ;;  %v557_v36 = vld [vmem:[%s688_s24 + $0x92] sm:$0xff] }
  0x1e   : > { %v241_v57 = vmax.f32 %v225_v47, %v725_v28  ;;  %v256_v60 = vmax.f32 %v240_v50, %v720_v24  ;;  %v242_v61 = vmax.f32 %v226_v51, %v735_v35  ;;  %v210_v1 = vmax.f32 %v194_v48, %v531_v52  ;;  %v634_v46 = vld [vmem:[%s821_s2 + $0x1] ss:$0 sm:$0xff]  ;;  %v635_v49 = vld [vmem:[%s821_s2 + $0x2] ss:$0 sm:$0xff] }
  0x1f   : > { %v286_v62 = vmax.f32 %v270_v55, %v701_v13  ;;  %v272_v63 = vmax.f32 %v255_v56, %v513_v22  ;;  %v287_v2 = vmax.f32 %v271_v59, %v708_v17  ;;  %v211_v5 = vmax.f32 %v195_v53, %v555_v58 }
  0x20   : > { %v257_v0 = vmax.f32 %v241_v57, %v728_v29  ;;  %v273_v3 = vmax.f32 %v256_v60, %v537_v27  ;;  %v258_v4 = vmax.f32 %v242_v61, %v531_v52  ;;  %387 = vmatpush.bf16.msra.mxu0 %v594_v54  ;;  %615 = vmatpush.bf16.msra.mxu1 %v594_v54 }
  0x21   : > { %v288_v8 = vmax.f32 %v272_v63, %v717_v23  ;;  %616 = vmatpush.bf16.msra.mxu2 %v594_v54  ;;  %617 = vmatpush.bf16.msra.mxu3 %v594_v54  ;;  %v302_v13 = vmax.f32 %v286_v62, %v704_v14  ;;  %v227_v16 = vmax.f32 %v210_v1, %v539_v40  ;;  %v533_v23 = vld [vmem:[%s688_s24 + $0x82] sm:$0xff] }
  0x22   : > { %v274_v9 = vmax.f32 %v257_v0, %v515_v34  ;;  %v289_v10 = vmax.f32 %v273_v3, %v725_v28  ;;  %v275_v11 = vmax.f32 %v258_v4, %v539_v40  ;;  %v228_v17 = vmax.f32 %v211_v5, %v517_v6  ;;  %v592_v14 = vld [vmem:[%s820_s1] sm:$0xff] }
  0x23   : > { %v303_v19 = vmax.f32 %v287_v2, %v711_v18  ;;  %v304_v20 = vmax.f32 %v288_v8, %v720_v24  ;;  %v243_v26 = vmax.f32 %v227_v16, %v743_v41  ;;  %v541_v24 = vld [vmem:[%s688_s24 + $0x90] sm:$0xff] }
  0x24   : > { %v290_v15 = vmax.f32 %v274_v9, %v735_v35  ;;  %v305_v21 = vmax.f32 %v289_v10, %v728_v29  ;;  %v291_v22 = vmax.f32 %v275_v11, %v743_v41  ;;  %388 = vmatpush.bf16.msra.mxu0 %v593_v7  ;;  %618 = vmatpush.bf16.msra.mxu1 %v593_v7 }
  0x25   : > { %v244_v27 = vmax.f32 %v228_v17, %v525_v12  ;;  %619 = vmatpush.bf16.msra.mxu2 %v593_v7  ;;  %620 = vmatpush.bf16.msra.mxu3 %v593_v7  ;;  %v259_v28 = vmax.f32 %v243_v26, %v555_v58  ;;  %v310_v30 = vpack.c.bf16 %v303_v19, %v302_v13 }
  0x26   : > { %v306_v25 = vmax.f32 %v290_v15, %v531_v52  ;;  %v307_v18 = vmax.f32 %v291_v22, %v555_v58  ;;  %v311_v31 = vpack.c.bf16 %v305_v21, %v304_v20 }
  0x27   : > { %v260_v29 = vmax.f32 %v244_v27, %v533_v23  ;;  %v276_v34 = vmax.f32 %v259_v28, %v517_v6 }
  0x28   : > { %389 = vmatpush.bf16.msra.mxu0 %v592_v14  ;;  %621 = vmatpush.bf16.msra.mxu1 %v592_v14  ;;  %v312_v33 = vpack.c.bf16 %v307_v18, %v306_v25 }
  0x29   : > { %v277_v35 = vmax.f32 %v260_v29, %v541_v24  ;;  %622 = vmatpush.bf16.msra.mxu2 %v592_v14  ;;  %623 = vmatpush.bf16.msra.mxu3 %v592_v14  ;;  %v292_v37 = vmax.f32 %v276_v34, %v525_v12 }
  0x2b   : > { %v293_v38 = vmax.f32 %v277_v35, %v549_v32  ;;  %390 = vmatmul.bf16.vlgmr.msra.gmra.mxu0 %v310_v30  ;;  %395 = vmatmul.bf16.vlgmr.msra.gmra.mxu1 %v311_v31  ;;  %v308_v39 = vmax.f32 %v292_v37, %v533_v23 }
  0x2c   : > { %400 = vmatmul.bf16.vlgmr.msra.gmra.mxu2 %v312_v33 }
  0x2d   : > { %v309_v40 = vmax.f32 %v293_v38, %v557_v36 }
  0x2f   : > { %v313_v41 = vpack.c.bf16 %v309_v40, %v308_v39 }
  0x31   : > { %405 = vmatmul.bf16.vlgmr.msra.gmra.mxu3 %v313_v41 }
  0xa8   : > { %v391_v43 = vpop.f32.mrf.mxu0  ;;  %v396_v44 = vpop.f32.mrf.mxu1 }
  0xa9   : > { %v392_v45 = vadd.f32 %v633_v42, %v391_v43  ;;  %v397_v47 = vadd.f32 %v633_v42, %v396_v44 }
  0xab   : > { %v411_v48 = vmax.f32 %v392_v45, 0.0  ;;  %v413_v50 = vmax.f32 %v397_v47, 0.0 }
  0xad   : > { %v420_v51 = vmul.f32 %v634_v46, %v411_v48  ;;  %v422_v52 = vmul.f32 %v634_v46, %v413_v50 }
  0xaf   : > { %v429_v53 = vadd.f32 %v635_v49, %v420_v51  ;;  %v431_v54 = vadd.f32 %v635_v49, %v422_v52  ;;  %v401_v55 = vpop.f32.mrf.mxu2 }
  0xb0   : > { %v402_v56 = vadd.f32 %v633_v42, %v401_v55  ;;  %v393_v57 = vpop.f32.mrf.mxu0  ;;  %v398_v58 = vpop.f32.mrf.mxu1 }
  0xb1   : > { %438 = vst.msk [vmem:[%s798_s19] sm:$0xff] %vm437_vm0, %v429_v53  ;;  %v394_v59 = vadd.f32 %v633_v42, %v393_v57  ;;  %v399_v60 = vadd.f32 %v633_v42, %v398_v58 }
  0xb2   : > { %440 = vst.msk [vmem:[%s798_s19 + $0x10] sm:$0xff] %vm437_vm0, %v431_v54  ;;  %v415_v61 = vmax.f32 %v402_v56, 0.0 }
  0xb3   : > { %v412_v63 = vmax.f32 %v394_v59, 0.0  ;;  %v414_v0 = vmax.f32 %v399_v60, 0.0 }
  0xb4   : > { %v406_v62 = vpop.f32.mrf.mxu3  ;;  %v424_v1 = vmul.f32 %v634_v46, %v415_v61 }
  0xb5   : > { %v407_v2 = vadd.f32 %v633_v42, %v406_v62  ;;  %v421_v3 = vmul.f32 %v634_v46, %v412_v63  ;;  %v423_v4 = vmul.f32 %v634_v46, %v414_v0 }
  0xb6   : > { %v433_v5 = vadd.f32 %v635_v49, %v424_v1 }
  0xb7   : > { %v417_v6 = vmax.f32 %v407_v2, 0.0  ;;  %v430_v7 = vadd.f32 %v635_v49, %v421_v3  ;;  %v432_v8 = vadd.f32 %v635_v49, %v423_v4  ;;  %v403_v9 = vpop.f32.mrf.mxu2 }
  0xb8   : > { %442 = vst.msk [vmem:[%s798_s19 + $0x20] sm:$0xff] %vm437_vm0, %v433_v5  ;;  %v404_v11 = vadd.f32 %v633_v42, %v403_v9 }
  0xb9   : > { %v426_v10 = vmul.f32 %v634_v46, %v417_v6  ;;  %439 = vst.msk [vmem:[%s798_s19 + $0x8] sm:$0xff] %vm437_vm0, %v430_v7 }
  0xba   : > { %441 = vst.msk [vmem:[%s798_s19 + $0x18] sm:$0xff] %vm437_vm0, %v432_v8  ;;  %v416_v13 = vmax.f32 %v404_v11, 0.0 }
  0xbb   : > { %v435_v12 = vadd.f32 %v635_v49, %v426_v10 }
  0xbc   : > { %v408_v15 = vpop.f32.mrf.mxu3  ;;  %v425_v16 = vmul.f32 %v634_v46, %v416_v13 }
  0xbd   : > { %444 = vst.msk [vmem:[%s798_s19 + $0x30] sm:$0xff] %vm437_vm0, %v435_v12  ;;  %v409_v17 = vadd.f32 %v633_v42, %v408_v15 }
  0xbe   : > { %v434_v19 = vadd.f32 %v635_v49, %v425_v16 }
  0xbf   : > { %v418_v20 = vmax.f32 %v409_v17, 0.0 }
  0xc0   : > { %443 = vst.msk [vmem:[%s798_s19 + $0x28] sm:$0xff] %vm437_vm0, %v434_v19 }
  0xc1   : > { %v427_v21 = vmul.f32 %v634_v46, %v418_v20 }
  0xc3   : > { %v436_v22 = vadd.f32 %v635_v49, %v427_v21 }
  0xc5   : > { %445 = vst.msk [vmem:[%s798_s19 + $0x38] sm:$0xff] %vm437_vm0, %v436_v22 }
  0xc6 PF: > { %s13_s12 = sadd.s32 1, %s642_s12  }
  0xc7   : > { %p10_p5 = scmp.ge.s32.totalorder %s13_s12, 4  }
  0xc9   :  { %12 = sbr.rel (!%p10_p5) target bundleno = 1 (0x1), region = 64 }

// kernel: feature_conv_layer_single.11
= control target key start
LH: loop header
LB: loop body
LE: loop exit
PB: predicated region body
PF: predicated region fallthrough
CT: control target
= control target key end

     0   :  { %8 = vsyncpa [#allocation3], 0  ;;  %s8835_s0 = inlined_call_operand.vmem [shape: f32[2,10,10,256], index: 0, kind: input, shape index: {}]   ;;  %s8836_s1 = inlined_call_operand.vmem [shape: bf16[9,256,256], index: 1, kind: input, shape index: {}]   ;;  %s8837_s2 = inlined_call_operand.vmem [shape: f32[8,256], index: 2, kind: input, shape index: {}]   ;;  %s8838_s3 = inlined_call_operand.hbm [shape: f32[128,256], index: 3, kind: output, shape index: {}]  }
   0x1   :  { %10 = vsyncpa [#allocation3 + $0x1], 0  ;;  %s6133_s12 = smov 0   ;;  %s6135_s13 = smov 0  }
   0x2   :  { %s6137_s14 = smov 0   ;;  %s6139_s15 = smov 0  }
   0x3 LB: > { %s6154_s16 = sadd.s32 4294967295, %s6109_s15   ;;  %s4133_s17 = sadd.s32 4294967294, %s6109_s15   ;;  %s6109_s15 = sphi %s6139_s15, %s8848_s15   ;;  %s6105_s14 = sphi %s6137_s14, %s8847_s14   ;;  %s6101_s13 = sphi %s6135_s13, %s8846_s13   ;;  %s6097_s12 = sphi %s6133_s12, %s8845_s12  }
   0x4   : > { %s6158_s18 = sadd.s32 1, %s6109_s15   ;;  %s91_s19 = sadd.s32 1, %s6105_s14 }
   0x5   : > { %s88_s20 = ssub.s32 %s6109_s15, %s6158_s18  ;;  %p101_p0 = scmp.ne.s32.totalorder %s6105_s14, %s6101_s13 }
   0x6   : > { %p89_p1 = scmp.eq.s32.totalorder %s88_s20, 0  ;;  %p102_p2 = scmp.eq.s32.totalorder %s6154_s16, 1 }
   0x7   : > { %p107_p3 = scmp.ne.s32.totalorder %s6101_s13, %s6097_s12  ;;  %p108_p4 = scmp.eq.s32.totalorder %s4133_s17, 1 }
   0x8   : > { %s6169_s21 = scalar_select %p89_p1, %s6105_s14, %s91_s19  }
   0x9   : > { %p6171_p5 = por %p102_p2, %p101_p0  ;;  %p6175_p6 = por %p108_p4, %p107_p3 }
   0xa   : > { %p4136_p7 = scmp.ge.s32.totalorder %s6109_s15, 1  ;;  %p140_p8 = scmp.lt.s32.totalorder %s6109_s15, 3 }
   0xc   : > { %p141_p9 = pnand %p4136_p7, %p140_p8 }
   0xe   : > { %144 = sbr.rel (%p141_p9) target bundleno = 773 (0x305), region = 32 }
  0x13   : > { %v4229_v0 = vld [vmem:[%s8836_s1 + $0x170] sm:$0xf]  ;;  %v5762_v1 = vld [vmem:[%s8836_s1 + $0x174] sm:$0xf0]  ;;  %v5761_v5 = vld [vmem:[%s8836_s1 + $0x174] sm:$0xf] }
  0x14   : > { %v4293_v2 = vld [vmem:[%s8836_s1 + $0x1f0] sm:$0xf]  ;;  %v4230_v3 = vor.u32 %v5762_v1, %v4229_v0  ;;  %v5778_v4 = vld [vmem:[%s8836_s1 + $0x1f4] sm:$0xf0]  ;;  %v4231_v6 = vld [vmem:[%s8836_s1 + $0x178] sm:$0xf0] }
  0x15   : > { %v4294_v7 = vor.u32 %v5778_v4, %v4293_v2  ;;  %v4234_v8 = vor.u32 %v5761_v5, %v4231_v6  ;;  %v5777_v9 = vld [vmem:[%s8836_s1 + $0x1f4] sm:$0xf]  ;;  %v4295_v10 = vld [vmem:[%s8836_s1 + $0x1f8] sm:$0xf0]  ;;  %v4221_v11 = vld [vmem:[%s8836_s1 + $0x160] sm:$0xf] }
  0x16   : > { %556 = vmatpush.bf16.msra.mxu0 %v4230_v3  ;;  %v4298_v12 = vor.u32 %v5777_v9, %v4295_v10  ;;  %v5760_v13 = vld [vmem:[%s8836_s1 + $0x164] sm:$0xf0]  ;;  %v4285_v14 = vld [vmem:[%s8836_s1 + $0x1e0] sm:$0xf]  ;;  %v5759_v18 = vld [vmem:[%s8836_s1 + $0x164] sm:$0xf] }
  0x17   : > { %v5776_v15 = vld [vmem:[%s8836_s1 + $0x1e4] sm:$0xf0]  ;;  %585 = vmatpush.bf16.msra.mxu1 %v4294_v7  ;;  %614 = vmatpush.bf16.msra.mxu2 %v4234_v8  ;;  %v4222_v16 = vor.u32 %v5760_v13, %v4221_v11  ;;  %v4223_v19 = vld [vmem:[%s8836_s1 + $0x168] sm:$0xf0]  ;;  %v5775_v20 = vld [vmem:[%s8836_s1 + $0x1e4] sm:$0xf] }
  0x18   : > { %v4286_v17 = vor.u32 %v5776_v15, %v4285_v14  ;;  %643 = vmatpush.bf16.msra.mxu3 %v4298_v12  ;;  %v4226_v21 = vor.u32 %v5759_v18, %v4223_v19  ;;  %v4287_v22 = vld [vmem:[%s8836_s1 + $0x1e8] sm:$0xf0]  ;;  %v4213_v23 = vld [vmem:[%s8836_s1 + $0x150] sm:$0xf]  ;;  %v5758_v24 = vld [vmem:[%s8836_s1 + $0x154] sm:$0xf0] }
  0x19   : > { %v4290_v25 = vor.u32 %v5775_v20, %v4287_v22  ;;  %v4277_v26 = vld [vmem:[%s8836_s1 + $0x1d0] sm:$0xf]  ;;  %v5774_v27 = vld [vmem:[%s8836_s1 + $0x1d4] sm:$0xf0]  ;;  %v5757_v28 = vld [vmem:[%s8836_s1 + $0x154] sm:$0xf]  ;;  %v4214_v29 = vor.u32 %v5758_v24, %v4213_v23 }
  0x1a   : > { %557 = vmatpush.bf16.msra.mxu0 %v4222_v16  ;;  %v4215_v30 = vld [vmem:[%s8836_s1 + $0x158] sm:$0xf0]  ;;  %v5773_v31 = vld [vmem:[%s8836_s1 + $0x1d4] sm:$0xf]  ;;  %v4278_v33 = vor.u32 %v5774_v27, %v4277_v26  ;;  %v4205_v35 = vld [vmem:[%s8836_s1 + $0x140] sm:$0xf] }
  0x1b   : > { %v4279_v32 = vld [vmem:[%s8836_s1 + $0x1d8] sm:$0xf0]  ;;  %586 = vmatpush.bf16.msra.mxu1 %v4286_v17  ;;  %615 = vmatpush.bf16.msra.mxu2 %v4226_v21  ;;  %v4218_v34 = vor.u32 %v5757_v28, %v4215_v30  ;;  %v5756_v36 = vld [vmem:[%s8836_s1 + $0x144] sm:$0xf0]  ;;  %v4269_v37 = vld [vmem:[%s8836_s1 + $0x1c0] sm:$0xf] }
  0x1c   : > { %644 = vmatpush.bf16.msra.mxu3 %v4290_v25  ;;  %v4282_v38 = vor.u32 %v5773_v31, %v4279_v32  ;;  %v5772_v39 = vld [vmem:[%s8836_s1 + $0x1c4] sm:$0xf0]  ;;  %v5755_v40 = vld [vmem:[%s8836_s1 + $0x144] sm:$0xf]  ;;  %v4207_v41 = vld [vmem:[%s8836_s1 + $0x148] sm:$0xf0]  ;;  %v4206_v44 = vor.u32 %v5756_v36, %v4205_v35 }
  0x1d   : > { %v5771_v42 = vld [vmem:[%s8836_s1 + $0x1c4] sm:$0xf]  ;;  %v4271_v43 = vld [vmem:[%s8836_s1 + $0x1c8] sm:$0xf0]  ;;  %v4270_v45 = vor.u32 %v5772_v39, %v4269_v37  ;;  %v4210_v46 = vor.u32 %v5755_v40, %v4207_v41  ;;  %v4197_v47 = vld [vmem:[%s8836_s1 + $0x130] sm:$0xf] }
  0x1e   : > { %558 = vmatpush.bf16.msra.mxu0 %v4214_v29  ;;  %v5754_v48 = vld [vmem:[%s8836_s1 + $0x134] sm:$0xf0]  ;;  %v4261_v49 = vld [vmem:[%s8836_s1 + $0x1b0] sm:$0xf]  ;;  %v4274_v50 = vor.u32 %v5771_v42, %v4271_v43  ;;  %v5753_v52 = vld [vmem:[%s8836_s1 + $0x134] sm:$0xf] }
  0x1f   : > { %587 = vmatpush.bf16.msra.mxu1 %v4278_v33  ;;  %616 = vmatpush.bf16.msra.mxu2 %v4218_v34  ;;  %v5770_v51 = vld [vmem:[%s8836_s1 + $0x1b4] sm:$0xf0]  ;;  %v4199_v53 = vld [vmem:[%s8836_s1 + $0x138] sm:$0xf0]  ;;  %v5769_v54 = vld [vmem:[%s8836_s1 + $0x1b4] sm:$0xf]  ;;  %v4198_v56 = vor.u32 %v5754_v48, %v4197_v47 }
  0x20   : > { %645 = vmatpush.bf16.msra.mxu3 %v4282_v38  ;;  %v4263_v55 = vld [vmem:[%s8836_s1 + $0x1b8] sm:$0xf0]  ;;  %v4262_v57 = vor.u32 %v5770_v51, %v4261_v49  ;;  %v4202_v58 = vor.u32 %v5753_v52, %v4199_v53  ;;  %v4189_v59 = vld [vmem:[%s8836_s1 + $0x120] sm:$0xf]  ;;  %v5752_v60 = vld [vmem:[%s8836_s1 + $0x124] sm:$0xf0] }
  0x21   : > { %v4253_v61 = vld [vmem:[%s8836_s1 + $0x1a0] sm:$0xf]  ;;  %v4266_v62 = vor.u32 %v5769_v54, %v4263_v55  ;;  %v5768_v63 = vld [vmem:[%s8836_s1 + $0x1a4] sm:$0xf0]  ;;  %v5751_v0 = vld [vmem:[%s8836_s1 + $0x124] sm:$0xf]  ;;  %v4190_v4 = vor.u32 %v5752_v60, %v4189_v59 }
  0x22   : > { %559 = vmatpush.bf16.msra.mxu0 %v4206_v44  ;;  %v4191_v1 = vld [vmem:[%s8836_s1 + $0x128] sm:$0xf0]  ;;  %v5767_v2 = vld [vmem:[%s8836_s1 + $0x1a4] sm:$0xf]  ;;  %v4181_v5 = vld [vmem:[%s8836_s1 + $0x110] sm:$0xf]  ;;  %v4254_v7 = vor.u32 %v5768_v63, %v4253_v61 }
  0x23   : > { %588 = vmatpush.bf16.msra.mxu1 %v4270_v45  ;;  %617 = vmatpush.bf16.msra.mxu2 %v4210_v46  ;;  %v4255_v3 = vld [vmem:[%s8836_s1 + $0x1a8] sm:$0xf0]  ;;  %v5750_v6 = vld [vmem:[%s8836_s1 + $0x114] sm:$0xf0]  ;;  %v4194_v8 = vor.u32 %v5751_v0, %v4191_v1  ;;  %v4245_v9 = vld [vmem:[%s8836_s1 + $0x190] sm:$0xf] }
  0x24   : > { %646 = vmatpush.bf16.msra.mxu3 %v4274_v50  ;;  %v5766_v10 = vld [vmem:[%s8836_s1 + $0x194] sm:$0xf0]  ;;  %v5749_v11 = vld [vmem:[%s8836_s1 + $0x114] sm:$0xf]  ;;  %v4258_v12 = vor.u32 %v5767_v2, %v4255_v3  ;;  %v4183_v13 = vld [vmem:[%s8836_s1 + $0x118] sm:$0xf0]  ;;  %v4182_v18 = vor.u32 %v5750_v6, %v4181_v5 }
  0x25   : > { %v5765_v14 = vld [vmem:[%s8836_s1 + $0x194] sm:$0xf]  ;;  %p164_p10 = scmp.lt.s32.totalorder %s6154_s16, 1  ;;  %v4247_v15 = vld [vmem:[%s8836_s1 + $0x198] sm:$0xf0]  ;;  %v4246_v22 = vor.u32 %v5766_v10, %v4245_v9  ;;  %v4186_v23 = vor.u32 %v5749_v11, %v4183_v13  ;;  %vm290_vm0 = vcmask 1046528  }
  0x26   : > { %560 = vmatpush.bf16.msra.mxu0 %v4198_v56  ;;  %v4173_v16 = vld [vmem:[%s8836_s1 + $0x100] sm:$0xf]  ;;  %v5748_v17 = vld [vmem:[%s8836_s1 + $0x104] sm:$0xf0]  ;;  %v5747_v21 = vld [vmem:[%s8836_s1 + $0x104] sm:$0xf]  ;;  %v4250_v27 = vor.u32 %v5765_v14, %v4247_v15 }
  0x27   : > { %589 = vmatpush.bf16.msra.mxu1 %v4262_v57  ;;  %618 = vmatpush.bf16.msra.mxu2 %v4202_v58  ;;  %v4237_v19 = vld [vmem:[%s8836_s1 + $0x180] sm:$0xf]  ;;  %v5764_v20 = vld [vmem:[%s8836_s1 + $0x184] sm:$0xf0]  ;;  %s165_s11 = scalar_select %p164_p10, %s6154_s16, 1  ;;  %v4174_v33 = vor.u32 %v5748_v17, %v4173_v16  ;;  %vm1012_vm1 = vcmask 1045504  }
  0x28   : > { %647 = vmatpush.bf16.msra.mxu3 %v4266_v62  ;;  %v4175_v24 = vld [vmem:[%s8836_s1 + $0x108] sm:$0xf0]  ;;  %v5763_v25 = vld [vmem:[%s8836_s1 + $0x184] sm:$0xf]  ;;  %v5729_v28 = vld [vmem:[%s8836_s1 + $0x74] sm:$0xf]  ;;  %v4238_v37 = vor.u32 %v5764_v20, %v4237_v19 }
  0x29   : > { %v4239_v26 = vld [vmem:[%s8836_s1 + $0x188] sm:$0xf0]  ;;  %s6005_s27 = smul.u32 320, %s165_s11  ;;  %v4359_v29 = vld [vmem:[%s8836_s1 + $0x78] sm:$0xf0]  ;;  %v4178_v38 = vor.u32 %v5747_v21, %v4175_v24  ;;  %s161_s10 = sand.u32 1, %s6101_s13  }
  0x2a   : > { %561 = vmatpush.bf16.msra.mxu0 %v4190_v4  ;;  %v5745_v30 = vld [vmem:[%s8836_s1 + $0xf4] sm:$0xf]  ;;  %v4423_v31 = vld [vmem:[%s8836_s1 + $0xf8] sm:$0xf0]  ;;  %v4357_v32 = vld [vmem:[%s8836_s1 + $0x70] sm:$0xf]  ;;  %v4242_v39 = vor.u32 %v5763_v25, %v4239_v26  ;;  %v4362_v47 = vor.u32 %v5729_v28, %v4359_v29 }
  0x2b   : > { %590 = vmatpush.bf16.msra.mxu1 %v4254_v7  ;;  %619 = vmatpush.bf16.msra.mxu2 %v4194_v8  ;;  %s6393_s19 = scalar_lea.vmem %s8835_s0, %s6005_s27  ;;  %v5730_v34 = vld [vmem:[%s8836_s1 + $0x74] sm:$0xf0]  ;;  %v4421_v35 = vld [vmem:[%s8836_s1 + $0xf0] sm:$0xf]  ;;  %v5727_v48 = vld [vmem:[%s8836_s1 + $0x64] sm:$0xf]  ;;  %v4426_v55 = vor.u32 %v5745_v30, %v4423_v31 }
  0x2c   : > { %648 = vmatpush.bf16.msra.mxu3 %v4258_v12  ;;  %v5746_v36 = vld [vmem:[%s8836_s1 + $0xf4] sm:$0xf0]  ;;  %v226_v40 = vld [vmem:[%s6393_s19] sm:$0xfe]  ;;  %v228_v41 = vld [vmem:[%s6393_s19 + $0x10] sm:$0x1]  ;;  %v4358_v56 = vor.u32 %v5730_v34, %v4357_v32 }
  0x2d   : > { %v230_v42 = vld [vmem:[%s6393_s19 + $0x20] sm:$0xfe]  ;;  %v232_v43 = vld [vmem:[%s6393_s19 + $0x30] sm:$0x1]  ;;  %v291_v44 = vrot.slane %v226_v40, 1  ;;  %v292_v45 = vrot.slane %v228_v41, 1  ;;  %v4422_v3 = vor.u32 %v5746_v36, %v4421_v35 }
  0x2e   : > { %562 = vmatpush.bf16.msra.mxu0 %v4182_v18  ;;  %v297_v46 = vrot.slane %v230_v42, 1  ;;  %v4351_v49 = vld [vmem:[%s8836_s1 + $0x68] sm:$0xf0]  ;;  %v5743_v50 = vld [vmem:[%s8836_s1 + $0xe4] sm:$0xf]  ;;  %v298_v52 = vrot.slane %v232_v43, 1 }
  0x2f   : > { %591 = vmatpush.bf16.msra.mxu1 %v4246_v22  ;;  %620 = vmatpush.bf16.msra.mxu2 %v4186_v23  ;;  %v4415_v51 = vld [vmem:[%s8836_s1 + $0xe8] sm:$0xf0]  ;;  %v229_v54 = vld [vmem:[%s6393_s19 + $0x18] sm:$0x1]  ;;  %v4349_v57 = vld [vmem:[%s8836_s1 + $0x60] sm:$0xf]  ;;  %v293_v59 = vsel %vm290_vm0, %v291_v44, %v292_v45  ;;  %v4354_v11 = vor.u32 %v5727_v48, %v4351_v49 }
  0x30   : > { %649 = vmatpush.bf16.msra.mxu3 %v4250_v27  ;;  %v227_v53 = vld [vmem:[%s6393_s19 + $0x8] sm:$0xfe]  ;;  %v233_v61 = vld [vmem:[%s6393_s19 + $0x38] sm:$0x1]  ;;  %v295_v63 = vrot.slane %v229_v54, 1  ;;  %v299_v0 = vsel %vm290_vm0, %v297_v46, %v298_v52  ;;  %v4418_v12 = vor.u32 %v5743_v50, %v4415_v51  ;;  %s4137_s20 = sshll.u32 %s161_s10, 7 }
  0x31   : > { %v5728_v58 = vld [vmem:[%s8836_s1 + $0x64] sm:$0xf0]  ;;  %v294_v62 = vrot.slane %v227_v53, 1  ;;  %v301_v2 = vrot.slane %v233_v61, 1  ;;  %v6433_v4 = vld [vmem:[%s6393_s19 + $0x40] sm:$0xfe]  ;;  %v355_v6 = vpack.c.bf16 %v299_v0, %v293_v59 }
  0x32   : > { %563 = vmatpush.bf16.msra.mxu0 %v4174_v33  ;;  %v231_v60 = vld [vmem:[%s6393_s19 + $0x28] sm:$0xfe]  ;;  %v6436_v5 = vld [vmem:[%s6393_s19 + $0x50] sm:$0x1]  ;;  %v4413_v8 = vld [vmem:[%s8836_s1 + $0xe0] sm:$0xf]  ;;  %v4350_v15 = vor.u32 %v5728_v58, %v4349_v57 }
  0x33   : > { %592 = vmatpush.bf16.msra.mxu1 %v4238_v37  ;;  %621 = vmatpush.bf16.msra.mxu2 %v4178_v38  ;;  %v300_v1 = vrot.slane %v231_v60, 1  ;;  %v296_v7 = vsel %vm290_vm0, %v294_v62, %v295_v63  ;;  %v5744_v9 = vld [vmem:[%s8836_s1 + $0xe4] sm:$0xf0]  ;;  %v5725_v13 = vld [vmem:[%s8836_s1 + $0x54] sm:$0xf]  ;;  %v303_v18 = vrot.slane %v6433_v4, 1 }
  0x34   : > { %650 = vmatpush.bf16.msra.mxu3 %v4242_v39  ;;  %v238_v16 = vld [vmem:[%s6393_s19 + $0x60] sm:$0xfe]  ;;  %v240_v17 = vld [vmem:[%s6393_s19 + $0x70] sm:$0x1]  ;;  %v304_v19 = vrot.slane %v6436_v5, 1  ;;  %v4414_v20 = vor.u32 %v5744_v9, %v4413_v8  ;;  %s8702_s24 = scalar_lea.vmem [#allocation2], %s4137_s20 }
  0x35   : > { %v302_v10 = vsel %vm290_vm0, %v300_v1, %v301_v2  ;;  %564 = vmatmul.bf16.vlgmr.msra.gmra.mxu0 %v355_v6  ;;  %v235_v21 = vld [vmem:[%s6393_s19 + $0x48] sm:$0xfe]  ;;  %v237_v22 = vld [vmem:[%s6393_s19 + $0x58] sm:$0x1]  ;;  %v4343_v23 = vld [vmem:[%s8836_s1 + $0x58] sm:$0xf0] }
  0x36   : > { %832 = vmatpush.bf16.msrb.mxu0 %v4358_v56  ;;  %v356_v14 = vpack.c.bf16 %v302_v10, %v296_v7  ;;  %622 = vmatmul.bf16.vlgmr.msra.gmra.mxu2 %v355_v6  ;;  %v5741_v24 = vld [vmem:[%s8836_s1 + $0xd4] sm:$0xf]  ;;  %v239_v25 = vld [vmem:[%s6393_s19 + $0x68] sm:$0xfe]  ;;  %v241_v26 = vld [vmem:[%s6393_s19 + $0x78] sm:$0x1]  ;;  %v4346_v30 = vor.u32 %v5725_v13, %v4343_v23  ;;  %v305_v53 = vsel %vm290_vm0, %v303_v18, %v304_v19 }
  0x37   : > { %890 = vmatpush.bf16.msrb.mxu2 %v4362_v47  ;;  %861 = vmatpush.bf16.msrb.mxu1 %v4422_v3  ;;  %v4407_v27 = vld [vmem:[%s8836_s1 + $0xd8] sm:$0xf0]  ;;  %v4341_v28 = vld [vmem:[%s8836_s1 + $0x50] sm:$0xf]  ;;  %v5726_v29 = vld [vmem:[%s8836_s1 + $0x54] sm:$0xf0] }
  0x38   : > { %919 = vmatpush.bf16.msrb.mxu3 %v4426_v55  ;;  %593 = vmatmul.bf16.vlgmr.msra.gmra.mxu1 %v356_v14  ;;  %v4410_v31 = vor.u32 %v5741_v24, %v4407_v27  ;;  %v4405_v32 = vld [vmem:[%s8836_s1 + $0xd0] sm:$0xf]  ;;  %v5742_v33 = vld [vmem:[%s8836_s1 + $0xd4] sm:$0xf0]  ;;  %v5723_v34 = vld [vmem:[%s8836_s1 + $0x44] sm:$0xf]  ;;  %v4342_v35 = vor.u32 %v5726_v29, %v4341_v28 }
  0x39   : > { %651 = vmatmul.bf16.vlgmr.msra.gmra.mxu3 %v356_v14  ;;  %v4335_v36 = vld [vmem:[%s8836_s1 + $0x48] sm:$0xf0]  ;;  %v5739_v37 = vld [vmem:[%s8836_s1 + $0xc4] sm:$0xf]  ;;  %v309_v39 = vrot.slane %v238_v16, 1  ;;  %v310_v40 = vrot.slane %v240_v17, 1  ;;  %v4406_v41 = vor.u32 %v5742_v33, %v4405_v32 }
  0x3a   : > { %833 = vmatpush.bf16.msrb.mxu0 %v4350_v15  ;;  %v4399_v38 = vld [vmem:[%s8836_s1 + $0xc8] sm:$0xf0]  ;;  %v4333_v42 = vld [vmem:[%s8836_s1 + $0x40] sm:$0xf]  ;;  %v5724_v43 = vld [vmem:[%s8836_s1 + $0x44] sm:$0xf0]  ;;  %v4338_v50 = vor.u32 %v5723_v34, %v4335_v36 }
  0x3b   : > { %891 = vmatpush.bf16.msrb.mxu2 %v4354_v11  ;;  %862 = vmatpush.bf16.msrb.mxu1 %v4414_v20  ;;  %v306_v44 = vrot.slane %v235_v21, 1  ;;  %v307_v45 = vrot.slane %v237_v22, 1  ;;  %v4397_v46 = vld [vmem:[%s8836_s1 + $0xc0] sm:$0xf]  ;;  %v5740_v47 = vld [vmem:[%s8836_s1 + $0xc4] sm:$0xf0]  ;;  %v4402_v51 = vor.u32 %v5739_v37, %v4399_v38  ;;  %v4334_v52 = vor.u32 %v5724_v43, %v4333_v42 }
  0x3c   : > { %920 = vmatpush.bf16.msrb.mxu3 %v4418_v12  ;;  %v312_v48 = vrot.slane %v239_v25, 1  ;;  %v313_v49 = vrot.slane %v241_v26, 1  ;;  %v311_v54 = vsel %vm290_vm0, %v309_v39, %v310_v40  ;;  %v4398_v55 = vor.u32 %v5740_v47, %v4397_v46  ;;  %v5721_v56 = vld [vmem:[%s8836_s1 + $0x34] sm:$0xf]  ;;  %v4327_v57 = vld [vmem:[%s8836_s1 + $0x38] sm:$0xf0] }
  0x3d   : > { %v308_v58 = vsel %vm290_vm0, %v306_v44, %v307_v45  ;;  %v4330_v60 = vor.u32 %v5721_v56, %v4327_v57  ;;  %v5737_v61 = vld [vmem:[%s8836_s1 + $0xb4] sm:$0xf]  ;;  %v4391_v62 = vld [vmem:[%s8836_s1 + $0xb8] sm:$0xf0]  ;;  %v4325_v63 = vld [vmem:[%s8836_s1 + $0x30] sm:$0xf]  ;;  %v357_v0 = vpack.c.bf16 %v311_v54, %v305_v53 }
  0x3e   : > { %834 = vmatpush.bf16.msrb.mxu0 %v4342_v35  ;;  %v314_v59 = vsel %vm290_vm0, %v312_v48, %v313_v49  ;;  %v4394_v1 = vor.u32 %v5737_v61, %v4391_v62  ;;  %v5722_v2 = vld [vmem:[%s8836_s1 + $0x34] sm:$0xf0]  ;;  %v4389_v3 = vld [vmem:[%s8836_s1 + $0xb0] sm:$0xf]  ;;  %v6531_v5 = vld [vmem:[%s6393_s19 + $0x80] sm:$0xfe] }
  0x3f   : > { %892 = vmatpush.bf16.msrb.mxu2 %v4346_v30  ;;  %863 = vmatpush.bf16.msrb.mxu1 %v4406_v41  ;;  %v5738_v4 = vld [vmem:[%s8836_s1 + $0xb4] sm:$0xf0]  ;;  %v6534_v6 = vld [vmem:[%s6393_s19 + $0x90] sm:$0x1]  ;;  %v6537_v7 = vld [vmem:[%s6393_s19 + $0xa0] sm:$0xfe]  ;;  %v4326_v8 = vor.u32 %v5722_v2, %v4325_v63  ;;  %v358_v13 = vpack.c.bf16 %v314_v59, %v308_v58 }
  0x40   : > { %921 = vmatpush.bf16.msrb.mxu3 %v4410_v31  ;;  %v4390_v9 = vor.u32 %v5738_v4, %v4389_v3  ;;  %v5719_v10 = vld [vmem:[%s8836_s1 + $0x24] sm:$0xf]  ;;  %v4319_v11 = vld [vmem:[%s8836_s1 + $0x28] sm:$0xf0]  ;;  %v4317_v15 = vld [vmem:[%s8836_s1 + $0x20] sm:$0xf] }
  0x41   : > { %v5735_v12 = vld [vmem:[%s8836_s1 + $0xa4] sm:$0xf]  ;;  %v4383_v14 = vld [vmem:[%s8836_s1 + $0xa8] sm:$0xf0]  ;;  %v5720_v16 = vld [vmem:[%s8836_s1 + $0x24] sm:$0xf0]  ;;  %v4322_v18 = vor.u32 %v5719_v10, %v4319_v11 }
  0x42   : > { %835 = vmatpush.bf16.msrb.mxu0 %v4334_v52  ;;  %v248_v17 = vld [vmem:[%s6393_s19 + $0xb0] sm:$0x1]  ;;  %v4386_v19 = vor.u32 %v5735_v12, %v4383_v14  ;;  %v4381_v20 = vld [vmem:[%s8836_s1 + $0xa0] sm:$0xf]  ;;  %v5736_v21 = vld [vmem:[%s8836_s1 + $0xa4] sm:$0xf0]  ;;  %v4318_v26 = vor.u32 %v5720_v16, %v4317_v15 }
  0x43   : > { %893 = vmatpush.bf16.msrb.mxu2 %v4338_v50  ;;  %864 = vmatpush.bf16.msrb.mxu1 %v4398_v55  ;;  %v243_v22 = vld [vmem:[%s6393_s19 + $0x88] sm:$0xfe]  ;;  %v245_v23 = vld [vmem:[%s6393_s19 + $0x98] sm:$0x1]  ;;  %v4382_v27 = vor.u32 %v5736_v21, %v4381_v20  ;;  %v315_v28 = vrot.slane %v6531_v5, 1  ;;  %v316_v29 = vrot.slane %v6534_v6, 1 }
  0x44   : > { %922 = vmatpush.bf16.msrb.mxu3 %v4402_v51  ;;  %v247_v24 = vld [vmem:[%s6393_s19 + $0xa8] sm:$0xfe]  ;;  %v249_v25 = vld [vmem:[%s6393_s19 + $0xb8] sm:$0x1]  ;;  %v321_v30 = vrot.slane %v6537_v7, 1  ;;  %v322_v31 = vrot.slane %v248_v17, 1 }
  0x45   : > { %569 = vmatmul.bf16.gmra.mxu0 %v357_v0  ;;  %v318_v32 = vrot.slane %v243_v22, 1  ;;  %v319_v33 = vrot.slane %v245_v23, 1  ;;  %v5717_v34 = vld [vmem:[%s8836_s1 + $0x14] sm:$0xf]  ;;  %v4311_v35 = vld [vmem:[%s8836_s1 + $0x18] sm:$0xf0]  ;;  %v317_v54 = vsel %vm290_vm0, %v315_v28, %v316_v29 }
  0x46   : > { %627 = vmatmul.bf16.gmra.mxu2 %v357_v0  ;;  %836 = vmatpush.bf16.msrb.mxu0 %v4326_v8  ;;  %v324_v36 = vrot.slane %v247_v24, 1  ;;  %v325_v37 = vrot.slane %v249_v25, 1  ;;  %v4314_v38 = vor.u32 %v5717_v34, %v4311_v35  ;;  %v5733_v39 = vld [vmem:[%s8836_s1 + $0x94] sm:$0xf]  ;;  %v4375_v40 = vld [vmem:[%s8836_s1 + $0x98] sm:$0xf0]  ;;  %v323_v59 = vsel %vm290_vm0, %v321_v30, %v322_v31 }
  0x47   : > { %894 = vmatpush.bf16.msrb.mxu2 %v4330_v60  ;;  %865 = vmatpush.bf16.msrb.mxu1 %v4390_v9  ;;  %v4378_v41 = vor.u32 %v5733_v39, %v4375_v40  ;;  %v4309_v42 = vld [vmem:[%s8836_s1 + $0x10] sm:$0xf]  ;;  %v5718_v43 = vld [vmem:[%s8836_s1 + $0x14] sm:$0xf0]  ;;  %v5715_v47 = vld [vmem:[%s8836_s1 + $0x4] sm:$0xf]  ;;  %v320_v62 = vsel %vm290_vm0, %v318_v32, %v319_v33  ;;  %v359_v0 = vpack.c.bf16 %v323_v59, %v317_v54 }
  0x48   : > { %923 = vmatpush.bf16.msrb.mxu3 %v4394_v1  ;;  %598 = vmatmul.bf16.gmra.mxu1 %v358_v13  ;;  %v4373_v44 = vld [vmem:[%s8836_s1 + $0x90] sm:$0xf]  ;;  %v4310_v45 = vor.u32 %v5718_v43, %v4309_v42  ;;  %v5734_v46 = vld [vmem:[%s8836_s1 + $0x94] sm:$0xf0]  ;;  %v4303_v48 = vld [vmem:[%s8836_s1 + $0x8] sm:$0xf0]  ;;  %v326_v63 = vsel %vm290_vm0, %v324_v36, %v325_v37 }
  0x49   : > { %656 = vmatmul.bf16.gmra.mxu3 %v358_v13  ;;  %v4374_v49 = vor.u32 %v5734_v46, %v4373_v44  ;;  %v4306_v50 = vor.u32 %v5715_v47, %v4303_v48  ;;  %v5731_v51 = vld [vmem:[%s8836_s1 + $0x84] sm:$0xf]  ;;  %v4367_v52 = vld [vmem:[%s8836_s1 + $0x88] sm:$0xf0]  ;;  %v4301_v53 = vld [vmem:[%s8836_s1] sm:$0xf]  ;;  %v360_v3 = vpack.c.bf16 %v326_v63, %v320_v62 }
  0x4a   : > { %837 = vmatpush.bf16.msrb.mxu0 %v4318_v26  ;;  %v4370_v55 = vor.u32 %v5731_v51, %v4367_v52  ;;  %v5716_v56 = vld [vmem:[%s8836_s1 + $0x4] sm:$0xf0]  ;;  %v4365_v57 = vld [vmem:[%s8836_s1 + $0x80] sm:$0xf]  ;;  %v252_v2 = vld [vmem:[%s6393_s19 + $0xd0] sm:$0x1] }
  0x4b   : > { %895 = vmatpush.bf16.msrb.mxu2 %v4322_v18  ;;  %866 = vmatpush.bf16.msrb.mxu1 %v4382_v27  ;;  %v5732_v58 = vld [vmem:[%s8836_s1 + $0x84] sm:$0xf0]  ;;  %v4302_v60 = vor.u32 %v5716_v56, %v4301_v53  ;;  %v250_v1 = vld [vmem:[%s6393_s19 + $0xc0] sm:$0xfe]  ;;  %v256_v5 = vld [vmem:[%s6393_s19 + $0xf0] sm:$0x1] }
  0x4c   : > { %924 = vmatpush.bf16.msrb.mxu3 %v4386_v19  ;;  %v4366_v61 = vor.u32 %v5732_v58, %v4365_v57  ;;  %v254_v4 = vld [vmem:[%s6393_s19 + $0xe0] sm:$0xfe]  ;;  %v251_v6 = vld [vmem:[%s6393_s19 + $0xc8] sm:$0xfe]  ;;  %v327_v7 = vrot.slane %v250_v1, 1  ;;  %v328_v8 = vrot.slane %v252_v2, 1 }
  0x4d   : > { %v333_v9 = vrot.slane %v254_v4, 1  ;;  %v334_v10 = vrot.slane %v256_v5, 1  ;;  %v330_v11 = vrot.slane %v251_v6, 1  ;;  %v253_v12 = vld [vmem:[%s6393_s19 + $0xd8] sm:$0x1]  ;;  %s6004_s25 = sshll.u32 %s6154_s16, 7 }
  0x4e   : > { %838 = vmatpush.bf16.msrb.mxu0 %v4310_v45  ;;  %v255_v13 = vld [vmem:[%s6393_s19 + $0xe8] sm:$0xfe]  ;;  %v257_v14 = vld [vmem:[%s6393_s19 + $0xf8] sm:$0x1]  ;;  %v5793_v15 = vld [vmem:[%s8836_s1 + $0x274] sm:$0xf]  ;;  %v329_v42 = vsel %vm290_vm0, %v327_v7, %v328_v8  ;;  %s4067_s29 = scalar_lea.hbm %s8838_s3, %s6004_s25 }
  0x4f   : > { %896 = vmatpush.bf16.msrb.mxu2 %v4314_v38  ;;  %867 = vmatpush.bf16.msrb.mxu1 %v4374_v49  ;;  %v4519_v16 = vld [vmem:[%s8836_s1 + $0x278] sm:$0xf0]  ;;  %v5809_v17 = vld [vmem:[%s8836_s1 + $0x2f4] sm:$0xf]  ;;  %v4517_v20 = vld [vmem:[%s8836_s1 + $0x270] sm:$0xf]  ;;  %v335_v43 = vsel %vm290_vm0, %v333_v9, %v334_v10 }
  0x50   : > { %925 = vmatpush.bf16.msrb.mxu3 %v4378_v41  ;;  %v4522_v18 = vor.u32 %v5793_v15, %v4519_v16  ;;  %v4583_v19 = vld [vmem:[%s8836_s1 + $0x2f8] sm:$0xf0]  ;;  %v5794_v21 = vld [vmem:[%s8836_s1 + $0x274] sm:$0xf0]  ;;  %v4581_v24 = vld [vmem:[%s8836_s1 + $0x2f0] sm:$0xf]  ;;  %v361_v46 = vpack.c.bf16 %v335_v43, %v329_v42 }
  0x51   : > { %v4586_v22 = vor.u32 %v5809_v17, %v4583_v19  ;;  %v4518_v23 = vor.u32 %v5794_v21, %v4517_v20  ;;  %v5810_v25 = vld [vmem:[%s8836_s1 + $0x2f4] sm:$0xf0]  ;;  %v5791_v26 = vld [vmem:[%s8836_s1 + $0x264] sm:$0xf]  ;;  %v4511_v28 = vld [vmem:[%s8836_s1 + $0x268] sm:$0xf0] }
  0x52   : > { %839 = vmatpush.bf16.msrb.mxu0 %v4302_v60  ;;  %v4582_v27 = vor.u32 %v5810_v25, %v4581_v24  ;;  %v5807_v29 = vld [vmem:[%s8836_s1 + $0x2e4] sm:$0xf]  ;;  %v4575_v30 = vld [vmem:[%s8836_s1 + $0x2e8] sm:$0xf0]  ;;  %v4514_v31 = vor.u32 %v5791_v26, %v4511_v28  ;;  %v4509_v33 = vld [vmem:[%s8836_s1 + $0x260] sm:$0xf] }
  0x53   : > { %897 = vmatpush.bf16.msrb.mxu2 %v4306_v50  ;;  %868 = vmatpush.bf16.msrb.mxu1 %v4366_v61  ;;  %v4578_v32 = vor.u32 %v5807_v29, %v4575_v30  ;;  %v5792_v34 = vld [vmem:[%s8836_s1 + $0x264] sm:$0xf0]  ;;  %v4573_v35 = vld [vmem:[%s8836_s1 + $0x2e0] sm:$0xf]  ;;  %v331_v36 = vrot.slane %v253_v12, 1  ;;  %v336_v37 = vrot.slane %v255_v13, 1 }
  0x54   : > { %926 = vmatpush.bf16.msrb.mxu3 %v4370_v55  ;;  %v337_v38 = vrot.slane %v257_v14, 1  ;;  %v4510_v39 = vor.u32 %v5792_v34, %v4509_v33  ;;  %v5808_v40 = vld [vmem:[%s8836_s1 + $0x2e4] sm:$0xf0]  ;;  %v5789_v48 = vld [vmem:[%s8836_s1 + $0x254] sm:$0xf]  ;;  %v170_v8 = vld [vmem:[%s6393_s19] sm:$0xff] }
  0x55   : > { %574 = vmatmul.bf16.gmra.mxu0 %v359_v0  ;;  %v4574_v41 = vor.u32 %v5808_v40, %v4573_v35  ;;  %v332_v44 = vsel %vm290_vm0, %v330_v11, %v331_v36  ;;  %v4503_v49 = vld [vmem:[%s8836_s1 + $0x258] sm:$0xf0]  ;;  %v5805_v50 = vld [vmem:[%s8836_s1 + $0x2d4] sm:$0xf]  ;;  %v4501_v53 = vld [vmem:[%s8836_s1 + $0x250] sm:$0xf] }
  0x56   : > { %632 = vmatmul.bf16.gmra.mxu2 %v359_v0  ;;  %1278 = vmatpush.bf16.msra.mxu0 %v4518_v23  ;;  %v338_v45 = vsel %vm290_vm0, %v336_v37, %v337_v38  ;;  %v4506_v51 = vor.u32 %v5789_v48, %v4503_v49  ;;  %v4567_v52 = vld [vmem:[%s8836_s1 + $0x2d8] sm:$0xf0]  ;;  %v5790_v54 = vld [vmem:[%s8836_s1 + $0x254] sm:$0xf0]  ;;  %v4565_v57 = vld [vmem:[%s8836_s1 + $0x2d0] sm:$0xf] }
  0x57   : > { %1336 = vmatpush.bf16.msra.mxu2 %v4522_v18  ;;  %1307 = vmatpush.bf16.msra.mxu1 %v4582_v27  ;;  %v362_v47 = vpack.c.bf16 %v338_v45, %v332_v44  ;;  %v4570_v55 = vor.u32 %v5805_v50, %v4567_v52  ;;  %v4502_v56 = vor.u32 %v5790_v54, %v4501_v53  ;;  %v5806_v58 = vld [vmem:[%s8836_s1 + $0x2d4] sm:$0xf0]  ;;  %v5787_v59 = vld [vmem:[%s8836_s1 + $0x244] sm:$0xf]  ;;  %v4495_v61 = vld [vmem:[%s8836_s1 + $0x248] sm:$0xf0] }
  0x58   : > { %603 = vmatmul.bf16.gmra.mxu1 %v360_v3  ;;  %1365 = vmatpush.bf16.msra.mxu3 %v4586_v22  ;;  %v4566_v60 = vor.u32 %v5806_v58, %v4565_v57  ;;  %v5803_v62 = vld [vmem:[%s8836_s1 + $0x2c4] sm:$0xf]  ;;  %v4559_v63 = vld [vmem:[%s8836_s1 + $0x2c8] sm:$0xf0]  ;;  %v4498_v0 = vor.u32 %v5787_v59, %v4495_v61  ;;  %v4493_v2 = vld [vmem:[%s8836_s1 + $0x240] sm:$0xf] }
  0x59   : > { %661 = vmatmul.bf16.gmra.mxu3 %v360_v3  ;;  %v4562_v1 = vor.u32 %v5803_v62, %v4559_v63  ;;  %v5788_v3 = vld [vmem:[%s8836_s1 + $0x244] sm:$0xf0]  ;;  %v4557_v4 = vld [vmem:[%s8836_s1 + $0x2c0] sm:$0xf]  ;;  %v5785_v14 = vld [vmem:[%s8836_s1 + $0x234] sm:$0xf] }
  0x5a   : > { %1279 = vmatpush.bf16.msra.mxu0 %v4510_v39  ;;  %v4494_v5 = vor.u32 %v5788_v3, %v4493_v2  ;;  %v5804_v6 = vld [vmem:[%s8836_s1 + $0x2c4] sm:$0xf0]  ;;  %v6733_v9 = vld [vmem:[%s6393_s19 + $0x20] sm:$0xff]  ;;  %v4487_v15 = vld [vmem:[%s8836_s1 + $0x238] sm:$0xf0]  ;;  %s4068_s16 = sshll.u32 %s8702_s24, 4  ;;  %s4069_s16 = int_to_ptr.vmem [resolvable:$true] %s4068_s16 }
  0x5b   : > { %1337 = vmatpush.bf16.msra.mxu2 %v4514_v31  ;;  %1308 = vmatpush.bf16.msra.mxu1 %v4574_v41  ;;  %v4558_v7 = vor.u32 %v5804_v6, %v4557_v4  ;;  %v171_v10 = vld [vmem:[%s6393_s19 + $0x8] sm:$0xff]  ;;  %v186_v12 = vpack.c.bf16 %v6733_v9, %v170_v8  ;;  %v5801_v16 = vld [vmem:[%s8836_s1 + $0x2b4] sm:$0xf]  ;;  %v4490_v17 = vor.u32 %v5785_v14, %v4487_v15  ;;  %v4551_v18 = vld [vmem:[%s8836_s1 + $0x2b8] sm:$0xf0]  ;;  %s4070_s27 = sshll.u32 %s4067_s29, 4  ;;  %s4071_s27 = int_to_ptr.hbm [resolvable:$true] %s4070_s27 }
  0x5c   : > { %1366 = vmatpush.bf16.msra.mxu3 %v4578_v32  ;;  %v6737_v11 = vld [vmem:[%s6393_s19 + $0x28] sm:$0xff]  ;;  %v4485_v19 = vld [vmem:[%s8836_s1 + $0x230] sm:$0xf]  ;;  %v5786_v20 = vld [vmem:[%s8836_s1 + $0x234] sm:$0xf0]  ;;  %v4554_v21 = vor.u32 %v5801_v16, %v4551_v18  ;;  %s4055_s30 = scalar_lea.sflag [#allocation3], %s161_s10 }
  0x5d   : > { %v187_v13 = vpack.c.bf16 %v6737_v11, %v171_v10  ;;  %v4486_v22 = vor.u32 %v5786_v20, %v4485_v19  ;;  %v4549_v23 = vld [vmem:[%s8836_s1 + $0x2b0] sm:$0xf]  ;;  %v5802_v24 = vld [vmem:[%s8836_s1 + $0x2b4] sm:$0xf0]  ;;  %v5783_v25 = vld [vmem:[%s8836_s1 + $0x224] sm:$0xf] }
  0x5e   : > { %1280 = vmatpush.bf16.msra.mxu0 %v4502_v56  ;;  %v4550_v26 = vor.u32 %v5802_v24, %v4549_v23  ;;  %v4479_v27 = vld [vmem:[%s8836_s1 + $0x228] sm:$0xf0]  ;;  %v5799_v28 = vld [vmem:[%s8836_s1 + $0x2a4] sm:$0xf]  ;;  %v4477_v32 = vld [vmem:[%s8836_s1 + $0x220] sm:$0xf] }
  0x5f   : > { %1338 = vmatpush.bf16.msra.mxu2 %v4506_v51  ;;  %1309 = vmatpush.bf16.msra.mxu1 %v4566_v60  ;;  %v4543_v29 = vld [vmem:[%s8836_s1 + $0x2a8] sm:$0xf0]  ;;  %v4482_v30 = vor.u32 %v5783_v25, %v4479_v27  ;;  %v5784_v33 = vld [vmem:[%s8836_s1 + $0x224] sm:$0xf0]  ;;  %v4541_v34 = vld [vmem:[%s8836_s1 + $0x2a0] sm:$0xf] }
  0x60   : > { %1367 = vmatpush.bf16.msra.mxu3 %v4570_v55  ;;  %v4546_v31 = vor.u32 %v5799_v28, %v4543_v29  ;;  %v4478_v35 = vor.u32 %v5784_v33, %v4477_v32  ;;  %v5800_v36 = vld [vmem:[%s8836_s1 + $0x2a4] sm:$0xf0]  ;;  %v6790_v38 = vld [vmem:[%s6393_s19 + $0x40] sm:$0xff]  ;;  %v5781_v44 = vld [vmem:[%s8836_s1 + $0x214] sm:$0xf]  ;;  %s6061_s4 = sshra.s32 %s4071_s27, 4  ;;  %s6062_s4 = int_to_ptr.hbm [resolvable:$true] %s6061_s4 }
  0x61   : > { %v4542_v37 = vor.u32 %v5800_v36, %v4541_v34  ;;  %v6793_v39 = vld [vmem:[%s6393_s19 + $0x60] sm:$0xff]  ;;  %v6796_v40 = vld [vmem:[%s6393_s19 + $0x48] sm:$0xff]  ;;  %v4471_v45 = vld [vmem:[%s8836_s1 + $0x218] sm:$0xf0]  ;;  %s6063_s5 = scalar_lea.hbm %s6062_s4, 128  ;;  %s6067_s7 = scalar_lea.hbm %s8838_s3, 256 }
  0x62   : > { %1281 = vmatpush.bf16.msra.mxu0 %v4494_v5  ;;  %v6799_v41 = vld [vmem:[%s6393_s19 + $0x68] sm:$0xff]  ;;  %v188_v42 = vpack.c.bf16 %v6793_v39, %v6790_v38  ;;  %v4535_v48 = vld [vmem:[%s8836_s1 + $0x298] sm:$0xf0]  ;;  %v4469_v49 = vld [vmem:[%s8836_s1 + $0x210] sm:$0xf]  ;;  %p6064_p11 = scmp.ne.s32.totalorder %s6062_s4, %s6063_s5  ;;  %p6068_p0 = scmp.lt.s32.totalorder %s6062_s4, %s8838_s3 }
  0x63   : > { %1339 = vmatpush.bf16.msra.mxu2 %v4498_v0  ;;  %1310 = vmatpush.bf16.msra.mxu1 %v4558_v7  ;;  %v189_v43 = vpack.c.bf16 %v6799_v41, %v6796_v40  ;;  %v5782_v50 = vld [vmem:[%s8836_s1 + $0x214] sm:$0xf0]  ;;  %v4533_v53 = vld [vmem:[%s8836_s1 + $0x290] sm:$0xf]  ;;  %v5779_v55 = vld [vmem:[%s8836_s1 + $0x204] sm:$0xf]  ;;  %p6069_p1 = scmp.lt.s32.totalorder %s6067_s7, %s6063_s5 }
  0x64   : > { %1368 = vmatpush.bf16.msra.mxu3 %v4562_v1  ;;  %v4470_v52 = vor.u32 %v5782_v50, %v4469_v49  ;;  %v5798_v54 = vld [vmem:[%s8836_s1 + $0x294] sm:$0xf0]  ;;  %v4463_v57 = vld [vmem:[%s8836_s1 + $0x208] sm:$0xf0]  ;;  %v5795_v58 = vld [vmem:[%s8836_s1 + $0x284] sm:$0xf]  ;;  %p6065_p12 = pnand %p6064_p11, %p6171_p5 }
  0x65   : > { %579 = vmatmul.bf16.gmra.mxu0 %v361_v46  ;;  %v4534_v56 = vor.u32 %v5798_v54, %v4533_v53  ;;  %v4527_v59 = vld [vmem:[%s8836_s1 + $0x288] sm:$0xf0]  ;;  %v4466_v60 = vor.u32 %v5779_v55, %v4463_v57  ;;  %v6842_v62 = vld [vmem:[%s6393_s19 + $0x80] sm:$0xff]  ;;  %v5780_v4 = vld [vmem:[%s8836_s1 + $0x204] sm:$0xf0]  ;;  %p6070_p2 = por %p6069_p1, %p6068_p0 }
  0x66   : > { %637 = vmatmul.bf16.gmra.mxu2 %v361_v46  ;;  %1282 = vmatpush.bf16.msra.mxu0 %v4486_v22  ;;  %v5797_v46 = vld [vmem:[%s8836_s1 + $0x294] sm:$0xf]  ;;  %v4530_v61 = vor.u32 %v5795_v58, %v4527_v59  ;;  %v6845_v63 = vld [vmem:[%s6393_s19 + $0xa0] sm:$0xff]  ;;  %v6848_v0 = vld [vmem:[%s6393_s19 + $0x88] sm:$0xff]  ;;  %p6066_p13 = pneg %p6065_p12 }
  0x67   : > { %1340 = vmatpush.bf16.msra.mxu2 %v4490_v17  ;;  %1311 = vmatpush.bf16.msra.mxu1 %v4550_v26  ;;  %v4538_v51 = vor.u32 %v5797_v46, %v4535_v48  ;;  %v6851_v1 = vld [vmem:[%s6393_s19 + $0xa8] sm:$0xff]  ;;  %v190_v2 = vpack.c.bf16 %v6845_v63, %v6842_v62  ;;  %v4461_v3 = vld [vmem:[%s8836_s1 + $0x200] sm:$0xf]  ;;  %v5841_v15 = vld [vmem:[%s8836_s1 + $0x3f4] sm:$0xf] }
  0x68   : > { %608 = vmatmul.bf16.gmra.mxu1 %v362_v47  ;;  %1369 = vmatpush.bf16.msra.mxu3 %v4554_v21  ;;  %v4525_v5 = vld [vmem:[%s8836_s1 + $0x280] sm:$0xf]  ;;  %v4462_v6 = vor.u32 %v5780_v4, %v4461_v3  ;;  %v5796_v7 = vld [vmem:[%s8836_s1 + $0x284] sm:$0xf0]  ;;  %v191_v8 = vpack.c.bf16 %v6851_v1, %v6848_v0  ;;  %v4759_v16 = vld [vmem:[%s8836_s1 + $0x3f8] sm:$0xf0]  ;;  %p6071_p3 = pnand %p6070_p2, %p6066_p13 }
  0x69   : > { %666 = vmatmul.bf16.gmra.mxu3 %v362_v47  ;;  %v4474_v47 = vor.u32 %v5781_v44, %v4471_v45  ;;  %v4526_v10 = vor.u32 %v5796_v7, %v4525_v5  ;;  %v4762_v17 = vor.u32 %v5841_v15, %v4759_v16  ;;  %v6882_v18 = vld [vmem:[%s6393_s19 + $0xc0] sm:$0xff]  ;;  %v4693_v20 = vld [vmem:[%s8836_s1 + $0x370] sm:$0xf]  ;;  %v5826_v21 = vld [vmem:[%s8836_s1 + $0x374] sm:$0xf0] }
  0x6a   : > { %1283 = vmatpush.bf16.msra.mxu0 %v4478_v35  ;;  %v6885_v19 = vld [vmem:[%s6393_s19 + $0xe0] sm:$0xff]  ;;  %v4757_v22 = vld [vmem:[%s8836_s1 + $0x3f0] sm:$0xf]  ;;  %v4694_v23 = vor.u32 %v5826_v21, %v4693_v20  ;;  %v5842_v24 = vld [vmem:[%s8836_s1 + $0x3f4] sm:$0xf0] }
  0x6b   : > { %1341 = vmatpush.bf16.msra.mxu2 %v4482_v30  ;;  %1312 = vmatpush.bf16.msra.mxu1 %v4542_v37  ;;  %v5823_v25 = vld [vmem:[%s8836_s1 + $0x364] sm:$0xf]  ;;  %v4687_v26 = vld [vmem:[%s8836_s1 + $0x368] sm:$0xf0]  ;;  %v4758_v27 = vor.u32 %v5842_v24, %v4757_v22  ;;  %v192_v34 = vpack.c.bf16 %v6885_v19, %v6882_v18  ;;  %v4685_v37 = vld [vmem:[%s8836_s1 + $0x360] sm:$0xf] }
  0x6c   : > { %1370 = vmatpush.bf16.msra.mxu3 %v4546_v31  ;;  %v4690_v28 = vor.u32 %v5823_v25, %v4687_v26  ;;  %v5839_v29 = vld [vmem:[%s8836_s1 + $0x3e4] sm:$0xf]  ;;  %v4751_v30 = vld [vmem:[%s8836_s1 + $0x3e8] sm:$0xf0]  ;;  %v950_v44 = vld [vmem:[%s6393_s19 + $0x10] sm:$0x3] }
  0x6d   : > { %v6912_v31 = vld [vmem:[%s6393_s19 + $0xc8] sm:$0xff]  ;;  %v4754_v33 = vor.u32 %v5839_v29, %v4751_v30  ;;  %v948_v36 = vld [vmem:[%s6393_s19] sm:$0xfc]  ;;  %v954_v48 = vld [vmem:[%s6393_s19 + $0x30] sm:$0x3] }
  0x6e   : > { %1284 = vmatpush.bf16.msra.mxu0 %v4470_v52  ;;  %v6915_v32 = vld [vmem:[%s6393_s19 + $0xe8] sm:$0xff]  ;;  %v952_v45 = vld [vmem:[%s6393_s19 + $0x20] sm:$0xfc]  ;;  %v5821_v50 = vld [vmem:[%s8836_s1 + $0x354] sm:$0xf]  ;;  %v1020_v3 = vrot.slane %v954_v48, 2 }
  0x6f   : > { %1342 = vmatpush.bf16.msra.mxu2 %v4474_v47  ;;  %1313 = vmatpush.bf16.msra.mxu1 %v4534_v56  ;;  %v193_v35 = vpack.c.bf16 %v6915_v32, %v6912_v31  ;;  %v5840_v47 = vld [vmem:[%s8836_s1 + $0x3e4] sm:$0xf0]  ;;  %v5837_v54 = vld [vmem:[%s8836_s1 + $0x3d4] sm:$0xf]  ;;  %v4743_v55 = vld [vmem:[%s8836_s1 + $0x3d8] sm:$0xf0] }
  0x70   : > { %1371 = vmatpush.bf16.msra.mxu3 %v4538_v51  ;;  %v4679_v51 = vld [vmem:[%s8836_s1 + $0x358] sm:$0xf0]  ;;  %v949_v52 = vld [vmem:[%s6393_s19 + $0x8] sm:$0xfc]  ;;  %v951_v56 = vld [vmem:[%s6393_s19 + $0x18] sm:$0x3]  ;;  %v4746_v59 = vor.u32 %v5837_v54, %v4743_v55 }
  0x71   : > { %v4682_v53 = vor.u32 %v5821_v50, %v4679_v51  ;;  %v953_v57 = vld [vmem:[%s6393_s19 + $0x28] sm:$0xfc]  ;;  %v955_v58 = vld [vmem:[%s6393_s19 + $0x38] sm:$0x3]  ;;  %v1016_v4 = vrot.slane %v949_v52, 2  ;;  %v1017_v5 = vrot.slane %v951_v56, 2 }
  0x72   : > { %1285 = vmatpush.bf16.msra.mxu0 %v4462_v6  ;;  %v1022_v6 = vrot.slane %v953_v57, 2  ;;  %v1023_v7 = vrot.slane %v955_v58, 2  ;;  %v5838_v16 = vld [vmem:[%s8836_s1 + $0x3d4] sm:$0xf0]  ;;  %v4671_v20 = vld [vmem:[%s8836_s1 + $0x348] sm:$0xf0] }
  0x73   : > { %1343 = vmatpush.bf16.msra.mxu2 %v4466_v60  ;;  %1314 = vmatpush.bf16.msra.mxu1 %v4526_v10  ;;  %v1013_v60 = vrot.slane %v948_v36, 2  ;;  %v5822_v10 = vld [vmem:[%s8836_s1 + $0x354] sm:$0xf0]  ;;  %v4735_v24 = vld [vmem:[%s8836_s1 + $0x3c8] sm:$0xf0]  ;;  %v1018_v25 = vsel %vm1012_vm1, %v1016_v4, %v1017_v5 }
  0x74   : > { %1372 = vmatpush.bf16.msra.mxu3 %v4530_v61  ;;  %v1014_v61 = vrot.slane %v950_v44, 2  ;;  %v1024_v26 = vsel %vm1012_vm1, %v1022_v6, %v1023_v7  ;;  %v4669_v36 = vld [vmem:[%s8836_s1 + $0x340] sm:$0xf]  ;;  %v4663_v50 = vld [vmem:[%s8836_s1 + $0x338] sm:$0xf0] }
  0x75   : > { %840 = vmatmul.bf16.vlgmr.msrb.gmra.mxu0 %v186_v12  ;;  %v1078_v30 = vpack.c.bf16 %v1024_v26, %v1018_v25  ;;  %v960_v44 = vld [vmem:[%s6393_s19 + $0x60] sm:$0xfc]  ;;  %v957_v52 = vld [vmem:[%s6393_s19 + $0x48] sm:$0xfc]  ;;  %v5833_v54 = vld [vmem:[%s8836_s1 + $0x3b4] sm:$0xf] }
  0x76   : > { %898 = vmatmul.bf16.vlgmr.msrb.gmra.mxu2 %v186_v12  ;;  %v5825_v12 = vld [vmem:[%s8836_s1 + $0x374] sm:$0xf]  ;;  %1628 = vmatpush.bf16.msrb.mxu0 %v4694_v23  ;;  %v5835_v23 = vld [vmem:[%s8836_s1 + $0x3c4] sm:$0xf]  ;;  %v4727_v55 = vld [vmem:[%s8836_s1 + $0x3b8] sm:$0xf0] }
  0x77   : > { %v959_v56 = vld [vmem:[%s6393_s19 + $0x58] sm:$0x3]  ;;  %v961_v57 = vld [vmem:[%s6393_s19 + $0x68] sm:$0xfc]  ;;  %v1031_v4 = vrot.slane %v960_v44, 2 }
  0x78   : > { %869 = vmatmul.bf16.vlgmr.msrb.gmra.mxu1 %v187_v13  ;;  %v963_v58 = vld [vmem:[%s6393_s19 + $0x78] sm:$0x3]  ;;  %v4655_v25 = vld [vmem:[%s8836_s1 + $0x328] sm:$0xf0] }
  0x79   : > { %927 = vmatmul.bf16.vlgmr.msrb.gmra.mxu3 %v187_v13  ;;  %v4695_v13 = vld [vmem:[%s8836_s1 + $0x378] sm:$0xf0]  ;;  %1657 = vmatpush.bf16.msrb.mxu1 %v4758_v27  ;;  %v4738_v27 = vor.u32 %v5835_v23, %v4735_v24  ;;  %v5834_v23 = vld [vmem:[%s8836_s1 + $0x3b4] sm:$0xf0]  ;;  %v5815_v24 = vld [vmem:[%s8836_s1 + $0x324] sm:$0xf] }
  0x7a   : > { %v4698_v14 = vor.u32 %v5825_v12, %v4695_v13  ;;  %1715 = vmatpush.bf16.msrb.mxu3 %v4762_v17  ;;  %v4741_v12 = vld [vmem:[%s8836_s1 + $0x3d0] sm:$0xf]  ;;  %v1015_v13 = vsel %vm1012_vm1, %v1013_v60, %v1014_v61  ;;  %v5819_v17 = vld [vmem:[%s8836_s1 + $0x344] sm:$0xf] }
  0x7b   : > { %v4742_v21 = vor.u32 %v5838_v16, %v4741_v12  ;;  %v4674_v22 = vor.u32 %v5819_v17, %v4671_v20  ;;  %v1034_v12 = vrot.slane %v961_v57, 2  ;;  %v5818_v16 = vld [vmem:[%s8836_s1 + $0x334] sm:$0xf0]  ;;  %v4725_v17 = vld [vmem:[%s8836_s1 + $0x3b0] sm:$0xf] }
  0x7c   : > { %1686 = vmatpush.bf16.msrb.mxu2 %v4698_v14  ;;  %v4726_v26 = vor.u32 %v5834_v23, %v4725_v17 }
  0x7e   : > { %1716 = vmatpush.bf16.msrb.mxu3 %v4754_v33 }
  0x80   : > { %1687 = vmatpush.bf16.msrb.mxu2 %v4690_v28 }
  0x82   : > { %1717 = vmatpush.bf16.msrb.mxu3 %v4746_v59  ;;  %v4730_v59 = vor.u32 %v5833_v54, %v4727_v55  ;;  %v5832_v55 = vld [vmem:[%s8836_s1 + $0x3a4] sm:$0xf0] }
  0x84   : > { %1688 = vmatpush.bf16.msrb.mxu2 %v4682_v53 }
  0x85   : > { %845 = vmatmul.bf16.gmra.mxu0 %v188_v42 }
  0x86   : > { %903 = vmatmul.bf16.gmra.mxu2 %v188_v42  ;;  %v5824_v42 = vld [vmem:[%s8836_s1 + $0x364] sm:$0xf0]  ;;  %1718 = vmatpush.bf16.msrb.mxu3 %v4738_v27  ;;  %v4658_v27 = vor.u32 %v5815_v24, %v4655_v25 }
  0x87   : > { %v4686_v46 = vor.u32 %v5824_v42, %v4685_v37  ;;  %v5820_v37 = vld [vmem:[%s8836_s1 + $0x344] sm:$0xf0]  ;;  %v4733_v42 = vld [vmem:[%s8836_s1 + $0x3c0] sm:$0xf] }
  0x88   : > { %874 = vmatmul.bf16.gmra.mxu1 %v189_v43  ;;  %1689 = vmatpush.bf16.msrb.mxu2 %v4674_v22 }
  0x89   : > { %932 = vmatmul.bf16.gmra.mxu3 %v189_v43  ;;  %v4749_v43 = vld [vmem:[%s8836_s1 + $0x3e0] sm:$0xf]  ;;  %1629 = vmatpush.bf16.msrb.mxu0 %v4686_v46  ;;  %v5836_v46 = vld [vmem:[%s8836_s1 + $0x3c4] sm:$0xf0] }
  0x8a   : > { %v4750_v49 = vor.u32 %v5840_v47, %v4749_v43  ;;  %v958_v43 = vld [vmem:[%s6393_s19 + $0x50] sm:$0x3]  ;;  %v4734_v48 = vor.u32 %v5836_v46, %v4733_v42  ;;  %1719 = vmatpush.bf16.msrb.mxu3 %v4730_v59  ;;  %v4647_v59 = vld [vmem:[%s8836_s1 + $0x318] sm:$0xf0] }
  0x8b   : > { %v962_v47 = vld [vmem:[%s6393_s19 + $0x70] sm:$0x3] }
  0x8c   : > { %1658 = vmatpush.bf16.msrb.mxu1 %v4750_v49  ;;  %v5817_v49 = vld [vmem:[%s8836_s1 + $0x334] sm:$0xf]  ;;  %v1032_v5 = vrot.slane %v962_v47, 2 }
  0x8d   : > { %v4666_v53 = vor.u32 %v5817_v49, %v4663_v50  ;;  %v4653_v49 = vld [vmem:[%s8836_s1 + $0x320] sm:$0xf]  ;;  %v5816_v50 = vld [vmem:[%s8836_s1 + $0x324] sm:$0xf0] }
  0x8e   : > { %v4654_v54 = vor.u32 %v5816_v50, %v4653_v49  ;;  %v4703_v49 = vld [vmem:[%s8836_s1 + $0x388] sm:$0xf0] }
  0x8f   : > { %1690 = vmatpush.bf16.msrb.mxu2 %v4666_v53  ;;  %v968_v53 = vld [vmem:[%s6393_s19 + $0xa0] sm:$0xfc] }
  0x90   : > { %1659 = vmatpush.bf16.msrb.mxu1 %v4742_v21  ;;  %v1033_v21 = vsel %vm1012_vm1, %v1031_v4, %v1032_v5  ;;  %v4711_v4 = vld [vmem:[%s8836_s1 + $0x398] sm:$0xf0]  ;;  %v967_v5 = vld [vmem:[%s6393_s19 + $0x98] sm:$0x3]  ;;  %v1043_v17 = vrot.slane %v968_v53, 2 }
  0x91   : > { %v1041_v24 = vrot.slane %v967_v5, 2 }
  0x93   : > { %1691 = vmatpush.bf16.msrb.mxu2 %v4658_v27 }
  0x94   : > { %1660 = vmatpush.bf16.msrb.mxu1 %v4734_v48  ;;  %v964_v48 = vld [vmem:[%s6393_s19 + $0x80] sm:$0xfc] }
  0x95   : > { %850 = vmatmul.bf16.gmra.mxu0 %v190_v2 }
  0x96   : > { %908 = vmatmul.bf16.gmra.mxu2 %v190_v2  ;;  %v1019_v2 = vrot.slane %v952_v45, 2  ;;  %v4670_v45 = vor.u32 %v5820_v37, %v4669_v36 }
  0x98   : > { %879 = vmatmul.bf16.gmra.mxu1 %v191_v8  ;;  %v1021_v14 = vsel %vm1012_vm1, %v1019_v2, %v1020_v3  ;;  %v1026_v3 = vrot.slane %v958_v43, 2 }
  0x99   : > { %937 = vmatmul.bf16.gmra.mxu3 %v191_v8  ;;  %v4677_v8 = vld [vmem:[%s8836_s1 + $0x350] sm:$0xf]  ;;  %v1077_v28 = vpack.c.bf16 %v1021_v14, %v1015_v13  ;;  %v1035_v13 = vrot.slane %v963_v58, 2  ;;  %1661 = vmatpush.bf16.msrb.mxu1 %v4726_v26  ;;  %v5813_v58 = vld [vmem:[%s8836_s1 + $0x314] sm:$0xf] }
  0x9a   : > { %v4678_v15 = vor.u32 %v5822_v10, %v4677_v8  ;;  %v1028_v8 = vrot.slane %v957_v52, 2  ;;  %v1029_v10 = vrot.slane %v959_v56, 2  ;;  %v966_v52 = vld [vmem:[%s6393_s19 + $0x90] sm:$0x3] }
  0x9b   : > { %v970_v56 = vld [vmem:[%s6393_s19 + $0xb0] sm:$0x3] }
  0x9c   : > { %1630 = vmatpush.bf16.msrb.mxu0 %v4678_v15  ;;  %v4661_v15 = vld [vmem:[%s8836_s1 + $0x330] sm:$0xf] }
  0x9d   : > { %v4662_v22 = vor.u32 %v5818_v16, %v4661_v15  ;;  %v1037_v15 = vrot.slane %v964_v48, 2  ;;  %v1038_v16 = vrot.slane %v966_v52, 2  ;;  %v5827_v48 = vld [vmem:[%s8836_s1 + $0x384] sm:$0xf] }
  0x9e   : > { %v4706_v53 = vor.u32 %v5827_v48, %v4703_v49 }
  0xa0   : > { %1631 = vmatpush.bf16.msrb.mxu0 %v4670_v45 }
  0xa4   : > { %1632 = vmatpush.bf16.msrb.mxu0 %v4662_v22 }
  0xa5   : > { %855 = vmatmul.bf16.gmra.mxu0 %v192_v34 }
  0xa6   : > { %913 = vmatmul.bf16.gmra.mxu2 %v192_v34 }
  0xa8   : > { %884 = vmatmul.bf16.gmra.mxu1 %v193_v35  ;;  %1633 = vmatpush.bf16.msrb.mxu0 %v4654_v54 }
  0xa9   : > { %942 = vmatmul.bf16.gmra.mxu3 %v193_v35  ;;  %v956_v35 = vld [vmem:[%s6393_s19 + $0x40] sm:$0xfc] }
  0xaa   : > { %v1025_v2 = vrot.slane %v956_v35, 2  ;;  %v1036_v35 = vsel %vm1012_vm1, %v1034_v12, %v1035_v13 }
  0xac   : > { %v1027_v20 = vsel %vm1012_vm1, %v1025_v2, %v1026_v3  ;;  %v4650_v2 = vor.u32 %v5813_v58, %v4647_v59  ;;  %v5829_v3 = vld [vmem:[%s8836_s1 + $0x394] sm:$0xf] }
  0xad   : > { %v1079_v37 = vpack.c.bf16 %v1033_v21, %v1027_v20  ;;  %v1044_v20 = vrot.slane %v970_v56, 2  ;;  %v5812_v56 = vld [vmem:[%s8836_s1 + $0x304] sm:$0xf0] }
  0xae   : > { %1692 = vmatpush.bf16.msrb.mxu2 %v4650_v2 }
  0xb2   : > { %v565_v29 = vpop.f32.mrf.mxu0 }
  0xb5   : > { %v594_v33 = vpop.f32.mrf.mxu1  ;;  %1286 = vmatmul.bf16.vlgmr.msra.gmra.mxu0 %v1077_v28 }
  0xb6   : > { %v6981_v34 = vadd.f32 %v594_v33, %v565_v29  ;;  %1344 = vmatmul.bf16.vlgmr.msra.gmra.mxu2 %v1077_v28  ;;  %v5831_v28 = vld [vmem:[%s8836_s1 + $0x3a4] sm:$0xf]  ;;  %v4719_v29 = vld [vmem:[%s8836_s1 + $0x3a8] sm:$0xf0]  ;;  %v1030_v33 = vsel %vm1012_vm1, %v1028_v8, %v1029_v10  ;;  %v971_v8 = vld [vmem:[%s6393_s19 + $0xb8] sm:$0x3]  ;;  %v4714_v10 = vor.u32 %v5829_v3, %v4711_v4 }
  0xb7   : > { %v4722_v36 = vor.u32 %v5831_v28, %v4719_v29  ;;  %v1080_v45 = vpack.c.bf16 %v1036_v35, %v1030_v33  ;;  %v1047_v26 = vrot.slane %v971_v8, 2  ;;  %v4645_v28 = vld [vmem:[%s8836_s1 + $0x310] sm:$0xf]  ;;  %v5814_v29 = vld [vmem:[%s8836_s1 + $0x314] sm:$0xf0]  ;;  %v1039_v33 = vsel %vm1012_vm1, %v1037_v15, %v1038_v16 }
  0xb8   : > { %1315 = vmatmul.bf16.vlgmr.msra.gmra.mxu1 %v1078_v30  ;;  %v1045_v35 = vsel %vm1012_vm1, %v1043_v17, %v1044_v20  ;;  %v972_v8 = vld [vmem:[%s6393_s19 + $0xc0] sm:$0xfc]  ;;  %v5857_v15 = vld [vmem:[%s8836_s1 + $0x474] sm:$0xf]  ;;  %v4887_v16 = vld [vmem:[%s8836_s1 + $0x478] sm:$0xf0] }
  0xb9   : > { %1373 = vmatmul.bf16.vlgmr.msra.gmra.mxu3 %v1078_v30  ;;  %v623_v51 = vpop.f32.mrf.mxu2  ;;  %v1081_v54 = vpack.c.bf16 %v1045_v35, %v1039_v33  ;;  %v5873_v17 = vld [vmem:[%s8836_s1 + $0x4f4] sm:$0xf]  ;;  %v1049_v35 = vrot.slane %v972_v8, 2 }
  0xba   : > { %v567_v61 = vpop.f32.mrf.mxu0  ;;  %1720 = vmatpush.bf16.msrb.mxu3 %v4722_v36  ;;  %v4646_v36 = vor.u32 %v5814_v29, %v4645_v28  ;;  %v979_v28 = vld [vmem:[%s6393_s19 + $0xf8] sm:$0x3] }
  0xbc   : > { %v652_v60 = vpop.f32.mrf.mxu3  ;;  %1634 = vmatpush.bf16.msrb.mxu0 %v4646_v36 }
  0xbd   : > { %v7015_v6 = vadd.f32 %v652_v60, %v623_v51  ;;  %v596_v7 = vpop.f32.mrf.mxu1  ;;  %v4717_v51 = vld [vmem:[%s8836_s1 + $0x3a0] sm:$0xf] }
  0xbe   : > { %v7017_v14 = vadd.f32 %v596_v7, %v567_v61  ;;  %v4718_v57 = vor.u32 %v5832_v55, %v4717_v51  ;;  %v965_v61 = vld [vmem:[%s6393_s19 + $0x88] sm:$0xfc]  ;;  %1721 = vmatpush.bf16.msrb.mxu3 %v4714_v10  ;;  %v4637_v55 = vld [vmem:[%s8836_s1 + $0x300] sm:$0xf]  ;;  %v974_v10 = vld [vmem:[%s6393_s19 + $0xd0] sm:$0x3] }
  0xbf   : > { %v969_v7 = vld [vmem:[%s6393_s19 + $0xa8] sm:$0xfc]  ;;  %v1040_v23 = vrot.slane %v965_v61, 2  ;;  %v1050_v36 = vrot.slane %v974_v10, 2 }
  0xc0   : > { %1662 = vmatpush.bf16.msrb.mxu1 %v4718_v57  ;;  %v1046_v25 = vrot.slane %v969_v7, 2  ;;  %v4701_v57 = vld [vmem:[%s8836_s1 + $0x380] sm:$0xf]  ;;  %v5828_v61 = vld [vmem:[%s8836_s1 + $0x384] sm:$0xf0] }
  0xc1   : > { %v625_v30 = vpop.f32.mrf.mxu2  ;;  %v1042_v51 = vsel %vm1012_vm1, %v1040_v23, %v1041_v24  ;;  %v4702_v4 = vor.u32 %v5828_v61, %v4701_v57  ;;  %v4890_v23 = vor.u32 %v5857_v15, %v4887_v16  ;;  %v4951_v24 = vld [vmem:[%s8836_s1 + $0x4f8] sm:$0xf0] }
  0xc2   : > { %v570_v43 = vpop.f32.mrf.mxu0  ;;  %v1048_v52 = vsel %vm1012_vm1, %v1046_v25, %v1047_v26  ;;  %1722 = vmatpush.bf16.msrb.mxu3 %v4706_v53  ;;  %v975_v25 = vld [vmem:[%s6393_s19 + $0xd8] sm:$0x3]  ;;  %v977_v26 = vld [vmem:[%s6393_s19 + $0xe8] sm:$0xfc]  ;;  %v4954_v29 = vor.u32 %v5873_v17, %v4951_v24 }
  0xc3   : > { %v1082_v3 = vpack.c.bf16 %v1048_v52, %v1042_v51  ;;  %v1053_v48 = vrot.slane %v975_v25, 2  ;;  %v1058_v49 = vrot.slane %v977_v26, 2  ;;  %v4885_v52 = vld [vmem:[%s8836_s1 + $0x470] sm:$0xf]  ;;  %v5858_v53 = vld [vmem:[%s8836_s1 + $0x474] sm:$0xf0] }
  0xc4   : > { %v654_v42 = vpop.f32.mrf.mxu3  ;;  %v4886_v57 = vor.u32 %v5858_v53, %v4885_v52  ;;  %v4877_v25 = vld [vmem:[%s8836_s1 + $0x460] sm:$0xf]  ;;  %v5856_v26 = vld [vmem:[%s8836_s1 + $0x464] sm:$0xf0] }
  0xc5   : > { %v7047_v44 = vadd.f32 %v654_v42, %v625_v30  ;;  %v599_v46 = vpop.f32.mrf.mxu1  ;;  %1291 = vmatmul.bf16.gmra.mxu0 %v1079_v37  ;;  %v4709_v30 = vld [vmem:[%s8836_s1 + $0x390] sm:$0xf]  ;;  %v5811_v42 = vld [vmem:[%s8836_s1 + $0x304] sm:$0xf] }
  0xc6   : > { %v7049_v47 = vadd.f32 %v599_v46, %v570_v43  ;;  %1349 = vmatmul.bf16.gmra.mxu2 %v1079_v37  ;;  %v5830_v37 = vld [vmem:[%s8836_s1 + $0x394] sm:$0xf0]  ;;  %v4639_v43 = vld [vmem:[%s8836_s1 + $0x308] sm:$0xf0]  ;;  %2176 = vmatpush.bf16.msra.mxu3 %v4954_v29  ;;  %v4878_v29 = vor.u32 %v5856_v26, %v4877_v25 }
  0xc7   : > { %v4642_v46 = vor.u32 %v5811_v42, %v4639_v43 }
  0xc8   : > { %1320 = vmatmul.bf16.gmra.mxu1 %v1080_v45 }
  0xc9   : > { %1378 = vmatmul.bf16.gmra.mxu3 %v1080_v45  ;;  %v628_v60 = vpop.f32.mrf.mxu2  ;;  %v4710_v45 = vor.u32 %v5830_v37, %v4709_v30  ;;  %1693 = vmatpush.bf16.msrb.mxu2 %v4642_v46 }
  0xca   : > { %v572_v13 = vpop.f32.mrf.mxu0 }
  0xcb   : > { %1663 = vmatpush.bf16.msrb.mxu1 %v4710_v45 }
  0xcc   : > { %v657_v12 = vpop.f32.mrf.mxu3 }
  0xcd   : > { %v7083_v21 = vadd.f32 %v657_v12, %v628_v60  ;;  %v601_v22 = vpop.f32.mrf.mxu1  ;;  %v4638_v60 = vor.u32 %v5812_v56, %v4637_v55  ;;  %v976_v12 = vld [vmem:[%s6393_s19 + $0xe0] sm:$0xfc]  ;;  %2147 = vmatpush.bf16.msra.mxu2 %v4890_v23  ;;  %v1051_v55 = vsel %vm1012_vm1, %v1049_v35, %v1050_v36  ;;  %v5853_v35 = vld [vmem:[%s8836_s1 + $0x454] sm:$0xf]  ;;  %v4871_v36 = vld [vmem:[%s8836_s1 + $0x458] sm:$0xf0] }
  0xce   : > { %v7085_v27 = vadd.f32 %v601_v22, %v572_v13  ;;  %v978_v13 = vld [vmem:[%s6393_s19 + $0xf0] sm:$0x3]  ;;  %v973_v22 = vld [vmem:[%s6393_s19 + $0xc8] sm:$0xfc]  ;;  %v1055_v37 = vrot.slane %v976_v12, 2 }
  0xcf   : > { %1635 = vmatpush.bf16.msrb.mxu0 %v4638_v60  ;;  %1664 = vmatpush.bf16.msrb.mxu1 %v4702_v4  ;;  %v1056_v42 = vrot.slane %v978_v13, 2  ;;  %v1052_v46 = vrot.slane %v973_v22, 2  ;;  %v4879_v60 = vld [vmem:[%s8836_s1 + $0x468] sm:$0xf0]  ;;  %v5871_v4 = vld [vmem:[%s8836_s1 + $0x4e4] sm:$0xf] }
  0xd1   : > { %v630_v50 = vpop.f32.mrf.mxu2  ;;  %v1057_v56 = vsel %vm1012_vm1, %v1055_v37, %v1056_v42  ;;  %v1054_v10 = vsel %vm1012_vm1, %v1052_v46, %v1053_v48  ;;  %v5869_v37 = vld [vmem:[%s8836_s1 + $0x4d4] sm:$0xf]  ;;  %v4935_v46 = vld [vmem:[%s8836_s1 + $0x4d8] sm:$0xf0] }
  0xd2   : > { %v575_v59 = vpop.f32.mrf.mxu0  ;;  %v1083_v15 = vpack.c.bf16 %v1057_v56, %v1051_v55  ;;  %v4938_v48 = vor.u32 %v5869_v37, %v4935_v46  ;;  %v4869_v55 = vld [vmem:[%s8836_s1 + $0x450] sm:$0xf]  ;;  %v5854_v56 = vld [vmem:[%s8836_s1 + $0x454] sm:$0xf0]  ;;  %v4919_v37 = vld [vmem:[%s8836_s1 + $0x4b8] sm:$0xf0] }
  0xd3   : > { %2089 = vmatpush.bf16.msra.mxu0 %v4886_v57  ;;  %v4933_v57 = vld [vmem:[%s8836_s1 + $0x4d0] sm:$0xf] }
  0xd4   : > { %v659_v58 = vpop.f32.mrf.mxu3 }
  0xd5   : > { %v7127_v2 = vadd.f32 %v659_v58, %v630_v50  ;;  %v604_v5 = vpop.f32.mrf.mxu1  ;;  %1296 = vmatmul.bf16.gmra.mxu0 %v1081_v54  ;;  %v1059_v50 = vrot.slane %v979_v28, 2  ;;  %v5874_v58 = vld [vmem:[%s8836_s1 + $0x4f4] sm:$0xf0]  ;;  %v4941_v28 = vld [vmem:[%s8836_s1 + $0x4e0] sm:$0xf] }
  0xd6   : > { %v7129_v7 = vadd.f32 %v604_v5, %v575_v59  ;;  %1354 = vmatmul.bf16.gmra.mxu2 %v1081_v54  ;;  %v4949_v54 = vld [vmem:[%s8836_s1 + $0x4f0] sm:$0xf]  ;;  %v5855_v59 = vld [vmem:[%s8836_s1 + $0x464] sm:$0xf]  ;;  %v4943_v5 = vld [vmem:[%s8836_s1 + $0x4e8] sm:$0xf0] }
  0xd7   : > { %v4950_v61 = vor.u32 %v5874_v58, %v4949_v54  ;;  %v1060_v12 = vsel %vm1012_vm1, %v1058_v49, %v1059_v50  ;;  %v4946_v13 = vor.u32 %v5871_v4, %v4943_v5  ;;  %2090 = vmatpush.bf16.msra.mxu0 %v4878_v29  ;;  %v4870_v58 = vor.u32 %v5854_v56, %v4869_v55  ;;  %v5867_v5 = vld [vmem:[%s8836_s1 + $0x4c4] sm:$0xf]  ;;  %v5849_v29 = vld [vmem:[%s8836_s1 + $0x434] sm:$0xf]  ;;  %v4853_v56 = vld [vmem:[%s8836_s1 + $0x430] sm:$0xf] }
  0xd8   : > { %1325 = vmatmul.bf16.gmra.mxu1 %v1082_v3  ;;  %v1084_v22 = vpack.c.bf16 %v1060_v12, %v1054_v10 }
  0xd9   : > { %1383 = vmatmul.bf16.gmra.mxu3 %v1082_v3  ;;  %v633_v20 = vpop.f32.mrf.mxu2  ;;  %v4882_v3 = vor.u32 %v5855_v59, %v4879_v60  ;;  %2118 = vmatpush.bf16.msra.mxu1 %v4950_v61  ;;  %v5870_v59 = vld [vmem:[%s8836_s1 + $0x4d4] sm:$0xf0]  ;;  %v5851_v60 = vld [vmem:[%s8836_s1 + $0x444] sm:$0xf]  ;;  %v4863_v61 = vld [vmem:[%s8836_s1 + $0x448] sm:$0xf0] }
  0xda   : > { %v577_v33 = vpop.f32.mrf.mxu0  ;;  %2177 = vmatpush.bf16.msra.mxu3 %v4946_v13  ;;  %v4866_v4 = vor.u32 %v5851_v60, %v4863_v61  ;;  %v1427_v13 = vpack.c.bf16 %v6790_v38, %v6733_v9  ;;  %v4861_v9 = vld [vmem:[%s8836_s1 + $0x440] sm:$0xf]  ;;  %v5852_v38 = vld [vmem:[%s8836_s1 + $0x444] sm:$0xf0]  ;;  %v4847_v60 = vld [vmem:[%s8836_s1 + $0x428] sm:$0xf0] }
  0xdb   : > { %2148 = vmatpush.bf16.msra.mxu2 %v4882_v3  ;;  %v4934_v3 = vor.u32 %v5870_v59, %v4933_v57  ;;  %2091 = vmatpush.bf16.msra.mxu0 %v4870_v58  ;;  %v4917_v57 = vld [vmem:[%s8836_s1 + $0x4b0] sm:$0xf]  ;;  %v5847_v59 = vld [vmem:[%s8836_s1 + $0x424] sm:$0xf] }
  0xdc   : > { %v662_v30 = vpop.f32.mrf.mxu3 }
  0xdd   : > { %v7151_v43 = vadd.f32 %v662_v30, %v633_v20  ;;  %v606_v45 = vpop.f32.mrf.mxu1  ;;  %v5872_v30 = vld [vmem:[%s8836_s1 + $0x4e4] sm:$0xf0] }
  0xde   : > { %v7153_v51 = vadd.f32 %v606_v45, %v577_v33  ;;  %v4942_v33 = vor.u32 %v5872_v30, %v4941_v28  ;;  %v4874_v45 = vor.u32 %v5853_v35, %v4871_v36  ;;  %2178 = vmatpush.bf16.msra.mxu3 %v4938_v48  ;;  %v4862_v28 = vor.u32 %v5852_v38, %v4861_v9  ;;  %v4855_v30 = vld [vmem:[%s8836_s1 + $0x438] sm:$0xf0] }
  0xdf   : > { %v4858_v36 = vor.u32 %v5849_v29, %v4855_v30  ;;  %v4903_v30 = vld [vmem:[%s8836_s1 + $0x498] sm:$0xf0] }
  0xe0   : > { %2119 = vmatpush.bf16.msra.mxu1 %v4942_v33  ;;  %2149 = vmatpush.bf16.msra.mxu2 %v4874_v45  ;;  %v5865_v33 = vld [vmem:[%s8836_s1 + $0x4b4] sm:$0xf] }
  0xe1   : > { %v635_v8 = vpop.f32.mrf.mxu2  ;;  %2092 = vmatpush.bf16.msra.mxu0 %v4862_v28  ;;  %v4922_v45 = vor.u32 %v5865_v33, %v4919_v37  ;;  %v4839_v28 = vld [vmem:[%s8836_s1 + $0x418] sm:$0xf0] }
  0xe2   : > { %v580_v17 = vpop.f32.mrf.mxu0 }
  0xe4   : > { %v664_v16 = vpop.f32.mrf.mxu3  ;;  %2120 = vmatpush.bf16.msra.mxu1 %v4934_v3  ;;  %2150 = vmatpush.bf16.msra.mxu2 %v4866_v4  ;;  %v4850_v3 = vor.u32 %v5847_v59, %v4847_v60  ;;  %v5863_v4 = vld [vmem:[%s8836_s1 + $0x4a4] sm:$0xf]  ;;  %v4895_v60 = vld [vmem:[%s8836_s1 + $0x488] sm:$0xf0] }
  0xe5   : > { %v7183_v20 = vadd.f32 %v664_v16, %v635_v8  ;;  %v609_v23 = vpop.f32.mrf.mxu1  ;;  %1301 = vmatmul.bf16.gmra.mxu0 %v1083_v15  ;;  %v4927_v8 = vld [vmem:[%s8836_s1 + $0x4c8] sm:$0xf0]  ;;  %v5859_v59 = vld [vmem:[%s8836_s1 + $0x484] sm:$0xf] }
  0xe6   : > { %v7185_v24 = vadd.f32 %v609_v23, %v580_v17  ;;  %1359 = vmatmul.bf16.gmra.mxu2 %v1083_v15  ;;  %v4930_v12 = vor.u32 %v5867_v5, %v4927_v8  ;;  %v1428_v23 = vpack.c.bf16 %v6796_v40, %v6737_v11  ;;  %v5868_v11 = vld [vmem:[%s8836_s1 + $0x4c4] sm:$0xf0]  ;;  %v4911_v5 = vld [vmem:[%s8836_s1 + $0x4a8] sm:$0xf0] }
  0xe8   : > { %1330 = vmatmul.bf16.gmra.mxu1 %v1084_v22  ;;  %2179 = vmatpush.bf16.msra.mxu3 %v4930_v12 }
  0xe9   : > { %1388 = vmatmul.bf16.gmra.mxu3 %v1084_v22  ;;  %v638_v42 = vpop.f32.mrf.mxu2  ;;  %2151 = vmatpush.bf16.msra.mxu2 %v4858_v36 }
  0xea   : > { %v582_v50 = vpop.f32.mrf.mxu0 }
  0xec   : > { %v667_v49 = vpop.f32.mrf.mxu3  ;;  %2180 = vmatpush.bf16.msra.mxu3 %v4922_v45 }
  0xed   : > { %v7211_v52 = vadd.f32 %v667_v49, %v638_v42  ;;  %v611_v53 = vpop.f32.mrf.mxu1  ;;  %2152 = vmatpush.bf16.msra.mxu2 %v4850_v3  ;;  %v4898_v3 = vor.u32 %v5859_v59, %v4895_v60 }
  0xee   : > { %v7213_v54 = vadd.f32 %v611_v53, %v582_v50 }
  0xf1   : > { %v640_v10 = vpop.f32.mrf.mxu2 }
  0xf2   : > { %v841_v16 = vpop.f32.mrf.mxu0 }
  0xf3   : > { %v842_v22 = vadd.f32 %v841_v16, %v6981_v34  ;;  %v4925_v34 = vld [vmem:[%s8836_s1 + $0x4c0] sm:$0xf] }
  0xf4   : > { %v669_v15 = vpop.f32.mrf.mxu3  ;;  %v4926_v40 = vor.u32 %v5868_v11, %v4925_v34  ;;  %v5845_v34 = vld [vmem:[%s8836_s1 + $0x414] sm:$0xf] }
  0xf5   : > { %v7241_v17 = vadd.f32 %v669_v15, %v640_v10  ;;  %v870_v25 = vpop.f32.mrf.mxu1  ;;  %1636 = vmatmul.bf16.vlgmr.msrb.gmra.mxu0 %v1427_v13  ;;  %v4914_v10 = vor.u32 %v5863_v4, %v4911_v5  ;;  %v5861_v11 = vld [vmem:[%s8836_s1 + $0x494] sm:$0xf]  ;;  %v4842_v29 = vor.u32 %v5845_v34, %v4839_v28  ;;  %v1431_v5 = vpack.c.bf16 %v6882_v18, %v6845_v63  ;;  %v5860_v63 = vld [vmem:[%s8836_s1 + $0x484] sm:$0xf0] }
  0xf6   : > { %v7246_v26 = vadd.f32 %v870_v25, %v842_v22  ;;  %1694 = vmatmul.bf16.vlgmr.msrb.gmra.mxu2 %v1427_v13  ;;  %2121 = vmatpush.bf16.msra.mxu1 %v4926_v40  ;;  %v1429_v13 = vpack.c.bf16 %v6842_v62, %v6793_v39  ;;  %v1430_v25 = vpack.c.bf16 %v6848_v0, %v6799_v41  ;;  %v4845_v39 = vld [vmem:[%s8836_s1 + $0x420] sm:$0xf]  ;;  %v5848_v62 = vld [vmem:[%s8836_s1 + $0x424] sm:$0xf0] }
  0xf7   : > { %2181 = vmatpush.bf16.msra.mxu3 %v4914_v10  ;;  %v5864_v41 = vld [vmem:[%s8836_s1 + $0x4a4] sm:$0xf0]  ;;  %2153 = vmatpush.bf16.msra.mxu2 %v4842_v29 }
  0xf8   : > { %1665 = vmatmul.bf16.vlgmr.msrb.gmra.mxu1 %v1428_v23  ;;  %v5844_v10 = vld [vmem:[%s8836_s1 + $0x404] sm:$0xf0] }
  0xf9   : > { %1723 = vmatmul.bf16.vlgmr.msrb.gmra.mxu3 %v1428_v23  ;;  %v899_v35 = vpop.f32.mrf.mxu2 }
  0xfa   : > { %v900_v42 = vadd.f32 %v899_v35, %v7015_v6  ;;  %v843_v48 = vpop.f32.mrf.mxu0  ;;  %v5850_v6 = vld [vmem:[%s8836_s1 + $0x434] sm:$0xf0]  ;;  %v4906_v35 = vor.u32 %v5861_v11, %v4903_v30 }
  0xfb   : > { %v844_v50 = vadd.f32 %v843_v48, %v7017_v14  ;;  %v4854_v58 = vor.u32 %v5850_v6, %v4853_v56  ;;  %v5866_v14 = vld [vmem:[%s8836_s1 + $0x4b4] sm:$0xf0]  ;;  %v5843_v6 = vld [vmem:[%s8836_s1 + $0x404] sm:$0xf] }
  0xfc   : > { %v928_v46 = vpop.f32.mrf.mxu3  ;;  %v4918_v61 = vor.u32 %v5866_v14, %v4917_v57  ;;  %2182 = vmatpush.bf16.msra.mxu3 %v4906_v35  ;;  %v4831_v57 = vld [vmem:[%s8836_s1 + $0x408] sm:$0xf0] }
  0xfd   : > { %v7273_v49 = vadd.f32 %v928_v46, %v900_v42  ;;  %v872_v53 = vpop.f32.mrf.mxu1  ;;  %2093 = vmatpush.bf16.msra.mxu0 %v4854_v58  ;;  %v4834_v14 = vor.u32 %v5843_v6, %v4831_v57  ;;  %v4602_v35 = vld [vmem:[%s6393_s19 + $0x108] sm:$0xff]  ;;  %v5903_v57 = vld [vmem:[%s8836_s1 + $0x5e4] sm:$0xf] }
  0xfe   : > { %v7276_v55 = vadd.f32 %v872_v53, %v844_v50  ;;  %2122 = vmatpush.bf16.msra.mxu1 %v4918_v61  ;;  %v4837_v50 = vld [vmem:[%s8836_s1 + $0x410] sm:$0xf] }
  0xff   : > { %v4901_v53 = vld [vmem:[%s8836_s1 + $0x490] sm:$0xf]  ;;  %2154 = vmatpush.bf16.msra.mxu2 %v4834_v14 }
 0x100   : > { %2183 = vmatpush.bf16.msra.mxu3 %v4898_v3  ;;  %v4763_v3 = vld [vmem:[%s6393_s19 + $0x20] sm:$0xfe] }
 0x101   : > { %v901_v8 = vpop.f32.mrf.mxu2 }
 0x102   : > { %v902_v12 = vadd.f32 %v901_v8, %v7047_v44  ;;  %v846_v16 = vpop.f32.mrf.mxu0  ;;  %v4909_v44 = vld [vmem:[%s8836_s1 + $0x4a0] sm:$0xf] }
 0x103   : > { %v847_v23 = vadd.f32 %v846_v16, %v7049_v47  ;;  %v4846_v47 = vor.u32 %v5848_v62, %v4845_v39  ;;  %v4910_v0 = vor.u32 %v5864_v41, %v4909_v44  ;;  %v4829_v8 = vld [vmem:[%s8836_s1 + $0x400] sm:$0xf]  ;;  %v5889_v62 = vld [vmem:[%s8836_s1 + $0x574] sm:$0xf] }
 0x104   : > { %v930_v15 = vpop.f32.mrf.mxu3  ;;  %v5905_v44 = vld [vmem:[%s8836_s1 + $0x5f4] sm:$0xf] }
 0x105   : > { %v7305_v22 = vadd.f32 %v930_v15, %v902_v12  ;;  %v875_v9 = vpop.f32.mrf.mxu1  ;;  %1641 = vmatmul.bf16.gmra.mxu0 %v1429_v13  ;;  %2123 = vmatpush.bf16.msra.mxu1 %v4910_v0  ;;  %v4893_v12 = vld [vmem:[%s8836_s1 + $0x480] sm:$0xf] }
 0x106   : > { %v7310_v38 = vadd.f32 %v875_v9, %v847_v23  ;;  %1699 = vmatmul.bf16.gmra.mxu2 %v1429_v13  ;;  %2094 = vmatpush.bf16.msra.mxu0 %v4846_v47  ;;  %v1432_v23 = vpack.c.bf16 %v6912_v31, %v6851_v1  ;;  %v5143_v47 = vld [vmem:[%s8836_s1 + $0x5f8] sm:$0xf0] }
 0x107   : > { %v5146_v0 = vor.u32 %v5905_v44, %v5143_v47 }
 0x108   : > { %1670 = vmatmul.bf16.gmra.mxu1 %v1430_v25 }
 0x109   : > { %1728 = vmatmul.bf16.gmra.mxu3 %v1430_v25  ;;  %v904_v40 = vpop.f32.mrf.mxu2  ;;  %v4894_v25 = vor.u32 %v5860_v63, %v4893_v12  ;;  %v4769_v12 = vld [vmem:[%s6393_s19 + $0x50] sm:$0x1]  ;;  %v5888_v63 = vld [vmem:[%s8836_s1 + $0x564] sm:$0xf0] }
 0x10a   : > { %v905_v33 = vadd.f32 %v904_v40, %v7083_v21  ;;  %v848_v37 = vpop.f32.mrf.mxu0  ;;  %v5846_v21 = vld [vmem:[%s8836_s1 + $0x414] sm:$0xf0]  ;;  %2637 = vmatpush.bf16.msrb.mxu3 %v5146_v0  ;;  %v5127_v0 = vld [vmem:[%s8836_s1 + $0x5d8] sm:$0xf0] }
 0x10b   : > { %v849_v45 = vadd.f32 %v848_v37, %v7085_v27  ;;  %v4838_v56 = vor.u32 %v5846_v21, %v4837_v50  ;;  %v5862_v27 = vld [vmem:[%s8836_s1 + $0x494] sm:$0xf0]  ;;  %v5141_v37 = vld [vmem:[%s8836_s1 + $0x5f0] sm:$0xf]  ;;  %v5887_v50 = vld [vmem:[%s8836_s1 + $0x564] sm:$0xf] }
 0x10c   : > { %v933_v36 = vpop.f32.mrf.mxu3  ;;  %v4902_v58 = vor.u32 %v5862_v27, %v4901_v53  ;;  %v5071_v21 = vld [vmem:[%s8836_s1 + $0x568] sm:$0xf0] }
 0x10d   : > { %v7337_v42 = vadd.f32 %v933_v36, %v905_v33  ;;  %v877_v46 = vpop.f32.mrf.mxu1  ;;  %2095 = vmatpush.bf16.msra.mxu0 %v4838_v56  ;;  %v4601_v33 = vld [vmem:[%s6393_s19 + $0x100] sm:$0xff]  ;;  %v5077_v36 = vld [vmem:[%s8836_s1 + $0x570] sm:$0xf]  ;;  %v5074_v6 = vor.u32 %v5887_v50, %v5071_v21 }
 0x10e   : > { %v7340_v48 = vadd.f32 %v877_v46, %v849_v45  ;;  %2124 = vmatpush.bf16.msra.mxu1 %v4902_v58  ;;  %v5906_v46 = vld [vmem:[%s8836_s1 + $0x5f4] sm:$0xf0]  ;;  %v1433_v56 = vpack.c.bf16 %v4601_v33, %v6885_v19  ;;  %v5135_v58 = vld [vmem:[%s8836_s1 + $0x5e8] sm:$0xf0]  ;;  %v1831_v33 = vrot.slane %v4769_v12, 1 }
 0x10f   : > { %v5142_v27 = vor.u32 %v5906_v46, %v5141_v37  ;;  %v5138_v60 = vor.u32 %v5903_v57, %v5135_v58  ;;  %v5119_v12 = vld [vmem:[%s8836_s1 + $0x5c8] sm:$0xf0] }
 0x111   : > { %v906_v61 = vpop.f32.mrf.mxu2  ;;  %2638 = vmatpush.bf16.msrb.mxu3 %v5138_v60  ;;  %v5883_v60 = vld [vmem:[%s8836_s1 + $0x544] sm:$0xf] }
 0x112   : > { %v907_v4 = vadd.f32 %v906_v61, %v7127_v2  ;;  %v851_v15 = vpop.f32.mrf.mxu0  ;;  %v4830_v2 = vor.u32 %v5844_v10, %v4829_v8  ;;  %2125 = vmatpush.bf16.msra.mxu1 %v4894_v25  ;;  %v1434_v61 = vpack.c.bf16 %v4602_v35, %v6915_v32  ;;  %v4765_v8 = vld [vmem:[%s6393_s19 + $0x30] sm:$0x1]  ;;  %v4767_v10 = vld [vmem:[%s6393_s19 + $0x40] sm:$0xfe]  ;;  %v4766_v32 = vld [vmem:[%s6393_s19 + $0x38] sm:$0x1] }
 0x113   : > { %v852_v16 = vadd.f32 %v851_v15, %v7129_v7  ;;  %v5079_v7 = vld [vmem:[%s8836_s1 + $0x578] sm:$0xf0]  ;;  %v4768_v15 = vld [vmem:[%s6393_s19 + $0x48] sm:$0xfe] }
 0x114   : > { %v935_v13 = vpop.f32.mrf.mxu3  ;;  %2096 = vmatpush.bf16.msra.mxu0 %v4830_v2  ;;  %v5082_v31 = vor.u32 %v5889_v62, %v5079_v7  ;;  %v5069_v2 = vld [vmem:[%s8836_s1 + $0x560] sm:$0xf]  ;;  %v5885_v62 = vld [vmem:[%s8836_s1 + $0x554] sm:$0xf]  ;;  %v5063_v7 = vld [vmem:[%s8836_s1 + $0x558] sm:$0xf0] }
 0x115   : > { %v7381_v18 = vadd.f32 %v935_v13, %v907_v4  ;;  %v880_v9 = vpop.f32.mrf.mxu1  ;;  %1646 = vmatmul.bf16.gmra.mxu0 %v1431_v5  ;;  %v1824_v13 = vrot.slane %v4763_v3, 1  ;;  %v5070_v25 = vor.u32 %v5888_v63, %v5069_v2  ;;  %v5066_v47 = vor.u32 %v5885_v62, %v5063_v7  ;;  %v4771_v2 = vld [vmem:[%s6393_s19 + $0x60] sm:$0xfe] }
 0x116   : > { %v7386_v39 = vadd.f32 %v880_v9, %v852_v16  ;;  %1704 = vmatmul.bf16.gmra.mxu2 %v1431_v5  ;;  %2579 = vmatpush.bf16.msrb.mxu1 %v5142_v27  ;;  %v5133_v16 = vld [vmem:[%s8836_s1 + $0x5e0] sm:$0xf]  ;;  %v5904_v9 = vld [vmem:[%s8836_s1 + $0x5e4] sm:$0xf0]  ;;  %v5125_v27 = vld [vmem:[%s8836_s1 + $0x5d0] sm:$0xf] }
 0x117   : > { %2608 = vmatpush.bf16.msrb.mxu2 %v5082_v31  ;;  %v4770_v31 = vld [vmem:[%s6393_s19 + $0x58] sm:$0x1]  ;;  %v5134_v44 = vor.u32 %v5904_v9, %v5133_v16  ;;  %v4777_v9 = vld [vmem:[%s6393_s19 + $0x90] sm:$0x1]  ;;  %v1836_v62 = vrot.slane %v4771_v2, 1 }
 0x118   : > { %1675 = vmatmul.bf16.gmra.mxu1 %v1432_v23  ;;  %v1834_v46 = vrot.slane %v4770_v31, 1  ;;  %v4774_v31 = vld [vmem:[%s6393_s19 + $0x78] sm:$0x1] }
 0x119   : > { %1733 = vmatmul.bf16.gmra.mxu3 %v1432_v23  ;;  %v909_v1 = vpop.f32.mrf.mxu2 }
 0x11a   : > { %v910_v41 = vadd.f32 %v909_v1, %v7151_v43  ;;  %v853_v28 = vpop.f32.mrf.mxu0  ;;  %v5890_v43 = vld [vmem:[%s8836_s1 + $0x574] sm:$0xf0]  ;;  %2580 = vmatpush.bf16.msrb.mxu1 %v5134_v44  ;;  %v4776_v44 = vld [vmem:[%s6393_s19 + $0x88] sm:$0xfe] }
 0x11b   : > { %v854_v40 = vadd.f32 %v853_v28, %v7153_v51  ;;  %v5078_v51 = vor.u32 %v5890_v43, %v5077_v36  ;;  %2609 = vmatpush.bf16.msrb.mxu2 %v5074_v6 }
 0x11c   : > { %v938_v34 = vpop.f32.mrf.mxu3 }
 0x11d   : > { %v7401_v11 = vadd.f32 %v938_v34, %v910_v41  ;;  %v882_v29 = vpop.f32.mrf.mxu1  ;;  %2550 = vmatpush.bf16.msrb.mxu0 %v5078_v51  ;;  %v5901_v41 = vld [vmem:[%s8836_s1 + $0x5d4] sm:$0xf]  ;;  %v1833_v51 = vrot.slane %v4768_v15, 1 }
 0x11e   : > { %v7404_v30 = vadd.f32 %v882_v29, %v854_v40  ;;  %v1825_v40 = vrot.slane %v4765_v8, 1  ;;  %v1830_v29 = vrot.slane %v4767_v10, 1  ;;  %v5130_v35 = vor.u32 %v5901_v41, %v5127_v0  ;;  %v5899_v10 = vld [vmem:[%s8836_s1 + $0x5c4] sm:$0xf]  ;;  %v5884_v41 = vld [vmem:[%s8836_s1 + $0x544] sm:$0xf0] }
 0x11f   : > { %2610 = vmatpush.bf16.msrb.mxu2 %v5066_v47  ;;  %v1835_v58 = vsel %vm290_vm0, %v1833_v51, %v1834_v46  ;;  %v5053_v47 = vld [vmem:[%s8836_s1 + $0x540] sm:$0xf] }
 0x120   : > { %2639 = vmatpush.bf16.msrb.mxu3 %v5130_v35  ;;  %v1826_v21 = vsel %vm290_vm0, %v1824_v13, %v1825_v40  ;;  %v5117_v0 = vld [vmem:[%s8836_s1 + $0x5c0] sm:$0xf]  ;;  %v5881_v40 = vld [vmem:[%s8836_s1 + $0x534] sm:$0xf] }
 0x121   : > { %v911_v45 = vpop.f32.mrf.mxu2  ;;  %2551 = vmatpush.bf16.msrb.mxu0 %v5070_v25  ;;  %v4775_v25 = vld [vmem:[%s6393_s19 + $0x80] sm:$0xfe] }
 0x122   : > { %v912_v53 = vadd.f32 %v911_v45, %v7183_v20  ;;  %v856_v59 = vpop.f32.mrf.mxu0  ;;  %v1828_v45 = vrot.slane %v4766_v32, 1  ;;  %v5122_v32 = vor.u32 %v5899_v10, %v5119_v12 }
 0x123   : > { %v857_v19 = vadd.f32 %v856_v59, %v7185_v24  ;;  %v4764_v24 = vld [vmem:[%s6393_s19 + $0x28] sm:$0xfe]  ;;  %v5902_v59 = vld [vmem:[%s8836_s1 + $0x5d4] sm:$0xf0] }
 0x124   : > { %v940_v14 = vpop.f32.mrf.mxu3  ;;  %v1827_v37 = vrot.slane %v4764_v24, 1  ;;  %2640 = vmatpush.bf16.msrb.mxu3 %v5122_v32  ;;  %v5879_v32 = vld [vmem:[%s8836_s1 + $0x524] sm:$0xf] }
 0x125   : > { %v7434_v20 = vadd.f32 %v940_v14, %v912_v53  ;;  %v885_v4 = vpop.f32.mrf.mxu1  ;;  %1651 = vmatmul.bf16.gmra.mxu0 %v1433_v56  ;;  %v1832_v53 = vsel %vm290_vm0, %v1830_v29, %v1831_v33  ;;  %v5047_v29 = vld [vmem:[%s8836_s1 + $0x538] sm:$0xf0]  ;;  %v4778_v33 = vld [vmem:[%s6393_s19 + $0x98] sm:$0x1] }
 0x126   : > { %v7439_v5 = vadd.f32 %v885_v4, %v857_v19  ;;  %1709 = vmatmul.bf16.gmra.mxu2 %v1433_v56  ;;  %v5061_v56 = vld [vmem:[%s8836_s1 + $0x550] sm:$0xf]  ;;  %v1829_v57 = vsel %vm290_vm0, %v1827_v37, %v1828_v45  ;;  %v5055_v19 = vld [vmem:[%s8836_s1 + $0x548] sm:$0xf0]  ;;  %v1888_v3 = vpack.c.bf16 %v1832_v53, %v1826_v21  ;;  %v5126_v4 = vor.u32 %v5902_v59, %v5125_v27  ;;  %v5111_v37 = vld [vmem:[%s8836_s1 + $0x5b8] sm:$0xf0] }
 0x127   : > { %v5058_v8 = vor.u32 %v5883_v60, %v5055_v19  ;;  %v1842_v21 = vrot.slane %v4775_v25, 1  ;;  %v1843_v53 = vrot.slane %v4777_v9, 1  ;;  %v5103_v25 = vld [vmem:[%s8836_s1 + $0x5a8] sm:$0xf0] }
 0x128   : > { %1680 = vmatmul.bf16.gmra.mxu1 %v1434_v61 }
 0x129   : > { %1738 = vmatmul.bf16.gmra.mxu3 %v1434_v61  ;;  %v914_v23 = vpop.f32.mrf.mxu2  ;;  %2581 = vmatpush.bf16.msrb.mxu1 %v5126_v4  ;;  %v5045_v4 = vld [vmem:[%s8836_s1 + $0x530] sm:$0xf] }
 0x12a   : > { %v915_v1 = vadd.f32 %v914_v23, %v7211_v52  ;;  %v858_v28 = vpop.f32.mrf.mxu0  ;;  %2611 = vmatpush.bf16.msrb.mxu2 %v5058_v8  ;;  %v4773_v23 = vld [vmem:[%s6393_s19 + $0x70] sm:$0x1]  ;;  %v5882_v8 = vld [vmem:[%s8836_s1 + $0x534] sm:$0xf0] }
 0x12b   : > { %v859_v52 = vadd.f32 %v858_v28, %v7213_v54  ;;  %v5886_v54 = vld [vmem:[%s8836_s1 + $0x554] sm:$0xf0]  ;;  %v5900_v28 = vld [vmem:[%s8836_s1 + $0x5c4] sm:$0xf0]  ;;  %v1837_v46 = vrot.slane %v4773_v23, 1 }
 0x12c   : > { %v943_v34 = vpop.f32.mrf.mxu3  ;;  %v5062_v14 = vor.u32 %v5886_v54, %v5061_v56  ;;  %v5118_v35 = vor.u32 %v5900_v28, %v5117_v0  ;;  %v5895_v23 = vld [vmem:[%s8836_s1 + $0x5a4] sm:$0xf] }
 0x12d   : > { %v7473_v36 = vadd.f32 %v943_v34, %v915_v1  ;;  %v887_v43 = vpop.f32.mrf.mxu1  ;;  %v4772_v1 = vld [vmem:[%s6393_s19 + $0x68] sm:$0xfe]  ;;  %v1838_v19 = vsel %vm290_vm0, %v1836_v62, %v1837_v46  ;;  %v4783_v28 = vld [vmem:[%s6393_s19 + $0xc0] sm:$0xfe] }
 0x12e   : > { %v7476_v50 = vadd.f32 %v887_v43, %v859_v52  ;;  %2552 = vmatpush.bf16.msrb.mxu0 %v5062_v14  ;;  %v5050_v52 = vor.u32 %v5881_v40, %v5047_v29  ;;  %v5897_v43 = vld [vmem:[%s8836_s1 + $0x5b4] sm:$0xf]  ;;  %2582 = vmatpush.bf16.msrb.mxu1 %v5118_v35  ;;  %v1846_v14 = vrot.slane %v4778_v33, 1  ;;  %v4785_v40 = vld [vmem:[%s6393_s19 + $0xd0] sm:$0x1] }
 0x12f   : > { %v5114_v56 = vor.u32 %v5897_v43, %v5111_v37  ;;  %v4780_v35 = vld [vmem:[%s6393_s19 + $0xa8] sm:$0xfe] }
 0x130   : > { %2612 = vmatpush.bf16.msrb.mxu2 %v5050_v52  ;;  %v4782_v52 = vld [vmem:[%s6393_s19 + $0xb8] sm:$0x1]  ;;  %v4784_v43 = vld [vmem:[%s6393_s19 + $0xc8] sm:$0xfe] }
 0x131   : > { %v916_v6 = vpop.f32.mrf.mxu2  ;;  %2641 = vmatpush.bf16.msrb.mxu3 %v5114_v56  ;;  %v5880_v37 = vld [vmem:[%s8836_s1 + $0x524] sm:$0xf0]  ;;  %v4786_v56 = vld [vmem:[%s6393_s19 + $0xd8] sm:$0x1] }
 0x132   : > { %v917_v61 = vadd.f32 %v916_v6, %v7241_v17  ;;  %v1287_v24 = vpop.f32.mrf.mxu0  ;;  %v1889_v17 = vpack.c.bf16 %v1835_v58, %v1829_v57  ;;  %v1839_v6 = vrot.slane %v4772_v1, 1  ;;  %v1840_v57 = vrot.slane %v4774_v31, 1  ;;  %v5896_v46 = vld [vmem:[%s8836_s1 + $0x5a4] sm:$0xf0] }
 0x133   : > { %v1845_v58 = vrot.slane %v4776_v44, 1  ;;  %v5106_v1 = vor.u32 %v5895_v23, %v5103_v25 }
 0x134   : > { %v945_v13 = vpop.f32.mrf.mxu3  ;;  %v1841_v12 = vsel %vm290_vm0, %v1839_v6, %v1840_v57  ;;  %v5893_v6 = vld [vmem:[%s8836_s1 + $0x594] sm:$0xf]  ;;  %v5095_v57 = vld [vmem:[%s8836_s1 + $0x598] sm:$0xf0] }
 0x135   : > { %v7507_v15 = vadd.f32 %v945_v13, %v917_v61  ;;  %v1316_v63 = vpop.f32.mrf.mxu1  ;;  %2097 = vmatmul.bf16.vlgmr.msra.gmra.mxu0 %v1888_v3  ;;  %v1844_v61 = vsel %vm290_vm0, %v1842_v21, %v1843_v53  ;;  %v1847_v13 = vsel %vm290_vm0, %v1845_v58, %v1846_v14  ;;  %2642 = vmatpush.bf16.msrb.mxu3 %v5106_v1  ;;  %v5877_v21 = vld [vmem:[%s8836_s1 + $0x514] sm:$0xf]  ;;  %v5031_v53 = vld [vmem:[%s8836_s1 + $0x518] sm:$0xf0]  ;;  %v5875_v1 = vld [vmem:[%s8836_s1 + $0x504] sm:$0xf] }
 0x136   : > { %v1317_v16 = vadd.f32 %v1316_v63, %v1287_v24  ;;  %2155 = vmatmul.bf16.vlgmr.msra.gmra.mxu2 %v1888_v3  ;;  %v5898_v24 = vld [vmem:[%s8836_s1 + $0x5b4] sm:$0xf0]  ;;  %v1890_v2 = vpack.c.bf16 %v1844_v61, %v1838_v19  ;;  %v1891_v44 = vpack.c.bf16 %v1847_v13, %v1841_v12  ;;  %v1854_v19 = vrot.slane %v4783_v28, 1 }
 0x137   : > { %v1855_v61 = vrot.slane %v4785_v40, 1  ;;  %v1852_v12 = vrot.slane %v4782_v52, 1  ;;  %v1857_v13 = vrot.slane %v4784_v43, 1  ;;  %v5085_v52 = vld [vmem:[%s8836_s1 + $0x580] sm:$0xf] }
 0x138   : > { %v7514_v7 = vadd.f32 %v1317_v16, %v7246_v26  ;;  %2126 = vmatmul.bf16.vlgmr.msra.gmra.mxu1 %v1889_v17  ;;  %v5054_v26 = vor.u32 %v5884_v41, %v5053_v47  ;;  %v4779_v47 = vld [vmem:[%s6393_s19 + $0xa0] sm:$0xfe] }
 0x139   : > { %2184 = vmatmul.bf16.vlgmr.msra.gmra.mxu3 %v1889_v17  ;;  %v1345_v34 = vpop.f32.mrf.mxu2  ;;  %v5039_v17 = vld [vmem:[%s8836_s1 + $0x528] sm:$0xf0]  ;;  %v1848_v29 = vrot.slane %v4779_v47, 1  ;;  %v1856_v23 = vsel %vm290_vm0, %v1854_v19, %v1855_v61 }
 0x13a   : > { %v1289_v51 = vpop.f32.mrf.mxu0  ;;  %2553 = vmatpush.bf16.msrb.mxu0 %v5054_v26  ;;  %v5042_v16 = vor.u32 %v5879_v32, %v5039_v17  ;;  %v4781_v26 = vld [vmem:[%s6393_s19 + $0xb0] sm:$0x1]  ;;  %v4788_v61 = vld [vmem:[%s6393_s19 + $0xe8] sm:$0xfe] }
 0x13b   : > { %v5029_v17 = vld [vmem:[%s8836_s1 + $0x510] sm:$0xf] }
 0x13c   : > { %v1374_v45 = vpop.f32.mrf.mxu3  ;;  %2613 = vmatpush.bf16.msrb.mxu2 %v5042_v16 }
 0x13d   : > { %v1375_v54 = vadd.f32 %v1374_v45, %v1345_v34  ;;  %v1318_v27 = vpop.f32.mrf.mxu1  ;;  %v5101_v45 = vld [vmem:[%s8836_s1 + $0x5a0] sm:$0xf] }
 0x13e   : > { %v1319_v60 = vadd.f32 %v1318_v27, %v1289_v51  ;;  %v5034_v27 = vor.u32 %v5877_v21, %v5031_v53 }
 0x13f   : > { %v7545_v59 = vadd.f32 %v1375_v54, %v7273_v49  ;;  %v5109_v49 = vld [vmem:[%s8836_s1 + $0x5b0] sm:$0xf]  ;;  %v5102_v54 = vor.u32 %v5896_v46, %v5101_v45  ;;  %v5892_v45 = vld [vmem:[%s8836_s1 + $0x584] sm:$0xf0] }
 0x140   : > { %v7550_v3 = vadd.f32 %v1319_v60, %v7276_v55  ;;  %v5046_v55 = vor.u32 %v5882_v8, %v5045_v4  ;;  %v5110_v63 = vor.u32 %v5898_v24, %v5109_v49  ;;  %v1849_v60 = vrot.slane %v4781_v26, 1  ;;  %2614 = vmatpush.bf16.msrb.mxu2 %v5034_v27  ;;  %v5087_v26 = vld [vmem:[%s8836_s1 + $0x588] sm:$0xf0]  ;;  %v4789_v27 = vld [vmem:[%s6393_s19 + $0xf0] sm:$0x1] }
 0x141   : > { %v1347_v10 = vpop.f32.mrf.mxu2  ;;  %v5098_v4 = vor.u32 %v5893_v6, %v5095_v57  ;;  %v5086_v46 = vor.u32 %v5892_v45, %v5085_v52  ;;  %v4791_v6 = vld [vmem:[%s6393_s19 + $0x100] sm:$0xfe]  ;;  %v4793_v57 = vld [vmem:[%s6393_s19 + $0x110] sm:$0x1] }
 0x142   : > { %v1292_v62 = vpop.f32.mrf.mxu0  ;;  %2554 = vmatpush.bf16.msrb.mxu0 %v5046_v55  ;;  %2583 = vmatpush.bf16.msrb.mxu1 %v5110_v63  ;;  %v1858_v55 = vrot.slane %v4786_v56, 1  ;;  %v5093_v63 = vld [vmem:[%s8836_s1 + $0x590] sm:$0xf]  ;;  %v1850_v16 = vsel %vm290_vm0, %v1848_v29, %v1849_v60  ;;  %v5021_v29 = vld [vmem:[%s8836_s1 + $0x500] sm:$0xf] }
 0x143   : > { %2643 = vmatpush.bf16.msrb.mxu3 %v5098_v4  ;;  %v1892_v28 = vpack.c.bf16 %v1856_v23, %v1850_v16  ;;  %v5937_v60 = vld [vmem:[%s8836_s1 + $0x6f4] sm:$0xf]  ;;  %v5919_v52 = vld [vmem:[%s8836_s1 + $0x664] sm:$0xf] }
 0x144   : > { %v1376_v9 = vpop.f32.mrf.mxu3 }
 0x145   : > { %v1377_v31 = vadd.f32 %v1376_v9, %v1347_v10  ;;  %v1321_v41 = vpop.f32.mrf.mxu1  ;;  %2102 = vmatmul.bf16.gmra.mxu0 %v1890_v2  ;;  %v1851_v10 = vrot.slane %v4780_v35, 1  ;;  %v5876_v35 = vld [vmem:[%s8836_s1 + $0x504] sm:$0xf0] }
 0x146   : > { %v1322_v34 = vadd.f32 %v1321_v41, %v1292_v62  ;;  %2160 = vmatmul.bf16.gmra.mxu2 %v1890_v2  ;;  %2584 = vmatpush.bf16.msrb.mxu1 %v5102_v54  ;;  %v5878_v2 = vld [vmem:[%s8836_s1 + $0x514] sm:$0xf0]  ;;  %v4787_v54 = vld [vmem:[%s6393_s19 + $0xe0] sm:$0xfe] }
 0x147   : > { %v7580_v0 = vadd.f32 %v1377_v31, %v7305_v22  ;;  %v5037_v22 = vld [vmem:[%s8836_s1 + $0x520] sm:$0xf]  ;;  %v5030_v25 = vor.u32 %v5878_v2, %v5029_v17  ;;  %v5023_v31 = vld [vmem:[%s8836_s1 + $0x508] sm:$0xf0]  ;;  %v1853_v41 = vsel %vm290_vm0, %v1851_v10, %v1852_v12  ;;  %v4794_v10 = vld [vmem:[%s6393_s19 + $0x118] sm:$0x1] }
 0x148   : > { %v7586_v33 = vadd.f32 %v1322_v34, %v7310_v38  ;;  %2131 = vmatmul.bf16.gmra.mxu1 %v1891_v44  ;;  %v5038_v38 = vor.u32 %v5880_v37, %v5037_v22  ;;  %v1859_v34 = vsel %vm290_vm0, %v1857_v13, %v1858_v55  ;;  %v5022_v37 = vor.u32 %v5876_v35, %v5021_v29  ;;  %v5938_v35 = vld [vmem:[%s8836_s1 + $0x6f4] sm:$0xf0] }
 0x149   : > { %2189 = vmatmul.bf16.gmra.mxu3 %v1891_v44  ;;  %v1350_v51 = vpop.f32.mrf.mxu2  ;;  %v5891_v44 = vld [vmem:[%s8836_s1 + $0x584] sm:$0xf]  ;;  %v1861_v17 = vrot.slane %v4789_v27, 1  ;;  %v1866_v2 = vrot.slane %v4791_v6, 1 }
 0x14a   : > { %v1294_v14 = vpop.f32.mrf.mxu0  ;;  %2555 = vmatpush.bf16.msrb.mxu0 %v5038_v38  ;;  %v5090_v40 = vor.u32 %v5891_v44, %v5087_v26  ;;  %v1893_v38 = vpack.c.bf16 %v1859_v34, %v1853_v41  ;;  %v5922_v26 = vld [vmem:[%s8836_s1 + $0x674] sm:$0xf0]  ;;  %v4955_v6 = vld [vmem:[%s6393_s19 + $0x20] sm:$0xfc] }
 0x14c   : > { %v1379_v58 = vpop.f32.mrf.mxu3  ;;  %2644 = vmatpush.bf16.msrb.mxu3 %v5090_v40 }
 0x14d   : > { %v1380_v8 = vadd.f32 %v1379_v58, %v1350_v51  ;;  %v1323_v49 = vpop.f32.mrf.mxu1 }
 0x14e   : > { %v1324_v32 = vadd.f32 %v1323_v49, %v1294_v14  ;;  %2556 = vmatpush.bf16.msrb.mxu0 %v5030_v25  ;;  %v5255_v14 = vld [vmem:[%s8836_s1 + $0x678] sm:$0xf0]  ;;  %v4792_v49 = vld [vmem:[%s6393_s19 + $0x108] sm:$0xfe]  ;;  %v1863_v25 = vrot.slane %v4788_v61, 1 }
 0x14f   : > { %v7617_v24 = vadd.f32 %v1380_v8, %v7337_v42  ;;  %v5894_v42 = vld [vmem:[%s8836_s1 + $0x594] sm:$0xf0]  ;;  %v4961_v61 = vld [vmem:[%s6393_s19 + $0x50] sm:$0x3] }
 0x150   : > { %v7634_v9 = vadd.f32 %v1324_v32, %v7340_v48  ;;  %v5094_v62 = vor.u32 %v5894_v42, %v5093_v63  ;;  %v5026_v48 = vor.u32 %v5875_v1, %v5023_v31  ;;  %v4790_v8 = vld [vmem:[%s6393_s19 + $0xf8] sm:$0x1]  ;;  %v1860_v32 = vrot.slane %v4787_v54, 1 }
 0x151   : > { %v1352_v47 = vpop.f32.mrf.mxu2  ;;  %v1867_v63 = vrot.slane %v4793_v57, 1  ;;  %v1864_v42 = vrot.slane %v4790_v8, 1  ;;  %v1870_v1 = vrot.slane %v4794_v10, 1  ;;  %v4956_v8 = vld [vmem:[%s6393_s19 + $0x28] sm:$0xfc] }
 0x152   : > { %2585 = vmatpush.bf16.msrb.mxu1 %v5094_v62  ;;  %v1297_v22 = vpop.f32.mrf.mxu0  ;;  %2615 = vmatpush.bf16.msrb.mxu2 %v5026_v48  ;;  %v1869_v62 = vrot.slane %v4792_v49, 1  ;;  %v5253_v48 = vld [vmem:[%s8836_s1 + $0x670] sm:$0xf]  ;;  %v4958_v49 = vld [vmem:[%s6393_s19 + $0x38] sm:$0x3] }
 0x153   : > { %2557 = vmatpush.bf16.msrb.mxu0 %v5022_v37  ;;  %v1868_v41 = vsel %vm290_vm0, %v1866_v2, %v1867_v63  ;;  %v1865_v40 = vsel %vm290_vm0, %v1863_v25, %v1864_v42  ;;  %v4960_v10 = vld [vmem:[%s6393_s19 + $0x48] sm:$0xfc]  ;;  %v5239_v2 = vld [vmem:[%s8836_s1 + $0x658] sm:$0xf0]  ;;  %v4962_v63 = vld [vmem:[%s6393_s19 + $0x58] sm:$0x3] }
 0x154   : > { %v1381_v43 = vpop.f32.mrf.mxu3  ;;  %v1871_v29 = vsel %vm290_vm0, %v1869_v62, %v1870_v1  ;;  %v5933_v25 = vld [vmem:[%s8836_s1 + $0x6d4] sm:$0xf]  ;;  %v5303_v42 = vld [vmem:[%s8836_s1 + $0x6d8] sm:$0xf0] }
 0x155   : > { %v1382_v51 = vadd.f32 %v1381_v43, %v1352_v47  ;;  %v1326_v21 = vpop.f32.mrf.mxu1  ;;  %2107 = vmatmul.bf16.gmra.mxu0 %v1892_v28  ;;  %v1862_v47 = vsel %vm290_vm0, %v1860_v32, %v1861_v17  ;;  %v5247_v43 = vld [vmem:[%s8836_s1 + $0x668] sm:$0xf0]  ;;  %v1895_v27 = vpack.c.bf16 %v1871_v29, %v1865_v40  ;;  %v5936_v32 = vld [vmem:[%s8836_s1 + $0x6e4] sm:$0xf0]  ;;  %v5917_v17 = vld [vmem:[%s8836_s1 + $0x654] sm:$0xf] }
 0x156   : > { %v1327_v56 = vadd.f32 %v1326_v21, %v1297_v22  ;;  %2165 = vmatmul.bf16.gmra.mxu2 %v1892_v28  ;;  %2586 = vmatpush.bf16.msrb.mxu1 %v5086_v46  ;;  %v1894_v22 = vpack.c.bf16 %v1868_v41, %v1862_v47  ;;  %v5250_v45 = vor.u32 %v5919_v52, %v5247_v43  ;;  %v2292_v41 = vrot.slane %v4961_v61, 2 }
 0x157   : > { %v7663_v53 = vadd.f32 %v1382_v51, %v7381_v18  ;;  %v5921_v18 = vld [vmem:[%s8836_s1 + $0x674] sm:$0xf]  ;;  %v5935_v51 = vld [vmem:[%s8836_s1 + $0x6e4] sm:$0xf]  ;;  %v2289_v40 = vrot.slane %v4958_v49, 2  ;;  %v2294_v29 = vrot.slane %v4960_v10, 2 }
 0x158   : > { %v7670_v58 = vadd.f32 %v1327_v56, %v7386_v39  ;;  %2136 = vmatmul.bf16.gmra.mxu1 %v1893_v38  ;;  %v5258_v4 = vor.u32 %v5921_v18, %v5255_v14  ;;  %v5319_v39 = vld [vmem:[%s8836_s1 + $0x6f8] sm:$0xf0] }
 0x159   : > { %2194 = vmatmul.bf16.gmra.mxu3 %v1893_v38  ;;  %v1355_v19 = vpop.f32.mrf.mxu2  ;;  %v5322_v12 = vor.u32 %v5937_v60, %v5319_v39  ;;  %v5311_v38 = vld [vmem:[%s8836_s1 + $0x6e8] sm:$0xf0]  ;;  %v4957_v60 = vld [vmem:[%s6393_s19 + $0x30] sm:$0x3] }
 0x15a   : > { %v1299_v55 = vpop.f32.mrf.mxu0  ;;  %2958 = vmatpush.bf16.msra.mxu2 %v5258_v4  ;;  %v5314_v56 = vor.u32 %v5935_v51, %v5311_v38  ;;  %v2285_v4 = vrot.slane %v4955_v6, 2  ;;  %v5918_v51 = vld [vmem:[%s8836_s1 + $0x654] sm:$0xf0] }
 0x15b   : > { %2987 = vmatpush.bf16.msra.mxu3 %v5322_v12  ;;  %v5920_v12 = vld [vmem:[%s8836_s1 + $0x664] sm:$0xf0] }
 0x15c   : > { %v1384_v13 = vpop.f32.mrf.mxu3 }
 0x15d   : > { %v1385_v16 = vadd.f32 %v1384_v13, %v1355_v19  ;;  %v1328_v23 = vpop.f32.mrf.mxu1  ;;  %v4959_v19 = vld [vmem:[%s6393_s19 + $0x40] sm:$0xfc] }
 0x15e   : > { %v1329_v44 = vadd.f32 %v1328_v23, %v1299_v55  ;;  %2959 = vmatpush.bf16.msra.mxu2 %v5250_v45  ;;  %v5309_v13 = vld [vmem:[%s8836_s1 + $0x6e0] sm:$0xf]  ;;  %v5242_v23 = vor.u32 %v5917_v17, %v5239_v2  ;;  %v2291_v47 = vrot.slane %v4959_v19, 2  ;;  %v5237_v45 = vld [vmem:[%s8836_s1 + $0x650] sm:$0xf] }
 0x15f   : > { %v7689_v31 = vadd.f32 %v1385_v16, %v7401_v11  ;;  %v5317_v11 = vld [vmem:[%s8836_s1 + $0x6f0] sm:$0xf]  ;;  %2988 = vmatpush.bf16.msra.mxu3 %v5314_v56  ;;  %v5310_v16 = vor.u32 %v5936_v32, %v5309_v13  ;;  %v5934_v56 = vld [vmem:[%s8836_s1 + $0x6d4] sm:$0xf0]  ;;  %v5295_v19 = vld [vmem:[%s8836_s1 + $0x6c8] sm:$0xf0] }
 0x160   : > { %v7694_v34 = vadd.f32 %v1329_v44, %v7404_v30  ;;  %v5254_v30 = vor.u32 %v5922_v26, %v5253_v48  ;;  %v5318_v37 = vor.u32 %v5938_v35, %v5317_v11  ;;  %v2286_v44 = vrot.slane %v4957_v60, 2  ;;  %v5931_v60 = vld [vmem:[%s8836_s1 + $0x6c4] sm:$0xf]  ;;  %v4969_v17 = vld [vmem:[%s6393_s19 + $0x90] sm:$0x3] }
 0x161   : > { %v1357_v28 = vpop.f32.mrf.mxu2  ;;  %v5306_v48 = vor.u32 %v5933_v25, %v5303_v42  ;;  %v4967_v32 = vld [vmem:[%s6393_s19 + $0x80] sm:$0xfc]  ;;  %v4968_v25 = vld [vmem:[%s6393_s19 + $0x88] sm:$0xfc] }
 0x162   : > { %v1302_v21 = vpop.f32.mrf.mxu0  ;;  %2900 = vmatpush.bf16.msra.mxu0 %v5254_v30  ;;  %2929 = vmatpush.bf16.msra.mxu1 %v5318_v37  ;;  %v2295_v30 = vrot.slane %v4962_v63, 2  ;;  %v2287_v43 = vsel %vm1012_vm1, %v2285_v4, %v2286_v44  ;;  %v5916_v42 = vld [vmem:[%s8836_s1 + $0x644] sm:$0xf0] }
 0x163   : > { %2960 = vmatpush.bf16.msra.mxu2 %v5242_v23  ;;  %2989 = vmatpush.bf16.msra.mxu3 %v5306_v48  ;;  %v4966_v23 = vld [vmem:[%s6393_s19 + $0x78] sm:$0x3]  ;;  %v5932_v44 = vld [vmem:[%s8836_s1 + $0x6c4] sm:$0xf0] }
 0x164   : > { %v1386_v46 = vpop.f32.mrf.mxu3  ;;  %v4970_v48 = vld [vmem:[%s6393_s19 + $0x98] sm:$0x3] }
 0x165   : > { %v1387_v54 = vadd.f32 %v1386_v46, %v1357_v28  ;;  %v1331_v57 = vpop.f32.mrf.mxu1  ;;  %2112 = vmatmul.bf16.gmra.mxu0 %v1894_v22  ;;  %v2288_v28 = vrot.slane %v4956_v8, 2  ;;  %v5298_v8 = vor.u32 %v5931_v60, %v5295_v19  ;;  %v5914_v60 = vld [vmem:[%s8836_s1 + $0x634] sm:$0xf0] }
 0x166   : > { %v1332_v14 = vadd.f32 %v1331_v57, %v1302_v21  ;;  %2170 = vmatmul.bf16.gmra.mxu2 %v1894_v22  ;;  %2930 = vmatpush.bf16.msra.mxu1 %v5310_v16  ;;  %v2293_v22 = vsel %vm1012_vm1, %v2291_v47, %v2292_v41  ;;  %v2296_v21 = vsel %vm1012_vm1, %v2294_v29, %v2295_v30  ;;  %v4964_v16 = vld [vmem:[%s6393_s19 + $0x68] sm:$0xfc]  ;;  %v5913_v47 = vld [vmem:[%s8836_s1 + $0x634] sm:$0xf]  ;;  %v5223_v41 = vld [vmem:[%s8836_s1 + $0x638] sm:$0xf0] }
 0x167   : > { %v7724_v18 = vadd.f32 %v1387_v54, %v7434_v20  ;;  %v5245_v20 = vld [vmem:[%s8836_s1 + $0x660] sm:$0xf]  ;;  %v2290_v46 = vsel %vm1012_vm1, %v2288_v28, %v2289_v40  ;;  %v5915_v54 = vld [vmem:[%s8836_s1 + $0x644] sm:$0xf]  ;;  %v2349_v6 = vpack.c.bf16 %v2293_v22, %v2287_v43  ;;  %2990 = vmatpush.bf16.msra.mxu3 %v5298_v8  ;;  %v5929_v28 = vld [vmem:[%s8836_s1 + $0x6b4] sm:$0xf] }
 0x168   : > { %v7730_v39 = vadd.f32 %v1332_v14, %v7439_v5  ;;  %2141 = vmatmul.bf16.gmra.mxu1 %v1895_v27  ;;  %v5246_v5 = vor.u32 %v5920_v12, %v5245_v20  ;;  %v2350_v10 = vpack.c.bf16 %v2296_v21, %v2290_v46  ;;  %v4963_v20 = vld [vmem:[%s6393_s19 + $0x60] sm:$0xfc]  ;;  %v5287_v40 = vld [vmem:[%s8836_s1 + $0x6b8] sm:$0xf0]  ;;  %v2303_v43 = vrot.slane %v4967_v32, 2 }
 0x169   : > { %2199 = vmatmul.bf16.gmra.mxu3 %v1895_v27  ;;  %v1360_v55 = vpop.f32.mrf.mxu2  ;;  %v5231_v27 = vld [vmem:[%s8836_s1 + $0x648] sm:$0xf0]  ;;  %v2297_v2 = vrot.slane %v4963_v20, 2  ;;  %v2304_v22 = vrot.slane %v4969_v17, 2  ;;  %v2301_v46 = vrot.slane %v4966_v23, 2  ;;  %v2306_v21 = vrot.slane %v4968_v25, 2 }
 0x16a   : > { %v1304_v1 = vpop.f32.mrf.mxu0  ;;  %2901 = vmatpush.bf16.msra.mxu0 %v5246_v5  ;;  %v5234_v14 = vor.u32 %v5915_v54, %v5231_v27  ;;  %v4965_v5 = vld [vmem:[%s6393_s19 + $0x70] sm:$0x3]  ;;  %v5930_v8 = vld [vmem:[%s8836_s1 + $0x6b4] sm:$0xf0]  ;;  %v5279_v32 = vld [vmem:[%s8836_s1 + $0x6a8] sm:$0xf0] }
 0x16c   : > { %v1389_v62 = vpop.f32.mrf.mxu3  ;;  %2961 = vmatpush.bf16.msra.mxu2 %v5234_v14  ;;  %v5221_v14 = vld [vmem:[%s8836_s1 + $0x630] sm:$0xf] }
 0x16d   : > { %v1390_v26 = vadd.f32 %v1389_v62, %v1360_v55  ;;  %v1333_v11 = vpop.f32.mrf.mxu1  ;;  %v5293_v62 = vld [vmem:[%s8836_s1 + $0x6c0] sm:$0xf] }
 0x16e   : > { %v1334_v52 = vadd.f32 %v1333_v11, %v1304_v1  ;;  %v5226_v11 = vor.u32 %v5913_v47, %v5223_v41  ;;  %v4977_v47 = vld [vmem:[%s6393_s19 + $0xd0] sm:$0x3] }
 0x16f   : > { %v7761_v35 = vadd.f32 %v1390_v26, %v7473_v36  ;;  %v5301_v36 = vld [vmem:[%s8836_s1 + $0x6d0] sm:$0xf]  ;;  %v5294_v26 = vor.u32 %v5932_v44, %v5293_v62  ;;  %v4975_v44 = vld [vmem:[%s6393_s19 + $0xc0] sm:$0xfc] }
 0x170   : > { %v7766_v37 = vadd.f32 %v1334_v52, %v7476_v50  ;;  %v5238_v50 = vor.u32 %v5918_v51, %v5237_v45  ;;  %v5302_v57 = vor.u32 %v5934_v56, %v5301_v36  ;;  %v2298_v52 = vrot.slane %v4965_v5, 2  ;;  %2962 = vmatpush.bf16.msra.mxu2 %v5226_v11  ;;  %v5927_v5 = vld [vmem:[%s8836_s1 + $0x6a4] sm:$0xf]  ;;  %v4974_v11 = vld [vmem:[%s6393_s19 + $0xb8] sm:$0x3] }
 0x171   : > { %v1362_v38 = vpop.f32.mrf.mxu2  ;;  %v5290_v45 = vor.u32 %v5929_v28, %v5287_v40  ;;  %v4976_v28 = vld [vmem:[%s6393_s19 + $0xc8] sm:$0xfc] }
 0x172   : > { %v1637_v4 = vpop.f32.mrf.mxu0  ;;  %2902 = vmatpush.bf16.msra.mxu0 %v5238_v50  ;;  %2931 = vmatpush.bf16.msra.mxu1 %v5302_v57  ;;  %v2307_v50 = vrot.slane %v4970_v48, 2  ;;  %v2299_v27 = vsel %vm1012_vm1, %v2297_v2, %v2298_v52  ;;  %v5912_v40 = vld [vmem:[%s8836_s1 + $0x624] sm:$0xf0] }
 0x173   : > { %2991 = vmatpush.bf16.msra.mxu3 %v5290_v45  ;;  %v5928_v52 = vld [vmem:[%s8836_s1 + $0x6a4] sm:$0xf0]  ;;  %v4978_v45 = vld [vmem:[%s6393_s19 + $0xd8] sm:$0x3] }
 0x174   : > { %v1391_v61 = vpop.f32.mrf.mxu3 }
 0x175   : > { %v1392_v49 = vadd.f32 %v1391_v61, %v1362_v38  ;;  %v1666_v12 = vpop.f32.mrf.mxu1  ;;  %2558 = vmatmul.bf16.vlgmr.msrb.gmra.mxu0 %v2349_v6  ;;  %v2300_v38 = vrot.slane %v4964_v16, 2  ;;  %v5282_v16 = vor.u32 %v5927_v5, %v5279_v32 }
 0x176   : > { %v1667_v55 = vadd.f32 %v1666_v12, %v1637_v4  ;;  %2616 = vmatmul.bf16.vlgmr.msrb.gmra.mxu2 %v2349_v6  ;;  %2932 = vmatpush.bf16.msra.mxu1 %v5294_v26  ;;  %v2305_v6 = vsel %vm1012_vm1, %v2303_v43, %v2304_v22  ;;  %v2308_v4 = vsel %vm1012_vm1, %v2306_v21, %v2307_v50  ;;  %v4972_v26 = vld [vmem:[%s6393_s19 + $0xa8] sm:$0xfc]  ;;  %v5909_v43 = vld [vmem:[%s8836_s1 + $0x614] sm:$0xf]  ;;  %v5207_v22 = vld [vmem:[%s8836_s1 + $0x618] sm:$0xf0] }
 0x177   : > { %v7796_v13 = vadd.f32 %v1392_v49, %v7507_v15  ;;  %v5229_v15 = vld [vmem:[%s8836_s1 + $0x640] sm:$0xf]  ;;  %v2302_v61 = vsel %vm1012_vm1, %v2300_v38, %v2301_v46  ;;  %v5911_v49 = vld [vmem:[%s8836_s1 + $0x624] sm:$0xf]  ;;  %v2351_v20 = vpack.c.bf16 %v2305_v6, %v2299_v27  ;;  %2992 = vmatpush.bf16.msra.mxu3 %v5282_v16  ;;  %v5925_v38 = vld [vmem:[%s8836_s1 + $0x694] sm:$0xf] }
 0x178   : > { %v7802_v63 = vadd.f32 %v1667_v55, %v7514_v7  ;;  %2587 = vmatmul.bf16.vlgmr.msrb.gmra.mxu1 %v2350_v10  ;;  %v5230_v7 = vor.u32 %v5916_v42, %v5229_v15  ;;  %v2352_v25 = vpack.c.bf16 %v2308_v4, %v2302_v61  ;;  %v4971_v15 = vld [vmem:[%s6393_s19 + $0xa0] sm:$0xfc]  ;;  %v5271_v46 = vld [vmem:[%s8836_s1 + $0x698] sm:$0xf0]  ;;  %v2315_v27 = vrot.slane %v4975_v44, 2 }
 0x179   : > { %2645 = vmatmul.bf16.vlgmr.msrb.gmra.mxu3 %v2350_v10  ;;  %v1695_v1 = vpop.f32.mrf.mxu2  ;;  %v5215_v10 = vld [vmem:[%s8836_s1 + $0x628] sm:$0xf0]  ;;  %v2309_v41 = vrot.slane %v4971_v15, 2  ;;  %v2316_v6 = vrot.slane %v4977_v47, 2  ;;  %v2313_v61 = vrot.slane %v4974_v11, 2  ;;  %v2318_v4 = vrot.slane %v4976_v28, 2 }
 0x17a   : > { %v1639_v30 = vpop.f32.mrf.mxu0  ;;  %2903 = vmatpush.bf16.msra.mxu0 %v5230_v7  ;;  %v5218_v55 = vor.u32 %v5911_v49, %v5215_v10  ;;  %v4973_v7 = vld [vmem:[%s6393_s19 + $0xb0] sm:$0x3]  ;;  %v5907_v16 = vld [vmem:[%s8836_s1 + $0x604] sm:$0xf]  ;;  %v5261_v11 = vld [vmem:[%s8836_s1 + $0x680] sm:$0xf] }
 0x17b   : > { %v5205_v10 = vld [vmem:[%s8836_s1 + $0x610] sm:$0xf]  ;;  %v2317_v5 = vsel %vm1012_vm1, %v2315_v27, %v2316_v6  ;;  %v4980_v6 = vld [vmem:[%s6393_s19 + $0xe8] sm:$0xfc] }
 0x17c   : > { %v1724_v29 = vpop.f32.mrf.mxu3  ;;  %2963 = vmatpush.bf16.msra.mxu2 %v5218_v55 }
 0x17d   : > { %v1725_v51 = vadd.f32 %v1724_v29, %v1695_v1  ;;  %v1668_v36 = vpop.f32.mrf.mxu1  ;;  %v5277_v29 = vld [vmem:[%s8836_s1 + $0x6a0] sm:$0xf] }
 0x17e   : > { %v1669_v54 = vadd.f32 %v1668_v36, %v1639_v30  ;;  %v5210_v36 = vor.u32 %v5909_v43, %v5207_v22 }
 0x17f   : > { %v7833_v56 = vadd.f32 %v1725_v51, %v7545_v59  ;;  %v5285_v59 = vld [vmem:[%s8836_s1 + $0x6b0] sm:$0xf]  ;;  %v5278_v51 = vor.u32 %v5928_v52, %v5277_v29  ;;  %v5924_v29 = vld [vmem:[%s8836_s1 + $0x684] sm:$0xf0] }
 0x180   : > { %v7838_v57 = vadd.f32 %v1669_v54, %v7550_v3  ;;  %v5222_v3 = vor.u32 %v5914_v60, %v5221_v14  ;;  %v5286_v12 = vor.u32 %v5930_v8, %v5285_v59  ;;  %v2310_v54 = vrot.slane %v4973_v7, 2  ;;  %2964 = vmatpush.bf16.msra.mxu2 %v5210_v36  ;;  %v5263_v7 = vld [vmem:[%s8836_s1 + $0x688] sm:$0xf0]  ;;  %v4981_v36 = vld [vmem:[%s6393_s19 + $0xf0] sm:$0x3] }
 0x181   : > { %v1697_v19 = vpop.f32.mrf.mxu2  ;;  %v5274_v14 = vor.u32 %v5925_v38, %v5271_v46  ;;  %v5262_v52 = vor.u32 %v5924_v29, %v5261_v11  ;;  %v4983_v38 = vld [vmem:[%s6393_s19 + $0x100] sm:$0xfc]  ;;  %v4985_v46 = vld [vmem:[%s6393_s19 + $0x110] sm:$0x3] }
 0x182   : > { %v1642_v2 = vpop.f32.mrf.mxu0  ;;  %2904 = vmatpush.bf16.msra.mxu0 %v5222_v3  ;;  %2933 = vmatpush.bf16.msra.mxu1 %v5286_v12  ;;  %v2319_v3 = vrot.slane %v4978_v45, 2  ;;  %v5269_v12 = vld [vmem:[%s8836_s1 + $0x690] sm:$0xf]  ;;  %v2311_v55 = vsel %vm1012_vm1, %v2309_v41, %v2310_v54  ;;  %v5197_v41 = vld [vmem:[%s8836_s1 + $0x600] sm:$0xf] }
 0x183   : > { %2993 = vmatpush.bf16.msra.mxu3 %v5274_v14  ;;  %v2353_v44 = vpack.c.bf16 %v2317_v5, %v2311_v55  ;;  %v5969_v54 = vld [vmem:[%s8836_s1 + $0x7f4] sm:$0xf]  ;;  %v5951_v11 = vld [vmem:[%s8836_s1 + $0x764] sm:$0xf] }
 0x184   : > { %v1726_v17 = vpop.f32.mrf.mxu3 }
 0x185   : > { %v1727_v23 = vadd.f32 %v1726_v17, %v1697_v19  ;;  %v1671_v42 = vpop.f32.mrf.mxu1  ;;  %2563 = vmatmul.bf16.gmra.mxu0 %v2351_v20  ;;  %v2312_v19 = vrot.slane %v4972_v26, 2  ;;  %v5908_v26 = vld [vmem:[%s8836_s1 + $0x604] sm:$0xf0] }
 0x186   : > { %v1672_v1 = vadd.f32 %v1671_v42, %v1642_v2  ;;  %2621 = vmatmul.bf16.gmra.mxu2 %v2351_v20  ;;  %2934 = vmatpush.bf16.msra.mxu1 %v5278_v51  ;;  %v5910_v20 = vld [vmem:[%s8836_s1 + $0x614] sm:$0xf0]  ;;  %v4979_v51 = vld [vmem:[%s6393_s19 + $0xe0] sm:$0xfc] }
 0x187   : > { %v7868_v62 = vadd.f32 %v1727_v23, %v7580_v0  ;;  %v5213_v0 = vld [vmem:[%s8836_s1 + $0x620] sm:$0xf]  ;;  %v5206_v32 = vor.u32 %v5910_v20, %v5205_v10  ;;  %v5199_v23 = vld [vmem:[%s8836_s1 + $0x608] sm:$0xf0]  ;;  %v2314_v42 = vsel %vm1012_vm1, %v2312_v19, %v2313_v61  ;;  %v4986_v19 = vld [vmem:[%s6393_s19 + $0x118] sm:$0x3] }
 0x188   : > { %v7874_v48 = vadd.f32 %v1672_v1, %v7586_v33  ;;  %2592 = vmatmul.bf16.gmra.mxu1 %v2352_v25  ;;  %v5214_v33 = vor.u32 %v5912_v40, %v5213_v0  ;;  %v2320_v1 = vsel %vm1012_vm1, %v2318_v4, %v2319_v3  ;;  %v5198_v40 = vor.u32 %v5908_v26, %v5197_v41 }
 0x189   : > { %2650 = vmatmul.bf16.gmra.mxu3 %v2352_v25  ;;  %v1700_v30 = vpop.f32.mrf.mxu2  ;;  %v5923_v25 = vld [vmem:[%s8836_s1 + $0x684] sm:$0xf]  ;;  %v2322_v10 = vrot.slane %v4981_v36, 2  ;;  %v2327_v20 = vrot.slane %v4983_v38, 2 }
 0x18a   : > { %v1644_v50 = vpop.f32.mrf.mxu0  ;;  %2905 = vmatpush.bf16.msra.mxu0 %v5214_v33  ;;  %v5266_v47 = vor.u32 %v5923_v25, %v5263_v7  ;;  %v2354_v33 = vpack.c.bf16 %v2320_v1, %v2314_v42  ;;  %v5954_v7 = vld [vmem:[%s8836_s1 + $0x774] sm:$0xf0] }
 0x18c   : > { %v1729_v21 = vpop.f32.mrf.mxu3  ;;  %2994 = vmatpush.bf16.msra.mxu3 %v5266_v47 }
 0x18d   : > { %v1730_v60 = vadd.f32 %v1729_v21, %v1700_v30  ;;  %v1673_v59 = vpop.f32.mrf.mxu1 }
 0x18e   : > { %v1674_v49 = vadd.f32 %v1673_v59, %v1644_v50  ;;  %2906 = vmatpush.bf16.msra.mxu0 %v5206_v32  ;;  %v5447_v50 = vld [vmem:[%s8836_s1 + $0x778] sm:$0xf0]  ;;  %v4984_v59 = vld [vmem:[%s6393_s19 + $0x108] sm:$0xfc]  ;;  %v2324_v32 = vrot.slane %v4980_v6, 2 }
 0x18f   : > { %v7905_v8 = vadd.f32 %v1730_v60, %v7617_v24  ;;  %v5926_v24 = vld [vmem:[%s8836_s1 + $0x694] sm:$0xf0] }
 0x190   : > { %v7922_v17 = vadd.f32 %v1674_v49, %v7634_v9  ;;  %v5270_v2 = vor.u32 %v5926_v24, %v5269_v12  ;;  %v5202_v9 = vor.u32 %v5907_v16, %v5199_v23  ;;  %v4982_v60 = vld [vmem:[%s6393_s19 + $0xf8] sm:$0x3]  ;;  %v2321_v49 = vrot.slane %v4979_v51, 2 }
 0x191   : > { %v1702_v15 = vpop.f32.mrf.mxu2  ;;  %v2328_v12 = vrot.slane %v4985_v46, 2  ;;  %v2325_v24 = vrot.slane %v4982_v60, 2  ;;  %v2331_v16 = vrot.slane %v4986_v19, 2  ;;  %v5431_v60 = vld [vmem:[%s8836_s1 + $0x758] sm:$0xf0] }
 0x192   : > { %2935 = vmatpush.bf16.msra.mxu1 %v5270_v2  ;;  %v1647_v0 = vpop.f32.mrf.mxu0  ;;  %2965 = vmatpush.bf16.msra.mxu2 %v5202_v9  ;;  %v2330_v2 = vrot.slane %v4984_v59, 2  ;;  %v5445_v9 = vld [vmem:[%s8836_s1 + $0x770] sm:$0xf] }
 0x193   : > { %2907 = vmatpush.bf16.msra.mxu0 %v5198_v40  ;;  %v2329_v42 = vsel %vm1012_vm1, %v2327_v20, %v2328_v12  ;;  %v2326_v47 = vsel %vm1012_vm1, %v2324_v32, %v2325_v24  ;;  %v5446_v26 = vor.u32 %v5954_v7, %v5445_v9  ;;  %v5147_v32 = vld [vmem:[%s6393_s19 + $0x40] sm:$0xff] }
 0x194   : > { %v1731_v28 = vpop.f32.mrf.mxu3  ;;  %v2332_v41 = vsel %vm1012_vm1, %v2330_v2, %v2331_v16  ;;  %v5149_v24 = vld [vmem:[%s6393_s19 + $0x60] sm:$0xff]  ;;  %v5148_v2 = vld [vmem:[%s6393_s19 + $0x48] sm:$0xff] }
 0x195   : > { %v1732_v30 = vadd.f32 %v1731_v28, %v1702_v15  ;;  %v1676_v43 = vpop.f32.mrf.mxu1  ;;  %2568 = vmatmul.bf16.gmra.mxu0 %v2353_v44  ;;  %v2323_v15 = vsel %vm1012_vm1, %v2321_v49, %v2322_v10  ;;  %v5439_v28 = vld [vmem:[%s8836_s1 + $0x768] sm:$0xf0]  ;;  %v2356_v36 = vpack.c.bf16 %v2332_v41, %v2326_v47  ;;  %v2699_v47 = vpack.c.bf16 %v5149_v24, %v5147_v32  ;;  %v5413_v32 = vld [vmem:[%s8836_s1 + $0x730] sm:$0xf]  ;;  %v5946_v24 = vld [vmem:[%s8836_s1 + $0x734] sm:$0xf0] }
 0x196   : > { %v1677_v45 = vadd.f32 %v1676_v43, %v1647_v0  ;;  %2626 = vmatmul.bf16.gmra.mxu2 %v2353_v44  ;;  %2936 = vmatpush.bf16.msra.mxu1 %v5262_v52  ;;  %v2355_v0 = vpack.c.bf16 %v2329_v42, %v2323_v15  ;;  %v5442_v29 = vor.u32 %v5951_v11, %v5439_v28  ;;  %v5150_v16 = vld [vmem:[%s6393_s19 + $0x68] sm:$0xff]  ;;  %v5429_v15 = vld [vmem:[%s8836_s1 + $0x750] sm:$0xf]  ;;  %v5950_v42 = vld [vmem:[%s8836_s1 + $0x754] sm:$0xf0] }
 0x197   : > { %v7951_v22 = vadd.f32 %v1732_v30, %v7663_v53  ;;  %v5953_v53 = vld [vmem:[%s8836_s1 + $0x774] sm:$0xf]  ;;  %v5967_v30 = vld [vmem:[%s8836_s1 + $0x7e4] sm:$0xf]  ;;  %3361 = vmatpush.bf16.msrb.mxu0 %v5446_v26  ;;  %v5430_v7 = vor.u32 %v5950_v42, %v5429_v15  ;;  %v5487_v11 = vld [vmem:[%s8836_s1 + $0x7c8] sm:$0xf0] }
 0x198   : > { %v7958_v21 = vadd.f32 %v1677_v45, %v7670_v58  ;;  %2597 = vmatmul.bf16.gmra.mxu1 %v2354_v33  ;;  %v5450_v14 = vor.u32 %v5953_v53, %v5447_v50  ;;  %v5511_v58 = vld [vmem:[%s8836_s1 + $0x7f8] sm:$0xf0]  ;;  %v5962_v15 = vld [vmem:[%s8836_s1 + $0x7b4] sm:$0xf0]  ;;  %v5407_v42 = vld [vmem:[%s8836_s1 + $0x728] sm:$0xf0] }
 0x199   : > { %2655 = vmatmul.bf16.gmra.mxu3 %v2354_v33  ;;  %v1705_v27 = vpop.f32.mrf.mxu2  ;;  %v5514_v61 = vor.u32 %v5969_v54, %v5511_v58  ;;  %v5503_v33 = vld [vmem:[%s8836_s1 + $0x7e8] sm:$0xf0]  ;;  %v5437_v54 = vld [vmem:[%s8836_s1 + $0x760] sm:$0xf]  ;;  %v5949_v58 = vld [vmem:[%s8836_s1 + $0x754] sm:$0xf] }
 0x19a   : > { %v1649_v3 = vpop.f32.mrf.mxu0  ;;  %3419 = vmatpush.bf16.msrb.mxu2 %v5450_v14  ;;  %v5506_v45 = vor.u32 %v5967_v30, %v5503_v33  ;;  %v5434_v19 = vor.u32 %v5949_v58, %v5431_v60  ;;  %v2700_v30 = vpack.c.bf16 %v5150_v16, %v5148_v2  ;;  %v5414_v16 = vor.u32 %v5946_v24, %v5413_v32  ;;  %v5391_v32 = vld [vmem:[%s8836_s1 + $0x708] sm:$0xf0]  ;;  %v5955_v24 = vld [vmem:[%s8836_s1 + $0x784] sm:$0xf] }
 0x19b   : > { %3448 = vmatpush.bf16.msrb.mxu3 %v5514_v61  ;;  %v5965_v61 = vld [vmem:[%s8836_s1 + $0x7d4] sm:$0xf] }
 0x19c   : > { %v1734_v4 = vpop.f32.mrf.mxu3 }
 0x19d   : > { %v1735_v55 = vadd.f32 %v1734_v4, %v1705_v27  ;;  %v1678_v5 = vpop.f32.mrf.mxu1  ;;  %v5952_v27 = vld [vmem:[%s8836_s1 + $0x764] sm:$0xf0]  ;;  %v5495_v4 = vld [vmem:[%s8836_s1 + $0x7d8] sm:$0xf0] }
 0x19e   : > { %v1679_v25 = vadd.f32 %v1678_v5, %v1649_v3  ;;  %3420 = vmatpush.bf16.msrb.mxu2 %v5442_v29  ;;  %v5438_v14 = vor.u32 %v5952_v27, %v5437_v54  ;;  %v5498_v10 = vor.u32 %v5965_v61, %v5495_v4  ;;  %v5945_v54 = vld [vmem:[%s8836_s1 + $0x734] sm:$0xf]  ;;  %v5415_v27 = vld [vmem:[%s8836_s1 + $0x738] sm:$0xf0] }
 0x19f   : > { %v7977_v23 = vadd.f32 %v1735_v55, %v7689_v31  ;;  %v5509_v31 = vld [vmem:[%s8836_s1 + $0x7f0] sm:$0xf]  ;;  %3449 = vmatpush.bf16.msrb.mxu3 %v5506_v45 }
 0x1a0   : > { %v7982_v1 = vadd.f32 %v1679_v25, %v7694_v34  ;;  %v5970_v34 = vld [vmem:[%s8836_s1 + $0x7f4] sm:$0xf0]  ;;  %3362 = vmatpush.bf16.msrb.mxu0 %v5438_v14  ;;  %v5961_v14 = vld [vmem:[%s8836_s1 + $0x7b4] sm:$0xf] }
 0x1a1   : > { %v1707_v44 = vpop.f32.mrf.mxu2  ;;  %v5510_v40 = vor.u32 %v5970_v34, %v5509_v31  ;;  %v5966_v31 = vld [vmem:[%s8836_s1 + $0x7d4] sm:$0xf0]  ;;  %v5963_v34 = vld [vmem:[%s8836_s1 + $0x7c4] sm:$0xf] }
 0x1a2   : > { %v1652_v43 = vpop.f32.mrf.mxu0  ;;  %3421 = vmatpush.bf16.msrb.mxu2 %v5434_v19 }
 0x1a3   : > { %3390 = vmatpush.bf16.msrb.mxu1 %v5510_v40  ;;  %3450 = vmatpush.bf16.msrb.mxu3 %v5498_v10  ;;  %v5490_v40 = vor.u32 %v5963_v34, %v5487_v11  ;;  %v5153_v10 = vld [vmem:[%s6393_s19 + $0xa0] sm:$0xff] }
 0x1a4   : > { %v1736_v52 = vpop.f32.mrf.mxu3  ;;  %3363 = vmatpush.bf16.msrb.mxu0 %v5430_v7 }
 0x1a5   : > { %v1737_v51 = vadd.f32 %v1736_v52, %v1707_v44  ;;  %v1681_v38 = vpop.f32.mrf.mxu1  ;;  %2573 = vmatmul.bf16.gmra.mxu0 %v2355_v0  ;;  %v5423_v44 = vld [vmem:[%s8836_s1 + $0x748] sm:$0xf0] }
 0x1a6   : > { %v1682_v53 = vadd.f32 %v1681_v38, %v1652_v43  ;;  %2631 = vmatmul.bf16.gmra.mxu2 %v2355_v0 }
 0x1a7   : > { %v8011_v46 = vadd.f32 %v1737_v51, %v7724_v18  ;;  %v5501_v18 = vld [vmem:[%s8836_s1 + $0x7e0] sm:$0xf]  ;;  %3451 = vmatpush.bf16.msrb.mxu3 %v5490_v40 }
 0x1a8   : > { %v8014_v50 = vadd.f32 %v1682_v53, %v7730_v39  ;;  %2602 = vmatmul.bf16.gmra.mxu1 %v2356_v36  ;;  %v5968_v39 = vld [vmem:[%s8836_s1 + $0x7e4] sm:$0xf0]  ;;  %v5421_v51 = vld [vmem:[%s8836_s1 + $0x740] sm:$0xf] }
 0x1a9   : > { %2660 = vmatmul.bf16.gmra.mxu3 %v2356_v36  ;;  %v1710_v6 = vpop.f32.mrf.mxu2  ;;  %v5502_v59 = vor.u32 %v5968_v39, %v5501_v18  ;;  %v5948_v36 = vld [vmem:[%s8836_s1 + $0x744] sm:$0xf0]  ;;  %v5479_v39 = vld [vmem:[%s8836_s1 + $0x7b8] sm:$0xf0] }
 0x1aa   : > { %v1654_v49 = vpop.f32.mrf.mxu0  ;;  %v5422_v53 = vor.u32 %v5948_v36, %v5421_v51  ;;  %v5941_v51 = vld [vmem:[%s8836_s1 + $0x714] sm:$0xf]  ;;  %v5399_v36 = vld [vmem:[%s8836_s1 + $0x718] sm:$0xf0] }
 0x1ab   : > { %3391 = vmatpush.bf16.msrb.mxu1 %v5502_v59  ;;  %v5482_v59 = vor.u32 %v5961_v14, %v5479_v39 }
 0x1ac   : > { %v1739_v3 = vpop.f32.mrf.mxu3  ;;  %3364 = vmatpush.bf16.msrb.mxu0 %v5422_v53  ;;  %v5957_v53 = vld [vmem:[%s8836_s1 + $0x794] sm:$0xf] }
 0x1ad   : > { %v1740_v20 = vadd.f32 %v1739_v3, %v1710_v6  ;;  %v1683_v12 = vpop.f32.mrf.mxu1  ;;  %v5418_v6 = vor.u32 %v5945_v54, %v5415_v27  ;;  %3452 = vmatpush.bf16.msrb.mxu3 %v5482_v59  ;;  %v5942_v59 = vld [vmem:[%s8836_s1 + $0x714] sm:$0xf0] }
 0x1ae   : > { %v1684_v5 = vadd.f32 %v1683_v12, %v1654_v49  ;;  %v5151_v49 = vld [vmem:[%s6393_s19 + $0x80] sm:$0xff]  ;;  %v5154_v12 = vld [vmem:[%s6393_s19 + $0xa8] sm:$0xff] }
 0x1af   : > { %v8041_v55 = vadd.f32 %v1740_v20, %v7761_v35  ;;  %v5493_v35 = vld [vmem:[%s8836_s1 + $0x7d0] sm:$0xf]  ;;  %v5152_v20 = vld [vmem:[%s6393_s19 + $0x88] sm:$0xff] }
 0x1b0   : > { %v8048_v25 = vadd.f32 %v1684_v5, %v7766_v37  ;;  %v5947_v37 = vld [vmem:[%s8836_s1 + $0x744] sm:$0xf]  ;;  %v5494_v41 = vor.u32 %v5966_v31, %v5493_v35  ;;  %v2701_v35 = vpack.c.bf16 %v5153_v10, %v5151_v49  ;;  %3365 = vmatpush.bf16.msrb.mxu0 %v5414_v16  ;;  %v2702_v34 = vpack.c.bf16 %v5154_v12, %v5152_v20  ;;  %v5158_v16 = vld [vmem:[%s6393_s19 + $0xe8] sm:$0xff] }
 0x1b1   : > { %v1712_v9 = vpop.f32.mrf.mxu2  ;;  %v5426_v26 = vor.u32 %v5947_v37, %v5423_v44  ;;  %v5959_v31 = vld [vmem:[%s8836_s1 + $0x7a4] sm:$0xf]  ;;  %v5471_v37 = vld [vmem:[%s8836_s1 + $0x7a8] sm:$0xf0] }
 0x1b2   : > { %v2098_v0 = vpop.f32.mrf.mxu0  ;;  %3392 = vmatpush.bf16.msrb.mxu1 %v5494_v41  ;;  %v5474_v41 = vor.u32 %v5959_v31, %v5471_v37  ;;  %v5939_v12 = vld [vmem:[%s8836_s1 + $0x704] sm:$0xf] }
 0x1b3   : > { %3422 = vmatpush.bf16.msrb.mxu2 %v5426_v26 }
 0x1b4   : > { %v1741_v28 = vpop.f32.mrf.mxu3  ;;  %3453 = vmatpush.bf16.msrb.mxu3 %v5474_v41 }
 0x1b5   : > { %v1742_v29 = vadd.f32 %v1741_v28, %v1712_v9  ;;  %v2127_v33 = vpop.f32.mrf.mxu1  ;;  %2908 = vmatmul.bf16.vlgmr.msra.gmra.mxu0 %v2699_v47 }
 0x1b6   : > { %v2128_v43 = vadd.f32 %v2127_v33, %v2098_v0  ;;  %2966 = vmatmul.bf16.vlgmr.msra.gmra.mxu2 %v2699_v47 }
 0x1b7   : > { %v8075_v52 = vadd.f32 %v1742_v29, %v7796_v13  ;;  %v5485_v13 = vld [vmem:[%s8836_s1 + $0x7c0] sm:$0xf]  ;;  %3423 = vmatpush.bf16.msrb.mxu2 %v5418_v6 }
 0x1b8   : > { %v8078_v45 = vadd.f32 %v2128_v43, %v7802_v63  ;;  %2937 = vmatmul.bf16.vlgmr.msra.gmra.mxu1 %v2700_v30  ;;  %v5964_v63 = vld [vmem:[%s8836_s1 + $0x7c4] sm:$0xf0]  ;;  %v5405_v29 = vld [vmem:[%s8836_s1 + $0x720] sm:$0xf] }
 0x1b9   : > { %2995 = vmatmul.bf16.vlgmr.msra.gmra.mxu3 %v2700_v30  ;;  %v2156_v38 = vpop.f32.mrf.mxu2  ;;  %v5486_v18 = vor.u32 %v5964_v63, %v5485_v13  ;;  %v5944_v30 = vld [vmem:[%s8836_s1 + $0x724] sm:$0xf0]  ;;  %v5463_v63 = vld [vmem:[%s8836_s1 + $0x798] sm:$0xf0] }
 0x1ba   : > { %v2100_v60 = vpop.f32.mrf.mxu0  ;;  %v5406_v43 = vor.u32 %v5944_v30, %v5405_v29 }
 0x1bb   : > { %3393 = vmatpush.bf16.msrb.mxu1 %v5486_v18  ;;  %v5466_v18 = vor.u32 %v5957_v53, %v5463_v63 }
 0x1bc   : > { %v2185_v58 = vpop.f32.mrf.mxu3  ;;  %3366 = vmatpush.bf16.msrb.mxu0 %v5406_v43 }
 0x1bd   : > { %v2186_v19 = vadd.f32 %v2185_v58, %v2156_v38  ;;  %v2129_v61 = vpop.f32.mrf.mxu1  ;;  %v5402_v38 = vor.u32 %v5941_v51, %v5399_v36  ;;  %3454 = vmatpush.bf16.msrb.mxu3 %v5466_v18  ;;  %v5161_v18 = vld [vmem:[%s6393_s19 + $0x120] sm:$0xff] }
 0x1be   : > { %v2130_v3 = vadd.f32 %v2129_v61, %v2100_v60  ;;  %v5397_v60 = vld [vmem:[%s8836_s1 + $0x710] sm:$0xf]  ;;  %v5155_v61 = vld [vmem:[%s6393_s19 + $0xc0] sm:$0xff] }
 0x1bf   : > { %v8105_v4 = vadd.f32 %v2186_v19, %v7833_v56  ;;  %v5477_v56 = vld [vmem:[%s8836_s1 + $0x7b0] sm:$0xf]  ;;  %v5398_v49 = vor.u32 %v5942_v59, %v5397_v60  ;;  %v5986_v59 = vld [vmem:[%s8836_s1 + $0x874] sm:$0xf0] }
 0x1c0   : > { %v8112_v5 = vadd.f32 %v2130_v3, %v7838_v57  ;;  %v5943_v57 = vld [vmem:[%s8836_s1 + $0x724] sm:$0xf]  ;;  %v5478_v9 = vor.u32 %v5962_v15, %v5477_v56  ;;  %v5461_v19 = vld [vmem:[%s8836_s1 + $0x790] sm:$0xf]  ;;  %v5394_v15 = vor.u32 %v5939_v12, %v5391_v32 }
 0x1c1   : > { %v2158_v2 = vpop.f32.mrf.mxu2  ;;  %v5410_v7 = vor.u32 %v5943_v57, %v5407_v42  ;;  %v5157_v3 = vld [vmem:[%s6393_s19 + $0xe0] sm:$0xff]  ;;  %3367 = vmatpush.bf16.msrb.mxu0 %v5398_v49  ;;  %v5637_v60 = vld [vmem:[%s8836_s1 + $0x870] sm:$0xf]  ;;  %v5631_v49 = vld [vmem:[%s8836_s1 + $0x868] sm:$0xf0] }
 0x1c2   : > { %v2103_v47 = vpop.f32.mrf.mxu0  ;;  %3394 = vmatpush.bf16.msrb.mxu1 %v5478_v9  ;;  %v2703_v57 = vpack.c.bf16 %v5157_v3, %v5155_v61  ;;  %v5940_v9 = vld [vmem:[%s8836_s1 + $0x704] sm:$0xf0]  ;;  %v5638_v61 = vor.u32 %v5986_v59, %v5637_v60  ;;  %v5983_v3 = vld [vmem:[%s8836_s1 + $0x864] sm:$0xf] }
 0x1c3   : > { %3424 = vmatpush.bf16.msrb.mxu2 %v5410_v7  ;;  %v5453_v7 = vld [vmem:[%s8836_s1 + $0x780] sm:$0xf]  ;;  %v5634_v12 = vor.u32 %v5983_v3, %v5631_v49  ;;  %v5999_v32 = vld [vmem:[%s8836_s1 + $0x8e4] sm:$0xf] }
 0x1c4   : > { %v2187_v44 = vpop.f32.mrf.mxu3 }
 0x1c5   : > { %v2188_v26 = vadd.f32 %v2187_v44, %v2158_v2  ;;  %v2132_v11 = vpop.f32.mrf.mxu1  ;;  %2913 = vmatmul.bf16.gmra.mxu0 %v2701_v35  ;;  %v5156_v2 = vld [vmem:[%s6393_s19 + $0xc8] sm:$0xff] }
 0x1c6   : > { %v2133_v0 = vadd.f32 %v2132_v11, %v2103_v47  ;;  %2971 = vmatmul.bf16.gmra.mxu2 %v2701_v35  ;;  %v5389_v35 = vld [vmem:[%s8836_s1 + $0x700] sm:$0xf]  ;;  %v5956_v47 = vld [vmem:[%s8836_s1 + $0x784] sm:$0xf0] }
 0x1c7   : > { %v8139_v28 = vadd.f32 %v2188_v26, %v7868_v62  ;;  %v5469_v62 = vld [vmem:[%s8836_s1 + $0x7a0] sm:$0xf]  ;;  %3425 = vmatpush.bf16.msrb.mxu2 %v5402_v38  ;;  %v5390_v44 = vor.u32 %v5940_v9, %v5389_v35  ;;  %v2704_v26 = vpack.c.bf16 %v5158_v16, %v5156_v2 }
 0x1c8   : > { %v8142_v40 = vadd.f32 %v2133_v0, %v7874_v48  ;;  %2942 = vmatmul.bf16.gmra.mxu1 %v2702_v34  ;;  %v5960_v48 = vld [vmem:[%s8836_s1 + $0x7a4] sm:$0xf0] }
 0x1c9   : > { %3000 = vmatmul.bf16.gmra.mxu3 %v2702_v34  ;;  %v2161_v33 = vpop.f32.mrf.mxu2  ;;  %v5470_v13 = vor.u32 %v5960_v48, %v5469_v62  ;;  %v5454_v34 = vor.u32 %v5956_v47, %v5453_v7  ;;  %3368 = vmatpush.bf16.msrb.mxu0 %v5390_v44  ;;  %v5985_v62 = vld [vmem:[%s8836_s1 + $0x874] sm:$0xf]  ;;  %v5703_v48 = vld [vmem:[%s8836_s1 + $0x8f8] sm:$0xf0]  ;;  %v5325_v7 = vld [vmem:[%s6393_s19 + $0x50] sm:$0x1] }
 0x1ca   : > { %v2105_v27 = vpop.f32.mrf.mxu0 }
 0x1cb   : > { %3395 = vmatpush.bf16.msrb.mxu1 %v5470_v13  ;;  %3426 = vmatpush.bf16.msrb.mxu2 %v5394_v15 }
 0x1cc   : > { %v2190_v54 = vpop.f32.mrf.mxu3 }
 0x1cd   : > { %v2191_v6 = vadd.f32 %v2190_v54, %v2161_v33  ;;  %v2134_v14 = vpop.f32.mrf.mxu1  ;;  %v6001_v33 = vld [vmem:[%s8836_s1 + $0x8f4] sm:$0xf]  ;;  %3822 = vmatpush.bf16.msra.mxu0 %v5638_v61 }
 0x1ce   : > { %v2135_v58 = vadd.f32 %v2134_v14, %v2105_v27  ;;  %v5706_v51 = vor.u32 %v6001_v33, %v5703_v48  ;;  %v5159_v27 = vld [vmem:[%s6393_s19 + $0x100] sm:$0xff]  ;;  %v5162_v14 = vld [vmem:[%s6393_s19 + $0x128] sm:$0xff]  ;;  %v5981_v33 = vld [vmem:[%s8836_s1 + $0x854] sm:$0xf] }
 0x1cf   : > { %v8169_v39 = vadd.f32 %v2191_v6, %v7905_v8  ;;  %v5958_v8 = vld [vmem:[%s8836_s1 + $0x794] sm:$0xf0]  ;;  %v5160_v6 = vld [vmem:[%s6393_s19 + $0x108] sm:$0xff] }
 0x1d0   : > { %v8186_v10 = vadd.f32 %v2135_v58, %v7922_v17  ;;  %v5462_v20 = vor.u32 %v5958_v8, %v5461_v19  ;;  %v5455_v17 = vld [vmem:[%s8836_s1 + $0x788] sm:$0xf0]  ;;  %v2705_v8 = vpack.c.bf16 %v5161_v18, %v5159_v27 }
 0x1d1   : > { %v2163_v56 = vpop.f32.mrf.mxu2  ;;  %v5458_v42 = vor.u32 %v5955_v24, %v5455_v17  ;;  %v5695_v24 = vld [vmem:[%s8836_s1 + $0x8e8] sm:$0xf0]  ;;  %v2706_v17 = vpack.c.bf16 %v5162_v14, %v5160_v6 }
 0x1d2   : > { %3396 = vmatpush.bf16.msrb.mxu1 %v5462_v20  ;;  %v2108_v37 = vpop.f32.mrf.mxu0  ;;  %v5698_v16 = vor.u32 %v5999_v32, %v5695_v24  ;;  %v5982_v32 = vld [vmem:[%s8836_s1 + $0x854] sm:$0xf0] }
 0x1d3   : > { %3455 = vmatpush.bf16.msrb.mxu3 %v5458_v42 }
 0x1d4   : > { %v2192_v31 = vpop.f32.mrf.mxu3 }
 0x1d5   : > { %v2193_v41 = vadd.f32 %v2192_v31, %v2163_v56  ;;  %v2137_v11 = vpop.f32.mrf.mxu1  ;;  %2918 = vmatmul.bf16.gmra.mxu0 %v2703_v57  ;;  %v5327_v31 = vld [vmem:[%s6393_s19 + $0x60] sm:$0xfe] }
 0x1d6   : > { %v2138_v29 = vadd.f32 %v2137_v11, %v2108_v37  ;;  %2976 = vmatmul.bf16.gmra.mxu2 %v2703_v57  ;;  %3397 = vmatpush.bf16.msrb.mxu1 %v5454_v34  ;;  %v5323_v57 = vld [vmem:[%s6393_s19 + $0x40] sm:$0xfe]  ;;  %v5329_v37 = vld [vmem:[%s6393_s19 + $0x70] sm:$0x1]  ;;  %v5328_v34 = vld [vmem:[%s6393_s19 + $0x68] sm:$0xfe] }
 0x1d7   : > { %v8215_v0 = vadd.f32 %v2193_v41, %v7951_v22  ;;  %v5639_v22 = vld [vmem:[%s8836_s1 + $0x878] sm:$0xf0]  ;;  %3909 = vmatpush.bf16.msra.mxu3 %v5706_v51  ;;  %v3096_v44 = vrot.slane %v5323_v57, 1  ;;  %v5324_v41 = vld [vmem:[%s6393_s19 + $0x48] sm:$0xfe]  ;;  %v3102_v27 = vrot.slane %v5327_v31, 1 }
 0x1d8   : > { %v8218_v30 = vadd.f32 %v2138_v29, %v7958_v21  ;;  %2947 = vmatmul.bf16.gmra.mxu1 %v2704_v26  ;;  %v5642_v43 = vor.u32 %v5985_v62, %v5639_v22  ;;  %v5984_v11 = vld [vmem:[%s8836_s1 + $0x864] sm:$0xf0]  ;;  %v5693_v29 = vld [vmem:[%s8836_s1 + $0x8e0] sm:$0xf]  ;;  %v3103_v18 = vrot.slane %v5329_v37, 1  ;;  %v3099_v59 = vrot.slane %v5324_v41, 1 }
 0x1d9   : > { %3005 = vmatmul.bf16.gmra.mxu3 %v2704_v26  ;;  %v2166_v21 = vpop.f32.mrf.mxu2  ;;  %v5326_v26 = vld [vmem:[%s6393_s19 + $0x58] sm:$0x1]  ;;  %v6000_v22 = vld [vmem:[%s8836_s1 + $0x8e4] sm:$0xf0]  ;;  %v5679_v31 = vld [vmem:[%s8836_s1 + $0x8c8] sm:$0xf0] }
 0x1da   : > { %v2110_v13 = vpop.f32.mrf.mxu0  ;;  %3880 = vmatpush.bf16.msra.mxu2 %v5642_v43  ;;  %v5330_v43 = vld [vmem:[%s6393_s19 + $0x78] sm:$0x1]  ;;  %v5694_v48 = vor.u32 %v6000_v22, %v5693_v29  ;;  %v5335_v22 = vld [vmem:[%s6393_s19 + $0xa0] sm:$0xfe] }
 0x1db   : > { %3910 = vmatpush.bf16.msra.mxu3 %v5698_v16  ;;  %v3106_v61 = vrot.slane %v5330_v43, 1  ;;  %v5998_v16 = vld [vmem:[%s8836_s1 + $0x8d4] sm:$0xf0] }
 0x1dc   : > { %v2195_v36 = vpop.f32.mrf.mxu3 }
 0x1dd   : > { %v2196_v38 = vadd.f32 %v2195_v36, %v2166_v21  ;;  %v2139_v53 = vpop.f32.mrf.mxu1  ;;  %v5623_v21 = vld [vmem:[%s8836_s1 + $0x858] sm:$0xf0]  ;;  %v5997_v36 = vld [vmem:[%s8836_s1 + $0x8d4] sm:$0xf] }
 0x1de   : > { %v2140_v54 = vadd.f32 %v2139_v53, %v2110_v13  ;;  %3881 = vmatpush.bf16.msra.mxu2 %v5634_v12  ;;  %v5626_v51 = vor.u32 %v5981_v33, %v5623_v21  ;;  %v5687_v13 = vld [vmem:[%s8836_s1 + $0x8d8] sm:$0xf0]  ;;  %v5621_v12 = vld [vmem:[%s8836_s1 + $0x850] sm:$0xf] }
 0x1df   : > { %v8233_v63 = vadd.f32 %v2196_v38, %v7977_v23  ;;  %v5701_v23 = vld [vmem:[%s8836_s1 + $0x8f0] sm:$0xf]  ;;  %v5690_v6 = vor.u32 %v5997_v36, %v5687_v13  ;;  %v5336_v36 = vld [vmem:[%s6393_s19 + $0xa8] sm:$0xfe] }
 0x1e0   : > { %v8240_v58 = vadd.f32 %v2140_v54, %v7982_v1  ;;  %v6002_v1 = vld [vmem:[%s8836_s1 + $0x8f4] sm:$0xf0]  ;;  %v3097_v54 = vrot.slane %v5325_v7, 1  ;;  %v5995_v7 = vld [vmem:[%s8836_s1 + $0x8c4] sm:$0xf] }
 0x1e1   : > { %v2168_v19 = vpop.f32.mrf.mxu2  ;;  %v5702_v20 = vor.u32 %v6002_v1, %v5701_v23  ;;  %v3100_v23 = vrot.slane %v5326_v26, 1  ;;  %3911 = vmatpush.bf16.msra.mxu3 %v5690_v6  ;;  %v5682_v41 = vor.u32 %v5995_v7, %v5679_v31  ;;  %v5337_v33 = vld [vmem:[%s6393_s19 + $0xb0] sm:$0x1]  ;;  %v5980_v13 = vld [vmem:[%s8836_s1 + $0x844] sm:$0xf0] }
 0x1e2   : > { %v2113_v2 = vpop.f32.mrf.mxu0  ;;  %3882 = vmatpush.bf16.msra.mxu2 %v5626_v51  ;;  %v3098_v49 = vsel %vm290_vm0, %v3096_v44, %v3097_v54  ;;  %v5334_v51 = vld [vmem:[%s6393_s19 + $0x98] sm:$0x1]  ;;  %v5996_v54 = vld [vmem:[%s8836_s1 + $0x8c4] sm:$0xf0] }
 0x1e3   : > { %3851 = vmatpush.bf16.msra.mxu1 %v5702_v20  ;;  %v5338_v6 = vld [vmem:[%s6393_s19 + $0xb8] sm:$0x1] }
 0x1e4   : > { %v2197_v56 = vpop.f32.mrf.mxu3  ;;  %v5978_v7 = vld [vmem:[%s8836_s1 + $0x834] sm:$0xf0] }
 0x1e5   : > { %v2198_v15 = vadd.f32 %v2197_v56, %v2168_v19  ;;  %v2142_v42 = vpop.f32.mrf.mxu1  ;;  %2923 = vmatmul.bf16.gmra.mxu0 %v2705_v8  ;;  %v3105_v19 = vrot.slane %v5328_v34, 1  ;;  %v3101_v56 = vsel %vm290_vm0, %v3099_v59, %v3100_v23  ;;  %3912 = vmatpush.bf16.msra.mxu3 %v5682_v41  ;;  %v5993_v59 = vld [vmem:[%s8836_s1 + $0x8b4] sm:$0xf]  ;;  %v5671_v23 = vld [vmem:[%s8836_s1 + $0x8b8] sm:$0xf0] }
 0x1e6   : > { %v2143_v9 = vadd.f32 %v2142_v42, %v2113_v2  ;;  %2981 = vmatmul.bf16.gmra.mxu2 %v2705_v8  ;;  %v3104_v8 = vsel %vm290_vm0, %v3102_v27, %v3103_v18  ;;  %v5977_v27 = vld [vmem:[%s8836_s1 + $0x834] sm:$0xf]  ;;  %v5607_v18 = vld [vmem:[%s8836_s1 + $0x838] sm:$0xf0]  ;;  %v5994_v41 = vld [vmem:[%s8836_s1 + $0x8b4] sm:$0xf0] }
 0x1e7   : > { %v8268_v35 = vadd.f32 %v2198_v15, %v8011_v46  ;;  %v5629_v46 = vld [vmem:[%s8836_s1 + $0x860] sm:$0xf]  ;;  %3852 = vmatpush.bf16.msra.mxu1 %v5694_v48  ;;  %v3107_v2 = vsel %vm290_vm0, %v3105_v19, %v3106_v61  ;;  %v5979_v15 = vld [vmem:[%s8836_s1 + $0x844] sm:$0xf]  ;;  %v3160_v57 = vpack.c.bf16 %v3104_v8, %v3098_v49  ;;  %v5332_v48 = vld [vmem:[%s6393_s19 + $0x88] sm:$0xfe] }
 0x1e8   : > { %v8274_v47 = vadd.f32 %v2143_v9, %v8014_v50  ;;  %2952 = vmatmul.bf16.gmra.mxu1 %v2706_v17  ;;  %v5630_v50 = vor.u32 %v5984_v11, %v5629_v46  ;;  %v3161_v34 = vpack.c.bf16 %v3107_v2, %v3101_v56  ;;  %v5331_v46 = vld [vmem:[%s6393_s19 + $0x80] sm:$0xfe]  ;;  %v3114_v49 = vrot.slane %v5335_v22, 1  ;;  %v5663_v22 = vld [vmem:[%s8836_s1 + $0x8a8] sm:$0xf0] }
 0x1e9   : > { %3010 = vmatmul.bf16.gmra.mxu3 %v2706_v17  ;;  %v2171_v62 = vpop.f32.mrf.mxu2  ;;  %v5615_v17 = vld [vmem:[%s8836_s1 + $0x848] sm:$0xf0]  ;;  %v3108_v21 = vrot.slane %v5331_v46, 1  ;;  %v3115_v8 = vrot.slane %v5337_v33, 1  ;;  %v3112_v56 = vrot.slane %v5334_v51, 1  ;;  %v3117_v2 = vrot.slane %v5336_v36, 1 }
 0x1ea   : > { %v2115_v53 = vpop.f32.mrf.mxu0  ;;  %3823 = vmatpush.bf16.msra.mxu0 %v5630_v50  ;;  %v5618_v9 = vor.u32 %v5979_v15, %v5615_v17  ;;  %v5333_v50 = vld [vmem:[%s6393_s19 + $0x90] sm:$0x1] }
 0x1ec   : > { %v2200_v38 = vpop.f32.mrf.mxu3  ;;  %3883 = vmatpush.bf16.msra.mxu2 %v5618_v9  ;;  %v5605_v9 = vld [vmem:[%s8836_s1 + $0x830] sm:$0xf] }
 0x1ed   : > { %v2201_v14 = vadd.f32 %v2200_v38, %v2171_v62  ;;  %v2144_v60 = vpop.f32.mrf.mxu1  ;;  %v5677_v38 = vld [vmem:[%s8836_s1 + $0x8c0] sm:$0xf] }
 0x1ee   : > { %v2145_v3 = vadd.f32 %v2144_v60, %v2115_v53  ;;  %v5610_v60 = vor.u32 %v5977_v27, %v5607_v18  ;;  %v5345_v27 = vld [vmem:[%s6393_s19 + $0xf0] sm:$0x1] }
 0x1ef   : > { %v8305_v1 = vadd.f32 %v2201_v14, %v8041_v55  ;;  %v5685_v55 = vld [vmem:[%s8836_s1 + $0x8d0] sm:$0xf]  ;;  %v5678_v14 = vor.u32 %v5996_v54, %v5677_v38  ;;  %v5343_v54 = vld [vmem:[%s6393_s19 + $0xe0] sm:$0xfe] }
 0x1f0   : > { %v8310_v20 = vadd.f32 %v2145_v3, %v8048_v25  ;;  %v5622_v25 = vor.u32 %v5982_v32, %v5621_v12  ;;  %v5686_v42 = vor.u32 %v5998_v16, %v5685_v55  ;;  %v3109_v3 = vrot.slane %v5333_v50, 1  ;;  %3884 = vmatpush.bf16.msra.mxu2 %v5610_v60  ;;  %v5991_v50 = vld [vmem:[%s8836_s1 + $0x8a4] sm:$0xf]  ;;  %v5342_v60 = vld [vmem:[%s6393_s19 + $0xd8] sm:$0x1] }
 0x1f1   : > { %v2173_v24 = vpop.f32.mrf.mxu2  ;;  %v5674_v12 = vor.u32 %v5993_v59, %v5671_v23  ;;  %v5344_v59 = vld [vmem:[%s6393_s19 + $0xe8] sm:$0xfe] }
 0x1f2   : > { %v2559_v44 = vpop.f32.mrf.mxu0  ;;  %3824 = vmatpush.bf16.msra.mxu0 %v5622_v25  ;;  %3853 = vmatpush.bf16.msra.mxu1 %v5686_v42  ;;  %v3118_v25 = vrot.slane %v5338_v6, 1  ;;  %v3110_v17 = vsel %vm290_vm0, %v3108_v21, %v3109_v3  ;;  %v5976_v23 = vld [vmem:[%s8836_s1 + $0x824] sm:$0xf0] }
 0x1f3   : > { %3913 = vmatpush.bf16.msra.mxu3 %v5674_v12  ;;  %v5992_v3 = vld [vmem:[%s8836_s1 + $0x8a4] sm:$0xf0]  ;;  %v5346_v12 = vld [vmem:[%s6393_s19 + $0xf8] sm:$0x1] }
 0x1f4   : > { %v2202_v37 = vpop.f32.mrf.mxu3 }
 0x1f5   : > { %v2203_v26 = vadd.f32 %v2202_v37, %v2173_v24  ;;  %v2588_v11 = vpop.f32.mrf.mxu1  ;;  %3369 = vmatmul.bf16.vlgmr.msrb.gmra.mxu0 %v3160_v57  ;;  %v3111_v24 = vrot.slane %v5332_v48, 1  ;;  %v5666_v48 = vor.u32 %v5991_v50, %v5663_v22 }
 0x1f6   : > { %v2589_v62 = vadd.f32 %v2588_v11, %v2559_v44  ;;  %3427 = vmatmul.bf16.vlgmr.msrb.gmra.mxu2 %v3160_v57  ;;  %3854 = vmatpush.bf16.msra.mxu1 %v5678_v14  ;;  %v3116_v57 = vsel %vm290_vm0, %v3114_v49, %v3115_v8  ;;  %v3119_v44 = vsel %vm290_vm0, %v3117_v2, %v3118_v25  ;;  %v5340_v14 = vld [vmem:[%s6393_s19 + $0xc8] sm:$0xfe]  ;;  %v5973_v49 = vld [vmem:[%s8836_s1 + $0x814] sm:$0xf]  ;;  %v5591_v8 = vld [vmem:[%s8836_s1 + $0x818] sm:$0xf0] }
 0x1f7   : > { %v8340_v29 = vadd.f32 %v2203_v26, %v8075_v52  ;;  %v5613_v52 = vld [vmem:[%s8836_s1 + $0x840] sm:$0xf]  ;;  %v3113_v37 = vsel %vm290_vm0, %v3111_v24, %v3112_v56  ;;  %v5975_v26 = vld [vmem:[%s8836_s1 + $0x824] sm:$0xf]  ;;  %v3162_v46 = vpack.c.bf16 %v3116_v57, %v3110_v17  ;;  %3914 = vmatpush.bf16.msra.mxu3 %v5666_v48  ;;  %v5989_v24 = vld [vmem:[%s8836_s1 + $0x894] sm:$0xf] }
 0x1f8   : > { %v8346_v43 = vadd.f32 %v2589_v62, %v8078_v45  ;;  %3398 = vmatmul.bf16.vlgmr.msrb.gmra.mxu1 %v3161_v34  ;;  %v5614_v45 = vor.u32 %v5980_v13, %v5613_v52  ;;  %v3163_v36 = vpack.c.bf16 %v3119_v44, %v3113_v37  ;;  %v5339_v52 = vld [vmem:[%s6393_s19 + $0xc0] sm:$0xfe]  ;;  %v5655_v56 = vld [vmem:[%s8836_s1 + $0x898] sm:$0xf0]  ;;  %v3126_v17 = vrot.slane %v5343_v54, 1 }
 0x1f9   : > { %3456 = vmatmul.bf16.vlgmr.msrb.gmra.mxu3 %v3161_v34  ;;  %v2617_v53 = vpop.f32.mrf.mxu2  ;;  %v5599_v34 = vld [vmem:[%s8836_s1 + $0x828] sm:$0xf0]  ;;  %v3120_v18 = vrot.slane %v5339_v52, 1  ;;  %v3127_v57 = vrot.slane %v5345_v27, 1  ;;  %v3124_v37 = vrot.slane %v5342_v60, 1  ;;  %v3129_v44 = vrot.slane %v5344_v59, 1 }
 0x1fa   : > { %v2561_v61 = vpop.f32.mrf.mxu0  ;;  %3825 = vmatpush.bf16.msra.mxu0 %v5614_v45  ;;  %v5602_v62 = vor.u32 %v5975_v26, %v5599_v34  ;;  %v5341_v45 = vld [vmem:[%s6393_s19 + $0xd0] sm:$0x1]  ;;  %v5971_v48 = vld [vmem:[%s8836_s1 + $0x804] sm:$0xf]  ;;  %v5645_v60 = vld [vmem:[%s8836_s1 + $0x880] sm:$0xf] }
 0x1fb   : > { %v5589_v34 = vld [vmem:[%s8836_s1 + $0x810] sm:$0xf]  ;;  %v3128_v50 = vsel %vm290_vm0, %v3126_v17, %v3127_v57  ;;  %v5350_v17 = vld [vmem:[%s6393_s19 + $0x118] sm:$0x1]  ;;  %v5352_v57 = vld [vmem:[%s6393_s19 + $0x128] sm:$0xfe] }
 0x1fc   : > { %v2646_v19 = vpop.f32.mrf.mxu3  ;;  %3885 = vmatpush.bf16.msra.mxu2 %v5602_v62 }
 0x1fd   : > { %v2647_v32 = vadd.f32 %v2646_v19, %v2617_v53  ;;  %v2590_v55 = vpop.f32.mrf.mxu1  ;;  %v5661_v19 = vld [vmem:[%s8836_s1 + $0x8a0] sm:$0xf] }
 0x1fe   : > { %v2591_v15 = vadd.f32 %v2590_v55, %v2561_v61  ;;  %v5594_v55 = vor.u32 %v5973_v49, %v5591_v8 }
 0x1ff   : > { %v8377_v16 = vadd.f32 %v2647_v32, %v8105_v4  ;;  %v5669_v4 = vld [vmem:[%s8836_s1 + $0x8b0] sm:$0xf]  ;;  %v5662_v32 = vor.u32 %v5992_v3, %v5661_v19  ;;  %v5988_v19 = vld [vmem:[%s8836_s1 + $0x884] sm:$0xf0] }
 0x200   : > { %v8382_v42 = vadd.f32 %v2591_v15, %v8112_v5  ;;  %v5606_v5 = vor.u32 %v5978_v7, %v5605_v9  ;;  %v5670_v11 = vor.u32 %v5994_v41, %v5669_v4  ;;  %v3121_v15 = vrot.slane %v5341_v45, 1  ;;  %3886 = vmatpush.bf16.msra.mxu2 %v5594_v55  ;;  %v5647_v45 = vld [vmem:[%s8836_s1 + $0x888] sm:$0xf0] }
 0x201   : > { %v2619_v31 = vpop.f32.mrf.mxu2  ;;  %v5658_v9 = vor.u32 %v5989_v24, %v5655_v56  ;;  %v5646_v3 = vor.u32 %v5988_v19, %v5645_v60  ;;  %v5349_v24 = vld [vmem:[%s6393_s19 + $0x110] sm:$0x1]  ;;  %v5351_v56 = vld [vmem:[%s6393_s19 + $0x120] sm:$0xfe]  ;;  %v5518_v19 = vld [vmem:[%s6393_s19 + $0x58] sm:$0x3] }
 0x202   : > { %v2564_v21 = vpop.f32.mrf.mxu0  ;;  %3826 = vmatpush.bf16.msra.mxu0 %v5606_v5  ;;  %3855 = vmatpush.bf16.msra.mxu1 %v5670_v11  ;;  %v3130_v5 = vrot.slane %v5346_v12, 1  ;;  %v5653_v11 = vld [vmem:[%s8836_s1 + $0x890] sm:$0xf]  ;;  %v3122_v62 = vsel %vm290_vm0, %v3120_v18, %v3121_v15  ;;  %v5581_v18 = vld [vmem:[%s8836_s1 + $0x800] sm:$0xf] }
 0x203   : > { %3915 = vmatpush.bf16.msra.mxu3 %v5658_v9  ;;  %v3164_v54 = vpack.c.bf16 %v3128_v50, %v3122_v62  ;;  %v5348_v15 = vld [vmem:[%s6393_s19 + $0x108] sm:$0xfe]  ;;  %v5519_v60 = vld [vmem:[%s6393_s19 + $0x60] sm:$0xfc] }
 0x204   : > { %v2648_v33 = vpop.f32.mrf.mxu3 }
 0x205   : > { %v2649_v51 = vadd.f32 %v2648_v33, %v2619_v31  ;;  %v2593_v13 = vpop.f32.mrf.mxu1  ;;  %3374 = vmatmul.bf16.gmra.mxu0 %v3162_v46  ;;  %v3123_v31 = vrot.slane %v5340_v14, 1  ;;  %v5972_v14 = vld [vmem:[%s8836_s1 + $0x804] sm:$0xf0] }
 0x206   : > { %v2594_v53 = vadd.f32 %v2593_v13, %v2564_v21  ;;  %3432 = vmatmul.bf16.gmra.mxu2 %v3162_v46  ;;  %3856 = vmatpush.bf16.msra.mxu1 %v5662_v32  ;;  %v5974_v46 = vld [vmem:[%s8836_s1 + $0x814] sm:$0xf0]  ;;  %v5347_v32 = vld [vmem:[%s6393_s19 + $0x100] sm:$0xfe] }
 0x207   : > { %v8412_v38 = vadd.f32 %v2649_v51, %v8139_v28  ;;  %v5597_v28 = vld [vmem:[%s8836_s1 + $0x820] sm:$0xf]  ;;  %v5590_v22 = vor.u32 %v5974_v46, %v5589_v34  ;;  %v5583_v51 = vld [vmem:[%s8836_s1 + $0x808] sm:$0xf0]  ;;  %v3125_v13 = vsel %vm290_vm0, %v3123_v31, %v3124_v37  ;;  %v3133_v31 = vrot.slane %v5349_v24, 1 }
 0x208   : > { %v8418_v6 = vadd.f32 %v2594_v53, %v8142_v40  ;;  %3403 = vmatmul.bf16.gmra.mxu1 %v3163_v36  ;;  %v5598_v40 = vor.u32 %v5976_v23, %v5597_v28  ;;  %v3131_v53 = vsel %vm290_vm0, %v3129_v44, %v3130_v5  ;;  %v5582_v23 = vor.u32 %v5972_v14, %v5581_v18  ;;  %v5517_v14 = vld [vmem:[%s6393_s19 + $0x50] sm:$0x3] }
 0x209   : > { %3461 = vmatmul.bf16.gmra.mxu3 %v3163_v36  ;;  %v2622_v61 = vpop.f32.mrf.mxu2  ;;  %v5987_v36 = vld [vmem:[%s8836_s1 + $0x884] sm:$0xf]  ;;  %v3138_v37 = vrot.slane %v5351_v56, 1  ;;  %v3136_v34 = vrot.slane %v5350_v17, 1  ;;  %v3141_v46 = vrot.slane %v5352_v57, 1 }
 0x20a   : > { %v2566_v25 = vpop.f32.mrf.mxu0  ;;  %3827 = vmatpush.bf16.msra.mxu0 %v5598_v40  ;;  %v5650_v27 = vor.u32 %v5987_v36, %v5647_v45  ;;  %v3165_v40 = vpack.c.bf16 %v3131_v53, %v3125_v13 }
 0x20c   : > { %v2651_v2 = vpop.f32.mrf.mxu3  ;;  %3916 = vmatpush.bf16.msra.mxu3 %v5650_v27  ;;  %v5515_v27 = vld [vmem:[%s6393_s19 + $0x40] sm:$0xfc] }
 0x20d   : > { %v2652_v7 = vadd.f32 %v2651_v2, %v2622_v61  ;;  %v2595_v4 = vpop.f32.mrf.mxu1  ;;  %v5353_v2 = vld [vmem:[%s6393_s19 + $0x130] sm:$0x1] }
 0x20e   : > { %v2596_v26 = vadd.f32 %v2595_v4, %v2566_v25  ;;  %3828 = vmatpush.bf16.msra.mxu0 %v5590_v22  ;;  %v3132_v4 = vrot.slane %v5347_v32, 1  ;;  %v3139_v44 = vrot.slane %v5353_v2, 1  ;;  %v3563_v32 = vrot.slane %v5519_v60, 2 }
 0x20f   : > { %v8449_v41 = vadd.f32 %v2652_v7, %v8169_v39  ;;  %v5990_v39 = vld [vmem:[%s8836_s1 + $0x894] sm:$0xf0] }
 0x210   : > { %v8466_v33 = vadd.f32 %v2596_v26, %v8186_v10  ;;  %v5654_v21 = vor.u32 %v5990_v39, %v5653_v11  ;;  %v5586_v10 = vor.u32 %v5971_v48, %v5583_v51  ;;  %v3134_v22 = vsel %vm290_vm0, %v3132_v4, %v3133_v31 }
 0x211   : > { %v2624_v52 = vpop.f32.mrf.mxu2  ;;  %v3140_v39 = vsel %vm290_vm0, %v3138_v37, %v3139_v44 }
 0x212   : > { %3857 = vmatpush.bf16.msra.mxu1 %v5654_v21  ;;  %v2569_v28 = vpop.f32.mrf.mxu0  ;;  %3887 = vmatpush.bf16.msra.mxu2 %v5586_v10 }
 0x213   : > { %3829 = vmatpush.bf16.msra.mxu0 %v5582_v23  ;;  %v5516_v23 = vld [vmem:[%s6393_s19 + $0x48] sm:$0xfc] }
 0x214   : > { %v2653_v59 = vpop.f32.mrf.mxu3 }
 0x215   : > { %v2654_v61 = vadd.f32 %v2653_v59, %v2624_v52  ;;  %v2598_v49 = vpop.f32.mrf.mxu1  ;;  %3379 = vmatmul.bf16.gmra.mxu0 %v3164_v54  ;;  %v3166_v52 = vpack.c.bf16 %v3140_v39, %v3134_v22  ;;  %v5521_v59 = vld [vmem:[%s6393_s19 + $0x70] sm:$0x3] }
 0x216   : > { %v2599_v12 = vadd.f32 %v2598_v49, %v2569_v28  ;;  %3437 = vmatmul.bf16.gmra.mxu2 %v3164_v54  ;;  %3858 = vmatpush.bf16.msra.mxu1 %v5646_v3  ;;  %v3557_v49 = vrot.slane %v5515_v27, 2  ;;  %v3564_v24 = vrot.slane %v5521_v59, 2  ;;  %v5525_v39 = vld [vmem:[%s6393_s19 + $0x90] sm:$0x3] }
 0x217   : > { %v8495_v8 = vadd.f32 %v2654_v61, %v8215_v0  ;;  %v5354_v0 = vld [vmem:[%s6393_s19 + $0x138] sm:$0x1]  ;;  %v5520_v61 = vld [vmem:[%s6393_s19 + $0x68] sm:$0xfc] }
 0x218   : > { %v8499_v55 = vadd.f32 %v2599_v12, %v8218_v30  ;;  %3408 = vmatmul.bf16.gmra.mxu1 %v3165_v40  ;;  %v3135_v30 = vrot.slane %v5348_v15, 1  ;;  %v3142_v11 = vrot.slane %v5354_v0, 1  ;;  %v3558_v12 = vrot.slane %v5517_v14, 2 }
 0x219   : > { %3466 = vmatmul.bf16.gmra.mxu3 %v3165_v40  ;;  %v2627_v25 = vpop.f32.mrf.mxu2  ;;  %v5522_v40 = vld [vmem:[%s6393_s19 + $0x78] sm:$0x3]  ;;  %v3566_v15 = vrot.slane %v5520_v61, 2 }
 0x21a   : > { %v2571_v7 = vpop.f32.mrf.mxu0  ;;  %v3137_v51 = vsel %vm290_vm0, %v3135_v30, %v3136_v34  ;;  %v3143_v36 = vsel %vm290_vm0, %v3141_v46, %v3142_v11  ;;  %v3567_v17 = vrot.slane %v5522_v40, 2 }
 0x21b   : > { %v3167_v10 = vpack.c.bf16 %v3143_v36, %v3137_v51  ;;  %v5529_v51 = vld [vmem:[%s6393_s19 + $0xb0] sm:$0x3] }
 0x21c   : > { %v2656_v9 = vpop.f32.mrf.mxu3  ;;  %v3568_v44 = vsel %vm1012_vm1, %v3566_v15, %v3567_v17  ;;  %v3576_v14 = vrot.slane %v5529_v51, 2 }
 0x21d   : > { %v2657_v5 = vadd.f32 %v2656_v9, %v2627_v25  ;;  %v2600_v26 = vpop.f32.mrf.mxu1  ;;  %v3561_v25 = vrot.slane %v5518_v19, 2  ;;  %v3559_v9 = vsel %vm1012_vm1, %v3557_v49, %v3558_v12 }
 0x21e   : > { %v2601_v50 = vadd.f32 %v2600_v26, %v2571_v7  ;;  %v3565_v7 = vsel %vm1012_vm1, %v3563_v32, %v3564_v24 }
 0x21f   : > { %v8509_v62 = vadd.f32 %v2657_v5, %v8233_v63  ;;  %v3621_v5 = vpack.c.bf16 %v3565_v7, %v3559_v9  ;;  %v5533_v7 = vld [vmem:[%s6393_s19 + $0xd0] sm:$0x3] }
 0x220   : > { %v8514_v21 = vadd.f32 %v2601_v50, %v8240_v58  ;;  %v5523_v50 = vld [vmem:[%s6393_s19 + $0x80] sm:$0xfc] }
 0x221   : > { %v2629_v48 = vpop.f32.mrf.mxu2 }
 0x222   : > { %v2574_v13 = vpop.f32.mrf.mxu0 }
 0x224   : > { %v2658_v63 = vpop.f32.mrf.mxu3 }
 0x225   : > { %v2659_v53 = vadd.f32 %v2658_v63, %v2629_v48  ;;  %v2603_v45 = vpop.f32.mrf.mxu1  ;;  %3384 = vmatmul.bf16.gmra.mxu0 %v3166_v52  ;;  %v5527_v48 = vld [vmem:[%s6393_s19 + $0xa0] sm:$0xfc]  ;;  %v5526_v63 = vld [vmem:[%s6393_s19 + $0x98] sm:$0x3] }
 0x226   : > { %v2604_v54 = vadd.f32 %v2603_v45, %v2574_v13  ;;  %3442 = vmatmul.bf16.gmra.mxu2 %v3166_v52  ;;  %v5524_v52 = vld [vmem:[%s6393_s19 + $0x88] sm:$0xfc]  ;;  %v3569_v45 = vrot.slane %v5523_v50, 2  ;;  %v3575_v27 = vrot.slane %v5527_v48, 2 }
 0x227   : > { %v8519_v58 = vadd.f32 %v2659_v53, %v8268_v35  ;;  %v5528_v13 = vld [vmem:[%s6393_s19 + $0xa8] sm:$0xfc]  ;;  %v5530_v53 = vld [vmem:[%s6393_s19 + $0xb8] sm:$0x3] }
 0x228   : > { %v8523_v18 = vadd.f32 %v2604_v54, %v8274_v47  ;;  %3413 = vmatmul.bf16.gmra.mxu1 %v3167_v10  ;;  %v3560_v47 = vrot.slane %v5516_v23, 2  ;;  %v3570_v54 = vrot.slane %v5525_v39, 2  ;;  %v3578_v23 = vrot.slane %v5528_v13, 2 }
 0x229   : > { %3471 = vmatmul.bf16.gmra.mxu3 %v3167_v10  ;;  %v2632_v28 = vpop.f32.mrf.mxu2  ;;  %v3579_v19 = vrot.slane %v5530_v53, 2 }
 0x22a   : > { %v2576_v35 = vpop.f32.mrf.mxu0  ;;  %v3562_v37 = vsel %vm1012_vm1, %v3560_v47, %v3561_v25 }
 0x22b   : > { %v3622_v34 = vpack.c.bf16 %v3568_v44, %v3562_v37  ;;  %v3580_v24 = vsel %vm1012_vm1, %v3578_v23, %v3579_v19  ;;  %v5537_v37 = vld [vmem:[%s6393_s19 + $0xf0] sm:$0x3] }
 0x22c   : > { %v2661_v3 = vpop.f32.mrf.mxu3  ;;  %v3588_v39 = vrot.slane %v5537_v37, 2 }
 0x22d   : > { %v2662_v56 = vadd.f32 %v2661_v3, %v2632_v28  ;;  %v2605_v2 = vpop.f32.mrf.mxu1  ;;  %v3573_v28 = vrot.slane %v5526_v63, 2  ;;  %v3571_v3 = vsel %vm1012_vm1, %v3569_v45, %v3570_v54 }
 0x22e   : > { %v2606_v0 = vadd.f32 %v2605_v2, %v2576_v35  ;;  %v3577_v35 = vsel %vm1012_vm1, %v3575_v27, %v3576_v14 }
 0x22f   : > { %v8533_v57 = vadd.f32 %v2662_v56, %v8305_v1  ;;  %v3623_v56 = vpack.c.bf16 %v3577_v35, %v3571_v3  ;;  %v5541_v35 = vld [vmem:[%s6393_s19 + $0x110] sm:$0x3] }
 0x230   : > { %v8538_v4 = vadd.f32 %v2606_v0, %v8310_v20  ;;  %v5531_v0 = vld [vmem:[%s6393_s19 + $0xc0] sm:$0xfc] }
 0x231   : > { %v2634_v31 = vpop.f32.mrf.mxu2 }
 0x232   : > { %v2909_v26 = vpop.f32.mrf.mxu0 }
 0x234   : > { %v2663_v1 = vpop.f32.mrf.mxu3 }
 0x235   : > { %v2664_v30 = vadd.f32 %v2663_v1, %v2634_v31  ;;  %v2938_v46 = vpop.f32.mrf.mxu1  ;;  %3830 = vmatmul.bf16.vlgmr.msra.gmra.mxu0 %v3621_v5  ;;  %v5535_v31 = vld [vmem:[%s6393_s19 + $0xe0] sm:$0xfc]  ;;  %v5534_v1 = vld [vmem:[%s6393_s19 + $0xd8] sm:$0x3] }
 0x236   : > { %v2939_v11 = vadd.f32 %v2938_v46, %v2909_v26  ;;  %3888 = vmatmul.bf16.vlgmr.msra.gmra.mxu2 %v3621_v5  ;;  %v5532_v5 = vld [vmem:[%s6393_s19 + $0xc8] sm:$0xfc]  ;;  %v3581_v46 = vrot.slane %v5531_v0, 2  ;;  %v3587_v50 = vrot.slane %v5535_v31, 2 }
 0x237   : > { %v8543_v20 = vadd.f32 %v2664_v30, %v8340_v29  ;;  %v5536_v26 = vld [vmem:[%s6393_s19 + $0xe8] sm:$0xfc]  ;;  %v5538_v30 = vld [vmem:[%s6393_s19 + $0xf8] sm:$0x3] }
 0x238   : > { %v8547_v22 = vadd.f32 %v2939_v11, %v8346_v43  ;;  %3859 = vmatmul.bf16.vlgmr.msra.gmra.mxu1 %v3622_v34  ;;  %v3572_v43 = vrot.slane %v5524_v52, 2  ;;  %v3582_v11 = vrot.slane %v5533_v7, 2  ;;  %v3590_v52 = vrot.slane %v5536_v26, 2 }
 0x239   : > { %3917 = vmatmul.bf16.vlgmr.msra.gmra.mxu3 %v3622_v34  ;;  %v2967_v36 = vpop.f32.mrf.mxu2  ;;  %v3591_v63 = vrot.slane %v5538_v30, 2 }
 0x23a   : > { %v2911_v29 = vpop.f32.mrf.mxu0  ;;  %v3574_v32 = vsel %vm1012_vm1, %v3572_v43, %v3573_v28 }
 0x23b   : > { %v3624_v25 = vpack.c.bf16 %v3580_v24, %v3574_v32  ;;  %v3592_v14 = vsel %vm1012_vm1, %v3590_v52, %v3591_v63  ;;  %v5545_v32 = vld [vmem:[%s6393_s19 + $0x130] sm:$0x3] }
 0x23c   : > { %v2996_v10 = vpop.f32.mrf.mxu3  ;;  %v3600_v7 = vrot.slane %v5545_v32, 2 }
 0x23d   : > { %v2997_v60 = vadd.f32 %v2996_v10, %v2967_v36  ;;  %v2940_v59 = vpop.f32.mrf.mxu1  ;;  %v3585_v36 = vrot.slane %v5534_v1, 2  ;;  %v3583_v10 = vsel %vm1012_vm1, %v3581_v46, %v3582_v11 }
 0x23e   : > { %v2941_v40 = vadd.f32 %v2940_v59, %v2911_v29  ;;  %v3589_v29 = vsel %vm1012_vm1, %v3587_v50, %v3588_v39 }
 0x23f   : > { %v8557_v61 = vadd.f32 %v2997_v60, %v8377_v16  ;;  %v3625_v60 = vpack.c.bf16 %v3589_v29, %v3583_v10 }
 0x240   : > { %v8562_v49 = vadd.f32 %v2941_v40, %v8382_v42  ;;  %v5539_v40 = vld [vmem:[%s6393_s19 + $0x100] sm:$0xfc] }
 0x241   : > { %v2969_v12 = vpop.f32.mrf.mxu2 }
 0x242   : > { %v2914_v2 = vpop.f32.mrf.mxu0 }
 0x244   : > { %v2998_v16 = vpop.f32.mrf.mxu3 }
 0x245   : > { %v2999_v47 = vadd.f32 %v2998_v16, %v2969_v12  ;;  %v2943_v15 = vpop.f32.mrf.mxu1  ;;  %3835 = vmatmul.bf16.gmra.mxu0 %v3623_v56  ;;  %v5543_v12 = vld [vmem:[%s6393_s19 + $0x120] sm:$0xfc]  ;;  %v5542_v16 = vld [vmem:[%s6393_s19 + $0x118] sm:$0x3] }
 0x246   : > { %v2944_v17 = vadd.f32 %v2943_v15, %v2914_v2  ;;  %3893 = vmatmul.bf16.gmra.mxu2 %v3623_v56  ;;  %v5540_v56 = vld [vmem:[%s6393_s19 + $0x108] sm:$0xfc]  ;;  %v3593_v15 = vrot.slane %v5539_v40, 2  ;;  %v3599_v0 = vrot.slane %v5543_v12, 2 }
 0x247   : > { %v8567_v42 = vadd.f32 %v2999_v47, %v8412_v38  ;;  %v5544_v2 = vld [vmem:[%s6393_s19 + $0x128] sm:$0xfc]  ;;  %v5546_v47 = vld [vmem:[%s6393_s19 + $0x138] sm:$0x3] }
 0x248   : > { %v8571_v9 = vadd.f32 %v2944_v17, %v8418_v6  ;;  %3864 = vmatmul.bf16.gmra.mxu1 %v3624_v25  ;;  %v3584_v6 = vrot.slane %v5532_v5, 2  ;;  %v3594_v17 = vrot.slane %v5541_v35, 2  ;;  %v3602_v5 = vrot.slane %v5544_v2, 2 }
 0x249   : > { %3922 = vmatmul.bf16.gmra.mxu3 %v3624_v25  ;;  %v2972_v44 = vpop.f32.mrf.mxu2  ;;  %v3603_v1 = vrot.slane %v5546_v47, 2 }
 0x24a   : > { %v2916_v38 = vpop.f32.mrf.mxu0  ;;  %v3586_v27 = vsel %vm1012_vm1, %v3584_v6, %v3585_v36 }
 0x24b   : > { %v3626_v28 = vpack.c.bf16 %v3592_v14, %v3586_v27  ;;  %v3604_v39 = vsel %vm1012_vm1, %v3602_v5, %v3603_v1 }
 0x24c   : > { %v3001_v34 = vpop.f32.mrf.mxu3 }
 0x24d   : > { %v3002_v48 = vadd.f32 %v3001_v34, %v2972_v44  ;;  %v2945_v51 = vpop.f32.mrf.mxu1  ;;  %v3597_v44 = vrot.slane %v5542_v16, 2  ;;  %v3595_v34 = vsel %vm1012_vm1, %v3593_v15, %v3594_v17 }
 0x24e   : > { %v2946_v53 = vadd.f32 %v2945_v51, %v2916_v38  ;;  %v3601_v38 = vsel %vm1012_vm1, %v3599_v0, %v3600_v7 }
 0x24f   : > { %v8581_v13 = vadd.f32 %v3002_v48, %v8449_v41  ;;  %v3627_v48 = vpack.c.bf16 %v3601_v38, %v3595_v34 }
 0x250   : > { %v8586_v45 = vadd.f32 %v2946_v53, %v8466_v33 }
 0x251   : > { %v2974_v54 = vpop.f32.mrf.mxu2 }
 0x252   : > { %v2919_v59 = vpop.f32.mrf.mxu0 }
 0x254   : > { %v3003_v41 = vpop.f32.mrf.mxu3 }
 0x255   : > { %v3004_v43 = vadd.f32 %v3003_v41, %v2974_v54  ;;  %v2948_v23 = vpop.f32.mrf.mxu1  ;;  %3840 = vmatmul.bf16.gmra.mxu0 %v3625_v60 }
 0x256   : > { %v2949_v19 = vadd.f32 %v2948_v23, %v2919_v59  ;;  %3898 = vmatmul.bf16.gmra.mxu2 %v3625_v60 }
 0x257   : > { %v8591_v33 = vadd.f32 %v3004_v43, %v8495_v8 }
 0x258   : > { %v8595_v3 = vadd.f32 %v2949_v19, %v8499_v55  ;;  %3869 = vmatmul.bf16.gmra.mxu1 %v3626_v28  ;;  %v3596_v55 = vrot.slane %v5540_v56, 2 }
 0x259   : > { %3927 = vmatmul.bf16.gmra.mxu3 %v3626_v28  ;;  %v2977_v24 = vpop.f32.mrf.mxu2 }
 0x25a   : > { %v2921_v8 = vpop.f32.mrf.mxu0  ;;  %v3598_v50 = vsel %vm1012_vm1, %v3596_v55, %v3597_v44 }
 0x25b   : > { %v3628_v52 = vpack.c.bf16 %v3604_v39, %v3598_v50 }
 0x25c   : > { %v3006_v25 = vpop.f32.mrf.mxu3 }
 0x25d   : > { %v3007_v31 = vadd.f32 %v3006_v25, %v2977_v24  ;;  %v2950_v37 = vpop.f32.mrf.mxu1 }
 0x25e   : > { %v2951_v30 = vadd.f32 %v2950_v37, %v2921_v8 }
 0x25f   : > { %v8605_v26 = vadd.f32 %v3007_v31, %v8509_v62 }
 0x260   : > { %v8610_v46 = vadd.f32 %v2951_v30, %v8514_v21 }
 0x261   : > { %v2979_v11 = vpop.f32.mrf.mxu2 }
 0x262   : > { %v2924_v6 = vpop.f32.mrf.mxu0 }
 0x264   : > { %v3008_v51 = vpop.f32.mrf.mxu3 }
 0x265   : > { %v3009_v36 = vadd.f32 %v3008_v51, %v2979_v11  ;;  %v2953_v62 = vpop.f32.mrf.mxu1  ;;  %3845 = vmatmul.bf16.gmra.mxu0 %v3627_v48 }
 0x266   : > { %v2954_v53 = vadd.f32 %v2953_v62, %v2924_v6  ;;  %3903 = vmatmul.bf16.gmra.mxu2 %v3627_v48  ;;  %v3954_v6 = vld [vmem:[%s8837_s2] ss:$8 sm:$0x3] }
 0x267   : > { %v8615_v63 = vadd.f32 %v3009_v36, %v8519_v58 }
 0x268   : > { %v8618_v21 = vadd.f32 %v2954_v53, %v8523_v18  ;;  %3874 = vmatmul.bf16.gmra.mxu1 %v3628_v52  ;;  %v8677_v53 = vperm.slane %v3954_v6, 0 }
 0x269   : > { %3932 = vmatmul.bf16.gmra.mxu3 %v3628_v52  ;;  %v2982_v10 = vpop.f32.mrf.mxu2 }
 0x26a   : > { %v2926_v54 = vpop.f32.mrf.mxu0 }
 0x26c   : > { %v3011_v29 = vpop.f32.mrf.mxu3 }
 0x26d   : > { %v3012_v27 = vadd.f32 %v3011_v29, %v2982_v10  ;;  %v2955_v14 = vpop.f32.mrf.mxu1  ;;  %v5707_v29 = vld [vmem:[%s8837_s2 + $0x1] ss:$8 sm:$0x3] }
 0x26e   : > { %v2956_v41 = vadd.f32 %v2955_v14, %v2926_v54 }
 0x26f   : > { %v8621_v60 = vadd.f32 %v3012_v27, %v8533_v57  ;;  %v5708_v27 = vld [vmem:[%s8837_s2 + $0x2] ss:$8 sm:$0x3] }
 0x270   : > { %v8624_v58 = vadd.f32 %v2956_v41, %v8538_v4 }
 0x271   : > { %v2984_v59 = vpop.f32.mrf.mxu2 }
 0x272   : > { %v3370_v28 = vpop.f32.mrf.mxu0 }
 0x274   : > { %v3013_v43 = vpop.f32.mrf.mxu3 }
 0x275   : > { %v3014_v23 = vadd.f32 %v3013_v43, %v2984_v59  ;;  %v3399_v18 = vpop.f32.mrf.mxu1  ;;  %v8687_v43 = vperm.slane %v5707_v29, 0 }
 0x276   : > { %v3400_v39 = vadd.f32 %v3399_v18, %v3370_v28 }
 0x277   : > { %v8627_v19 = vadd.f32 %v3014_v23, %v8543_v20 }
 0x278   : > { %v3477_v52 = vadd.f32 %v3400_v39, %v8547_v22  ;;  %v8694_v39 = vperm.slane %v3954_v6, 1 }
 0x279   : > { %8841 = vst [vmem:[#allocation5_spill] sm:$0xff] %v8627_v19  ;;  %v3428_v40 = vpop.f32.mrf.mxu2 }
 0x27a   : > { %v3372_v12 = vpop.f32.mrf.mxu0 }
 0x27c   : > { %v3457_v35 = vpop.f32.mrf.mxu3 }
 0x27d   : > { %v3401_v32 = vpop.f32.mrf.mxu1  ;;  %v3458_v10 = vadd.f32 %v3457_v35, %v3428_v40  ;;  %v8692_v40 = vperm.slane %v5708_v27, 0 }
 0x27e   : > { %v3402_v41 = vadd.f32 %v3401_v32, %v3372_v12 }
 0x27f   : > { %v3478_v22 = vadd.f32 %v3458_v10, %v8557_v61 }
 0x281   : > { %v3430_v24 = vpop.f32.mrf.mxu2 }
 0x282   : > { %v3375_v57 = vpop.f32.mrf.mxu0 }
 0x284   : > { %v3459_v56 = vpop.f32.mrf.mxu3 }
 0x285   : > { %v3404_v16 = vpop.f32.mrf.mxu1 }
 0x286   : > { %v3405_v19 = vadd.f32 %v3404_v16, %v3375_v57 }
 0x288   : > { %v3481_v16 = vadd.f32 %v3405_v19, %v8571_v9 }
 0x289   : > { %v8629_v2 = vpop.f32.mrf.mxu2 }
 0x28a   : > { %v8633_v47 = vpop.f32.mrf.mxu0 }
 0x28c   : > { %v8631_v4 = vpop.f32.mrf.mxu3 }
 0x28d   : > { %v8635_v25 = vpop.f32.mrf.mxu1 }
 0x291   : > { %v8637_v8 = vpop.f32.mrf.mxu2 }
 0x292   : > { %v8641_v15 = vpop.f32.mrf.mxu0 }
 0x294   : > { %v8639_v20 = vpop.f32.mrf.mxu3 }
 0x295   : > { %v8643_v17 = vpop.f32.mrf.mxu1 }
 0x299   : > { %v8645_v0 = vpop.f32.mrf.mxu2 }
 0x29a   : > { %v8649_v31 = vpop.f32.mrf.mxu0 }
 0x29c   : > { %v8647_v7 = vpop.f32.mrf.mxu3 }
 0x29d   : > { %v8651_v37 = vpop.f32.mrf.mxu1 }
 0x2a1   : > { %v8653_v55 = vpop.f32.mrf.mxu2 }
 0x2a2   : > { %v8657_v5 = vpop.f32.mrf.mxu0 }
 0x2a4   : > { %v8655_v44 = vpop.f32.mrf.mxu3 }
 0x2a5   : > { %v8659_v1 = vpop.f32.mrf.mxu1 }
 0x2a9   : > { %v8661_v30 = vpop.f32.mrf.mxu2 }
 0x2aa   : > { %v8665_v38 = vpop.f32.mrf.mxu0 }
 0x2ac   : > { %v8663_v34 = vpop.f32.mrf.mxu3 }
 0x2ad   : > { %v8667_v11 = vpop.f32.mrf.mxu1 }
 0x2b1   : > { %v8669_v50 = vpop.f32.mrf.mxu2 }
 0x2b2   : > { %v3831_v51 = vpop.f32.mrf.mxu0 }
 0x2b4   : > { %v8671_v48 = vpop.f32.mrf.mxu3 }
 0x2b5   : > { %8842 = vst [vmem:[#allocation6_spill] sm:$0xff] %v8671_v48  ;;  %v3860_v36 = vpop.f32.mrf.mxu1 }
 0x2b6   : > { %v3861_v62 = vadd.f32 %v3860_v36, %v3831_v51  ;;  %v3479_v36 = vadd.f32 %v3402_v41, %v8562_v49  ;;  %v8705_v49 = vperm.slane %v5708_v27, 1 }
 0x2b8   : > { %v3938_v54 = vadd.f32 %v3861_v62, %v3477_v52  ;;  %v3460_v62 = vadd.f32 %v3459_v56, %v3430_v24 }
 0x2b9   : > { %v3889_v14 = vpop.f32.mrf.mxu2 }
 0x2ba   : > { %v3964_v59 = vadd.f32 %v8677_v53, %v3938_v54  ;;  %v3833_v23 = vpop.f32.mrf.mxu0  ;;  %v8700_v54 = vperm.slane %v5707_v29, 1  ;;  %v3480_v41 = vadd.f32 %v3460_v62, %v8567_v42 }
 0x2bc   : > { %v3918_v28 = vpop.f32.mrf.mxu3  ;;  %v3980_v18 = vmax.f32 %v3964_v59, 0.0 }
 0x2bd   : > { %v3919_v35 = vadd.f32 %v3918_v28, %v3889_v14  ;;  %v3862_v51 = vpop.f32.mrf.mxu1 }
 0x2be   : > { %v4001_v12 = vmul.f32 %v8687_v43, %v3980_v18  ;;  %v3863_v52 = vadd.f32 %v3862_v51, %v3833_v23  ;;  %v3463_v51 = vadd.f32 %v8631_v4, %v8629_v2 }
 0x2bf   : > { %v3939_v32 = vadd.f32 %v3919_v35, %v3478_v22 }
 0x2c0   : > { %v4022_v61 = vadd.f32 %v8692_v40, %v4001_v12  ;;  %v3940_v59 = vadd.f32 %v3863_v52, %v3479_v36 }
 0x2c1   : > { %v3965_v10 = vadd.f32 %v8694_v39, %v3939_v32  ;;  %v3891_v48 = vpop.f32.mrf.mxu2 }
 0x2c2   : > { %4038 = vst [vmem:[%s8702_s24] sm:$0xff] %v4022_v61  ;;  %v3966_v14 = vadd.f32 %v8677_v53, %v3940_v59  ;;  %v3836_v56 = vpop.f32.mrf.mxu0  ;;  %v3482_v61 = vadd.f32 %v3463_v51, %v8581_v13 }
 0x2c3   : > { %v3981_v6 = vmax.f32 %v3965_v10, 0.0 }
 0x2c4   : > { %v3920_v24 = vpop.f32.mrf.mxu3  ;;  %v3982_v22 = vmax.f32 %v3966_v14, 0.0 }
 0x2c5   : > { %v4002_v29 = vmul.f32 %v8700_v54, %v3981_v6  ;;  %v3921_v57 = vadd.f32 %v3920_v24, %v3891_v48  ;;  %v3865_v28 = vpop.f32.mrf.mxu1  ;;  %v3407_v48 = vadd.f32 %v8635_v25, %v8633_v47 }
 0x2c6   : > { %v4003_v18 = vmul.f32 %v8687_v43, %v3982_v22  ;;  %v3866_v35 = vadd.f32 %v3865_v28, %v3836_v56  ;;  %v3465_v56 = vadd.f32 %v8639_v20, %v8637_v8  ;;  %v3410_v22 = vadd.f32 %v8643_v17, %v8641_v15 }
 0x2c7   : > { %v4023_v23 = vadd.f32 %v8705_v49, %v4002_v29  ;;  %v3941_v27 = vadd.f32 %v3921_v57, %v3480_v41  ;;  %v3483_v59 = vadd.f32 %v3407_v48, %v8586_v45 }
 0x2c8   : > { %v4024_v42 = vadd.f32 %v8692_v40, %v4003_v18  ;;  %v3942_v12 = vadd.f32 %v3866_v35, %v3481_v16  ;;  %v3484_v18 = vadd.f32 %v3465_v56, %v8591_v33  ;;  %v3485_v35 = vadd.f32 %v3410_v22, %v8595_v3 }
 0x2c9   : > { %4039 = vst [vmem:[%s8702_s24 + $0x8] sm:$0xff] %v4023_v23  ;;  %v3967_v36 = vadd.f32 %v8694_v39, %v3941_v27  ;;  %v3894_v9 = vpop.f32.mrf.mxu2  ;;  %v3415_v56 = vadd.f32 %v8659_v1, %v8657_v5 }
 0x2ca   : > { %4040 = vst [vmem:[%s8702_s24 + $0x10] sm:$0xff] %v4024_v42  ;;  %v3968_v32 = vadd.f32 %v8677_v53, %v3942_v12  ;;  %v3838_v62 = vpop.f32.mrf.mxu0  ;;  %v3468_v12 = vadd.f32 %v8647_v7, %v8645_v0 }
 0x2cb   : > { %v3983_v19 = vmax.f32 %v3967_v36, 0.0 }
 0x2cc   : > { %v3923_v52 = vpop.f32.mrf.mxu3  ;;  %v3984_v4 = vmax.f32 %v3968_v32, 0.0 }
 0x2cd   : > { %v4004_v2 = vmul.f32 %v8700_v54, %v3983_v19  ;;  %v3924_v10 = vadd.f32 %v3923_v52, %v3894_v9  ;;  %v3867_v6 = vpop.f32.mrf.mxu1  ;;  %v3412_v19 = vadd.f32 %v8651_v37, %v8649_v31 }
 0x2ce   : > { %v4005_v25 = vmul.f32 %v8687_v43, %v3984_v4  ;;  %v3868_v24 = vadd.f32 %v3867_v6, %v3838_v62 }
 0x2cf   : > { %v4025_v47 = vadd.f32 %v8705_v49, %v4004_v2  ;;  %v3943_v14 = vadd.f32 %v3924_v10, %v3482_v61  ;;  %v3486_v2 = vadd.f32 %v3468_v12, %v8605_v26  ;;  %v3487_v10 = vadd.f32 %v3412_v19, %v8610_v46 }
 0x2d0   : > { %v4026_v13 = vadd.f32 %v8692_v40, %v4005_v25  ;;  %v3944_v29 = vadd.f32 %v3868_v24, %v3483_v59  ;;  %v3470_v25 = vadd.f32 %v8655_v44, %v8653_v55 }
 0x2d1   : > { %4041 = vst [vmem:[%s8702_s24 + $0x18] sm:$0xff] %v4025_v47  ;;  %v3969_v41 = vadd.f32 %v8694_v39, %v3943_v14  ;;  %v3896_v45 = vpop.f32.mrf.mxu2 }
 0x2d2   : > { %4042 = vst [vmem:[%s8702_s24 + $0x20] sm:$0xff] %v4026_v13  ;;  %v3970_v16 = vadd.f32 %v8677_v53, %v3944_v29  ;;  %v3841_v23 = vpop.f32.mrf.mxu0 }
 0x2d3   : > { %v3985_v57 = vmax.f32 %v3969_v41, 0.0 }
 0x2d4   : > { %v3925_v28 = vpop.f32.mrf.mxu3  ;;  %v3986_v20 = vmax.f32 %v3970_v16, 0.0  ;;  %v3489_v16 = vadd.f32 %v3415_v56, %v8618_v21 }
 0x2d5   : > { %v4006_v8 = vmul.f32 %v8700_v54, %v3985_v57  ;;  %v3926_v27 = vadd.f32 %v3925_v28, %v3896_v45  ;;  %v3870_v51 = vpop.f32.mrf.mxu1  ;;  %v3488_v45 = vadd.f32 %v3470_v25, %v8615_v63 }
 0x2d6   : > { %v4007_v17 = vmul.f32 %v8687_v43, %v3986_v20  ;;  %v3871_v36 = vadd.f32 %v3870_v51, %v3841_v23 }
 0x2d7   : > { %v4027_v15 = vadd.f32 %v8705_v49, %v4006_v8  ;;  %v3945_v42 = vadd.f32 %v3926_v27, %v3484_v18  ;;  %v3473_v8 = vadd.f32 %v8663_v34, %v8661_v30 }
 0x2d8   : > { %v4028_v33 = vadd.f32 %v8692_v40, %v4007_v17  ;;  %v3946_v9 = vadd.f32 %v3871_v36, %v3485_v35  ;;  %v3417_v35 = vadd.f32 %v8667_v11, %v8665_v38 }
 0x2d9   : > { %4043 = vst [vmem:[%s8702_s24 + $0x28] sm:$0xff] %v4027_v15  ;;  %v3971_v48 = vadd.f32 %v8694_v39, %v3945_v42  ;;  %v3899_v3 = vpop.f32.mrf.mxu2  ;;  %v3490_v36 = vadd.f32 %v3473_v8, %v8621_v60 }
 0x2da   : > { %4044 = vst [vmem:[%s8702_s24 + $0x30] sm:$0xff] %v4028_v33  ;;  %v3972_v52 = vadd.f32 %v8677_v53, %v3946_v9  ;;  %v3843_v61 = vpop.f32.mrf.mxu0  ;;  %v3491_v33 = vadd.f32 %v3417_v35, %v8624_v58 }
 0x2db   : > { %v3987_v32 = vmax.f32 %v3971_v48, 0.0 }
 0x2dc   : > { %v3928_v62 = vpop.f32.mrf.mxu3  ;;  %v3988_v7 = vmax.f32 %v3972_v52, 0.0 }
 0x2dd   : > { %v4008_v0 = vmul.f32 %v8700_v54, %v3987_v32  ;;  %v3929_v4 = vadd.f32 %v3928_v62, %v3899_v3  ;;  %v3872_v59 = vpop.f32.mrf.mxu1  ;;  %v8843_v3 = vld [vmem:[#allocation6_spill] sm:$0xff] }
 0x2de   : > { %v4009_v37 = vmul.f32 %v8687_v43, %v3988_v7  ;;  %v3873_v47 = vadd.f32 %v3872_v59, %v3843_v61  ;;  %v3475_v32 = vadd.f32 %v8843_v3, %v8669_v50  ;;  %v8844_v7 = vld [vmem:[#allocation5_spill] sm:$0xff] }
 0x2df   : > { %v4029_v31 = vadd.f32 %v8705_v49, %v4008_v0  ;;  %v3947_v6 = vadd.f32 %v3929_v4, %v3486_v2 }
 0x2e0   : > { %v4030_v26 = vadd.f32 %v8692_v40, %v4009_v37  ;;  %v3948_v24 = vadd.f32 %v3873_v47, %v3487_v10  ;;  %v3492_v4 = vadd.f32 %v3475_v32, %v8844_v7 }
 0x2e1   : > { %4045 = vst [vmem:[%s8702_s24 + $0x38] sm:$0xff] %v4029_v31  ;;  %v3973_v14 = vadd.f32 %v8694_v39, %v3947_v6  ;;  %v3901_v46 = vpop.f32.mrf.mxu2 }
 0x2e2   : > { %4046 = vst [vmem:[%s8702_s24 + $0x40] sm:$0xff] %v4030_v26  ;;  %v3974_v41 = vadd.f32 %v8677_v53, %v3948_v24  ;;  %v3846_v22 = vpop.f32.mrf.mxu0 }
 0x2e3   : > { %v3989_v13 = vmax.f32 %v3973_v14, 0.0 }
 0x2e4   : > { %v3930_v29 = vpop.f32.mrf.mxu3  ;;  %v3990_v44 = vmax.f32 %v3974_v41, 0.0 }
 0x2e5   : > { %v4010_v55 = vmul.f32 %v8700_v54, %v3989_v13  ;;  %v3931_v57 = vadd.f32 %v3930_v29, %v3901_v46  ;;  %v3875_v28 = vpop.f32.mrf.mxu1 }
 0x2e6   : > { %v4011_v1 = vmul.f32 %v8687_v43, %v3990_v44  ;;  %v3876_v18 = vadd.f32 %v3875_v28, %v3846_v22 }
 0x2e7   : > { %v4031_v5 = vadd.f32 %v8705_v49, %v4010_v55  ;;  %v3949_v23 = vadd.f32 %v3931_v57, %v3488_v45 }
 0x2e8   : > { %v4032_v63 = vadd.f32 %v8692_v40, %v4011_v1  ;;  %v3950_v27 = vadd.f32 %v3876_v18, %v3489_v16 }
 0x2e9   : > { %4047 = vst [vmem:[%s8702_s24 + $0x48] sm:$0xff] %v4031_v5  ;;  %v3975_v20 = vadd.f32 %v8694_v39, %v3949_v23  ;;  %v3904_v21 = vpop.f32.mrf.mxu2 }
 0x2ea   : > { %4048 = vst [vmem:[%s8702_s24 + $0x50] sm:$0xff] %v4032_v63  ;;  %v3976_v15 = vadd.f32 %v8677_v53, %v3950_v27  ;;  %v3848_v42 = vpop.f32.mrf.mxu0 }
 0x2eb   : > { %v3991_v51 = vmax.f32 %v3975_v20, 0.0 }
 0x2ec   : > { %v3933_v17 = vpop.f32.mrf.mxu3  ;;  %v3992_v34 = vmax.f32 %v3976_v15, 0.0 }
 0x2ed   : > { %v4012_v30 = vmul.f32 %v8700_v54, %v3991_v51  ;;  %v3934_v12 = vadd.f32 %v3933_v17, %v3904_v21  ;;  %v3877_v48 = vpop.f32.mrf.mxu1 }
 0x2ee   : > { %v4013_v11 = vmul.f32 %v8687_v43, %v3992_v34  ;;  %v3878_v19 = vadd.f32 %v3877_v48, %v3848_v42 }
 0x2ef   : > { %v4033_v38 = vadd.f32 %v8705_v49, %v4012_v30  ;;  %v3951_v9 = vadd.f32 %v3934_v12, %v3490_v36 }
 0x2f0   : > { %v4034_v60 = vadd.f32 %v8692_v40, %v4013_v11  ;;  %v3952_v62 = vadd.f32 %v3878_v19, %v3491_v33 }
 0x2f1   : > { %4049 = vst [vmem:[%s8702_s24 + $0x58] sm:$0xff] %v4033_v38  ;;  %v3977_v52 = vadd.f32 %v8694_v39, %v3951_v9  ;;  %v3906_v61 = vpop.f32.mrf.mxu2 }
 0x2f2   : > { %4050 = vst [vmem:[%s8702_s24 + $0x60] sm:$0xff] %v4034_v60  ;;  %v3978_v2 = vadd.f32 %v8677_v53, %v3952_v62 }
 0x2f3   : > { %v3993_v58 = vmax.f32 %v3977_v52, 0.0 }
 0x2f4   : > { %v3935_v0 = vpop.f32.mrf.mxu3  ;;  %v3994_v50 = vmax.f32 %v3978_v2, 0.0 }
 0x2f5   : > { %v4014_v10 = vmul.f32 %v8700_v54, %v3993_v58  ;;  %v3936_v59 = vadd.f32 %v3935_v0, %v3906_v61 }
 0x2f6   : > { %v4015_v37 = vmul.f32 %v8687_v43, %v3994_v50 }
 0x2f7   : > { %v4035_v31 = vadd.f32 %v8705_v49, %v4014_v10  ;;  %v3953_v6 = vadd.f32 %v3936_v59, %v3492_v4 }
 0x2f8   : > { %v4036_v53 = vadd.f32 %v8692_v40, %v4015_v37 }
 0x2f9   : > { %4051 = vst [vmem:[%s8702_s24 + $0x68] sm:$0xff] %v4035_v31  ;;  %v3979_v47 = vadd.f32 %v8694_v39, %v3953_v6 }
 0x2fa   : > { %4052 = vst [vmem:[%s8702_s24 + $0x70] sm:$0xff] %v4036_v53 }
 0x2fb   : > { %v3995_v25 = vmax.f32 %v3979_v47, 0.0 }
 0x2fd   : > { %v4016_v26 = vmul.f32 %v8700_v54, %v3995_v25 }
 0x2ff   : > { %v4037_v43 = vadd.f32 %v8705_v49, %v4016_v26 }
 0x301   : > { %4053 = vst [vmem:[%s8702_s24 + $0x78] sm:$0xff] %v4037_v43 }
 0x302   : > { %6074 = shalt.err (!%p6071_p3)
}
 0x303   : > { %s6111_s10 = smov 256   ;;  %s6112_s11 = smov 16  }
 0x304   : > { %6006 = dma.vmem_to_hbm [thread:$0]  (%p6171_p5), %s4069_s16, 2048, %s4071_s27, %s4055_s30, %s6111_s10, %s6111_s10, %s6112_s11  }
 0x305 PF: > { %p6012_p4 = scmp.ge.s32.totalorder %s6109_s15, 2  ;;  %s4085_s17 = sand.u32 1, %s6097_s12  }
 0x306   : > { %s4086_s20 = scalar_lea.sflag [#allocation3], %s4085_s17 }
 0x307   : > { %p6009_p7 = pnand %p6012_p4, %p6175_p6 }
 0x309   : > { %p6010_p8 = pneg %p6009_p7 }
 0x30b   : > { %6092 = dma.done.wait (%p6010_p8), %s4086_s20, 2048  }
 0x30c   : > { %6094 = vsyncadd (%p6010_p8), %s4086_s20, 4294965248  ;;  %p13_p9 = scmp.ge.s32.totalorder %s6158_s18, 4   ;;  %s8845_s12 = smov %s6101_s13 }
 0x30d   : > { %s8846_s13 = smov %s6105_s14  ;;  %s8847_s14 = smov %s6169_s21 }
 0x30e   : > { %s8848_s15 = smov %s6158_s18  ;;  %15 = sbr.rel (!%p13_p9) target bundleno = 3 (0x3), region = 79 }
 0x313   :  { %4092 = vsyncpa [#allocation3], 1 }
 0x314   :  { %4094 = vsyncpa [#allocation3 + $0x1], 1 }

</bundles_post_ra>
